<compile_context>
chip_gen: v5e
topology: v5e:2x2
jax: 0.10.0
libtpu: 0.0.40
codegen_flags: <defaults>
</compile_context>

<pallas_src>
import jax
import jax.numpy as jnp
from jax.experimental import pallas as pl
from jax.experimental.pallas import tpu as pltpu


# ------------------------------ Pallas kernel ------------------------------ #

def _make_fused_kernel(B, Hh, Wh, Ho, Wo, C, NCpad, conv_first):
    """Fully fused AuxiliaryHead forward for one batch block of B images."""
    Ho2, Wo2 = Ho - 1, Wo - 1

    def kernel(xph_ref, w1_ref, s1_ref, b1_ref,
               w2_ref, s2_ref, b2_ref, wfc_ref, bfc_ref, out_ref):
        # xph_ref: (B, 4, Hh, Wh, C) -- the four stride-2 phase planes of the
        # zero-padded input.  Tap (ki, kj) of the 5x5 pool lives in phase
        # (ki % 2, kj % 2) at offset (ki // 2, kj // 2): all 25 taps are
        # unit-stride shifted slices (no 25x im2col blowup).
        x_all = xph_ref[...]                                   # (B,4,Hh,Wh,C)

        if conv_first:
            # C < 128: ReLU -> 1x1 conv -> pooled SUM (conv & pool commute),
            # so the 25-tap accumulation is lane-dense over 128 channels.
            acc = jnp.zeros((B, Ho, Wo, 128), jnp.float32)
            for pi in range(2):
                for pj in range(2):
                    plane = jnp.maximum(x_all[:, 2 * pi + pj], 0.0)
                    y = jnp.dot(
                        plane.reshape(B * Hh * Wh, C).astype(jnp.bfloat16),
                        w1_ref[...], preferred_element_type=jnp.float32)
                    y = y.reshape(B, Hh, Wh, 128)
                    for di in range(3 - pi):                   # ki = 2*di + pi
                        for dj in range(3 - pj):               # kj = 2*dj + pj
                            acc = acc + y[:, di:di + Ho, dj:dj + Wo, :]
            h1 = acc                                           # pre-BN, f32
        else:
            # C >= 128: pool-first (4x fewer conv MACs; lanes already dense).
            # TODO(synk): on v5e with very large C, chunk this accumulation in
            # 128-lane slabs to avoid accumulator store-slot pressure.
            acc = jnp.zeros((B, Ho, Wo, C), jnp.float32)
            for pi in range(2):
                for pj in range(2):
                    plane = jnp.maximum(x_all[:, 2 * pi + pj], 0.0)
                    for di in range(3 - pi):
                        for dj in range(3 - pj):
                            acc = acc + plane[:, di:di + Ho, dj:dj + Wo, :]
            h1 = jnp.dot(acc.reshape(B * Ho * Wo, C).astype(jnp.bfloat16),
                         w1_ref[...], preferred_element_type=jnp.float32)
            h1 = h1.reshape(B, Ho, Wo, 128)

        # BN1 (scale already contains the 1/25 AvgPool divisor) + ReLU.
        h1 = jnp.maximum(h1 * s1_ref[...] + b1_ref[...], 0.0)
        h1 = h1.astype(jnp.bfloat16)                           # (B,Ho,Wo,128)

        # 2x2 valid conv as ONE K=512 matmul: shift the 128-lane input, concat
        # the 4 taps along lanes, contract against the (512, 768) weight.
        cat = jnp.concatenate(
            [h1[:, kh:kh + Ho2, kw:kw + Wo2, :]
             for kh in range(2) for kw in range(2)], axis=-1)  # (B,Ho2,Wo2,512)
        h2 = jnp.dot(cat.reshape(B * Ho2 * Wo2, 4 * 128), w2_ref[...],
                     preferred_element_type=jnp.float32)       # (M2, 768)
        h2 = jnp.maximum(h2 * s2_ref[...] + b2_ref[...], 0.0)  # BN2 + ReLU

        # AdaptiveAvgPool2d(1): per-image spatial SUM (the 1/(Ho2*Wo2) divisor
        # is folded into wfc).  Then the classifier, all fused.
        pooled = jnp.sum(h2.reshape(B, Ho2 * Wo2, 768), axis=1)        # (B,768)
        logits = jnp.dot(pooled.astype(jnp.bfloat16), wfc_ref[...],
                         preferred_element_type=jnp.float32) + bfc_ref[...]
        out_ref[...] = logits.reshape(B, 1, NCpad)             # lane-dense

    return kernel


# ------------------------------ Forward pass ------------------------------- #

def _pick_batch_block(n, target):
    """Largest b <= target dividing n, preferring >=2 grid steps (v7x 2 TCs)."""
    b = max(1, min(target, n))
    while b > 1 and (n % b != 0 or n // b < 2):
        b -= 1
    return b


def auxiliary_head_forward(x_nchw, params, *, batch_block=4):
    if x_nchw.ndim != 4:
        raise ValueError(f"Expected 4D input tensor, got shape {x_nchw.shape}")
    N, C, H, W = x_nchw.shape
    num_classes = params["w_fc"].shape[1]
    NCpad = ((num_classes + 127) // 128) * 128

    x = jnp.transpose(x_nchw, (0, 2, 3, 1)).astype(jnp.float32)   # NHWC

    # AvgPool2d(k=5, s=2, p=2) output extent.
    Ho = (H - 1) // 2 + 1
    Wo = (W - 1) // 2 + 1
    Hh, Wh = Ho + 2, Wo + 2
    Ho2, Wo2 = Ho - 1, Wo - 1

    # Zero-pad 2 on top/left (the nn.AvgPool2d padding); pad bottom/right so
    # the padded extent is exactly (2*Hh, 2*Wh).  Rows/cols beyond PyTorch's
    # own padding are zeros that no contributing pool tap distinguishes, so
    # semantics are unchanged (count_include_pad=True divides by 25 anyway).
    xp = jnp.pad(x, ((0, 0), (2, 2 * Hh - H - 2), (2, 2 * Wh - W - 2), (0, 0)))
    # Stride-2 phase planes: (N, 4, Hh, Wh, C), phase index p = 2*(ki%2)+(kj%2).
    xph = (xp.reshape(N, Hh, 2, Wh, 2, C)
             .transpose(0, 2, 4, 1, 3, 5)
             .reshape(N, 4, Hh, Wh, C))

    B_BLK = _pick_batch_block(N, batch_block)
    conv_first = C < 128

    # Fold the global-average-pool divisor into the classifier weight; pad the
    # classifier to a lane-dense 128-multiple (sliced back below).
    wfc = params["w_fc"] * (1.0 / float(Ho2 * Wo2))
    wfc = jnp.pad(wfc, ((0, 0), (0, NCpad - num_classes))).astype(jnp.bfloat16)
    bfc = jnp.pad(params["b_fc"].reshape(1, -1),
                  ((0, 0), (0, NCpad - num_classes))).astype(jnp.float32)

    cparams = pltpu.CompilerParams(
        dimension_semantics=("parallel",),          # batch grid -> both v7x TCs
        vmem_limit_bytes=32 * 1024 * 1024,          # fits v7x 64 MiB physical
    )

    out = pl.pallas_call(
        _make_fused_kernel(B_BLK, Hh, Wh, Ho, Wo, C, NCpad, conv_first),
        out_shape=jax.ShapeDtypeStruct((N, 1, NCpad), jnp.float32),
        grid=(N // B_BLK,),
        in_specs=[
            pl.BlockSpec((B_BLK, 4, Hh, Wh, C), lambda n: (n, 0, 0, 0, 0)),
            pl.BlockSpec((C, 128), lambda n: (0, 0)),        # resident weight
            pl.BlockSpec((1, 128), lambda n: (0, 0)),        # resident BN1 scale
            pl.BlockSpec((1, 128), lambda n: (0, 0)),        # resident BN1 bias
            pl.BlockSpec((4 * 128, 768), lambda n: (0, 0)),  # resident conv2 w
            pl.BlockSpec((1, 768), lambda n: (0, 0)),        # resident BN2 scale
            pl.BlockSpec((1, 768), lambda n: (0, 0)),        # resident BN2 bias
            pl.BlockSpec((768, NCpad), lambda n: (0, 0)),    # resident fc w
            pl.BlockSpec((1, NCpad), lambda n: (0, 0)),      # resident fc b
        ],
        out_specs=pl.BlockSpec((B_BLK, 1, NCpad), lambda n: (n, 0, 0)),
        compiler_params=cparams,
    )(xph, params["w1"], params["scale1"], params["bias1"],
      params["w2"], params["scale2"], params["bias2"], wfc, bfc)

    return out.reshape(N, NCpad)[:, :num_classes]


# ----------------------------- Parameter init ------------------------------ #

def init_params(key, in_channels, num_classes):
    eps = 1e-5
    k1, k2, k3, k4 = jax.random.split(key, 4)

    # Conv1: torch weight (128, Cin, 1, 1) -> stored (Cin, 128) bf16 MXU operand.
    w1 = jax.random.normal(k1, (in_channels, 128), jnp.float32) / jnp.sqrt(
        jnp.float32(in_channels))
    # BN1 eval-mode fold (PyTorch defaults: weight=1, bias=0, rm=0, rv=1).
    # The 1/25 AvgPool divisor (count_include_pad=True) is folded into scale1.
    g1 = jnp.ones((128,), jnp.float32); b1 = jnp.zeros((128,), jnp.float32)
    m1 = jnp.zeros((128,), jnp.float32); v1 = jnp.ones((128,), jnp.float32)
    inv1 = g1 / jnp.sqrt(v1 + eps)
    scale1 = (inv1 / 25.0).reshape(1, 128)
    bias1 = (b1 - m1 * inv1).reshape(1, 128)

    # Conv2: torch weight (768, 128, 2, 2) -> transpose to (kh, kw, cin, cout)
    # -> reshape (512, 768); row order (kh, kw, cin) matches the kernel's
    # lane-concat order of the four shifted taps.
    w2 = jax.random.normal(k2, (2, 2, 128, 768), jnp.float32) / jnp.sqrt(
        jnp.float32(2 * 2 * 128))
    w2 = w2.reshape(512, 768)
    g2 = jnp.ones((768,), jnp.float32); b2 = jnp.zeros((768,), jnp.float32)
    m2 = jnp.zeros((768,), jnp.float32); v2 = jnp.ones((768,), jnp.float32)
    inv2 = g2 / jnp.sqrt(v2 + eps)
    scale2 = inv2.reshape(1, 768)
    bias2 = (b2 - m2 * inv2).reshape(1, 768)

    # Classifier Linear(768, num_classes): stored as torch weight.T, f32 (the
    # GAP divisor is folded + bf16 cast happens in the wrapper).
    # TODO(synk): init distribution differs from PyTorch's default uniform init;
    # irrelevant once real trained weights are loaded.
    w_fc = jax.random.normal(k3, (768, num_classes), jnp.float32) * 0.02
    b_fc = jax.random.normal(k4, (num_classes,), jnp.float32) * 0.02

    return dict(
        w1=w1.astype(jnp.bfloat16),
        scale1=scale1, bias1=bias1,
        w2=w2.astype(jnp.bfloat16),
        scale2=scale2, bias2=bias2,
        w_fc=w_fc, b_fc=b_fc,
    )


if __name__ == "__main__":
    key = jax.random.PRNGKey(0)
    kx, kp = jax.random.split(key)

    in_channels, num_classes = 4, 10
    x = jax.random.normal(kx, (2, in_channels, 16, 16), jnp.float32)  # NCHW
    params = init_params(kp, in_channels, num_classes)

    out = jax.jit(auxiliary_head_forward)(x, params)
    out = jax.block_until_ready(out)
    assert out.shape == (2, num_classes), out.shape
    assert bool(jnp.all(jnp.isfinite(out)))
    print("KERNEL_OK")
</pallas_src>

<mosaic_0001>
module attributes {stable_mosaic.version = 11 : i64} {
  func.func @kernel(%arg0: i32, %arg1: memref<1x4x10x10x4xf32, #tpu.memory_space<vmem>>, %arg2: memref<4x128xbf16, #tpu.memory_space<vmem>>, %arg3: memref<1x128xf32, #tpu.memory_space<vmem>>, %arg4: memref<1x128xf32, #tpu.memory_space<vmem>>, %arg5: memref<512x768xbf16, #tpu.memory_space<vmem>>, %arg6: memref<1x768xf32, #tpu.memory_space<vmem>>, %arg7: memref<1x768xf32, #tpu.memory_space<vmem>>, %arg8: memref<768x128xbf16, #tpu.memory_space<vmem>>, %arg9: memref<1x128xf32, #tpu.memory_space<vmem>>, %arg10: memref<1x1x128xf32, #tpu.memory_space<vmem>>) attributes {dimension_semantics = [#tpu.dimension_semantics<parallel>], iteration_bounds = array<i64: 2>, scalar_prefetch = 0 : i64, scratch_operands = 0 : i64, tpu.core_type = #tpu.core_type<tc>, window_params = [{transform_indices = @transform_0, window_bounds = array<i64: 1, 4, 10, 10, 4>}, {pipeline_mode = #tpu.pipeline_mode<synchronous>, transform_indices = @transform_1, window_bounds = array<i64: 4, 128>}, {pipeline_mode = #tpu.pipeline_mode<synchronous>, transform_indices = @transform_2, window_bounds = array<i64: 1, 128>}, {pipeline_mode = #tpu.pipeline_mode<synchronous>, transform_indices = @transform_3, window_bounds = array<i64: 1, 128>}, {pipeline_mode = #tpu.pipeline_mode<synchronous>, transform_indices = @transform_4, window_bounds = array<i64: 512, 768>}, {pipeline_mode = #tpu.pipeline_mode<synchronous>, transform_indices = @transform_5, window_bounds = array<i64: 1, 768>}, {pipeline_mode = #tpu.pipeline_mode<synchronous>, transform_indices = @transform_6, window_bounds = array<i64: 1, 768>}, {pipeline_mode = #tpu.pipeline_mode<synchronous>, transform_indices = @transform_7, window_bounds = array<i64: 768, 128>}, {pipeline_mode = #tpu.pipeline_mode<synchronous>, transform_indices = @transform_8, window_bounds = array<i64: 1, 128>}, {transform_indices = @transform_9, window_bounds = array<i64: 1, 1, 128>}]} {
    %c0 = arith.constant 0 : index
    %c0_0 = arith.constant 0 : index
    %c0_1 = arith.constant 0 : index
    %c0_2 = arith.constant 0 : index
    %c0_3 = arith.constant 0 : index
    %0 = vector.load %arg1[%c0, %c0_0, %c0_1, %c0_2, %c0_3] : memref<1x4x10x10x4xf32, #tpu.memory_space<vmem>>, vector<1x4x10x10x4xf32>
    %cst = arith.constant 0.000000e+00 : f32
    %1 = vector.broadcast %cst : f32 to vector<1x8x8x128xf32>
    %2 = vector.extract_strided_slice %0 {offsets = [0, 0, 0, 0, 0], sizes = [1, 1, 10, 10, 4], strides = [1, 1, 1, 1, 1]} : vector<1x4x10x10x4xf32> to vector<1x1x10x10x4xf32>
    %3 = vector.shape_cast %2 : vector<1x1x10x10x4xf32> to vector<1x10x10x4xf32>
    %cst_4 = arith.constant 0.000000e+00 : f32
    %4 = vector.broadcast %cst_4 : f32 to vector<1x10x10x4xf32>
    %5 = arith.maximumf %3, %4 : vector<1x10x10x4xf32>
    %6 = vector.shape_cast %5 : vector<1x10x10x4xf32> to vector<100x4xf32>
    %7 = arith.truncf %6 : vector<100x4xf32> to vector<100x4xbf16>
    %c0_5 = arith.constant 0 : index
    %c0_6 = arith.constant 0 : index
    %8 = vector.load %arg2[%c0_5, %c0_6] : memref<4x128xbf16, #tpu.memory_space<vmem>>, vector<4x128xbf16>
    %cst_7 = arith.constant dense<0.000000e+00> : vector<100x128xf32>
    %9 = tpu.matmul %7, %8, %cst_7 {dimension_numbers = #tpu.dot_dimension_numbers<[1], [0], [0], [1], [0, 0, 1, 1], [], []>} : vector<100x4xbf16>, vector<4x128xbf16>, vector<100x128xf32> -> vector<100x128xf32>
    %10 = vector.shape_cast %9 : vector<100x128xf32> to vector<1x10x10x128xf32>
    %11 = vector.extract_strided_slice %10 {offsets = [0, 0, 0, 0], sizes = [1, 8, 8, 128], strides = [1, 1, 1, 1]} : vector<1x10x10x128xf32> to vector<1x8x8x128xf32>
    %12 = arith.addf %1, %11 : vector<1x8x8x128xf32>
    %13 = vector.extract_strided_slice %10 {offsets = [0, 0, 1, 0], sizes = [1, 8, 8, 128], strides = [1, 1, 1, 1]} : vector<1x10x10x128xf32> to vector<1x8x8x128xf32>
    %14 = arith.addf %12, %13 : vector<1x8x8x128xf32>
    %15 = vector.extract_strided_slice %10 {offsets = [0, 0, 2, 0], sizes = [1, 8, 8, 128], strides = [1, 1, 1, 1]} : vector<1x10x10x128xf32> to vector<1x8x8x128xf32>
    %16 = arith.addf %14, %15 : vector<1x8x8x128xf32>
    %17 = vector.extract_strided_slice %10 {offsets = [0, 1, 0, 0], sizes = [1, 8, 8, 128], strides = [1, 1, 1, 1]} : vector<1x10x10x128xf32> to vector<1x8x8x128xf32>
    %18 = arith.addf %16, %17 : vector<1x8x8x128xf32>
    %19 = vector.extract_strided_slice %10 {offsets = [0, 1, 1, 0], sizes = [1, 8, 8, 128], strides = [1, 1, 1, 1]} : vector<1x10x10x128xf32> to vector<1x8x8x128xf32>
    %20 = arith.addf %18, %19 : vector<1x8x8x128xf32>
    %21 = vector.extract_strided_slice %10 {offsets = [0, 1, 2, 0], sizes = [1, 8, 8, 128], strides = [1, 1, 1, 1]} : vector<1x10x10x128xf32> to vector<1x8x8x128xf32>
    %22 = arith.addf %20, %21 : vector<1x8x8x128xf32>
    %23 = vector.extract_strided_slice %10 {offsets = [0, 2, 0, 0], sizes = [1, 8, 8, 128], strides = [1, 1, 1, 1]} : vector<1x10x10x128xf32> to vector<1x8x8x128xf32>
    %24 = arith.addf %22, %23 : vector<1x8x8x128xf32>
    %25 = vector.extract_strided_slice %10 {offsets = [0, 2, 1, 0], sizes = [1, 8, 8, 128], strides = [1, 1, 1, 1]} : vector<1x10x10x128xf32> to vector<1x8x8x128xf32>
    %26 = arith.addf %24, %25 : vector<1x8x8x128xf32>
    %27 = vector.extract_strided_slice %10 {offsets = [0, 2, 2, 0], sizes = [1, 8, 8, 128], strides = [1, 1, 1, 1]} : vector<1x10x10x128xf32> to vector<1x8x8x128xf32>
    %28 = arith.addf %26, %27 : vector<1x8x8x128xf32>
    %29 = vector.extract_strided_slice %0 {offsets = [0, 1, 0, 0, 0], sizes = [1, 1, 10, 10, 4], strides = [1, 1, 1, 1, 1]} : vector<1x4x10x10x4xf32> to vector<1x1x10x10x4xf32>
    %30 = vector.shape_cast %29 : vector<1x1x10x10x4xf32> to vector<1x10x10x4xf32>
    %cst_8 = arith.constant 0.000000e+00 : f32
    %31 = vector.broadcast %cst_8 : f32 to vector<1x10x10x4xf32>
    %32 = arith.maximumf %30, %31 : vector<1x10x10x4xf32>
    %33 = vector.shape_cast %32 : vector<1x10x10x4xf32> to vector<100x4xf32>
    %34 = arith.truncf %33 : vector<100x4xf32> to vector<100x4xbf16>
    %c0_9 = arith.constant 0 : index
    %c0_10 = arith.constant 0 : index
    %35 = vector.load %arg2[%c0_9, %c0_10] : memref<4x128xbf16, #tpu.memory_space<vmem>>, vector<4x128xbf16>
    %cst_11 = arith.constant dense<0.000000e+00> : vector<100x128xf32>
    %36 = tpu.matmul %34, %35, %cst_11 {dimension_numbers = #tpu.dot_dimension_numbers<[1], [0], [0], [1], [0, 0, 1, 1], [], []>} : vector<100x4xbf16>, vector<4x128xbf16>, vector<100x128xf32> -> vector<100x128xf32>
    %37 = vector.shape_cast %36 : vector<100x128xf32> to vector<1x10x10x128xf32>
    %38 = vector.extract_strided_slice %37 {offsets = [0, 0, 0, 0], sizes = [1, 8, 8, 128], strides = [1, 1, 1, 1]} : vector<1x10x10x128xf32> to vector<1x8x8x128xf32>
    %39 = arith.addf %28, %38 : vector<1x8x8x128xf32>
    %40 = vector.extract_strided_slice %37 {offsets = [0, 0, 1, 0], sizes = [1, 8, 8, 128], strides = [1, 1, 1, 1]} : vector<1x10x10x128xf32> to vector<1x8x8x128xf32>
    %41 = arith.addf %39, %40 : vector<1x8x8x128xf32>
    %42 = vector.extract_strided_slice %37 {offsets = [0, 1, 0, 0], sizes = [1, 8, 8, 128], strides = [1, 1, 1, 1]} : vector<1x10x10x128xf32> to vector<1x8x8x128xf32>
    %43 = arith.addf %41, %42 : vector<1x8x8x128xf32>
    %44 = vector.extract_strided_slice %37 {offsets = [0, 1, 1, 0], sizes = [1, 8, 8, 128], strides = [1, 1, 1, 1]} : vector<1x10x10x128xf32> to vector<1x8x8x128xf32>
    %45 = arith.addf %43, %44 : vector<1x8x8x128xf32>
    %46 = vector.extract_strided_slice %37 {offsets = [0, 2, 0, 0], sizes = [1, 8, 8, 128], strides = [1, 1, 1, 1]} : vector<1x10x10x128xf32> to vector<1x8x8x128xf32>
    %47 = arith.addf %45, %46 : vector<1x8x8x128xf32>
    %48 = vector.extract_strided_slice %37 {offsets = [0, 2, 1, 0], sizes = [1, 8, 8, 128], strides = [1, 1, 1, 1]} : vector<1x10x10x128xf32> to vector<1x8x8x128xf32>
    %49 = arith.addf %47, %48 : vector<1x8x8x128xf32>
    %50 = vector.extract_strided_slice %0 {offsets = [0, 2, 0, 0, 0], sizes = [1, 1, 10, 10, 4], strides = [1, 1, 1, 1, 1]} : vector<1x4x10x10x4xf32> to vector<1x1x10x10x4xf32>
    %51 = vector.shape_cast %50 : vector<1x1x10x10x4xf32> to vector<1x10x10x4xf32>
    %cst_12 = arith.constant 0.000000e+00 : f32
    %52 = vector.broadcast %cst_12 : f32 to vector<1x10x10x4xf32>
    %53 = arith.maximumf %51, %52 : vector<1x10x10x4xf32>
    %54 = vector.shape_cast %53 : vector<1x10x10x4xf32> to vector<100x4xf32>
    %55 = arith.truncf %54 : vector<100x4xf32> to vector<100x4xbf16>
    %c0_13 = arith.constant 0 : index
    %c0_14 = arith.constant 0 : index
    %56 = vector.load %arg2[%c0_13, %c0_14] : memref<4x128xbf16, #tpu.memory_space<vmem>>, vector<4x128xbf16>
    %cst_15 = arith.constant dense<0.000000e+00> : vector<100x128xf32>
    %57 = tpu.matmul %55, %56, %cst_15 {dimension_numbers = #tpu.dot_dimension_numbers<[1], [0], [0], [1], [0, 0, 1, 1], [], []>} : vector<100x4xbf16>, vector<4x128xbf16>, vector<100x128xf32> -> vector<100x128xf32>
    %58 = vector.shape_cast %57 : vector<100x128xf32> to vector<1x10x10x128xf32>
    %59 = vector.extract_strided_slice %58 {offsets = [0, 0, 0, 0], sizes = [1, 8, 8, 128], strides = [1, 1, 1, 1]} : vector<1x10x10x128xf32> to vector<1x8x8x128xf32>
    %60 = arith.addf %49, %59 : vector<1x8x8x128xf32>
    %61 = vector.extract_strided_slice %58 {offsets = [0, 0, 1, 0], sizes = [1, 8, 8, 128], strides = [1, 1, 1, 1]} : vector<1x10x10x128xf32> to vector<1x8x8x128xf32>
    %62 = arith.addf %60, %61 : vector<1x8x8x128xf32>
    %63 = vector.extract_strided_slice %58 {offsets = [0, 0, 2, 0], sizes = [1, 8, 8, 128], strides = [1, 1, 1, 1]} : vector<1x10x10x128xf32> to vector<1x8x8x128xf32>
    %64 = arith.addf %62, %63 : vector<1x8x8x128xf32>
    %65 = vector.extract_strided_slice %58 {offsets = [0, 1, 0, 0], sizes = [1, 8, 8, 128], strides = [1, 1, 1, 1]} : vector<1x10x10x128xf32> to vector<1x8x8x128xf32>
    %66 = arith.addf %64, %65 : vector<1x8x8x128xf32>
    %67 = vector.extract_strided_slice %58 {offsets = [0, 1, 1, 0], sizes = [1, 8, 8, 128], strides = [1, 1, 1, 1]} : vector<1x10x10x128xf32> to vector<1x8x8x128xf32>
    %68 = arith.addf %66, %67 : vector<1x8x8x128xf32>
    %69 = vector.extract_strided_slice %58 {offsets = [0, 1, 2, 0], sizes = [1, 8, 8, 128], strides = [1, 1, 1, 1]} : vector<1x10x10x128xf32> to vector<1x8x8x128xf32>
    %70 = arith.addf %68, %69 : vector<1x8x8x128xf32>
    %71 = vector.extract_strided_slice %0 {offsets = [0, 3, 0, 0, 0], sizes = [1, 1, 10, 10, 4], strides = [1, 1, 1, 1, 1]} : vector<1x4x10x10x4xf32> to vector<1x1x10x10x4xf32>
    %72 = vector.shape_cast %71 : vector<1x1x10x10x4xf32> to vector<1x10x10x4xf32>
    %cst_16 = arith.constant 0.000000e+00 : f32
    %73 = vector.broadcast %cst_16 : f32 to vector<1x10x10x4xf32>
    %74 = arith.maximumf %72, %73 : vector<1x10x10x4xf32>
    %75 = vector.shape_cast %74 : vector<1x10x10x4xf32> to vector<100x4xf32>
    %76 = arith.truncf %75 : vector<100x4xf32> to vector<100x4xbf16>
    %c0_17 = arith.constant 0 : index
    %c0_18 = arith.constant 0 : index
    %77 = vector.load %arg2[%c0_17, %c0_18] : memref<4x128xbf16, #tpu.memory_space<vmem>>, vector<4x128xbf16>
    %cst_19 = arith.constant dense<0.000000e+00> : vector<100x128xf32>
    %78 = tpu.matmul %76, %77, %cst_19 {dimension_numbers = #tpu.dot_dimension_numbers<[1], [0], [0], [1], [0, 0, 1, 1], [], []>} : vector<100x4xbf16>, vector<4x128xbf16>, vector<100x128xf32> -> vector<100x128xf32>
    %79 = vector.shape_cast %78 : vector<100x128xf32> to vector<1x10x10x128xf32>
    %80 = vector.extract_strided_slice %79 {offsets = [0, 0, 0, 0], sizes = [1, 8, 8, 128], strides = [1, 1, 1, 1]} : vector<1x10x10x128xf32> to vector<1x8x8x128xf32>
    %81 = arith.addf %70, %80 : vector<1x8x8x128xf32>
    %82 = vector.extract_strided_slice %79 {offsets = [0, 0, 1, 0], sizes = [1, 8, 8, 128], strides = [1, 1, 1, 1]} : vector<1x10x10x128xf32> to vector<1x8x8x128xf32>
    %83 = arith.addf %81, %82 : vector<1x8x8x128xf32>
    %84 = vector.extract_strided_slice %79 {offsets = [0, 1, 0, 0], sizes = [1, 8, 8, 128], strides = [1, 1, 1, 1]} : vector<1x10x10x128xf32> to vector<1x8x8x128xf32>
    %85 = arith.addf %83, %84 : vector<1x8x8x128xf32>
    %86 = vector.extract_strided_slice %79 {offsets = [0, 1, 1, 0], sizes = [1, 8, 8, 128], strides = [1, 1, 1, 1]} : vector<1x10x10x128xf32> to vector<1x8x8x128xf32>
    %87 = arith.addf %85, %86 : vector<1x8x8x128xf32>
    %c0_20 = arith.constant 0 : index
    %c0_21 = arith.constant 0 : index
    %88 = vector.load %arg3[%c0_20, %c0_21] : memref<1x128xf32, #tpu.memory_space<vmem>>, vector<1x128xf32>
    %89 = vector.shape_cast %88 : vector<1x128xf32> to vector<1x1x1x128xf32>
    %90 = vector.broadcast %89 : vector<1x1x1x128xf32> to vector<1x8x8x128xf32>
    %91 = arith.mulf %87, %90 : vector<1x8x8x128xf32>
    %c0_22 = arith.constant 0 : index
    %c0_23 = arith.constant 0 : index
    %92 = vector.load %arg4[%c0_22, %c0_23] : memref<1x128xf32, #tpu.memory_space<vmem>>, vector<1x128xf32>
    %93 = vector.shape_cast %92 : vector<1x128xf32> to vector<1x1x1x128xf32>
    %94 = vector.broadcast %93 : vector<1x1x1x128xf32> to vector<1x8x8x128xf32>
    %95 = arith.addf %91, %94 : vector<1x8x8x128xf32>
    %cst_24 = arith.constant 0.000000e+00 : f32
    %96 = vector.broadcast %cst_24 : f32 to vector<1x8x8x128xf32>
    %97 = arith.maximumf %95, %96 : vector<1x8x8x128xf32>
    %98 = arith.truncf %97 : vector<1x8x8x128xf32> to vector<1x8x8x128xbf16>
    %99 = vector.extract_strided_slice %98 {offsets = [0, 0, 0, 0], sizes = [1, 7, 7, 128], strides = [1, 1, 1, 1]} : vector<1x8x8x128xbf16> to vector<1x7x7x128xbf16>
    %100 = vector.extract_strided_slice %98 {offsets = [0, 0, 1, 0], sizes = [1, 7, 7, 128], strides = [1, 1, 1, 1]} : vector<1x8x8x128xbf16> to vector<1x7x7x128xbf16>
    %101 = vector.extract_strided_slice %98 {offsets = [0, 1, 0, 0], sizes = [1, 7, 7, 128], strides = [1, 1, 1, 1]} : vector<1x8x8x128xbf16> to vector<1x7x7x128xbf16>
    %102 = vector.extract_strided_slice %98 {offsets = [0, 1, 1, 0], sizes = [1, 7, 7, 128], strides = [1, 1, 1, 1]} : vector<1x8x8x128xbf16> to vector<1x7x7x128xbf16>
    %103 = tpu.concatenate %99, %100, %101, %102 in 3 : vector<1x7x7x128xbf16>, vector<1x7x7x128xbf16>, vector<1x7x7x128xbf16>, vector<1x7x7x128xbf16> -> vector<1x7x7x512xbf16>
    %104 = vector.shape_cast %103 : vector<1x7x7x512xbf16> to vector<49x512xbf16>
    %c0_25 = arith.constant 0 : index
    %c0_26 = arith.constant 0 : index
    %105 = vector.load %arg5[%c0_25, %c0_26] : memref<512x768xbf16, #tpu.memory_space<vmem>>, vector<512x768xbf16>
    %cst_27 = arith.constant dense<0.000000e+00> : vector<49x768xf32>
    %106 = tpu.matmul %104, %105, %cst_27 {dimension_numbers = #tpu.dot_dimension_numbers<[1], [0], [0], [1], [0, 0, 1, 1], [], []>} : vector<49x512xbf16>, vector<512x768xbf16>, vector<49x768xf32> -> vector<49x768xf32>
    %c0_28 = arith.constant 0 : index
    %c0_29 = arith.constant 0 : index
    %107 = vector.load %arg6[%c0_28, %c0_29] : memref<1x768xf32, #tpu.memory_space<vmem>>, vector<1x768xf32>
    %108 = vector.broadcast %107 : vector<1x768xf32> to vector<49x768xf32>
    %109 = arith.mulf %106, %108 : vector<49x768xf32>
    %c0_30 = arith.constant 0 : index
    %c0_31 = arith.constant 0 : index
    %110 = vector.load %arg7[%c0_30, %c0_31] : memref<1x768xf32, #tpu.memory_space<vmem>>, vector<1x768xf32>
    %111 = vector.broadcast %110 : vector<1x768xf32> to vector<49x768xf32>
    %112 = arith.addf %109, %111 : vector<49x768xf32>
    %cst_32 = arith.constant 0.000000e+00 : f32
    %113 = vector.broadcast %cst_32 : f32 to vector<49x768xf32>
    %114 = arith.maximumf %112, %113 : vector<49x768xf32>
    %115 = vector.shape_cast %114 : vector<49x768xf32> to vector<1x49x768xf32>
    %cst_33 = arith.constant dense<0.000000e+00> : vector<1x768xf32>
    %116 = vector.multi_reduction <add>, %115, %cst_33 [1] : vector<1x49x768xf32> to vector<1x768xf32>
    %117 = arith.truncf %116 : vector<1x768xf32> to vector<1x768xbf16>
    %c0_34 = arith.constant 0 : index
    %c0_35 = arith.constant 0 : index
    %118 = vector.load %arg8[%c0_34, %c0_35] : memref<768x128xbf16, #tpu.memory_space<vmem>>, vector<768x128xbf16>
    %cst_36 = arith.constant dense<0.000000e+00> : vector<1x128xf32>
    %119 = tpu.matmul %117, %118, %cst_36 {dimension_numbers = #tpu.dot_dimension_numbers<[1], [0], [0], [1], [0, 0, 1, 1], [], []>} : vector<1x768xbf16>, vector<768x128xbf16>, vector<1x128xf32> -> vector<1x128xf32>
    %c0_37 = arith.constant 0 : index
    %c0_38 = arith.constant 0 : index
    %120 = vector.load %arg9[%c0_37, %c0_38] : memref<1x128xf32, #tpu.memory_space<vmem>>, vector<1x128xf32>
    %121 = arith.addf %119, %120 : vector<1x128xf32>
    %122 = vector.shape_cast %121 : vector<1x128xf32> to vector<1x1x128xf32>
    %c0_39 = arith.constant 0 : index
    %c0_40 = arith.constant 0 : index
    %c0_41 = arith.constant 0 : index
    %123 = vector.load %arg10[%c0_39, %c0_40, %c0_41] : memref<1x1x128xf32, #tpu.memory_space<vmem>>, vector<1x1x128xf32>
    tpu.vector_store %arg10[%c0_39, %c0_40, %c0_41], %122 {strides = array<i32>} : memref<1x1x128xf32, #tpu.memory_space<vmem>>, vector<1x1x128xf32>,
    return
  }
  func.func @transform_0(%arg0: i32) -> (i32, i32, i32, i32, i32) {
    %c0_i32 = arith.constant 0 : i32
    %c0_i32_0 = arith.constant 0 : i32
    %c0_i32_1 = arith.constant 0 : i32
    %c0_i32_2 = arith.constant 0 : i32
    %c0_i32_3 = arith.constant 0 : i32
    return %arg0, %c0_i32, %c0_i32_0, %c0_i32_1, %c0_i32_2 : i32, i32, i32, i32, i32
  }
  func.func @transform_1(%arg0: i32) -> (i32, i32) {
    %c0_i32 = arith.constant 0 : i32
    %c0_i32_0 = arith.constant 0 : i32
    %c0_i32_1 = arith.constant 0 : i32
    return %c0_i32, %c0_i32_0 : i32, i32
  }
  func.func @transform_2(%arg0: i32) -> (i32, i32) {
    %c0_i32 = arith.constant 0 : i32
    %c0_i32_0 = arith.constant 0 : i32
    %c0_i32_1 = arith.constant 0 : i32
    return %c0_i32, %c0_i32_0 : i32, i32
  }
  func.func @transform_3(%arg0: i32) -> (i32, i32) {
    %c0_i32 = arith.constant 0 : i32
    %c0_i32_0 = arith.constant 0 : i32
    %c0_i32_1 = arith.constant 0 : i32
    return %c0_i32, %c0_i32_0 : i32, i32
  }
  func.func @transform_4(%arg0: i32) -> (i32, i32) {
    %c0_i32 = arith.constant 0 : i32
    %c0_i32_0 = arith.constant 0 : i32
    %c0_i32_1 = arith.constant 0 : i32
    return %c0_i32, %c0_i32_0 : i32, i32
  }
  func.func @transform_5(%arg0: i32) -> (i32, i32) {
    %c0_i32 = arith.constant 0 : i32
    %c0_i32_0 = arith.constant 0 : i32
    %c0_i32_1 = arith.constant 0 : i32
    return %c0_i32, %c0_i32_0 : i32, i32
  }
  func.func @transform_6(%arg0: i32) -> (i32, i32) {
    %c0_i32 = arith.constant 0 : i32
    %c0_i32_0 = arith.constant 0 : i32
    %c0_i32_1 = arith.constant 0 : i32
    return %c0_i32, %c0_i32_0 : i32, i32
  }
  func.func @transform_7(%arg0: i32) -> (i32, i32) {
    %c0_i32 = arith.constant 0 : i32
    %c0_i32_0 = arith.constant 0 : i32
    %c0_i32_1 = arith.constant 0 : i32
    return %c0_i32, %c0_i32_0 : i32, i32
  }
  func.func @transform_8(%arg0: i32) -> (i32, i32) {
    %c0_i32 = arith.constant 0 : i32
    %c0_i32_0 = arith.constant 0 : i32
    %c0_i32_1 = arith.constant 0 : i32
    return %c0_i32, %c0_i32_0 : i32, i32
  }
  func.func @transform_9(%arg0: i32) -> (i32, i32, i32) {
    %c0_i32 = arith.constant 0 : i32
    %c0_i32_0 = arith.constant 0 : i32
    %c0_i32_1 = arith.constant 0 : i32
    return %arg0, %c0_i32, %c0_i32_0 : i32, i32, i32
  }
}

</mosaic_0001>

<bundles_post_ra>
// kernel: auxiliary_head_forward.1
= control target key start
LH: loop header
LB: loop body
LE: loop exit
PB: predicated region body
PF: predicated region fallthrough
CT: control target
= control target key end

     0   :  { %14 = vsyncpa [#allocation3], 0  ;;  %s12072_s0 = inlined_call_operand.vmem [shape: f32[2,4,10,10,4], index: 0, kind: input, shape index: {}]   ;;  %s12073_s1 = inlined_call_operand.vmem [shape: bf16[4,128], index: 1, kind: input, shape index: {}]   ;;  %s12074_s2 = inlined_call_operand.vmem [shape: f32[1,128], index: 2, kind: input, shape index: {}]   ;;  %s12075_s3 = inlined_call_operand.vmem [shape: f32[1,128], index: 3, kind: input, shape index: {}]   ;;  %s12076_s4 = inlined_call_operand.vmem [shape: bf16[512,768], index: 4, kind: input, shape index: {}]   ;;  %s12077_s5 = inlined_call_operand.vmem [shape: f32[1,768], index: 5, kind: input, shape index: {}]   ;;  %s12078_s6 = inlined_call_operand.vmem [shape: f32[1,768], index: 6, kind: input, shape index: {}]   ;;  %s12079_s7 = inlined_call_operand.vmem [shape: bf16[768,128], index: 7, kind: input, shape index: {}]   ;;  %s12080_s8 = inlined_call_operand.vmem [shape: f32[1,128], index: 8, kind: input, shape index: {}]   ;;  %s12081_s9 = inlined_call_operand.hbm [shape: f32[2,1,128], index: 9, kind: output, shape index: {}]  }
   0x1   :  { %16 = vsyncpa [#allocation3 + $0x1], 0  ;;  %s7781_s30 = smov 0   ;;  %s7783_s10 = smov 0  }
   0x2   :  { %s7785_s11 = smov 0   ;;  %s7787_s12 = smov 0  }
   0x3 LB: > { %s7802_s13 = sadd.s32 4294967295, %s7729_s12   ;;  %s6317_s14 = sadd.s32 4294967294, %s7729_s12   ;;  %s7729_s12 = sphi %s7787_s12, %s12353_s12   ;;  %s7725_s11 = sphi %s7785_s11, %s12352_s11   ;;  %s7721_s10 = sphi %s7783_s10, %s12351_s10   ;;  %s7717_s30 = sphi %s7781_s30, %s12350_s30  }
   0x4   : > { %s7806_s15 = sadd.s32 1, %s7729_s12   ;;  %s223_s16 = sadd.s32 1, %s7725_s11 }
   0x5   : > { %s220_s17 = ssub.s32 %s7729_s12, %s7806_s15  ;;  %p233_p0 = scmp.ne.s32.totalorder %s7725_s11, %s7721_s10 }
   0x6   : > { %p221_p1 = scmp.eq.s32.totalorder %s220_s17, 0  ;;  %p234_p2 = scmp.eq.s32.totalorder %s7802_s13, 1 }
   0x7   : > { %p239_p3 = scmp.ne.s32.totalorder %s7721_s10, %s7717_s30  ;;  %p240_p4 = scmp.eq.s32.totalorder %s6317_s14, 1 }
   0x8   : > { %s7817_s18 = scalar_select %p221_p1, %s7725_s11, %s223_s16  }
   0x9   : > { %p7819_p5 = por %p234_p2, %p233_p0  ;;  %p7823_p6 = por %p240_p4, %p239_p3 }
   0xa   : > { %p6320_p7 = scmp.ge.s32.totalorder %s7729_s12, 1  ;;  %p290_p8 = scmp.lt.s32.totalorder %s7729_s12, 3 }
   0xc   : > { %p291_p9 = pnand %p6320_p7, %p290_p8 }
   0xe   : > { %294 = sbr.rel (%p291_p9) target bundleno = 1333 (0x535), region = 56 }
  0x13   : > { %v571_v0 = vld [vmem:[%s12073_s1] sm:$0x3]  ;;  %vm594_vm0 = vcmask 1041408   ;;  %p325_p10 = scmp.lt.s32.totalorder %s7802_s13, 1  ;;  %vm572_vm1 = vcmask 31744   ;;  %vm760_vm2 = vcmask 1040384   ;;  %s6258_s25 = scalar_lea.hbm %s12081_s9, %s7802_s13 }
  0x14   : > { %v596_v1 = vsel %vm594_vm0, %v571_v0, 0  ;;  %vm761_vm3 = vcmask 1042434   ;;  %vm763_vm5 = vcmask 1044484   ;;  %vm765_vm7 = vcmask 1046534   ;;  %s323_s22 = sand.u32 1, %s7721_s10   ;;  %s6262_s28 = sshll.u32 %s6258_s25, 4  ;;  %s6263_s28 = int_to_ptr.hbm [resolvable:$true] %s6262_s28 }
  0x15   : > { %605 = vmatpush.bf16.msra.mxu0 %v596_v1  ;;  %1381 = vmatpush.bf16.msra.mxu1 %v596_v1  ;;  %s326_s23 = scalar_select %p325_p10, %s7802_s13, 1  ;;  %vm762_vm4 = vmor %vm760_vm2, %vm761_vm3  ;;  %vm3401_vm9 = vcmask 1041409   ;;  %vm3403_vm10 = vcmask 1043459   ;;  %vm3405_vm11 = vcmask 1042433   ;;  %vm3411_vm12 = vcmask 1043458  }
  0x16   : > { %7615 = vmatpush.bf16.msra.mxu2 %v596_v1  ;;  %7616 = vmatpush.bf16.msra.mxu3 %v596_v1  ;;  %vm764_vm6 = vmor %vm762_vm4, %vm763_vm5  ;;  %vm3416_vm13 = vcmask 1045509   ;;  %vm3418_vm14 = vcmask 1044483   ;;  %s324_s26 = scalar_lea.vmem [#allocation2], %s323_s22  ;;  %s6250_s29 = scalar_lea.sflag [#allocation3], %s323_s22 }
  0x17   : > { %s7617_s24 = smul.u32 640, %s326_s23  ;;  %vm7954_vm8 = vmor %vm764_vm6, %vm765_vm7  ;;  %s7681_s14 = sshra.s32 %s6263_s28, 4  ;;  %s7682_s14 = int_to_ptr.hbm [resolvable:$true] %s7681_s14 }
  0x18   : > { %s7683_s16 = scalar_lea.hbm %s7682_s14, 1  ;;  %s7687_s13 = scalar_lea.hbm %s12081_s9, 2 }
  0x19   : > { %s7838_s27 = scalar_lea.vmem %s12072_s0, %s7617_s24  ;;  %p7684_p11 = scmp.ne.s32.totalorder %s7682_s14, %s7683_s16 }
  0x1a   : > { %2047 = vmatpush.bf16.msrb.mxu2 %v596_v1  ;;  %2693 = vmatpush.bf16.msrb.mxu3 %v596_v1  ;;  %v331_v2 = vld [vmem:[%s7838_s27] sm:$0xff]  ;;  %v332_v3 = vld [vmem:[%s7838_s27 + $0x8] sm:$0x3]  ;;  %v333_v4 = vld [vmem:[%s7838_s27 + $0x10] sm:$0xff]  ;;  %p7688_p0 = scmp.lt.s32.totalorder %s7682_s14, %s12081_s9  ;;  %p7689_p1 = scmp.lt.s32.totalorder %s7687_s13, %s7683_s16 }
  0x1b   : > { %v411_v5 = vmax.f32 %v331_v2, 0.0  ;;  %v412_v6 = vmax.f32 %v332_v3, 0.0  ;;  %v413_v7 = vmax.f32 %v333_v4, 0.0  ;;  %v335_v13 = vld [vmem:[%s7838_s27 + $0x20] sm:$0xff]  ;;  %v334_v14 = vld [vmem:[%s7838_s27 + $0x18] sm:$0x3]  ;;  %p7685_p12 = pnand %p7684_p11, %p7819_p5 }
  0x1c   : > { %v415_v15 = vmax.f32 %v335_v13, 0.0  ;;  %v414_v17 = vmax.f32 %v334_v14, 0.0  ;;  %v336_v19 = vld [vmem:[%s7838_s27 + $0x28] sm:$0x3]  ;;  %v337_v21 = vld [vmem:[%s7838_s27 + $0x30] sm:$0xff]  ;;  %v339_v28 = vld [vmem:[%s7838_s27 + $0x40] sm:$0xff]  ;;  %p7690_p2 = por %p7689_p1, %p7688_p0 }
  0x1d   : > { %v451_v8 = vrot.slane %v411_v5, 2  ;;  %v452_v9 = vrot.slane %v411_v5, 4  ;;  %v453_v10 = vrot.slane %v411_v5, 6  ;;  %481 = vst [vmem:[#allocation1] ss:$4 sm:$0xff] %v411_v5  ;;  %v454_v11 = vrot.slane %v413_v7, 2  ;;  %p7686_p13 = pneg %p7685_p12 }
  0x1e   : > { %489 = vst [vmem:[#allocation1 + $0x20] ss:$4 sm:$0xff] %v412_v6  ;;  %v455_v12 = vrot.slane %v413_v7, 4  ;;  %v456_v16 = vrot.slane %v413_v7, 6  ;;  %v457_v20 = vrot.slane %v415_v15, 2  ;;  %v458_v22 = vrot.slane %v415_v15, 4 }
  0x1f   : > { %483 = vst [vmem:[#allocation1 + $0x1] ss:$4 sm:$0xff] %v451_v8  ;;  %v459_v23 = vrot.slane %v415_v15, 6  ;;  %v416_v25 = vmax.f32 %v336_v19, 0.0  ;;  %v417_v27 = vmax.f32 %v337_v21, 0.0  ;;  %v419_v31 = vmax.f32 %v339_v28, 0.0  ;;  %p7691_p3 = pnand %p7690_p2, %p7686_p13 }
  0x20   : > { %485 = vst [vmem:[#allocation1 + $0x2] ss:$4 sm:$0xff] %v452_v9  ;;  %v338_v29 = vld [vmem:[%s7838_s27 + $0x38] sm:$0x3]  ;;  %v341_v37 = vld [vmem:[%s7838_s27 + $0x50] sm:$0xff]  ;;  %v343_v46 = vld [vmem:[%s7838_s27 + $0x60] sm:$0xff] }
  0x21   : > { %487 = vst [vmem:[#allocation1 + $0x3] ss:$4 sm:$0xff] %v453_v10  ;;  %v460_v30 = vrot.slane %v417_v27, 2  ;;  %v461_v32 = vrot.slane %v417_v27, 4  ;;  %v462_v33 = vrot.slane %v417_v27, 6  ;;  %v418_v35 = vmax.f32 %v338_v29, 0.0 }
  0x22   : > { %491 = vst [vmem:[#allocation1 + $0x21] ss:$4 sm:$0xff] %v413_v7  ;;  %v463_v36 = vrot.slane %v419_v31, 2  ;;  %v464_v38 = vrot.slane %v419_v31, 4  ;;  %v465_v40 = vrot.slane %v419_v31, 6  ;;  %v421_v42 = vmax.f32 %v341_v37, 0.0 }
  0x23   : > { %493 = vst [vmem:[#allocation1 + $0x22] ss:$4 sm:$0xff] %v454_v11  ;;  %v340_v41 = vld [vmem:[%s7838_s27 + $0x48] sm:$0x3]  ;;  %v342_v45 = vld [vmem:[%s7838_s27 + $0x58] sm:$0x3] }
  0x24   : > { %495 = vst [vmem:[#allocation1 + $0x23] ss:$4 sm:$0xff] %v455_v12  ;;  %v420_v44 = vmax.f32 %v340_v41, 0.0  ;;  %v466_v47 = vrot.slane %v421_v42, 2  ;;  %v467_v48 = vrot.slane %v421_v42, 4  ;;  %v468_v50 = vrot.slane %v421_v42, 6 }
  0x25   : > { %v422_v51 = vmax.f32 %v342_v45, 0.0  ;;  %v423_v52 = vmax.f32 %v343_v46, 0.0  ;;  %v344_v55 = vld [vmem:[%s7838_s27 + $0x68] sm:$0x3]  ;;  %v345_v56 = vld [vmem:[%s7838_s27 + $0x70] sm:$0xff]  ;;  %v347_v0 = vld [vmem:[%s7838_s27 + $0x80] sm:$0xff] }
  0x26   : > { %v424_v59 = vmax.f32 %v344_v55, 0.0  ;;  %v425_v60 = vmax.f32 %v345_v56, 0.0  ;;  %v346_v62 = vld [vmem:[%s7838_s27 + $0x78] sm:$0x3]  ;;  %v427_v5 = vmax.f32 %v347_v0, 0.0  ;;  %v349_v7 = vld [vmem:[%s7838_s27 + $0x90] sm:$0xff] }
  0x27   : > { %v469_v53 = vrot.slane %v423_v52, 2  ;;  %v470_v57 = vrot.slane %v423_v52, 4  ;;  %v471_v58 = vrot.slane %v423_v52, 6  ;;  %v426_v3 = vmax.f32 %v346_v62, 0.0  ;;  %v348_v6 = vld [vmem:[%s7838_s27 + $0x88] sm:$0x3] }
  0x28   : > { %v496_v18 = vld.sshfl [vmem:[#allocation1] sm:$0xff pattern:$0x73625140]  ;;  %v472_v63 = vrot.slane %v425_v60, 2  ;;  %v473_v1 = vrot.slane %v425_v60, 4  ;;  %v474_v2 = vrot.slane %v425_v60, 6 }
  0x29   : > { %498 = vst [vmem:[#allocation1] ss:$4 sm:$0xff] %v456_v16  ;;  %v475_v8 = vrot.slane %v427_v5, 2  ;;  %v476_v9 = vrot.slane %v427_v5, 4  ;;  %v477_v10 = vrot.slane %v427_v5, 6  ;;  %v428_v12 = vmax.f32 %v348_v6, 0.0 }
  0x2a   : > { %499 = vst [vmem:[#allocation1 + $0x1] ss:$4 sm:$0xff] %v414_v17  ;;  %v429_v13 = vmax.f32 %v349_v7, 0.0  ;;  %v353_v19 = vld [vmem:[%s7838_s27 + $0xb0] sm:$0xff]  ;;  %v352_v21 = vld [vmem:[%s7838_s27 + $0xa8] sm:$0x3] }
  0x2b   : > { %v497_v24 = vld.sshfl [vmem:[#allocation1 + $0x20] sm:$0xff pattern:$0x73625140]  ;;  %500 = vst [vmem:[#allocation1 + $0x2] ss:$4 sm:$0xff] %v415_v15 }
  0x2c   : > { %v564_v26 = vpack.c.bf16 %v497_v24, %v496_v18  ;;  %501 = vst [vmem:[#allocation1 + $0x3] ss:$4 sm:$0xff] %v457_v20  ;;  %v478_v15 = vrot.slane %v429_v13, 2  ;;  %v479_v16 = vrot.slane %v429_v13, 4  ;;  %v350_v18 = vld [vmem:[%s7838_s27 + $0x98] sm:$0x3] }
  0x2d   : > { %502 = vst [vmem:[#allocation1 + $0x20] ss:$4 sm:$0xff] %v458_v22  ;;  %v480_v20 = vrot.slane %v429_v13, 6  ;;  %v430_v22 = vmax.f32 %v350_v18, 0.0  ;;  %v351_v24 = vld [vmem:[%s7838_s27 + $0xa0] sm:$0xff] }
  0x2e   : > { %6322 = vmatmul.msk.bf16.vlgmr.msra.gmra.mxu0 %vm572_vm1, %v564_v26  ;;  %503 = vst [vmem:[#allocation1 + $0x21] ss:$4 sm:$0xff] %v459_v23  ;;  %v1195_v23 = vmax.f32 %v353_v19, 0.0  ;;  %v1194_v26 = vmax.f32 %v352_v21, 0.0  ;;  %v354_v45 = vld [vmem:[%s7838_s27 + $0xb8] sm:$0x3] }
  0x2f   : > { %504 = vst [vmem:[#allocation1 + $0x22] ss:$4 sm:$0xff] %v416_v25  ;;  %v366_v19 = vld [vmem:[%s7838_s27 + $0x118] sm:$0x3] }
  0x30   : > { %505 = vst [vmem:[#allocation1 + $0x23] ss:$4 sm:$0xff] %v417_v27  ;;  %v1193_v27 = vmax.f32 %v351_v24, 0.0  ;;  %v1236_v28 = vrot.slane %v1195_v23, 2 }
  0x33   : > { %v506_v34 = vld.sshfl [vmem:[#allocation1] sm:$0xff pattern:$0x73625140] }
  0x34   : > { %508 = vst [vmem:[#allocation1] ss:$4 sm:$0xff] %v460_v30  ;;  %v1237_v30 = vrot.slane %v1195_v23, 4 }
  0x35   : > { %509 = vst [vmem:[#allocation1 + $0x1] ss:$4 sm:$0xff] %v461_v32  ;;  %v355_v32 = vld [vmem:[%s7838_s27 + $0xc0] sm:$0xff] }
  0x36   : > { %510 = vst [vmem:[#allocation1 + $0x2] ss:$4 sm:$0xff] %v462_v33  ;;  %v1234_v33 = vrot.slane %v1193_v27, 4 }
  0x37   : > { %v507_v39 = vld.sshfl [vmem:[#allocation1 + $0x20] sm:$0xff pattern:$0x73625140]  ;;  %511 = vst [vmem:[#allocation1 + $0x3] ss:$4 sm:$0xff] %v418_v35  ;;  %v1235_v35 = vrot.slane %v1193_v27, 6 }
  0x38   : > { %512 = vst [vmem:[#allocation1 + $0x20] ss:$4 sm:$0xff] %v419_v31  ;;  %v565_v43 = vpack.c.bf16 %v507_v39, %v506_v34  ;;  %v1233_v31 = vrot.slane %v1193_v27, 2  ;;  %v356_v39 = vld [vmem:[%s7838_s27 + $0xc8] sm:$0x3] }
  0x39   : > { %513 = vst [vmem:[#allocation1 + $0x21] ss:$4 sm:$0xff] %v463_v36  ;;  %v1197_v36 = vmax.f32 %v355_v32, 0.0 }
  0x3a   : > { %514 = vst [vmem:[#allocation1 + $0x22] ss:$4 sm:$0xff] %v464_v38 }
  0x3b   : > { %515 = vst [vmem:[#allocation1 + $0x23] ss:$4 sm:$0xff] %v465_v40  ;;  %v1240_v40 = vrot.slane %v1197_v36, 4  ;;  %v1241_v41 = vrot.slane %v1197_v36, 6 }
  0x3e   : > { %6323 = vmatmul.msk.bf16.gmra.mxu0 %vm572_vm1, %v565_v43  ;;  %v516_v49 = vld.sshfl [vmem:[#allocation1] sm:$0xff pattern:$0x73625140]  ;;  %v1198_v43 = vmax.f32 %v356_v39, 0.0 }
  0x3f   : > { %518 = vst [vmem:[#allocation1] ss:$4 sm:$0xff] %v420_v44 }
  0x40   : > { %519 = vst [vmem:[#allocation1 + $0x1] ss:$4 sm:$0xff] %v421_v42  ;;  %v357_v42 = vld [vmem:[%s7838_s27 + $0xd0] sm:$0xff] }
  0x41   : > { %520 = vst [vmem:[#allocation1 + $0x2] ss:$4 sm:$0xff] %v466_v47  ;;  %v1199_v46 = vmax.f32 %v357_v42, 0.0  ;;  %v1238_v47 = vrot.slane %v1195_v23, 6  ;;  %v373_v42 = vld [vmem:[%s7838_s27 + $0x150] sm:$0xff] }
  0x42   : > { %v517_v54 = vld.sshfl [vmem:[#allocation1 + $0x20] sm:$0xff pattern:$0x73625140]  ;;  %521 = vst [vmem:[#allocation1 + $0x3] ss:$4 sm:$0xff] %v467_v48 }
  0x43   : > { %522 = vst [vmem:[#allocation1 + $0x20] ss:$4 sm:$0xff] %v468_v50  ;;  %v566_v14 = vpack.c.bf16 %v517_v54, %v516_v49  ;;  %v359_v48 = vld [vmem:[%s7838_s27 + $0xe0] sm:$0xff]  ;;  %v1196_v49 = vmax.f32 %v354_v45, 0.0  ;;  %v1244_v62 = vrot.slane %v1199_v46, 6 }
  0x44   : > { %523 = vst [vmem:[#allocation1 + $0x21] ss:$4 sm:$0xff] %v422_v51  ;;  %v1239_v51 = vrot.slane %v1197_v36, 2  ;;  %v372_v45 = vld [vmem:[%s7838_s27 + $0x148] sm:$0x3] }
  0x45   : > { %524 = vst [vmem:[#allocation1 + $0x22] ss:$4 sm:$0xff] %v423_v52  ;;  %v1201_v52 = vmax.f32 %v359_v48, 0.0  ;;  %v1861_v48 = vmax.f32 %v373_v42, 0.0  ;;  %v380_v42 = vld [vmem:[%s7838_s27 + $0x188] sm:$0x3] }
  0x46   : > { %525 = vst [vmem:[#allocation1 + $0x23] ss:$4 sm:$0xff] %v469_v53 }
  0x47   : > { %v1245_v54 = vrot.slane %v1201_v52, 2  ;;  %v1246_v55 = vrot.slane %v1201_v52, 4 }
  0x49   : > { %v7857_v61 = vld.sshfl [vmem:[#allocation1] sm:$0xff pattern:$0x73625140] }
  0x4a   : > { %528 = vst [vmem:[#allocation1] ss:$4 sm:$0xff] %v470_v57  ;;  %v1247_v57 = vrot.slane %v1201_v52, 6 }
  0x4b   : > { %529 = vst [vmem:[#allocation1 + $0x1] ss:$4 sm:$0xff] %v471_v58  ;;  %v358_v58 = vld [vmem:[%s7838_s27 + $0xd8] sm:$0x3] }
  0x4c   : > { %530 = vst [vmem:[#allocation1 + $0x2] ss:$4 sm:$0xff] %v424_v59  ;;  %v1242_v59 = vrot.slane %v1199_v46, 2  ;;  %v1200_v0 = vmax.f32 %v358_v58, 0.0 }
  0x4d   : > { %v527_v4 = vld.sshfl [vmem:[#allocation1 + $0x20] sm:$0xff pattern:$0x73625140]  ;;  %531 = vst [vmem:[#allocation1 + $0x3] ss:$4 sm:$0xff] %v425_v60  ;;  %v1243_v60 = vrot.slane %v1199_v46, 4 }
  0x4e   : > { %532 = vst [vmem:[#allocation1 + $0x20] ss:$4 sm:$0xff] %v472_v63  ;;  %6324 = vmatmul.msk.bf16.gmra.mxu0 %vm572_vm1, %v566_v14  ;;  %v567_v38 = vpack.c.bf16 %v527_v4, %v7857_v61  ;;  %v361_v61 = vld [vmem:[%s7838_s27 + $0xf0] sm:$0xff]  ;;  %v363_v63 = vld [vmem:[%s7838_s27 + $0x100] sm:$0xff] }
  0x4f   : > { %533 = vst [vmem:[#allocation1 + $0x21] ss:$4 sm:$0xff] %v473_v1  ;;  %v1205_v4 = vmax.f32 %v363_v63, 0.0 }
  0x50   : > { %534 = vst [vmem:[#allocation1 + $0x22] ss:$4 sm:$0xff] %v474_v2  ;;  %v362_v2 = vld [vmem:[%s7838_s27 + $0xf8] sm:$0x3] }
  0x51   : > { %535 = vst [vmem:[#allocation1 + $0x23] ss:$4 sm:$0xff] %v426_v3  ;;  %v1203_v3 = vmax.f32 %v361_v61, 0.0  ;;  %v1204_v7 = vmax.f32 %v362_v2, 0.0 }
  0x53   : > { %v1248_v14 = vrot.slane %v1203_v3, 2 }
  0x54   : > { %v7863_v11 = vld.sshfl [vmem:[#allocation1] sm:$0xff pattern:$0x73625140] }
  0x55   : > { %538 = vst [vmem:[#allocation1] ss:$4 sm:$0xff] %v427_v5  ;;  %v1250_v5 = vrot.slane %v1203_v3, 6 }
  0x56   : > { %539 = vst [vmem:[#allocation1 + $0x1] ss:$4 sm:$0xff] %v475_v8  ;;  %v360_v8 = vld [vmem:[%s7838_s27 + $0xe8] sm:$0x3] }
  0x57   : > { %540 = vst [vmem:[#allocation1 + $0x2] ss:$4 sm:$0xff] %v476_v9 }
  0x58   : > { %v7865_v17 = vld.sshfl [vmem:[#allocation1 + $0x20] sm:$0xff pattern:$0x73625140]  ;;  %541 = vst [vmem:[#allocation1 + $0x3] ss:$4 sm:$0xff] %v477_v10  ;;  %v1251_v10 = vrot.slane %v1205_v4, 2 }
  0x59   : > { %542 = vst [vmem:[#allocation1 + $0x20] ss:$4 sm:$0xff] %v428_v12  ;;  %v1202_v12 = vmax.f32 %v360_v8, 0.0  ;;  %v377_v8 = vld [vmem:[%s7838_s27 + $0x170] sm:$0xff] }
  0x5a   : > { %543 = vst [vmem:[#allocation1 + $0x21] ss:$4 sm:$0xff] %v429_v13  ;;  %v365_v13 = vld [vmem:[%s7838_s27 + $0x110] sm:$0xff] }
  0x5b   : > { %544 = vst [vmem:[#allocation1 + $0x22] ss:$4 sm:$0xff] %v478_v15  ;;  %v1207_v18 = vmax.f32 %v365_v13, 0.0 }
  0x5c   : > { %545 = vst [vmem:[#allocation1 + $0x23] ss:$4 sm:$0xff] %v479_v16  ;;  %v1249_v16 = vrot.slane %v1203_v3, 4 }
  0x5d   : > { %v1255_v21 = vrot.slane %v1207_v18, 4 }
  0x5e   : > { %6325 = vmatmul.msk.bf16.gmra.mxu0 %vm572_vm1, %v567_v38 }
  0x5f   : > { %v7872_v25 = vld.sshfl [vmem:[#allocation1] sm:$0xff pattern:$0x73625140] }
  0x60   : > { %548 = vst [vmem:[#allocation1] ss:$4 sm:$0xff] %v480_v20  ;;  %v1254_v20 = vrot.slane %v1207_v18, 2 }
  0x61   : > { %549 = vst [vmem:[#allocation1 + $0x1] ss:$4 sm:$0xff] %v430_v22  ;;  %v1256_v22 = vrot.slane %v1207_v18, 6 }
  0x63   : > { %v7874_v29 = vld.sshfl [vmem:[#allocation1 + $0x20] sm:$0xff pattern:$0x73625140] }
  0x64   : > { %1271 = vst [vmem:[#allocation1 + $0x20] ss:$4 sm:$0xff] %v1194_v26  ;;  %v364_v26 = vld [vmem:[%s7838_s27 + $0x108] sm:$0x3] }
  0x65   : > { %1273 = vst [vmem:[#allocation1 + $0x21] ss:$4 sm:$0xff] %v1195_v23  ;;  %v1208_v23 = vmax.f32 %v366_v19, 0.0  ;;  %v1206_v32 = vmax.f32 %v364_v26, 0.0 }
  0x66   : > { %1275 = vst [vmem:[#allocation1 + $0x22] ss:$4 sm:$0xff] %v1236_v28 }
  0x67   : > { %1277 = vst [vmem:[#allocation1 + $0x23] ss:$4 sm:$0xff] %v1237_v30  ;;  %v369_v30 = vld [vmem:[%s7838_s27 + $0x130] sm:$0xff] }
  0x68   : > { %v550_v34 = vld.sshfl [vmem:[#allocation1] sm:$0xff pattern:$0x73625140] }
  0x69   : > { %1263 = vst [vmem:[#allocation1] ss:$4 sm:$0xff] %v1193_v27  ;;  %v570_v37 = vpack.c.bf16 %v550_v34, %v550_v34  ;;  %v1252_v27 = vrot.slane %v1205_v4, 4 }
  0x6a   : > { %1265 = vst [vmem:[#allocation1 + $0x1] ss:$4 sm:$0xff] %v1233_v31  ;;  %v1253_v31 = vrot.slane %v1205_v4, 6 }
  0x6b   : > { %1267 = vst [vmem:[#allocation1 + $0x2] ss:$4 sm:$0xff] %v1234_v33  ;;  %6328 = vmatmul.msk.bf16.vlgmr.msra.gmra.mxu2 %vm572_vm1, %v570_v37  ;;  %v368_v33 = vld [vmem:[%s7838_s27 + $0x128] sm:$0x3] }
  0x6c   : > { %1269 = vst [vmem:[#allocation1 + $0x3] ss:$4 sm:$0xff] %v1235_v35  ;;  %v1211_v35 = vmax.f32 %v369_v30, 0.0  ;;  %v1210_v37 = vmax.f32 %v368_v33, 0.0 }
  0x6e   : > { %v1279_v44 = vld.sshfl [vmem:[#allocation1 + $0x20] sm:$0xff pattern:$0x73625140]  ;;  %v1260_v39 = vrot.slane %v1211_v35, 2 }
  0x6f   : > { %1284 = vst [vmem:[#allocation1 + $0x20] ss:$4 sm:$0xff] %v1240_v40  ;;  %v1261_v40 = vrot.slane %v1211_v35, 4 }
  0x70   : > { %1285 = vst [vmem:[#allocation1 + $0x21] ss:$4 sm:$0xff] %v1241_v41 }
  0x71   : > { %1286 = vst [vmem:[#allocation1 + $0x22] ss:$4 sm:$0xff] %v1198_v43 }
  0x72   : > { %1287 = vst [vmem:[#allocation1 + $0x23] ss:$4 sm:$0xff] %v1199_v46 }
  0x73   : > { %v1278_v50 = vld.sshfl [vmem:[#allocation1] sm:$0xff pattern:$0x73625140] }
  0x74   : > { %v1346_v53 = vpack.c.bf16 %v1279_v44, %v1278_v50  ;;  %1280 = vst [vmem:[#allocation1] ss:$4 sm:$0xff] %v1238_v47  ;;  %v1860_v50 = vmax.f32 %v372_v45, 0.0 }
  0x75   : > { %1281 = vst [vmem:[#allocation1 + $0x1] ss:$4 sm:$0xff] %v1196_v49  ;;  %v568_v49 = vpack.c.bf16 %v7865_v17, %v7863_v11  ;;  %v375_v17 = vld [vmem:[%s7838_s27 + $0x160] sm:$0xff] }
  0x76   : > { %6339 = vmatmul.msk.bf16.vlgmr.msra.gmra.mxu1 %vm572_vm1, %v1346_v53  ;;  %1282 = vst [vmem:[#allocation1 + $0x2] ss:$4 sm:$0xff] %v1197_v36  ;;  %v367_v36 = vld [vmem:[%s7838_s27 + $0x120] sm:$0xff]  ;;  %v370_v53 = vld [vmem:[%s7838_s27 + $0x138] sm:$0x3] }
  0x77   : > { %1283 = vst [vmem:[#allocation1 + $0x3] ss:$4 sm:$0xff] %v1239_v51  ;;  %v1209_v38 = vmax.f32 %v367_v36, 0.0  ;;  %6326 = vmatmul.msk.bf16.gmra.mxu0 %vm572_vm1, %v568_v49  ;;  %v1212_v11 = vmax.f32 %v370_v53, 0.0  ;;  %v386_v49 = vld [vmem:[%s7838_s27 + $0x1b8] sm:$0x3] }
  0x79   : > { %v1289_v56 = vld.sshfl [vmem:[#allocation1 + $0x20] sm:$0xff pattern:$0x73625140]  ;;  %v1257_v43 = vrot.slane %v1209_v38, 2  ;;  %v1258_v44 = vrot.slane %v1209_v38, 4  ;;  %v1259_v46 = vrot.slane %v1209_v38, 6 }
  0x7a   : > { %1294 = vst [vmem:[#allocation1 + $0x20] ss:$4 sm:$0xff] %v1201_v52  ;;  %v1902_v52 = vrot.slane %v1861_v48, 2 }
  0x7b   : > { %1295 = vst [vmem:[#allocation1 + $0x21] ss:$4 sm:$0xff] %v1245_v54 }
  0x7c   : > { %1296 = vst [vmem:[#allocation1 + $0x22] ss:$4 sm:$0xff] %v1246_v55  ;;  %v1903_v55 = vrot.slane %v1861_v48, 4 }
  0x7d   : > { %1297 = vst [vmem:[#allocation1 + $0x23] ss:$4 sm:$0xff] %v1247_v57  ;;  %v371_v57 = vld [vmem:[%s7838_s27 + $0x140] sm:$0xff] }
  0x7e   : > { %v1288_v1 = vld.sshfl [vmem:[#allocation1] sm:$0xff pattern:$0x73625140]  ;;  %v1859_v61 = vmax.f32 %v371_v57, 0.0 }
  0x7f   : > { %1290 = vst [vmem:[#allocation1] ss:$4 sm:$0xff] %v1242_v59  ;;  %v1347_v6 = vpack.c.bf16 %v1289_v56, %v1288_v1  ;;  %v1262_v56 = vrot.slane %v1211_v35, 6  ;;  %v1863_v59 = vmax.f32 %v375_v17, 0.0 }
  0x80   : > { %1291 = vst [vmem:[#allocation1 + $0x1] ss:$4 sm:$0xff] %v1243_v60  ;;  %v376_v60 = vld [vmem:[%s7838_s27 + $0x168] sm:$0x3]  ;;  %v1899_v2 = vrot.slane %v1859_v61, 2 }
  0x81   : > { %1292 = vst [vmem:[#allocation1 + $0x2] ss:$4 sm:$0xff] %v1244_v62  ;;  %v1906_v62 = vrot.slane %v1863_v59, 4  ;;  %v1907_v63 = vrot.slane %v1863_v59, 6 }
  0x82   : > { %1293 = vst [vmem:[#allocation1 + $0x3] ss:$4 sm:$0xff] %v1200_v0  ;;  %v1864_v0 = vmax.f32 %v376_v60, 0.0 }
  0x84   : > { %v1299_v9 = vld.sshfl [vmem:[#allocation1 + $0x20] sm:$0xff pattern:$0x73625140] }
  0x85   : > { %1304 = vst [vmem:[#allocation1 + $0x20] ss:$4 sm:$0xff] %v1250_v5  ;;  %v1901_v5 = vrot.slane %v1859_v61, 6 }
  0x86   : > { %6340 = vmatmul.msk.bf16.gmra.mxu1 %vm572_vm1, %v1347_v6  ;;  %1305 = vst [vmem:[#allocation1 + $0x21] ss:$4 sm:$0xff] %v1204_v7 }
  0x87   : > { %1306 = vst [vmem:[#allocation1 + $0x22] ss:$4 sm:$0xff] %v1205_v4  ;;  %v1900_v4 = vrot.slane %v1859_v61, 4 }
  0x88   : > { %1307 = vst [vmem:[#allocation1 + $0x23] ss:$4 sm:$0xff] %v1251_v10  ;;  %v1865_v10 = vmax.f32 %v377_v8, 0.0 }
  0x89   : > { %v1298_v15 = vld.sshfl [vmem:[#allocation1] sm:$0xff pattern:$0x73625140] }
  0x8a   : > { %1300 = vst [vmem:[#allocation1] ss:$4 sm:$0xff] %v1202_v12  ;;  %v1348_v28 = vpack.c.bf16 %v1299_v9, %v1298_v15  ;;  %v1904_v12 = vrot.slane %v1861_v48, 6  ;;  %v1908_v26 = vrot.slane %v1865_v10, 2  ;;  %v1909_v30 = vrot.slane %v1865_v10, 4 }
  0x8b   : > { %1301 = vst [vmem:[#allocation1 + $0x1] ss:$4 sm:$0xff] %v1203_v3  ;;  %v569_v3 = vpack.c.bf16 %v7874_v29, %v7872_v25  ;;  %v374_v25 = vld [vmem:[%s7838_s27 + $0x158] sm:$0x3]  ;;  %v379_v29 = vld [vmem:[%s7838_s27 + $0x180] sm:$0xff] }
  0x8c   : > { %1302 = vst [vmem:[#allocation1 + $0x2] ss:$4 sm:$0xff] %v1248_v14  ;;  %v1862_v13 = vmax.f32 %v374_v25, 0.0  ;;  %v1867_v14 = vmax.f32 %v379_v29, 0.0 }
  0x8d   : > { %1303 = vst [vmem:[#allocation1 + $0x3] ss:$4 sm:$0xff] %v1249_v16  ;;  %6327 = vmatmul.msk.bf16.gmra.mxu0 %vm572_vm1, %v569_v3  ;;  %v1905_v16 = vrot.slane %v1863_v59, 2 }
  0x8f   : > { %v1309_v24 = vld.sshfl [vmem:[#allocation1 + $0x20] sm:$0xff pattern:$0x73625140] }
  0x90   : > { %1314 = vst [vmem:[#allocation1 + $0x20] ss:$4 sm:$0xff] %v1254_v20  ;;  %v1911_v20 = vrot.slane %v1867_v14, 2 }
  0x91   : > { %1315 = vst [vmem:[#allocation1 + $0x21] ss:$4 sm:$0xff] %v1255_v21  ;;  %v1912_v21 = vrot.slane %v1867_v14, 4 }
  0x92   : > { %1316 = vst [vmem:[#allocation1 + $0x22] ss:$4 sm:$0xff] %v1256_v22  ;;  %v1913_v22 = vrot.slane %v1867_v14, 6 }
  0x93   : > { %1317 = vst [vmem:[#allocation1 + $0x23] ss:$4 sm:$0xff] %v1208_v23 }
  0x94   : > { %v1308_v34 = vld.sshfl [vmem:[#allocation1] sm:$0xff pattern:$0x73625140] }
  0x95   : > { %1310 = vst [vmem:[#allocation1] ss:$4 sm:$0xff] %v1252_v27  ;;  %v1349_v51 = vpack.c.bf16 %v1309_v24, %v1308_v34  ;;  %v381_v24 = vld [vmem:[%s7838_s27 + $0x190] sm:$0xff]  ;;  %v378_v27 = vld [vmem:[%s7838_s27 + $0x178] sm:$0x3] }
  0x96   : > { %6341 = vmatmul.msk.bf16.gmra.mxu1 %vm572_vm1, %v1348_v28  ;;  %1311 = vst [vmem:[#allocation1 + $0x1] ss:$4 sm:$0xff] %v1253_v31  ;;  %v383_v28 = vld [vmem:[%s7838_s27 + $0x1a0] sm:$0xff]  ;;  %v1910_v31 = vrot.slane %v1865_v10, 6  ;;  %v1869_v33 = vmax.f32 %v381_v24, 0.0 }
  0x97   : > { %1312 = vst [vmem:[#allocation1 + $0x2] ss:$4 sm:$0xff] %v1206_v32  ;;  %v382_v32 = vld [vmem:[%s7838_s27 + $0x198] sm:$0x3]  ;;  %v1871_v36 = vmax.f32 %v383_v28, 0.0 }
  0x98   : > { %1313 = vst [vmem:[#allocation1 + $0x3] ss:$4 sm:$0xff] %v1207_v18  ;;  %v1914_v45 = vrot.slane %v1869_v33, 2 }
  0x99   : > { %v1919_v57 = vrot.slane %v1871_v36, 6 }
  0x9a   : > { %v1319_v41 = vld.sshfl [vmem:[#allocation1 + $0x20] sm:$0xff pattern:$0x73625140] }
  0x9b   : > { %1324 = vst [vmem:[#allocation1 + $0x20] ss:$4 sm:$0xff] %v1210_v37  ;;  %v1916_v37 = vrot.slane %v1869_v33, 6 }
  0x9c   : > { %1325 = vst [vmem:[#allocation1 + $0x21] ss:$4 sm:$0xff] %v1211_v35  ;;  %v1866_v35 = vmax.f32 %v378_v27, 0.0 }
  0x9d   : > { %1326 = vst [vmem:[#allocation1 + $0x22] ss:$4 sm:$0xff] %v1260_v39 }
  0x9e   : > { %1327 = vst [vmem:[#allocation1 + $0x23] ss:$4 sm:$0xff] %v1261_v40 }
  0x9f   : > { %v1318_v47 = vld.sshfl [vmem:[#allocation1] sm:$0xff pattern:$0x73625140] }
  0xa0   : > { %1320 = vst [vmem:[#allocation1] ss:$4 sm:$0xff] %v1209_v38  ;;  %v1350_v6 = vpack.c.bf16 %v1319_v41, %v1318_v47  ;;  %v1870_v38 = vmax.f32 %v382_v32, 0.0  ;;  %v1917_v41 = vrot.slane %v1871_v36, 2 }
  0xa1   : > { %1321 = vst [vmem:[#allocation1 + $0x1] ss:$4 sm:$0xff] %v1257_v43  ;;  %v385_v43 = vld [vmem:[%s7838_s27 + $0x1b0] sm:$0xff] }
  0xa2   : > { %1322 = vst [vmem:[#allocation1 + $0x2] ss:$4 sm:$0xff] %v1258_v44  ;;  %v1868_v44 = vmax.f32 %v380_v42, 0.0 }
  0xa3   : > { %1323 = vst [vmem:[#allocation1 + $0x3] ss:$4 sm:$0xff] %v1259_v46  ;;  %v1873_v46 = vmax.f32 %v385_v43, 0.0 }
  0xa5   : > { %v7904_v54 = vld.sshfl [vmem:[#allocation1 + $0x20] sm:$0xff pattern:$0x73625140] }
  0xa6   : > { %1937 = vst [vmem:[#allocation1 + $0x20] ss:$4 sm:$0xff] %v1860_v50  ;;  %6342 = vmatmul.msk.bf16.gmra.mxu1 %vm572_vm1, %v1349_v51  ;;  %v1920_v50 = vrot.slane %v1873_v46, 2  ;;  %v1921_v51 = vrot.slane %v1873_v46, 4 }
  0xa7   : > { %1939 = vst [vmem:[#allocation1 + $0x21] ss:$4 sm:$0xff] %v1861_v48  ;;  %v1915_v48 = vrot.slane %v1869_v33, 4 }
  0xa8   : > { %1941 = vst [vmem:[#allocation1 + $0x22] ss:$4 sm:$0xff] %v1902_v52  ;;  %v1922_v52 = vrot.slane %v1873_v46, 6 }
  0xa9   : > { %1943 = vst [vmem:[#allocation1 + $0x23] ss:$4 sm:$0xff] %v1903_v55  ;;  %v384_v55 = vld [vmem:[%s7838_s27 + $0x1a8] sm:$0x3] }
  0xaa   : > { %v1328_v58 = vld.sshfl [vmem:[#allocation1] sm:$0xff pattern:$0x73625140] }
  0xab   : > { %1330 = vst [vmem:[#allocation1] ss:$4 sm:$0xff] %v1262_v56  ;;  %v1351_v23 = vpack.c.bf16 %v7904_v54, %v1328_v58  ;;  %v1874_v54 = vmax.f32 %v386_v49, 0.0  ;;  %v389_v56 = vld [vmem:[%s7838_s27 + $0x1d0] sm:$0xff]  ;;  %v388_v58 = vld [vmem:[%s7838_s27 + $0x1c8] sm:$0x3] }
  0xac   : > { %1331 = vst [vmem:[#allocation1 + $0x1] ss:$4 sm:$0xff] %v1212_v11  ;;  %v1918_v11 = vrot.slane %v1871_v36, 4  ;;  %v7934_v60 = vmax.f32 %v389_v56, 0.0 }
  0xae   : > { %v1928_v28 = vrot.slane %v7934_v60, 6 }
  0xb0   : > { %v1945_v1 = vld.sshfl [vmem:[#allocation1 + $0x20] sm:$0xff pattern:$0x73625140] }
  0xb1   : > { %1950 = vst [vmem:[#allocation1 + $0x20] ss:$4 sm:$0xff] %v1906_v62  ;;  %v1876_v62 = vmax.f32 %v388_v58, 0.0 }
  0xb2   : > { %1951 = vst [vmem:[#allocation1 + $0x21] ss:$4 sm:$0xff] %v1907_v63  ;;  %v387_v63 = vld [vmem:[%s7838_s27 + $0x1c0] sm:$0xff] }
  0xb3   : > { %v1332_v7 = vld.sshfl [vmem:[#allocation1] sm:$0xff pattern:$0x73625140]  ;;  %1952 = vst [vmem:[#allocation1 + $0x22] ss:$4 sm:$0xff] %v1864_v0  ;;  %v1926_v0 = vrot.slane %v7934_v60, 2 }
  0xb4   : > { %1929 = vst [vmem:[#allocation1] ss:$4 sm:$0xff] %v1859_v61  ;;  %v1352_v9 = vpack.c.bf16 %v1332_v7, %v1332_v7  ;;  %v1875_v3 = vmax.f32 %v387_v63, 0.0 }
  0xb5   : > { %1931 = vst [vmem:[#allocation1 + $0x1] ss:$4 sm:$0xff] %v1899_v2 }
  0xb6   : > { %1933 = vst [vmem:[#allocation1 + $0x2] ss:$4 sm:$0xff] %v1900_v4  ;;  %6343 = vmatmul.msk.bf16.gmra.mxu1 %vm572_vm1, %v1350_v6  ;;  %6345 = vmatmul.msk.bf16.vlgmr.msra.gmra.mxu3 %vm572_vm1, %v1352_v9  ;;  %v393_v4 = vld [vmem:[%s7838_s27 + $0x1f0] sm:$0xff]  ;;  %v1923_v6 = vrot.slane %v1875_v3, 2  ;;  %v1924_v8 = vrot.slane %v1875_v3, 4  ;;  %v1925_v9 = vrot.slane %v1875_v3, 6 }
  0xb7   : > { %1935 = vst [vmem:[#allocation1 + $0x3] ss:$4 sm:$0xff] %v1901_v5  ;;  %v392_v5 = vld [vmem:[%s7838_s27 + $0x1e8] sm:$0x3]  ;;  %v7947_v7 = vmax.f32 %v393_v4, 0.0 }
  0xb8   : > { %1953 = vst [vmem:[#allocation1 + $0x23] ss:$4 sm:$0xff] %v1865_v10  ;;  %v2506_v25 = vmax.f32 %v392_v5, 0.0 }
  0xb9   : > { %v2548_v29 = vrot.slane %v7947_v7, 2 }
  0xbe   : > { %v1944_v15 = vld.sshfl [vmem:[#allocation1] sm:$0xff pattern:$0x73625140] }
  0xbf   : > { %v2012_v18 = vpack.c.bf16 %v1945_v1, %v1944_v15  ;;  %1946 = vst [vmem:[#allocation1] ss:$4 sm:$0xff] %v1904_v12  ;;  %v1955_v19 = vld.sshfl [vmem:[#allocation1 + $0x20] sm:$0xff pattern:$0x73625140]  ;;  %v1927_v1 = vrot.slane %v7934_v60, 4  ;;  %v607_v12 = vpop.f32.mrf.mxu0 }
  0xc0   : > { %1947 = vst [vmem:[#allocation1 + $0x1] ss:$4 sm:$0xff] %v1862_v13  ;;  %v655_v15 = vrot.slane %v607_v12, 4 }
  0xc1   : > { %6363 = vmatmul.msk.bf16.vlgmr.msrb.gmra.mxu2 %vm572_vm1, %v2012_v18  ;;  %1948 = vst [vmem:[#allocation1 + $0x2] ss:$4 sm:$0xff] %v1863_v59  ;;  %v1872_v59 = vmax.f32 %v384_v55, 0.0 }
  0xc2   : > { %1949 = vst [vmem:[#allocation1 + $0x3] ss:$4 sm:$0xff] %v1905_v16  ;;  %v6329_v16 = vrot.slane %v607_v12, 9  ;;  %v772_v27 = vrot.slane %v655_v15, 7 }
  0xc3   : > { %1960 = vst [vmem:[#allocation1 + $0x20] ss:$4 sm:$0xff] %v1867_v14  ;;  %v654_v14 = vrot.slane %v607_v12, 2 }
  0xc4   : > { %1961 = vst [vmem:[#allocation1 + $0x21] ss:$4 sm:$0xff] %v1911_v20  ;;  %v2549_v20 = vrot.slane %v7947_v7, 4 }
  0xc5   : > { %1962 = vst [vmem:[#allocation1 + $0x22] ss:$4 sm:$0xff] %v1912_v21  ;;  %v769_v21 = vrot.slane %v654_v14, 7 }
  0xc6   : > { %1963 = vst [vmem:[#allocation1 + $0x23] ss:$4 sm:$0xff] %v1913_v22  ;;  %6344 = vmatmul.msk.bf16.gmra.mxu1 %vm572_vm1, %v1351_v23  ;;  %v395_v22 = vld [vmem:[%s7838_s27 + $0x200] sm:$0xff]  ;;  %v390_v23 = vld [vmem:[%s7838_s27 + $0x1d8] sm:$0x3] }
  0xc7   : > { %v770_v24 = vsel %vm7954_vm8, %v6329_v16, %v769_v21  ;;  %v7968_v32 = vmax.f32 %v395_v22, 0.0 }
  0xc9   : > { %v1954_v34 = vld.sshfl [vmem:[#allocation1] sm:$0xff pattern:$0x73625140] }
  0xca   : > { %1956 = vst [vmem:[#allocation1] ss:$4 sm:$0xff] %v1908_v26  ;;  %v2013_v39 = vpack.c.bf16 %v1955_v19, %v1954_v34  ;;  %v771_v26 = vrot.slane %v769_v21, 2  ;;  %v391_v34 = vld [vmem:[%s7838_s27 + $0x1e0] sm:$0xff] }
  0xcb   : > { %1957 = vst [vmem:[#allocation1 + $0x1] ss:$4 sm:$0xff] %v1909_v30  ;;  %v656_v30 = vrot.slane %v607_v12, 6 }
  0xcc   : > { %1958 = vst [vmem:[#allocation1 + $0x2] ss:$4 sm:$0xff] %v1910_v31  ;;  %v903_v31 = vadd.f32 %v770_v24, %v607_v12 }
  0xcd   : > { %1959 = vst [vmem:[#allocation1 + $0x3] ss:$4 sm:$0xff] %v1866_v35  ;;  %v1965_v40 = vld.sshfl [vmem:[#allocation1 + $0x20] sm:$0xff pattern:$0x73625140]  ;;  %v774_v35 = vrot.slane %v772_v27, 2 }
  0xce   : > { %1970 = vst [vmem:[#allocation1 + $0x20] ss:$4 sm:$0xff] %v1916_v37  ;;  %v396_v37 = vld [vmem:[%s7838_s27 + $0x208] sm:$0x3]  ;;  %v775_v43 = vrot.slane %v656_v30, 7 }
  0xcf   : > { %1971 = vst [vmem:[#allocation1 + $0x21] ss:$4 sm:$0xff] %v1870_v38 }
  0xd0   : > { %1972 = vst [vmem:[#allocation1 + $0x22] ss:$4 sm:$0xff] %v1871_v36  ;;  %v7971_v36 = vpop.f32.mrf.mxu0  ;;  %v776_v49 = vsel %vm7954_vm8, %v774_v35, %v775_v43 }
  0xd1   : > { %6364 = vmatmul.msk.bf16.gmra.mxu2 %vm572_vm1, %v2013_v39  ;;  %1973 = vst [vmem:[#allocation1 + $0x23] ss:$4 sm:$0xff] %v1917_v41  ;;  %v773_v39 = vsel %vm7954_vm8, %v771_v26, %v772_v27  ;;  %v657_v41 = vrot.slane %v7971_v36, 2  ;;  %v7980_v42 = vrot.slane %v7971_v36, 4  ;;  %v905_v58 = vadd.f32 %v776_v49, %v655_v15 }
  0xd4   : > { %v1964_v47 = vld.sshfl [vmem:[#allocation1] sm:$0xff pattern:$0x73625140] }
  0xd5   : > { %1966 = vst [vmem:[#allocation1] ss:$4 sm:$0xff] %v1868_v44  ;;  %v2014_v17 = vpack.c.bf16 %v1965_v40, %v1964_v47  ;;  %v935_v40 = vadd.f32 %v903_v31, %v654_v14  ;;  %v397_v44 = vld [vmem:[%s7838_s27 + $0x210] sm:$0xff]  ;;  %v6330_v47 = vrot.slane %v657_v41, 9 }
  0xd6   : > { %1967 = vst [vmem:[#allocation1 + $0x1] ss:$4 sm:$0xff] %v1869_v33  ;;  %v1878_v33 = vmax.f32 %v390_v23, 0.0  ;;  %v7993_v56 = vmax.f32 %v397_v44, 0.0  ;;  %v2550_v23 = vrot.slane %v7947_v7, 6 }
  0xd7   : > { %1968 = vst [vmem:[#allocation1 + $0x2] ss:$4 sm:$0xff] %v1914_v45  ;;  %v2552_v45 = vrot.slane %v7968_v32, 4  ;;  %v967_v55 = vadd.f32 %v935_v40, %v657_v41 }
  0xd8   : > { %1969 = vst [vmem:[#allocation1 + $0x3] ss:$4 sm:$0xff] %v1915_v48  ;;  %v7929_v53 = vld.sshfl [vmem:[#allocation1 + $0x20] sm:$0xff pattern:$0x73625140]  ;;  %v2553_v48 = vrot.slane %v7968_v32, 6 }
  0xd9   : > { %1980 = vst [vmem:[#allocation1 + $0x20] ss:$4 sm:$0xff] %v1920_v50  ;;  %v904_v50 = vadd.f32 %v773_v39, %v654_v14 }
  0xda   : > { %1981 = vst [vmem:[#allocation1 + $0x21] ss:$4 sm:$0xff] %v1921_v51  ;;  %v782_v51 = vrot.slane %v7980_v42, 7 }
  0xdb   : > { %1982 = vst [vmem:[#allocation1 + $0x22] ss:$4 sm:$0xff] %v1922_v52  ;;  %v2510_v52 = vmax.f32 %v396_v37, 0.0 }
  0xdc   : > { %1983 = vst [vmem:[#allocation1 + $0x23] ss:$4 sm:$0xff] %v1874_v54  ;;  %v7991_v54 = vrot.slane %v7971_v36, 6 }
  0xde   : > { %v785_v63 = vrot.slane %v7991_v54, 7 }
  0xdf   : > { %v1974_v61 = vld.sshfl [vmem:[#allocation1] sm:$0xff pattern:$0x73625140] }
  0xe0   : > { %1976 = vst [vmem:[#allocation1] ss:$4 sm:$0xff] %v1918_v11  ;;  %v2015_v13 = vpack.c.bf16 %v7929_v53, %v1974_v61  ;;  %v777_v11 = vrot.slane %v775_v43, 2  ;;  %v2555_v43 = vrot.slane %v7993_v56, 4 }
  0xe1   : > { %6365 = vmatmul.msk.bf16.gmra.mxu2 %vm572_vm1, %v2014_v17  ;;  %1977 = vst [vmem:[#allocation1 + $0x1] ss:$4 sm:$0xff] %v1919_v57  ;;  %v778_v17 = vrot.slane %v7971_v36, 7  ;;  %v783_v57 = vsel %vm7954_vm8, %v6330_v47, %v782_v51 }
  0xe2   : > { %1978 = vst [vmem:[#allocation1 + $0x2] ss:$4 sm:$0xff] %v1872_v59  ;;  %v907_v16 = vadd.f32 %v783_v57, %v657_v41 }
  0xe3   : > { %1979 = vst [vmem:[#allocation1 + $0x3] ss:$4 sm:$0xff] %v1873_v46  ;;  %v7940_v2 = vld.sshfl [vmem:[#allocation1 + $0x20] sm:$0xff pattern:$0x73625140]  ;;  %v2505_v46 = vmax.f32 %v391_v34, 0.0  ;;  %v779_v5 = vsel %vm7954_vm8, %v777_v11, %v778_v17 }
  0xe4   : > { %1990 = vst [vmem:[#allocation1 + $0x20] ss:$4 sm:$0xff] %v1876_v62  ;;  %v2554_v34 = vrot.slane %v7993_v56, 2  ;;  %v939_v37 = vadd.f32 %v907_v16, %v7980_v42 }
  0xe5   : > { %1991 = vst [vmem:[#allocation1 + $0x21] ss:$4 sm:$0xff] %v7934_v60  ;;  %v2545_v59 = vrot.slane %v2505_v46, 2  ;;  %v936_v60 = vadd.f32 %v904_v50, %v655_v15  ;;  %v2546_v61 = vrot.slane %v2505_v46, 4  ;;  %v2547_v4 = vrot.slane %v2505_v46, 6 }
  0xe6   : > { %1992 = vst [vmem:[#allocation1 + $0x22] ss:$4 sm:$0xff] %v1926_v0  ;;  %v1016_v0 = vadd.f32 %v967_v55, %v783_v57 }
  0xe7   : > { %1993 = vst [vmem:[#allocation1 + $0x23] ss:$4 sm:$0xff] %v1927_v1  ;;  %v612_v1 = vpop.f32.mrf.mxu0 }
  0xe8   : > { %v788_v12 = vrot.slane %v612_v1, 7  ;;  %v8014_v21 = vrot.slane %v612_v1, 2 }
  0xea   : > { %v7949_v10 = vld.sshfl [vmem:[#allocation1] sm:$0xff pattern:$0x73625140]  ;;  %v791_v39 = vrot.slane %v8014_v21, 7 }
  0xeb   : > { %1986 = vst [vmem:[#allocation1] ss:$4 sm:$0xff] %v1875_v3  ;;  %v2016_v62 = vpack.c.bf16 %v7940_v2, %v7949_v10  ;;  %v968_v2 = vadd.f32 %v936_v60, %v7980_v42  ;;  %v8007_v10 = vrot.slane %v612_v1, 6 }
  0xec   : > { %1987 = vst [vmem:[#allocation1 + $0x1] ss:$4 sm:$0xff] %v1923_v6  ;;  %v784_v6 = vrot.slane %v782_v51, 2 }
  0xed   : > { %1988 = vst [vmem:[#allocation1 + $0x2] ss:$4 sm:$0xff] %v1924_v8  ;;  %v661_v8 = vrot.slane %v612_v1, 4  ;;  %v795_v24 = vrot.slane %v8007_v10, 7 }
  0xee   : > { %1989 = vst [vmem:[#allocation1 + $0x3] ss:$4 sm:$0xff] %v1925_v9  ;;  %v7958_v19 = vld.sshfl [vmem:[#allocation1 + $0x20] sm:$0xff pattern:$0x73625140]  ;;  %v937_v9 = vadd.f32 %v905_v58, %v656_v30  ;;  %v786_v14 = vsel %vm7954_vm8, %v784_v6, %v785_v63 }
  0xef   : > { %2583 = vst [vmem:[#allocation1 + $0x20] ss:$4 sm:$0xff] %v2506_v25  ;;  %v787_v25 = vrot.slane %v785_v63, 2  ;;  %v6331_v15 = vrot.slane %v661_v8, 9  ;;  %v1017_v27 = vadd.f32 %v968_v2, %v786_v14  ;;  %v908_v41 = vadd.f32 %v786_v14, %v7980_v42  ;;  %v8036_v51 = vpop.f32.mrf.mxu0  ;;  %v399_v2 = vld [vmem:[%s7838_s27 + $0x220] sm:$0xff] }
  0xf0   : > { %2585 = vst [vmem:[#allocation1 + $0x21] ss:$4 sm:$0xff] %v7947_v7  ;;  %v969_v22 = vadd.f32 %v937_v9, %v7991_v54  ;;  %v790_v7 = vrot.slane %v788_v12, 2  ;;  %v797_v55 = vrot.slane %v795_v24, 2  ;;  %v798_v11 = vrot.slane %v8036_v51, 7 }
  0xf1   : > { %6366 = vmatmul.msk.bf16.gmra.mxu2 %vm572_vm1, %v2015_v13  ;;  %2587 = vst [vmem:[#allocation1 + $0x22] ss:$4 sm:$0xff] %v2548_v29  ;;  %v906_v29 = vadd.f32 %v779_v5, %v656_v30  ;;  %v1048_v13 = vadd.f32 %v1016_v0, %v7980_v42  ;;  %v796_v35 = vsel %vm7954_vm8, %v6331_v15, %v795_v24  ;;  %v8040_v42 = vrot.slane %v8036_v51, 2 }
  0xf2   : > { %2589 = vst [vmem:[#allocation1 + $0x23] ss:$4 sm:$0xff] %v2549_v20  ;;  %v394_v20 = vld [vmem:[%s7838_s27 + $0x1f8] sm:$0x3]  ;;  %v1049_v47 = vadd.f32 %v1017_v27, %v7991_v54  ;;  %v792_v17 = vsel %vm7954_vm8, %v790_v7, %v791_v39  ;;  %v971_v58 = vadd.f32 %v939_v37, %v661_v8  ;;  %v911_v63 = vadd.f32 %v796_v35, %v661_v8 }
  0xf3   : > { %v938_v26 = vadd.f32 %v906_v29, %v7971_v36  ;;  %v1080_v30 = vadd.f32 %v1048_v13, %v661_v8  ;;  %v2508_v31 = vmax.f32 %v394_v20, 0.0  ;;  %v8028_v36 = vpop.f32.mrf.mxu1  ;;  %v801_v9 = vrot.slane %v8040_v42, 7  ;;  %v398_v20 = vld [vmem:[%s7838_s27 + $0x218] sm:$0x3] }
  0xf4   : > { %v1431_v50 = vrot.slane %v8028_v36, 4  ;;  %v1081_v5 = vadd.f32 %v1049_v47, %v8007_v10  ;;  %v940_v8 = vadd.f32 %v908_v41, %v7991_v54  ;;  %v2556_v29 = vrot.slane %v7993_v56, 6 }
  0xf5   : > { %v7974_v38 = vld.sshfl [vmem:[#allocation1] sm:$0xff pattern:$0x73625140]  ;;  %v1129_v49 = vadd.f32 %v1080_v30, %v796_v35  ;;  %v8076_v24 = vadd.f32 %v911_v63, %v8007_v10  ;;  %v2512_v41 = vmax.f32 %v398_v20, 0.0 }
  0xf6   : > { %1996 = vst [vmem:[#allocation1] ss:$4 sm:$0xff] %v1928_v28  ;;  %v789_v28 = vsel %vm7954_vm8, %v787_v25, %v788_v12  ;;  %v1534_v6 = vrot.slane %v1431_v50, 7  ;;  %v1020_v25 = vadd.f32 %v971_v58, %v796_v35 }
  0xf7   : > { %1997 = vst [vmem:[#allocation1 + $0x1] ss:$4 sm:$0xff] %v1878_v33  ;;  %v2551_v33 = vrot.slane %v7968_v32, 2  ;;  %v1018_v40 = vadd.f32 %v969_v22, %v789_v28  ;;  %v909_v44 = vadd.f32 %v789_v28, %v7991_v54  ;;  %v1161_v0 = vadd.f32 %v1129_v49, %v8007_v10  ;;  %v8088_v37 = vpop.f32.mrf.mxu0 }
  0xf8   : > { %v1536_v14 = vrot.slane %v1534_v6, 2  ;;  %v2513_v22 = vmax.f32 %v399_v2, 0.0  ;;  %v8084_v30 = vadd.f32 %v1020_v25, %v8007_v10 }
  0xf9   : > { %v7988_v53 = vld.sshfl [vmem:[#allocation1 + $0x20] sm:$0xff pattern:$0x73625140]  ;;  %v1050_v57 = vadd.f32 %v1018_v40, %v612_v1  ;;  %v941_v60 = vadd.f32 %v909_v44, %v612_v1  ;;  %v1497_v16 = vadd.f32 %v8028_v36, %v1161_v0  ;;  %v8096_v44 = vrot.slane %v8088_v37, 2 }
  0xfa   : > { %2596 = vst [vmem:[#allocation1 + $0x20] ss:$4 sm:$0xff] %v2552_v45  ;;  %v1430_v45 = vrot.slane %v8028_v36, 2  ;;  %v2557_v49 = vrot.slane %v2513_v22, 2  ;;  %v2559_v58 = vrot.slane %v2513_v22, 6 }
  0xfb   : > { %2597 = vst [vmem:[#allocation1 + $0x21] ss:$4 sm:$0xff] %v2553_v48  ;;  %v970_v48 = vadd.f32 %v938_v26, %v612_v1  ;;  %v973_v28 = vadd.f32 %v941_v60, %v8036_v51 }
  0xfc   : > { %2598 = vst [vmem:[#allocation1 + $0x22] ss:$4 sm:$0xff] %v2510_v52 }
  0xfd   : > { %2599 = vst [vmem:[#allocation1 + $0x23] ss:$4 sm:$0xff] %v7993_v56  ;;  %v1019_v12 = vadd.f32 %v970_v48, %v792_v17  ;;  %v8103_v48 = vpop.f32.mrf.mxu1  ;;  %v811_v56 = vrot.slane %v8096_v44, 7 }
  0xfe   : > { %v8002_v3 = vld.sshfl [vmem:[#allocation1] sm:$0xff pattern:$0x73625140] }
  0xff   : > { %12151 = vst [vmem:[#allocation5_spill] sm:$0xff] %v8002_v3  ;;  %v813_v25 = vrot.slane %v811_v56, 2 }
 0x100   : > { %2575 = vst [vmem:[#allocation1] ss:$4 sm:$0xff] %v2505_v46 }
 0x101   : > { %2577 = vst [vmem:[#allocation1 + $0x1] ss:$4 sm:$0xff] %v2545_v59  ;;  %6367 = vmatmul.msk.bf16.gmra.mxu2 %vm572_vm1, %v2016_v62  ;;  %v1432_v59 = vrot.slane %v8028_v36, 6  ;;  %v1531_v62 = vrot.slane %v1430_v45, 7 }
 0x102   : > { %2579 = vst [vmem:[#allocation1 + $0x2] ss:$4 sm:$0xff] %v2546_v61  ;;  %v6346_v61 = vrot.slane %v8028_v36, 9 }
 0x103   : > { %2581 = vst [vmem:[#allocation1 + $0x3] ss:$4 sm:$0xff] %v2547_v4  ;;  %v2017_v4 = vpack.c.bf16 %v7958_v19, %v7974_v38  ;;  %v8066_v19 = vrot.slane %v1432_v59, 7  ;;  %v1082_v38 = vadd.f32 %v1050_v57, %v8036_v51  ;;  %v1533_v13 = vrot.slane %v1531_v62, 2 }
 0x104   : > { %v1532_v26 = vsel %vm7954_vm8, %v6346_v61, %v1531_v62  ;;  %v803_v57 = vrot.slane %v801_v9, 2  ;;  %v1051_v62 = vadd.f32 %v1019_v12, %v8014_v21 }
 0x105   : > { %v1535_v39 = vsel %vm7954_vm8, %v1533_v13, %v1534_v6  ;;  %v1538_v40 = vsel %vm7954_vm8, %v1536_v14, %v8066_v19  ;;  %v8131_v6 = vrot.slane %v8103_v48, 6  ;;  %v808_v14 = vrot.slane %v8088_v37, 7 }
 0x106   : > { %v1083_v12 = vadd.f32 %v1051_v62, %v8040_v42 }
 0x10a   : > { %v2590_v46 = vld.sshfl [vmem:[#allocation1] sm:$0xff pattern:$0x73625140] }
 0x10b   : > { %v2658_v52 = vpack.c.bf16 %v7988_v53, %v2590_v46  ;;  %2592 = vst [vmem:[#allocation1] ss:$4 sm:$0xff] %v2550_v23  ;;  %v910_v53 = vadd.f32 %v792_v17, %v612_v1  ;;  %v800_v1 = vrot.slane %v798_v11, 2  ;;  %v2601_v23 = vld.sshfl [vmem:[#allocation1 + $0x20] sm:$0xff pattern:$0x73625140]  ;;  %v8100_v46 = vadd.f32 %v1532_v26, %v1497_v16 }
 0x10c   : > { %2593 = vst [vmem:[#allocation1 + $0x1] ss:$4 sm:$0xff] %v2508_v31  ;;  %v1539_v31 = vrot.slane %v8066_v19, 2  ;;  %v2558_v17 = vrot.slane %v2513_v22, 4 }
 0x10d   : > { %6379 = vmatmul.msk.bf16.vlgmr.msrb.gmra.mxu3 %vm572_vm1, %v2658_v52  ;;  %2594 = vst [vmem:[#allocation1 + $0x2] ss:$4 sm:$0xff] %v7968_v32  ;;  %v8059_v32 = vsel %vm7954_vm8, %v797_v55, %v798_v11  ;;  %v942_v15 = vadd.f32 %v910_v53, %v8014_v21  ;;  %v802_v27 = vsel %vm7954_vm8, %v800_v1, %v801_v9  ;;  %v8106_v52 = vrot.slane %v8036_v51, 4 }
 0x10e   : > { %2595 = vst [vmem:[#allocation1 + $0x3] ss:$4 sm:$0xff] %v2551_v33  ;;  %v1130_v54 = vadd.f32 %v1081_v5, %v8059_v32  ;;  %v972_v33 = vadd.f32 %v940_v8, %v8007_v10  ;;  %v1131_v35 = vadd.f32 %v1082_v38, %v802_v27  ;;  %v1022_v55 = vadd.f32 %v973_v28, %v802_v27 }
 0x10f   : > { %2606 = vst [vmem:[#allocation1 + $0x20] ss:$4 sm:$0xff] %v2513_v22  ;;  %v8111_v11 = vrot.slane %v8103_v48, 4  ;;  %v8115_v53 = vrot.slane %v8088_v37, 4  ;;  %v804_v60 = vrot.slane %v8106_v52, 7  ;;  %v912_v63 = vadd.f32 %v8059_v32, %v8007_v10 }
 0x110   : > { %v1162_v47 = vadd.f32 %v1130_v54, %v8036_v51  ;;  %2607 = vst [vmem:[#allocation1 + $0x21] ss:$4 sm:$0xff] %v2557_v49  ;;  %v913_v10 = vadd.f32 %v802_v27, %v8036_v51  ;;  %v1054_v8 = vadd.f32 %v1022_v55, %v8040_v42  ;;  %v1021_v16 = vadd.f32 %v972_v33, %v8059_v32 }
 0x111   : > { %6368 = vmatmul.msk.bf16.gmra.mxu2 %vm572_vm1, %v2017_v4  ;;  %v8126_v4 = vrot.slane %v8088_v37, 6  ;;  %v805_v5 = vsel %vm7954_vm8, %v803_v57, %v804_v60  ;;  %v12084_v1 = vrot.slane %v8111_v11, 7  ;;  %2608 = vst [vmem:[#allocation1 + $0x22] ss:$4 sm:$0xff] %v2558_v17  ;;  %v814_v2 = vrot.slane %v8115_v53, 7  ;;  %v8178_v17 = vpop.f32.mrf.mxu1 }
 0x112   : > { %v1498_v0 = vadd.f32 %v1430_v45, %v1162_v47  ;;  %v914_v21 = vadd.f32 %v805_v5, %v8040_v42  ;;  %2609 = vst [vmem:[#allocation1 + $0x23] ss:$4 sm:$0xff] %v2559_v58  ;;  %v8148_v54 = vrot.slane %v8103_v48, 2  ;;  %v1547_v22 = vrot.slane %v8131_v6, 7 }
 0x113   : > { %v1546_v20 = vrot.slane %v12084_v1, 2  ;;  %v945_v26 = vadd.f32 %v913_v10, %v8040_v42  ;;  %v1540_v27 = vrot.slane %v8103_v48, 7  ;;  %v1086_v28 = vadd.f32 %v1054_v8, %v8096_v44 }
 0x114   : > { %v946_v38 = vadd.f32 %v914_v21, %v8106_v52  ;;  %v1666_v13 = vadd.f32 %v1535_v39, %v1498_v0  ;;  %v815_v32 = vsel %vm7954_vm8, %v813_v25, %v814_v2  ;;  %v8164_v49 = vrot.slane %v8036_v51, 6 }
 0x115   : > { %v2600_v7 = vld.sshfl [vmem:[#allocation1] sm:$0xff pattern:$0x73625140]  ;;  %v8172_v48 = vsel %vm7954_vm8, %v1546_v20, %v1547_v22  ;;  %v8176_v55 = vadd.f32 %v8100_v46, %v8148_v54  ;;  %v1541_v57 = vsel %vm7954_vm8, %v1539_v31, %v1540_v27  ;;  %v1550_v58 = vrot.slane %v8178_v17, 7  ;;  %v400_v27 = vld [vmem:[%s7838_s27 + $0x228] sm:$0x3] }
 0x116   : > { %2602 = vst [vmem:[#allocation1] ss:$4 sm:$0xff] %v2554_v34  ;;  %v1163_v34 = vadd.f32 %v1131_v35, %v8040_v42  ;;  %v2659_v61 = vpack.c.bf16 %v2601_v23, %v2600_v7  ;;  %v944_v23 = vadd.f32 %v912_v63, %v8036_v51  ;;  %v1132_v7 = vadd.f32 %v1083_v12, %v805_v5 }
 0x117   : > { %2603 = vst [vmem:[#allocation1 + $0x1] ss:$4 sm:$0xff] %v2555_v43  ;;  %v974_v43 = vadd.f32 %v942_v15, %v8040_v42  ;;  %v816_v15 = vrot.slane %v814_v2, 2  ;;  %v1698_v39 = vadd.f32 %v1666_v13, %v8111_v11  ;;  %v8167_v42 = vadd.f32 %v1021_v16, %v8036_v51 }
 0x118   : > { %2604 = vst [vmem:[#allocation1 + $0x2] ss:$4 sm:$0xff] %v2556_v29  ;;  %v1499_v45 = vadd.f32 %v1431_v50, %v1163_v34  ;;  %v817_v50 = vrot.slane %v8126_v4, 7  ;;  %v1549_v34 = vrot.slane %v1547_v22, 2  ;;  %v1135_v51 = vadd.f32 %v1086_v28, %v815_v32  ;;  %v401_v28 = vld [vmem:[%s7838_s27 + $0x230] sm:$0xff] }
 0x119   : > { %2605 = vst [vmem:[#allocation1 + $0x3] ss:$4 sm:$0xff] %v2512_v41  ;;  %v1023_v9 = vadd.f32 %v974_v43, %v805_v5  ;;  %v810_v41 = vrot.slane %v808_v14, 2  ;;  %v8187_v43 = vadd.f32 %v944_v23, %v8088_v37  ;;  %v1164_v46 = vadd.f32 %v1132_v7, %v8106_v52  ;;  %v2611_v19 = vld.sshfl [vmem:[#allocation1 + $0x20] sm:$0xff pattern:$0x73625140] }
 0x11a   : > { %v1667_v35 = vadd.f32 %v1538_v40, %v1499_v45  ;;  %v818_v47 = vsel %vm7954_vm8, %v816_v15, %v817_v50  ;;  %12152 = vst [vmem:[#allocation6_spill] sm:$0xff] %v8176_v55  ;;  %v8191_v63 = vadd.f32 %v1698_v39, %v8172_v48  ;;  %v977_v0 = vadd.f32 %v945_v26, %v8096_v44  ;;  %v8208_v45 = vpop.f32.mrf.mxu0  ;;  %v8220_v15 = vpop.f32.mrf.mxu2  ;;  %v403_v7 = vld [vmem:[%s7838_s27 + $0x240] sm:$0xff] }
 0x11b   : > { %v1055_v29 = vadd.f32 %v1023_v9, %v8106_v52  ;;  %v8195_v31 = vsel %vm7954_vm8, %v810_v41, %v811_v56  ;;  %v6332_v5 = vrot.slane %v8164_v49, 9  ;;  %v917_v9 = vadd.f32 %v815_v32, %v8096_v44  ;;  %12155 = vst [vmem:[#allocation9_spill] sm:$0xff] %v8220_v15 }
 0x11c   : > { %v1699_v60 = vadd.f32 %v1667_v35, %v8131_v6  ;;  %12153 = vst [vmem:[#allocation7_spill] sm:$0xff] %v8191_v63  ;;  %v8201_v21 = vadd.f32 %v8195_v31, %v8088_v37  ;;  %v978_v52 = vadd.f32 %v946_v38, %v8115_v53  ;;  %v8206_v10 = vrot.slane %v8178_v17, 6 }
 0x11d   : > { %6380 = vmatmul.msk.bf16.gmra.mxu3 %vm572_vm1, %v2659_v61  ;;  %v1087_v33 = vadd.f32 %v1055_v29, %v8115_v53  ;;  %v1167_v56 = vadd.f32 %v1135_v51, %v8115_v53  ;;  %v1551_v2 = vsel %vm7954_vm8, %v1549_v34, %v1550_v58  ;;  %v1552_v8 = vrot.slane %v1550_v58, 2  ;;  %v402_v58 = vld [vmem:[%s7838_s27 + $0x238] sm:$0x3] }
 0x11e   : > { %12154 = vst [vmem:[#allocation8_spill] sm:$0xff] %v8206_v10  ;;  %v6348_v25 = vrot.slane %v8178_v17, 9  ;;  %v1500_v38 = vadd.f32 %v1432_v59, %v1164_v46  ;;  %v8218_v13 = vrot.slane %v8208_v45, 4  ;;  %v1026_v50 = vadd.f32 %v977_v0, %v815_v32 }
 0x11f   : > { %v1136_v62 = vadd.f32 %v1087_v33, %v818_v47  ;;  %v8223_v16 = vrot.slane %v8178_v17, 4  ;;  %v8226_v20 = vrot.slane %v8208_v45, 6  ;;  %v8230_v22 = vsel %vm7954_vm8, %v6332_v5, %v808_v14  ;;  %v8263_v5 = vpop.f32.mrf.mxu1 }
 0x120   : > { %v2610_v61 = vld.sshfl [vmem:[#allocation1] sm:$0xff pattern:$0x73625140]  ;;  %v8233_v36 = vadd.f32 %v818_v47, %v8115_v53  ;;  %v949_v59 = vadd.f32 %v917_v9, %v8115_v53  ;;  %v8237_v23 = vrot.slane %v8208_v45, 2  ;;  %v915_v26 = vadd.f32 %v8230_v22, %v8164_v49 }
 0x121   : > { %v2660_v29 = vpack.c.bf16 %v2611_v19, %v2610_v61  ;;  %v1168_v12 = vadd.f32 %v1136_v62, %v8126_v4  ;;  %v1027_v35 = vadd.f32 %v978_v52, %v818_v47  ;;  %v1503_v32 = vadd.f32 %v8131_v6, %v1167_v56 }
 0x122   : > { %v12082_v14 = vrot.slane %v8206_v10, 7  ;;  %v8245_v33 = vadd.f32 %v1699_v60, %v1551_v2  ;;  %v1554_v41 = vsel %vm7954_vm8, %v1552_v8, %v6348_v25  ;;  %v1668_v34 = vadd.f32 %v1541_v57, %v1500_v38  ;;  %v639_v38 = vpop.f32.mrf.mxu2 }
 0x123   : > { %v1504_v39 = vadd.f32 %v8178_v17, %v1168_v12  ;;  %v824_v51 = vrot.slane %v8218_v13, 7  ;;  %v975_v47 = vadd.f32 %v8076_v24, %v8164_v49  ;;  %v827_v6 = vrot.slane %v8226_v20, 7  ;;  %v8271_v12 = vpop.f32.mrf.mxu0 }
 0x124   : > { %12156 = vst [vmem:[#allocation10_spill] sm:$0xff] %v8245_v33  ;;  %v2514_v61 = vmax.f32 %v400_v27, 0.0  ;;  %v2515_v60 = vmax.f32 %v401_v28, 0.0  ;;  %v6333_v62 = vrot.slane %v8208_v45, 9  ;;  %v821_v46 = vrot.slane %v8237_v23, 7 }
 0x125   : > { %v947_v19 = vadd.f32 %v915_v26, %v8088_v37  ;;  %v8260_v0 = vmax.f32 %v403_v7, 0.0  ;;  %v1058_v57 = vadd.f32 %v1026_v50, %v8115_v53  ;;  %v1700_v56 = vadd.f32 %v1668_v34, %v8178_v17 }
 0x126   : > { %v2560_v9 = vrot.slane %v2515_v60, 2  ;;  %v2561_v52 = vrot.slane %v2515_v60, 4  ;;  %v2562_v24 = vrot.slane %v2515_v60, 6  ;;  %2612 = vst [vmem:[#allocation1] ss:$4 sm:$0xff] %v2514_v61  ;;  %v826_v8 = vrot.slane %v824_v51, 2 }
 0x127   : > { %v8269_v25 = vrot.slane %v8263_v5, 2  ;;  %2613 = vst [vmem:[#allocation1 + $0x1] ss:$4 sm:$0xff] %v2515_v60  ;;  %v8275_v53 = vrot.slane %v12082_v14, 2  ;;  %v1024_v50 = vadd.f32 %v975_v47, %v8230_v22  ;;  %v829_v26 = vrot.slane %v827_v6, 2 }
 0x128   : > { %2614 = vst [vmem:[#allocation1 + $0x2] ss:$4 sm:$0xff] %v2560_v9  ;;  %v830_v17 = vrot.slane %v8271_v12, 7  ;;  %v8279_v27 = vadd.f32 %v1551_v2, %v1503_v32  ;;  %v8281_v28 = vadd.f32 %v1554_v41, %v1504_v39  ;;  %v2563_v7 = vrot.slane %v8260_v0, 2 }
 0x129   : > { %12157 = vst [vmem:[#allocation11_spill] sm:$0xff] %v8269_v25  ;;  %v1059_v34 = vadd.f32 %v1027_v35, %v8126_v4  ;;  %v823_v61 = vrot.slane %v821_v46, 2  ;;  %v979_v47 = vadd.f32 %v947_v19, %v8208_v45  ;;  %v1090_v60 = vadd.f32 %v1058_v57, %v8218_v13 }
 0x12a   : > { %2615 = vst [vmem:[#allocation1 + $0x3] ss:$4 sm:$0xff] %v2561_v52  ;;  %v8291_v9 = vadd.f32 %v1700_v56, %v1554_v41  ;;  %v828_v2 = vsel %vm7954_vm8, %v826_v8, %v827_v6  ;;  %v12083_v32 = vrot.slane %v8269_v25, 7  ;;  %v831_v35 = vsel %vm7954_vm8, %v829_v26, %v830_v17 }
 0x12b   : > { %2616 = vst [vmem:[#allocation1 + $0x20] ss:$4 sm:$0xff] %v2562_v24  ;;  %v1091_v41 = vadd.f32 %v1059_v34, %v8226_v20  ;;  %v6350_v19 = vrot.slane %v8263_v5, 11  ;;  %v2564_v6 = vrot.slane %v8260_v0, 4  ;;  %v672_v57 = vrot.slane %v8271_v12, 2 }
 0x12c   : > { %12158 = vst [vmem:[#allocation12_spill] sm:$0xff] %v8291_v9  ;;  %v8308_v52 = vrot.slane %v8271_v12, 4  ;;  %v1139_v56 = vadd.f32 %v1090_v60, %v828_v2  ;;  %v2565_v8 = vrot.slane %v8260_v0, 6  ;;  %v1565_v38 = vrot.slane %v12083_v32, 2 }
 0x12d   : > { %6381 = vmatmul.msk.bf16.gmra.mxu3 %vm572_vm1, %v2660_v29  ;;  %v2516_v29 = vmax.f32 %v402_v58, 0.0  ;;  %v8287_v58 = vsel %vm7954_vm8, %v6333_v62, %v821_v46  ;;  %v1056_v62 = vadd.f32 %v1024_v50, %v8088_v37  ;;  %v981_v46 = vadd.f32 %v949_v59, %v8218_v13  ;;  %2618 = vst [vmem:[#allocation1 + $0x22] ss:$4 sm:$0xff] %v8260_v0 }
 0x12e   : > { %v919_v39 = vadd.f32 %v8287_v58, %v8208_v45  ;;  %2619 = vst [vmem:[#allocation1 + $0x23] ss:$4 sm:$0xff] %v2563_v7  ;;  %v1028_v24 = vadd.f32 %v979_v47, %v8287_v58  ;;  %v1140_v59 = vadd.f32 %v1091_v41, %v831_v35  ;;  %v948_v50 = vadd.f32 %v8201_v21, %v8096_v44 }
 0x12f   : > { %2617 = vst [vmem:[#allocation1 + $0x21] ss:$4 sm:$0xff] %v2516_v29  ;;  %v950_v29 = vadd.f32 %v8233_v36, %v8126_v4  ;;  %v1025_v26 = vadd.f32 %v8187_v43, %v8195_v31  ;;  %v8322_v7 = vrot.slane %v8263_v5, 6  ;;  %v1085_v4 = vadd.f32 %v8167_v42, %v8088_v37 }
 0x130   : > { %v951_v17 = vadd.f32 %v919_v39, %v8237_v23  ;;  %v1172_v0 = vadd.f32 %v1140_v59, %v8271_v12  ;;  %v921_v36 = vadd.f32 %v828_v2, %v8218_v13  ;;  %v8328_v47 = vadd.f32 %v981_v46, %v828_v2 }
 0x131   : > { %v2620_v34 = vld.sshfl [vmem:[#allocation1] sm:$0xff pattern:$0x73625140]  ;;  %v6334_v21 = vrot.slane %v672_v57, 9  ;;  %v834_v60 = vrot.slane %v8308_v52, 7  ;;  %v1060_v43 = vadd.f32 %v1028_v24, %v8237_v23  ;;  %v8333_v39 = vadd.f32 %v1056_v62, %v8208_v45 }
 0x132   : > { %2622 = vst [vmem:[#allocation1] ss:$4 sm:$0xff] %v2564_v6  ;;  %v1508_v41 = vadd.f32 %v8269_v25, %v1172_v0  ;;  %v980_v59 = vadd.f32 %v948_v50, %v8237_v23  ;;  %v1171_v42 = vadd.f32 %v1139_v56, %v8226_v20  ;;  %v982_v14 = vadd.f32 %v950_v29, %v8226_v20 }
 0x133   : > { %2623 = vst [vmem:[#allocation1 + $0x1] ss:$4 sm:$0xff] %v2565_v8  ;;  %v8341_v2 = vsel %vm7954_vm8, %v1565_v38, %v6350_v19  ;;  %v1057_v46 = vadd.f32 %v1025_v26, %v8096_v44  ;;  %v8345_v24 = vrot.slane %v8271_v12, 6  ;;  %v825_v62 = vsel %vm7954_vm8, %v823_v61, %v824_v51 }
 0x134   : > { %12159 = vst [vmem:[#allocation13_spill] sm:$0xff] %v8341_v2  ;;  %v8348_v45 = vadd.f32 %v8341_v2, %v1508_v41  ;;  %v1134_v56 = vadd.f32 %v1085_v4, %v8195_v31  ;;  %v835_v19 = vsel %vm7954_vm8, %v6334_v21, %v834_v60  ;;  %v983_v29 = vadd.f32 %v951_v17, %v672_v57 }
 0x135   : > { %v920_v38 = vadd.f32 %v825_v62, %v8237_v23  ;;  %v922_v50 = vadd.f32 %v831_v35, %v8226_v20  ;;  %v923_v26 = vadd.f32 %v835_v19, %v672_v57  ;;  %v1092_v0 = vadd.f32 %v1060_v43, %v672_v57  ;;  %v404_v43 = vld [vmem:[%s7838_s27 + $0x248] sm:$0x3] }
 0x136   : > { %v2621_v6 = vld.sshfl [vmem:[#allocation1 + $0x20] sm:$0xff pattern:$0x73625140]  ;;  %v1029_v41 = vadd.f32 %v980_v59, %v825_v62  ;;  %v1031_v51 = vadd.f32 %v982_v14, %v831_v35  ;;  %v1704_v31 = vadd.f32 %v8281_v28, %v8269_v25  ;;  %v1089_v61 = vadd.f32 %v1057_v46, %v8237_v23  ;;  %v8391_v46 = vpop.f32.mrf.mxu0 }
 0x137   : > { %v2661_v8 = vpack.c.bf16 %v2621_v6, %v2620_v34  ;;  %v8365_v17 = vadd.f32 %v921_v36, %v8226_v20  ;;  %v836_v34 = vrot.slane %v834_v60, 2  ;;  %v837_v4 = vrot.slane %v8345_v24, 7 }
 0x138   : > { %v1166_v57 = vadd.f32 %v1134_v56, %v8096_v44  ;;  %v8370_v21 = vadd.f32 %v8263_v5, %v1171_v42  ;;  %v8374_v14 = vadd.f32 %v8279_v27, %v8263_v5  ;;  %v8376_v28 = vadd.f32 %v983_v29, %v835_v19  ;;  %v8389_v42 = vpop.f32.mrf.mxu1  ;;  %v405_v27 = vld [vmem:[%s7838_s27 + $0x250] sm:$0xff] }
 0x139   : > { %v952_v35 = vadd.f32 %v920_v38, %v8218_v13  ;;  %v8381_v36 = vadd.f32 %v922_v50, %v8271_v12  ;;  %v8384_v60 = vadd.f32 %v923_v26, %v8308_v52  ;;  %v8386_v44 = vadd.f32 %v1092_v0, %v835_v19  ;;  %v406_v38 = vld [vmem:[%s7838_s27 + $0x258] sm:$0x3] }
 0x13a   : > { %12160 = vst [vmem:[#allocation14_spill] sm:$0xff] %v8370_v21  ;;  %v1061_v59 = vadd.f32 %v1029_v41, %v8218_v13  ;;  %v8395_v6 = vadd.f32 %v1031_v51, %v8271_v12  ;;  %v8398_v56 = vadd.f32 %v1704_v31, %v8341_v2  ;;  %v8401_v29 = vrot.slane %v8389_v42, 2 }
 0x13b   : > { %12161 = vst [vmem:[#allocation15_spill] sm:$0xff] %v8374_v14  ;;  %v838_v19 = vsel %vm7954_vm8, %v836_v34, %v837_v4  ;;  %v839_v50 = vrot.slane %v837_v4, 2  ;;  %v1502_v26 = vadd.f32 %v8111_v11, %v1166_v57  ;;  %v2518_v0 = vmax.f32 %v404_v43, 0.0 }
 0x13c   : > { %12162 = vst [vmem:[#allocation16_spill] sm:$0xff] %v8384_v60  ;;  %v924_v41 = vadd.f32 %v838_v19, %v8308_v52  ;;  %v984_v12 = vadd.f32 %v952_v35, %v8308_v52  ;;  %v1570_v51 = vrot.slane %v8389_v42, 7  ;;  %v2519_v31 = vmax.f32 %v405_v27, 0.0 }
 0x13d   : > { %6382 = vmatmul.msk.bf16.gmra.mxu3 %vm572_vm1, %v2661_v8  ;;  %12163 = vst [vmem:[#allocation17_spill] sm:$0xff] %v8398_v56  ;;  %v1138_v8 = vadd.f32 %v1089_v61, %v825_v62  ;;  %v1093_v62 = vadd.f32 %v1061_v59, %v8308_v52  ;;  %v8412_v61 = vrot.slane %v8389_v42, 4  ;;  %v6351_v40 = vrot.slane %v8322_v7, 9 }
 0x13e   : > { %v2520_v1 = vmax.f32 %v406_v38, 0.0  ;;  %2624 = vst [vmem:[#allocation1 + $0x2] ss:$4 sm:$0xff] %v2518_v0  ;;  %v1573_v4 = vrot.slane %v8401_v29, 7  ;;  %v2566_v57 = vrot.slane %v2519_v31, 2  ;;  %v8418_v35 = vrot.slane %v8391_v46, 2 }
 0x13f   : > { %v1170_v34 = vadd.f32 %v1138_v8, %v8218_v13  ;;  %2625 = vst [vmem:[#allocation1 + $0x3] ss:$4 sm:$0xff] %v2519_v31  ;;  %v1670_v43 = vadd.f32 %v8172_v48, %v1502_v26  ;;  %v2567_v27 = vrot.slane %v2519_v31, 4  ;;  %v2568_v59 = vrot.slane %v2519_v31, 6 }
 0x140   : > { %2629 = vst [vmem:[#allocation1 + $0x23] ss:$4 sm:$0xff] %v2520_v1  ;;  %v840_v32 = vrot.slane %v8391_v46, 7  ;;  %v8423_v3 = vadd.f32 %v924_v41, %v8345_v24  ;;  %v1572_v38 = vrot.slane %v1570_v51, 2  ;;  %v12086_v13 = vrot.slane %v8220_v15, 2 }
 0x141   : > { %v12085_v8 = vrot.slane %v8220_v15, 7  ;;  %2626 = vst [vmem:[#allocation1 + $0x20] ss:$4 sm:$0xff] %v2566_v57  ;;  %v1033_v0 = vadd.f32 %v984_v12, %v838_v19  ;;  %v1142_v56 = vadd.f32 %v1093_v62, %v838_v19  ;;  %v12164_v60 = vrot.slane %v8263_v5, 7  ;;  %v8448_v62 = vpop.f32.mrf.mxu0 }
 0x142   : > { %2627 = vst [vmem:[#allocation1 + $0x21] ss:$4 sm:$0xff] %v2567_v27  ;;  %v1506_v26 = vadd.f32 %v8206_v10, %v1170_v34  ;;  %v842_v31 = vrot.slane %v840_v32, 2  ;;  %v843_v57 = vrot.slane %v8418_v35, 7  ;;  %v8440_v19 = vsel %vm7954_vm8, %v6351_v40, %v1570_v51  ;;  %v8462_v51 = vpop.f32.mrf.mxu1 }
 0x143   : > { %v8432_v48 = vsel %vm7954_vm8, %v8275_v53, %v12164_v60  ;;  %2628 = vst [vmem:[#allocation1 + $0x22] ss:$4 sm:$0xff] %v2568_v59  ;;  %v8442_v12 = vrot.slane %v1573_v4, 2  ;;  %v1702_v53 = vadd.f32 %v1670_v43, %v8206_v10  ;;  %v8446_v60 = vrot.slane %v8391_v46, 6 }
 0x144   : > { %12165 = vst [vmem:[#allocation18_spill] sm:$0xff] %v8432_v48  ;;  %v8452_v34 = vsel %vm7954_vm8, %v1572_v38, %v1573_v4  ;;  %v8456_v27 = vrot.slane %v12085_v8, 2  ;;  %v8460_v40 = vrot.slane %v12086_v13, 7  ;;  %v8465_v43 = vrot.slane %v8448_v62, 2 }
 0x145   : > { %v1174_v59 = vadd.f32 %v1142_v56, %v8345_v24  ;;  %v8469_v41 = vrot.slane %v8462_v51, 2  ;;  %v985_v4 = vadd.f32 %v8365_v17, %v8345_v24  ;;  %v986_v38 = vadd.f32 %v8381_v36, %v8391_v46 }
 0x146   : > { %12166 = vst [vmem:[#allocation19_spill] sm:$0xff] %v8456_v27  ;;  %v1674_v8 = vadd.f32 %v8432_v48, %v1506_v26  ;;  %v8477_v13 = vrot.slane %v8391_v46, 4  ;;  %v841_v1 = vsel %vm7954_vm8, %v839_v50, %v840_v32  ;;  %v844_v56 = vsel %vm7954_vm8, %v842_v31, %v843_v57  ;;  %v2630_v17 = vld.sshfl [vmem:[#allocation1] sm:$0xff pattern:$0x73625140] }
 0x147   : > { %12167 = vst [vmem:[#allocation20_spill] sm:$0xff] %v8460_v40  ;;  %v1751_v15 = vadd.f32 %v1702_v53, %v8432_v48  ;;  %v8485_v2 = vrot.slane %v8462_v51, 4  ;;  %v847_v9 = vrot.slane %v8446_v60, 7  ;;  %v850_v36 = vrot.slane %v8448_v62, 7 }
 0x148   : > { %v8494_v32 = vrot.slane %v8462_v51, 6  ;;  %v8497_v50 = vrot.slane %v8448_v62, 4  ;;  %v853_v31 = vrot.slane %v8465_v43, 7  ;;  %v1510_v57 = vadd.f32 %v8389_v42, %v1174_v59 }
 0x149   : > { %12168 = vst [vmem:[#allocation21_spill] sm:$0xff] %v8485_v2  ;;  %v1034_v14 = vadd.f32 %v985_v4, %v841_v1  ;;  %v1035_v33 = vadd.f32 %v986_v38, %v844_v56  ;;  %v6335_v21 = vrot.slane %v8477_v13, 9  ;;  %v926_v26 = vadd.f32 %v844_v56, %v8391_v46 }
 0x14a   : > { %v2631_v48 = vld.sshfl [vmem:[#allocation1 + $0x20] sm:$0xff pattern:$0x73625140]  ;;  %v1062_v40 = vadd.f32 %v8328_v47, %v8226_v20  ;;  %v849_v27 = vrot.slane %v847_v9, 2  ;;  %v852_v10 = vrot.slane %v850_v36, 2  ;;  %v925_v25 = vadd.f32 %v841_v1, %v8345_v24 }
 0x14b   : > { %v2662_v63 = vpack.c.bf16 %v2631_v48, %v2630_v17  ;;  %v1064_v59 = vadd.f32 %v8376_v28, %v8308_v52  ;;  %v1706_v53 = vadd.f32 %v1674_v8, %v8389_v42  ;;  %v855_v4 = vrot.slane %v853_v31, 2 }
 0x14c   : > { %v856_v48 = vrot.slane %v8497_v50, 7  ;;  %v1065_v38 = vadd.f32 %v1033_v0, %v8345_v24  ;;  %v1783_v17 = vadd.f32 %v1751_v15, %v8389_v42  ;;  %v1066_v20 = vadd.f32 %v1034_v14, %v8391_v46 }
 0x14d   : > { %6383 = vmatmul.msk.bf16.gmra.mxu3 %vm572_vm1, %v2662_v63  ;;  %v1067_v47 = vadd.f32 %v1035_v33, %v8418_v35  ;;  %v1173_v55 = vadd.f32 %v8386_v44, %v8308_v52  ;;  %v8520_v28 = vsel %vm7954_vm8, %v6335_v21, %v847_v9  ;;  %v958_v63 = vadd.f32 %v926_v26, %v8418_v35 }
 0x14e   : > { %v1094_v8 = vadd.f32 %v1062_v40, %v8345_v24  ;;  %v1095_v0 = vadd.f32 %v8395_v6, %v8391_v46  ;;  %v851_v15 = vsel %vm7954_vm8, %v849_v27, %v850_v36  ;;  %v854_v33 = vsel %vm7954_vm8, %v852_v10, %v853_v31 }
 0x14f   : > { %v957_v14 = vadd.f32 %v925_v25, %v8391_v46  ;;  %v1096_v52 = vadd.f32 %v1064_v59, %v8477_v13  ;;  %v857_v9 = vsel %vm7954_vm8, %v855_v4, %v856_v48  ;;  %v928_v21 = vadd.f32 %v851_v15, %v8446_v60 }
 0x150   : > { %v929_v24 = vadd.f32 %v854_v33, %v8448_v62  ;;  %v1097_v44 = vadd.f32 %v1065_v38, %v8446_v60  ;;  %v988_v6 = vadd.f32 %v8423_v3, %v8446_v60  ;;  %v1098_v27 = vadd.f32 %v1066_v20, %v8448_v62 }
 0x151   : > { %v1099_v10 = vadd.f32 %v1067_v47, %v8465_v43  ;;  %v1509_v25 = vadd.f32 %v8322_v7, %v1173_v55  ;;  %v930_v40 = vadd.f32 %v857_v9, %v8465_v43  ;;  %v990_v36 = vadd.f32 %v958_v63, %v8465_v43 }
 0x152   : > { %v1143_v26 = vadd.f32 %v1094_v8, %v841_v1  ;;  %v1144_v31 = vadd.f32 %v1095_v0, %v844_v56  ;;  %v8545_v59 = vadd.f32 %v8452_v34, %v1510_v57  ;;  %v8548_v4 = vadd.f32 %v1706_v53, %v8452_v34  ;;  %v1398_v0 = vpop.f32.mrf.mxu1 }
 0x153   : > { %v8551_v3 = vadd.f32 %v1783_v17, %v8452_v34  ;;  %v1145_v48 = vadd.f32 %v1096_v52, %v8520_v28  ;;  %v8555_v38 = vadd.f32 %v928_v21, %v8448_v62  ;;  %v8558_v55 = vadd.f32 %v929_v24, %v8465_v43 }
 0x154   : > { %v989_v1 = vadd.f32 %v957_v14, %v8448_v62  ;;  %v1146_v56 = vadd.f32 %v1097_v44, %v851_v15  ;;  %v1037_v20 = vadd.f32 %v988_v6, %v851_v15  ;;  %v1147_v57 = vadd.f32 %v1098_v27, %v854_v33 }
 0x155   : > { %12169 = vst [vmem:[#allocation22_spill] sm:$0xff] %v8551_v3  ;;  %v1148_v47 = vadd.f32 %v1099_v10, %v857_v9  ;;  %v1677_v53 = vadd.f32 %v8440_v19, %v1509_v25  ;;  %v8563_v63 = vadd.f32 %v930_v40, %v8497_v50  ;;  %v1039_v34 = vadd.f32 %v990_v36, %v857_v9 }
 0x156   : > { %v1175_v17 = vadd.f32 %v1143_v26, %v8391_v46  ;;  %v1176_v8 = vadd.f32 %v1144_v31, %v8418_v35  ;;  %v1177_v52 = vadd.f32 %v1145_v48, %v8446_v60  ;;  %v8568_v21 = vrot.slane %v1398_v0, 2 }
 0x157   : > { %v8570_v14 = vrot.slane %v1398_v0, 4  ;;  %v1583_v15 = vrot.slane %v8469_v41, 7  ;;  %v8573_v24 = vadd.f32 %v989_v1, %v854_v33  ;;  %v1178_v44 = vadd.f32 %v1146_v56, %v8448_v62 }
 0x158   : > { %v1586_v6 = vrot.slane %v8485_v2, 7  ;;  %v1589_v9 = vrot.slane %v8494_v32, 7  ;;  %v8579_v46 = vadd.f32 %v1037_v20, %v8448_v62  ;;  %v1179_v35 = vadd.f32 %v1147_v57, %v8465_v43 }
 0x159   : > { %v1180_v27 = vadd.f32 %v1148_v47, %v8497_v50  ;;  %v12170_v10 = vrot.slane %v8412_v61, 7  ;;  %v8586_v40 = vadd.f32 %v1039_v34, %v8497_v50  ;;  %v8588_v33 = vrot.slane %v1398_v0, 6 }
 0x15a   : > { %v1511_v36 = vadd.f32 %v8401_v29, %v1175_v17  ;;  %v1512_v26 = vadd.f32 %v8412_v61, %v1176_v8  ;;  %v1513_v31 = vadd.f32 %v8462_v51, %v1177_v52  ;;  %v1585_v48 = vrot.slane %v1583_v15, 2 }
 0x15b   : > { %v1578_v25 = vrot.slane %v12170_v10, 2  ;;  %v6354_v1 = vrot.slane %v8568_v21, 9  ;;  %v1596_v56 = vrot.slane %v8570_v14, 7  ;;  %v1514_v20 = vadd.f32 %v8469_v41, %v1178_v44 }
 0x15c   : > { %v1588_v57 = vrot.slane %v1586_v6, 2  ;;  %v1591_v47 = vrot.slane %v1589_v9, 2  ;;  %v1592_v10 = vrot.slane %v1398_v0, 7  ;;  %v1515_v50 = vadd.f32 %v8485_v2, %v1179_v35 }
 0x15d   : > { %v1516_v34 = vadd.f32 %v8494_v32, %v1180_v27  ;;  %v12171_v17 = vrot.slane %v8412_v61, 7  ;;  %v12173_v52 = vrot.slane %v8389_v42, 13  ;;  %v12174_v44 = vrot.slane %v8462_v51, 9 }
 0x15e   : > { %v1599_v35 = vrot.slane %v8588_v33, 7  ;;  %v1084_v27 = vadd.f32 %v8084_v30, %v8164_v49  ;;  %v1587_v42 = vsel %vm7954_vm8, %v1585_v48, %v1586_v6  ;;  %v1593_v30 = vsel %vm7954_vm8, %v1591_v47, %v1592_v10 }
 0x15f   : > { %v8603_v8 = vsel %vm7954_vm8, %v8442_v12, %v12171_v17  ;;  %v8609_v3 = vsel %vm7954_vm8, %v1578_v25, %v12173_v52  ;;  %v8615_v0 = vsel %vm7954_vm8, %v12174_v44, %v1583_v15  ;;  %v1137_v12 = vadd.f32 %v8333_v39, %v8287_v58 }
 0x160   : > { %12172 = vst [vmem:[#allocation23_spill] sm:$0xff] %v8603_v8  ;;  %v8626_v25 = vsel %vm7954_vm8, %v6354_v1, %v1596_v56  ;;  %v1679_v17 = vadd.f32 %v8603_v8, %v1511_v36  ;;  %v1680_v15 = vadd.f32 %v8609_v3, %v1512_v26  ;;  %v8632_v52 = vsel %vm7954_vm8, %v1588_v57, %v1589_v9 }
 0x161   : > { %12175 = vst [vmem:[#allocation24_spill] sm:$0xff] %v8615_v0  ;;  %v1598_v49 = vrot.slane %v1596_v56, 2  ;;  %v1133_v58 = vadd.f32 %v1084_v27, %v8230_v22  ;;  %v1681_v39 = vadd.f32 %v8615_v0, %v1513_v31  ;;  %v1708_v6 = vadd.f32 %v8348_v45, %v8412_v61 }
 0x162   : > { %12176 = vst [vmem:[#allocation25_spill] sm:$0xff] %v8632_v52  ;;  %v1169_v48 = vadd.f32 %v1137_v12, %v8237_v23  ;;  %v12177_v36 = vrot.slane %v8111_v11, 7  ;;  %v12178_v26 = vrot.slane %v8148_v54, 9  ;;  %v1682_v1 = vadd.f32 %v1587_v42, %v1514_v20 }
 0x163   : > { %v1683_v57 = vadd.f32 %v8632_v52, %v1515_v50  ;;  %v1709_v56 = vadd.f32 %v1677_v53, %v8462_v51  ;;  %v1165_v22 = vadd.f32 %v1133_v58, %v8088_v37  ;;  %v1710_v31 = vadd.f32 %v8545_v59, %v8469_v41  ;;  %v12180_v50 = vld [vmem:[#allocation6_spill] sm:$0xff] }
 0x164   : > { %v1545_v9 = vsel %vm7954_vm8, %v12178_v26, %v12177_v36  ;;  %v1711_v45 = vadd.f32 %v1679_v17, %v8485_v2  ;;  %v1712_v23 = vadd.f32 %v1680_v15, %v8494_v32  ;;  %v12179_v11 = vrot.slane %v8263_v5, 7  ;;  %v12181_v26 = vld [vmem:[#allocation11_spill] sm:$0xff] }
 0x165   : > { %v8658_v10 = vsel %vm7954_vm8, %v1598_v49, %v1599_v35  ;;  %v8660_v20 = vrot.slane %v1599_v35, 2  ;;  %v6349_v53 = vrot.slane %v8223_v16, 9  ;;  %v1746_v37 = vadd.f32 %v12180_v50, %v1545_v9 }
 0x166   : > { %v1562_v47 = vrot.slane %v12179_v11, 2  ;;  %v8664_v44 = vadd.f32 %v1593_v30, %v1516_v34  ;;  %v1713_v59 = vadd.f32 %v1681_v39, %v8568_v21  ;;  %v1757_v27 = vadd.f32 %v1708_v6, %v8609_v3 }
 0x167   : > { %v1505_v12 = vadd.f32 %v8223_v16, %v1169_v48  ;;  %v1714_v17 = vadd.f32 %v1682_v1, %v8570_v14  ;;  %v8671_v15 = vadd.f32 %v1683_v57, %v8588_v33  ;;  %v1758_v35 = vadd.f32 %v1709_v56, %v8615_v0  ;;  %v12183_v48 = vld [vmem:[#allocation8_spill] sm:$0xff]  ;;  %v12185_v57 = vld [vmem:[#allocation14_spill] sm:$0xff] }
 0x168   : > { %v1501_v49 = vadd.f32 %v8148_v54, %v1165_v22  ;;  %v1759_v58 = vadd.f32 %v1710_v31, %v1587_v42  ;;  %v1760_v36 = vadd.f32 %v1711_v45, %v8632_v52  ;;  %v8676_v34 = vadd.f32 %v1712_v23, %v1593_v30  ;;  %v12186_v54 = vld [vmem:[#allocation7_spill] sm:$0xff] }
 0x169   : > { %v12182_v39 = vrot.slane %v12181_v26, 7  ;;  %v12184_v11 = vrot.slane %v12183_v48, 7  ;;  %v1778_v56 = vadd.f32 %v1746_v37, %v8223_v16  ;;  %v1779_v22 = vadd.f32 %v12186_v54, %v12183_v48  ;;  %v12189_v54 = vld [vmem:[#allocation15_spill] sm:$0xff] }
 0x16a   : > { %v1787_v31 = vadd.f32 %v8548_v4, %v8469_v41  ;;  %v1789_v45 = vadd.f32 %v1757_v27, %v8494_v32  ;;  %v8696_v52 = vadd.f32 %v1713_v59, %v8626_v25  ;;  %v1790_v37 = vadd.f32 %v1758_v35, %v8568_v21  ;;  %v12190_v32 = vld [vmem:[#allocation12_spill] sm:$0xff] }
 0x16b   : > { %v1564_v6 = vsel %vm7954_vm8, %v1562_v47, %v12182_v39  ;;  %v1558_v1 = vsel %vm7954_vm8, %v6349_v53, %v12184_v11  ;;  %v12187_v47 = vld [vmem:[#allocation10_spill] sm:$0xff]  ;;  %v8699_v53 = vadd.f32 %v1714_v17, %v8658_v10  ;;  %v1669_v11 = vadd.f32 %v1545_v9, %v1501_v49 }
 0x16c   : > { %v1675_v50 = vadd.f32 %v1564_v6, %v12185_v57  ;;  %v1673_v23 = vadd.f32 %v1558_v1, %v1505_v12  ;;  %v1780_v39 = vadd.f32 %v12187_v47, %v8263_v5  ;;  %v2049_v57 = vpop.f32.mrf.mxu2  ;;  %v1791_v48 = vadd.f32 %v1759_v58, %v8570_v14  ;;  %v12191_v17 = vld [vmem:[#allocation18_spill] sm:$0xff] }
 0x16d   : > { %12188 = vst [vmem:[#allocation6_spill] sm:$0xff] %v8699_v53  ;;  %v1752_v41 = vadd.f32 %v12189_v54, %v1564_v6  ;;  %v1781_v4 = vadd.f32 %v12190_v32, %v12181_v26  ;;  %v8706_v5 = vrot.slane %v2049_v57, 2  ;;  %v8709_v59 = vadd.f32 %v1760_v36, %v8588_v33 }
 0x16e   : > { %v1707_v27 = vadd.f32 %v1675_v50, %v8401_v29  ;;  %v1827_v12 = vadd.f32 %v1778_v56, %v1558_v1  ;;  %v1828_v9 = vadd.f32 %v1779_v22, %v12191_v17  ;;  %v8713_v35 = vadd.f32 %v1787_v31, %v1587_v42  ;;  %v407_v50 = vld [vmem:[%s7838_s27 + $0x260] sm:$0xff]  ;;  %v408_v56 = vld [vmem:[%s7838_s27 + $0x268] sm:$0x3] }
 0x16f   : > { %v8715_v49 = vadd.f32 %v1789_v45, %v1593_v30  ;;  %v1705_v58 = vadd.f32 %v1673_v23, %v8322_v7  ;;  %v1829_v47 = vadd.f32 %v1780_v39, %v1564_v6  ;;  %v8719_v26 = vadd.f32 %v1790_v37, %v8626_v25  ;;  %v12195_v30 = vld [vmem:[#allocation13_spill] sm:$0xff] }
 0x170   : > { %12192 = vst [vmem:[#allocation11_spill] sm:$0xff] %v8713_v35  ;;  %v1701_v54 = vadd.f32 %v1669_v11, %v8223_v16  ;;  %v8722_v36 = vrot.slane %v2049_v57, 4  ;;  %v8724_v32 = vrot.slane %v2049_v57, 6  ;;  %v8729_v22 = vadd.f32 %v1791_v48, %v8658_v10  ;;  %v409_v45 = vld [vmem:[%s7838_s27 + $0x270] sm:$0xff]  ;;  %v8741_v11 = vpop.f32.mrf.mxu0 }
 0x171   : > { %12193 = vst [vmem:[#allocation8_spill] sm:$0xff] %v8715_v49  ;;  %v8732_v42 = vadd.f32 %v1752_v41, %v8401_v29  ;;  %v1830_v31 = vadd.f32 %v1781_v4, %v12195_v30  ;;  %v2194_v6 = vrot.slane %v8706_v5, 7  ;;  %v8738_v23 = vadd.f32 %v1707_v27, %v8603_v8 }
 0x172   : > { %v2160_v16 = vadd.f32 %v2049_v57, %v1827_v12  ;;  %v2161_v39 = vadd.f32 %v8706_v5, %v1828_v9  ;;  %v6370_v37 = vrot.slane %v2049_v57, 9  ;;  %v1754_v48 = vadd.f32 %v1705_v58, %v8440_v19 }
 0x173   : > { %12194 = vst [vmem:[#allocation14_spill] sm:$0xff] %v8732_v42  ;;  %v2162_v17 = vadd.f32 %v8722_v36, %v1829_v47  ;;  %v2521_v29 = vmax.f32 %v407_v50, 0.0  ;;  %v2522_v41 = vmax.f32 %v408_v56, 0.0  ;;  %v1750_v53 = vadd.f32 %v1701_v54, %v1558_v1 }
 0x174   : > { %12196 = vst [vmem:[#allocation7_spill] sm:$0xff] %v8738_v23  ;;  %v2197_v4 = vrot.slane %v8722_v36, 7  ;;  %v2200_v30 = vrot.slane %v8724_v32, 7  ;;  %v2523_v49 = vmax.f32 %v409_v45, 0.0  ;;  %v2196_v27 = vrot.slane %v2194_v6, 2 }
 0x175   : > { %v8748_v12 = vrot.slane %v8741_v11, 4  ;;  %v2569_v9 = vrot.slane %v2521_v29, 2  ;;  %v2570_v57 = vrot.slane %v2521_v29, 4  ;;  %2632 = vst [vmem:[#allocation1] ss:$4 sm:$0xff] %v2521_v29  ;;  %v2195_v58 = vsel %vm7954_vm8, %v6370_v37, %v2194_v6 }
 0x176   : > { %v2199_v35 = vrot.slane %v2197_v4, 2  ;;  %v8753_v47 = vrot.slane %v8741_v11, 6  ;;  %v2571_v1 = vrot.slane %v2521_v29, 6  ;;  %2636 = vst [vmem:[#allocation1 + $0x20] ss:$4 sm:$0xff] %v2522_v41  ;;  %v8756_v54 = vadd.f32 %v1754_v48, %v8462_v51 }
 0x177   : > { %v8759_v50 = vadd.f32 %v8724_v32, %v1830_v31  ;;  %v8762_v56 = vrot.slane %v8741_v11, 2  ;;  %v2572_v45 = vrot.slane %v2523_v49, 2  ;;  %2633 = vst [vmem:[#allocation1 + $0x1] ss:$4 sm:$0xff] %v2569_v9  ;;  %v1782_v0 = vadd.f32 %v1750_v53, %v8322_v7 }
 0x178   : > { %12197 = vst [vmem:[#allocation10_spill] sm:$0xff] %v8756_v54  ;;  %v8765_v6 = vrot.slane %v2200_v30, 2  ;;  %v2573_v37 = vrot.slane %v2523_v49, 4  ;;  %v8768_v29 = vrot.slane %v8448_v62, 6  ;;  %v2198_v51 = vsel %vm7954_vm8, %v2196_v27, %v2197_v4  ;;  %v8790_v31 = vpop.f32.mrf.mxu0 }
 0x179   : > { %2634 = vst [vmem:[#allocation1 + $0x2] ss:$4 sm:$0xff] %v2570_v57  ;;  %v2328_v48 = vadd.f32 %v2195_v58, %v2160_v16  ;;  %v860_v41 = vrot.slane %v8741_v11, 7  ;;  %v2201_v9 = vsel %vm7954_vm8, %v2199_v35, %v2200_v30  ;;  %v869_v7 = vrot.slane %v8753_v47, 7  ;;  %v8782_v16 = vpop.f32.mrf.mxu1  ;;  %v12198_v58 = vld [vmem:[#allocation16_spill] sm:$0xff] }
 0x17a   : > { %2635 = vst [vmem:[#allocation1 + $0x3] ss:$4 sm:$0xff] %v2571_v1  ;;  %v6336_v53 = vrot.slane %v8768_v29, 9  ;;  %v927_v62 = vadd.f32 %v8520_v28, %v8477_v13  ;;  %v1103_v4 = vadd.f32 %v8586_v40, %v8748_v12  ;;  %v863_v57 = vrot.slane %v8762_v56, 7 }
 0x17b   : > { %2637 = vst [vmem:[#allocation1 + $0x21] ss:$4 sm:$0xff] %v2523_v49  ;;  %v862_v27 = vrot.slane %v860_v41, 2  ;;  %v987_v35 = vadd.f32 %v12198_v58, %v8477_v13  ;;  %v2329_v30 = vadd.f32 %v2198_v51, %v2161_v39  ;;  %v8788_v1 = vrot.slane %v8782_v16, 4 }
 0x17c   : > { %2638 = vst [vmem:[#allocation1 + $0x22] ss:$4 sm:$0xff] %v2572_v45  ;;  %v959_v54 = vadd.f32 %v927_v62, %v8446_v60  ;;  %v992_v40 = vadd.f32 %v8555_v38, %v8741_v11  ;;  %v12199_v45 = vrot.slane %v8748_v12, 7  ;;  %v2574_v2 = vrot.slane %v2523_v49, 6 }
 0x17d   : > { %2639 = vst [vmem:[#allocation1 + $0x23] ss:$4 sm:$0xff] %v2573_v37  ;;  %v8798_v42 = vrot.slane %v8790_v31, 2  ;;  %v8802_v13 = vsel %vm7954_vm8, %v862_v27, %v863_v57  ;;  %v2330_v39 = vadd.f32 %v2201_v9, %v2162_v17  ;;  %v8805_v37 = vadd.f32 %v2328_v48, %v8706_v5 }
 0x17e   : > { %v868_v23 = vrot.slane %v12199_v45, 2  ;;  %v861_v51 = vsel %vm7954_vm8, %v6336_v53, %v860_v41  ;;  %v991_v38 = vadd.f32 %v959_v54, %v8768_v29  ;;  %v8811_v62 = vrot.slane %v8782_v16, 6 }
 0x17f   : > { %12200 = vst [vmem:[#allocation15_spill] sm:$0xff] %v8805_v37  ;;  %v12100_v49 = vrot.slane %v8782_v16, 7  ;;  %v931_v58 = vadd.f32 %v861_v51, %v8768_v29  ;;  %v1036_v45 = vadd.f32 %v987_v35, %v8520_v28  ;;  %v8817_v27 = vadd.f32 %v2329_v30, %v8722_v36  ;;  %v2051_v28 = vpop.f32.mrf.mxu2  ;;  %v8843_v37 = vpop.f32.mrf.mxu3 }
 0x180   : > { %12201 = vst [vmem:[#allocation12_spill] sm:$0xff] %v8811_v62  ;;  %v6355_v5 = vrot.slane %v8782_v16, 9  ;;  %v8822_v17 = vadd.f32 %v8664_v44, %v8782_v16  ;;  %v1041_v54 = vadd.f32 %v992_v40, %v8802_v13  ;;  %v8827_v41 = vsel %vm7954_vm8, %v868_v23, %v869_v7 }
 0x181   : > { %12202 = vst [vmem:[#allocation18_spill] sm:$0xff] %v8817_v27  ;;  %v2640_v48 = vld.sshfl [vmem:[#allocation1] sm:$0xff pattern:$0x73625140]  ;;  %v1604_v9 = vrot.slane %v12100_v49, 2  ;;  %v1001_v36 = vrot.slane %v8798_v42, 7  ;;  %v1040_v53 = vadd.f32 %v991_v38, %v861_v51  ;;  %v8833_v35 = vadd.f32 %v2330_v39, %v8724_v32 }
 0x182   : > { %2642 = vst [vmem:[#allocation1] ss:$4 sm:$0xff] %v2574_v2  ;;  %v1152_v44 = vadd.f32 %v1103_v4, %v8827_v41  ;;  %v2203_v30 = vrot.slane %v2051_v28, 7  ;;  %v865_v27 = vrot.slane %v863_v57, 2  ;;  %v1793_v40 = vadd.f32 %v8676_v34, %v8782_v16 }
 0x183   : > { %12203 = vst [vmem:[#allocation13_spill] sm:$0xff] %v8833_v35  ;;  %v8839_v7 = vrot.slane %v8790_v31, 4  ;;  %v963_v2 = vadd.f32 %v931_v58, %v8741_v11  ;;  %v1068_v49 = vadd.f32 %v1036_v45, %v8446_v60  ;;  %v1831_v32 = vadd.f32 %v1782_v0, %v8440_v19 }
 0x184   : > { %v2641_v23 = vld.sshfl [vmem:[#allocation1 + $0x20] sm:$0xff pattern:$0x73625140]  ;;  %v8846_v39 = vrot.slane %v2051_v28, 2  ;;  %v1073_v4 = vadd.f32 %v1041_v54, %v8762_v56  ;;  %v8851_v34 = vsel %vm7954_vm8, %v1604_v9, %v6355_v5  ;;  %v1003_v57 = vrot.slane %v1001_v36, 2 }
 0x185   : > { %v2663_v38 = vpack.c.bf16 %v2641_v23, %v2640_v48  ;;  %v1072_v35 = vadd.f32 %v1040_v53, %v8741_v11  ;;  %v993_v58 = vadd.f32 %v8558_v55, %v8762_v56  ;;  %v1184_v60 = vadd.f32 %v1152_v44, %v8753_v47 }
 0x186   : > { %v2204_v19 = vsel %vm7954_vm8, %v8765_v6, %v2203_v30  ;;  %v6337_v0 = vrot.slane %v8790_v31, 9  ;;  %v12204_v45 = vrot.slane %v8748_v12, 7  ;;  %v932_v48 = vadd.f32 %v8802_v13, %v8741_v11 }
 0x187   : > { %6384 = vmatmul.msk.bf16.gmra.mxu3 %vm572_vm1, %v2663_v38  ;;  %v995_v55 = vadd.f32 %v963_v2, %v8790_v31  ;;  %v1004_v54 = vrot.slane %v8839_v7, 7  ;;  %v1100_v9 = vadd.f32 %v1068_v49, %v8768_v29  ;;  %v8872_v53 = vadd.f32 %v1793_v40, %v8851_v34 }
 0x188   : > { %v867_v5 = vsel %vm7954_vm8, %v865_v27, %v12204_v45  ;;  %v8874_v6 = vrot.slane %v2051_v28, 4  ;;  %v1105_v44 = vadd.f32 %v1073_v4, %v8798_v42  ;;  %v1070_v30 = vadd.f32 %v8573_v24, %v8465_v43  ;;  %v1415_v45 = vpop.f32.mrf.mxu3 }
 0x189   : > { %v1005_v27 = vsel %vm7954_vm8, %v1003_v57, %v1004_v54  ;;  %v1104_v23 = vadd.f32 %v1072_v35, %v8790_v31  ;;  %v933_v2 = vadd.f32 %v867_v5, %v8762_v56  ;;  %v1042_v38 = vadd.f32 %v993_v58, %v867_v5 }
 0x18a   : > { %v1520_v29 = vadd.f32 %v8782_v16, %v1184_v60  ;;  %v2331_v49 = vadd.f32 %v2204_v19, %v8759_v50  ;;  %v8886_v40 = vrot.slane %v8790_v31, 6  ;;  %v1002_v4 = vsel %vm7954_vm8, %v6337_v0, %v1001_v36 }
 0x18b   : > { %v964_v43 = vadd.f32 %v932_v48, %v8762_v56  ;;  %v1044_v24 = vadd.f32 %v1002_v4, %v995_v55  ;;  %v1101_v57 = vadd.f32 %v8579_v46, %v8741_v11  ;;  %v1149_v35 = vadd.f32 %v1100_v9, %v861_v51 }
 0x18c   : > { %v8893_v8 = vrot.slane %v2051_v28, 6  ;;  %v1154_v58 = vadd.f32 %v1105_v44, %v1005_v27  ;;  %v1006_v60 = vrot.slane %v1004_v54, 2  ;;  %v1102_v50 = vadd.f32 %v1070_v30, %v8762_v56  ;;  %v8910_v30 = vpop.f32.mrf.mxu1 }
 0x18d   : > { %v8897_v31 = vadd.f32 %v8846_v39, %v1831_v32  ;;  %v1153_v19 = vadd.f32 %v1104_v23, %v1002_v4  ;;  %v965_v36 = vadd.f32 %v933_v2, %v8748_v12  ;;  %v1074_v0 = vadd.f32 %v1042_v38, %v8748_v12  ;;  %v8912_v23 = vpop.f32.mrf.mxu0 }
 0x18e   : > { %v1688_v48 = vadd.f32 %v8851_v34, %v1520_v29  ;;  %v8903_v51 = vadd.f32 %v2331_v49, %v2051_v28  ;;  %v1007_v55 = vrot.slane %v8886_v40, 7  ;;  %v996_v54 = vadd.f32 %v964_v43, %v8798_v42 }
 0x18f   : > { %v1076_v9 = vadd.f32 %v1044_v24, %v8798_v42  ;;  %v1150_v32 = vadd.f32 %v1101_v57, %v8802_v13  ;;  %v1181_v44 = vadd.f32 %v1149_v35, %v8741_v11  ;;  %v8915_v2 = vadd.f32 %v1154_v58, %v8839_v7 }
 0x190   : > { %12205 = vst [vmem:[#allocation16_spill] sm:$0xff] %v8903_v51  ;;  %v1008_v28 = vsel %vm7954_vm8, %v1006_v60, %v1007_v55  ;;  %v1151_v38 = vadd.f32 %v1102_v50, %v867_v5  ;;  %v8920_v29 = vrot.slane %v8910_v30, 2  ;;  %v1185_v49 = vadd.f32 %v1153_v19, %v8798_v42 }
 0x191   : > { %v997_v13 = vadd.f32 %v965_v36, %v8839_v7  ;;  %v1106_v11 = vadd.f32 %v1074_v0, %v8839_v7  ;;  %v934_v4 = vadd.f32 %v8827_v41, %v8748_v12  ;;  %v12102_v43 = vrot.slane %v8811_v62, 7 }
 0x192   : > { %v994_v24 = vadd.f32 %v8563_v63, %v8748_v12  ;;  %v1009_v57 = vrot.slane %v1007_v55, 2  ;;  %v1010_v5 = vrot.slane %v8912_v23, 7  ;;  %v8932_v35 = vadd.f32 %v8568_v21, %v1181_v44 }
 0x193   : > { %v8935_v42 = vrot.slane %v8910_v30, 6  ;;  %v8938_v45 = vrot.slane %v8912_v23, 4  ;;  %v966_v58 = vadd.f32 %v934_v4, %v8753_v47  ;;  %v1183_v60 = vadd.f32 %v1151_v38, %v8748_v12 }
 0x194   : > { %v12206_v50 = vrot.slane %v8782_v16, 7  ;;  %v687_v19 = vrot.slane %v8912_v23, 2  ;;  %v1043_v21 = vadd.f32 %v994_v24, %v8827_v41  ;;  %v8950_v36 = vadd.f32 %v8788_v1, %v1185_v49 }
 0x195   : > { %v1155_v0 = vadd.f32 %v1106_v11, %v1008_v28  ;;  %v1612_v55 = vrot.slane %v8910_v30, 7  ;;  %v998_v44 = vadd.f32 %v966_v58, %v8886_v40  ;;  %v1611_v12 = vrot.slane %v12102_v43, 2 }
 0x196   : > { %v1603_v63 = vsel %vm7954_vm8, %v8660_v20, %v12206_v50  ;;  %v8957_v16 = vrot.slane %v8912_v23, 6  ;;  %v1011_v20 = vsel %vm7954_vm8, %v1009_v57, %v1010_v5  ;;  %v1045_v38 = vadd.f32 %v1005_v27, %v996_v54  ;;  %v8966_v50 = vpop.f32.mrf.mxu2 }
 0x197   : > { %v1046_v4 = vadd.f32 %v1008_v28, %v997_v13  ;;  %v1615_v41 = vrot.slane %v8920_v29, 7  ;;  %v1114_v49 = vrot.slane %v8938_v45, 7  ;;  %v1182_v11 = vadd.f32 %v1150_v32, %v8762_v56 }
 0x198   : > { %v1519_v24 = vadd.f32 %v8588_v33, %v1183_v60  ;;  %v6357_v58 = vrot.slane %v8910_v30, 11  ;;  %v1075_v46 = vadd.f32 %v1043_v21, %v8753_v47  ;;  %v6338_v43 = vrot.slane %v687_v19, 9 }
 0x199   : > { %v1614_v51 = vrot.slane %v1612_v55, 2  ;;  %v1720_v57 = vadd.f32 %v1688_v48, %v8920_v29  ;;  %v1764_v27 = vadd.f32 %v8671_v15, %v1603_v63  ;;  %v1047_v54 = vadd.f32 %v1011_v20, %v998_v44 }
 0x19a   : > { %v1187_v28 = vadd.f32 %v1155_v0, %v8886_v40  ;;  %v8974_v56 = vsel %vm7954_vm8, %v1611_v12, %v1612_v55  ;;  %v1077_v33 = vadd.f32 %v1045_v38, %v8839_v7  ;;  %v1117_v32 = vrot.slane %v8957_v16, 7 }
 0x19b   : > { %12207 = vst [vmem:[#allocation26_spill] sm:$0xff] %v8974_v56  ;;  %v1617_v13 = vrot.slane %v1615_v41, 2  ;;  %v1108_v5 = vadd.f32 %v1076_v9, %v687_v19  ;;  %v1116_v47 = vrot.slane %v1114_v49, 2  ;;  %v1518_v60 = vadd.f32 %v8570_v14, %v1182_v11  ;;  %v8995_v19 = vpop.f32.mrf.mxu1 }
 0x19c   : > { %v1687_v21 = vadd.f32 %v1603_v63, %v1519_v24  ;;  %v8980_v48 = vadd.f32 %v8709_v59, %v1603_v63  ;;  %v1107_v15 = vadd.f32 %v1075_v46, %v8886_v40  ;;  %v1115_v0 = vsel %vm7954_vm8, %v6338_v43, %v1114_v49 }
 0x19d   : > { %v1616_v55 = vsel %vm7954_vm8, %v1614_v51, %v1615_v41  ;;  %v1796_v7 = vadd.f32 %v1764_v27, %v8910_v30  ;;  %v8989_v44 = vrot.slane %v8966_v50, 4  ;;  %v1079_v9 = vadd.f32 %v1047_v54, %v8912_v23 }
 0x19e   : > { %12208 = vst [vmem:[#allocation27_spill] sm:$0xff] %v8980_v48  ;;  %v1523_v14 = vadd.f32 %v8910_v30, %v1187_v28  ;;  %v1078_v59 = vadd.f32 %v1046_v4, %v8886_v40  ;;  %v1109_v63 = vadd.f32 %v1077_v33, %v8938_v45  ;;  %v1119_v46 = vrot.slane %v1117_v32, 2 }
 0x19f   : > { %v8999_v43 = vsel %vm7954_vm8, %v1617_v13, %v6357_v58  ;;  %v1118_v51 = vsel %vm7954_vm8, %v1116_v47, %v1117_v32  ;;  %v1157_v12 = vadd.f32 %v1115_v0, %v1108_v5  ;;  %v1686_v38 = vadd.f32 %v8658_v10, %v1518_v60  ;;  %v12209_v58 = vld [vmem:[#allocation9_spill] sm:$0xff]  ;;  %v12213_v0 = vld [vmem:[#allocation19_spill] sm:$0xff] }
 0x1a0   : > { %v1719_v41 = vadd.f32 %v1687_v21, %v8910_v30  ;;  %v9006_v49 = vrot.slane %v8966_v50, 6  ;;  %v1156_v40 = vadd.f32 %v1107_v15, %v1011_v20  ;;  %v1522_v4 = vadd.f32 %v8811_v62, %v8915_v2  ;;  %v9023_v2 = vpop.f32.mrf.mxu2 }
 0x1a1   : > { %v9011_v11 = vadd.f32 %v1720_v57, %v8999_v43  ;;  %v1111_v27 = vadd.f32 %v1079_v9, %v12209_v58  ;;  %v1457_v54 = vrot.slane %v8995_v19, 2  ;;  %v9016_v28 = vadd.f32 %v1796_v7, %v1616_v55  ;;  %12212 = vst [vmem:[#allocation28_spill] sm:$0xff] %v9023_v2  ;;  %v12214_v7 = vld [vmem:[#allocation20_spill] sm:$0xff] }
 0x1a2   : > { %v1110_v10 = vadd.f32 %v1078_v59, %v8957_v16  ;;  %v12211_v30 = vrot.slane %v12209_v58, 7  ;;  %v1158_v33 = vadd.f32 %v1118_v51, %v1109_v63  ;;  %v1622_v57 = vrot.slane %v8995_v19, 7 }
 0x1a3   : > { %12210 = vst [vmem:[#allocation9_spill] sm:$0xff] %v9016_v28  ;;  %v1718_v32 = vadd.f32 %v1686_v38, %v8811_v62  ;;  %v1189_v13 = vadd.f32 %v1157_v12, %v8938_v45  ;;  %v6356_v5 = vrot.slane %v8788_v1, 9  ;;  %v1691_v47 = vadd.f32 %v1616_v55, %v1523_v14 }
 0x1a4   : > { %v1121_v20 = vsel %vm7954_vm8, %v1119_v46, %v12211_v30  ;;  %v1768_v60 = vadd.f32 %v1719_v41, %v1616_v55  ;;  %v1188_v21 = vadd.f32 %v1156_v40, %v8912_v23  ;;  %v1690_v15 = vadd.f32 %v8974_v56, %v1522_v4  ;;  %v1408_v30 = vpop.f32.mrf.mxu1 }
 0x1a5   : > { %v12215_v9 = vsel %vm7954_vm8, %v12213_v0, %v12214_v7  ;;  %v9037_v63 = vrot.slane %v8995_v19, 4  ;;  %v1624_v46 = vrot.slane %v1622_v57, 2  ;;  %v1625_v51 = vrot.slane %v1457_v54, 7 }
 0x1a6   : > { %v1160_v59 = vadd.f32 %v12215_v9, %v1111_v27  ;;  %v1159_v45 = vadd.f32 %v1121_v20, %v1110_v10  ;;  %v1190_v12 = vadd.f32 %v1158_v33, %v8957_v16  ;;  %v6359_v55 = vrot.slane %v8995_v19, 13 }
 0x1a7   : > { %v6358_v23 = vrot.slane %v8935_v42, 9  ;;  %v1767_v14 = vadd.f32 %v1718_v32, %v8974_v56  ;;  %v9044_v38 = vrot.slane %v9023_v2, 2  ;;  %v1525_v41 = vadd.f32 %v8935_v42, %v1189_v13 }
 0x1a8   : > { %v12217_v40 = vrot.slane %v8811_v62, 7  ;;  %v1524_v27 = vadd.f32 %v8920_v29, %v1188_v21  ;;  %v1722_v16 = vadd.f32 %v1690_v15, %v8995_v19  ;;  %v9056_v10 = vrot.slane %v9023_v2, 6 }
 0x1a9   : > { %12216 = vst [vmem:[#allocation19_spill] sm:$0xff] %v9044_v38  ;;  %v12218_v33 = vrot.slane %v12209_v58, 2  ;;  %v1460_v13 = vrot.slane %v1408_v30, 2  ;;  %v1626_v0 = vsel %vm7954_vm8, %v1624_v46, %v1625_v51  ;;  %v9066_v21 = vsel %vm7954_vm8, %v6358_v23, %v1622_v57  ;;  %v9076_v57 = vpop.f32.mrf.mxu2 }
 0x1aa   : > { %v9051_v4 = vsel %vm7954_vm8, %v6356_v5, %v12217_v40  ;;  %v1627_v5 = vrot.slane %v1625_v51, 2  ;;  %v1628_v15 = vrot.slane %v9037_v63, 7  ;;  %v1723_v7 = vadd.f32 %v1691_v47, %v1457_v54 }
 0x1ab   : > { %v1689_v20 = vadd.f32 %v9051_v4, %v8950_v36  ;;  %v1192_v32 = vadd.f32 %v1160_v59, %v12218_v33  ;;  %v1191_v9 = vadd.f32 %v1159_v45, %v12209_v58  ;;  %v1799_v40 = vadd.f32 %v1767_v14, %v8995_v19 }
 0x1ac   : > { %v1461_v36 = vrot.slane %v1408_v30, 4  ;;  %v9071_v24 = vrot.slane %v1408_v30, 6  ;;  %v1693_v59 = vadd.f32 %v9066_v21, %v1525_v41  ;;  %v1692_v33 = vadd.f32 %v8999_v43, %v1524_v27 }
 0x1ad   : > { %v1721_v46 = vadd.f32 %v1689_v20, %v8935_v42  ;;  %v1771_v51 = vadd.f32 %v1722_v16, %v1626_v0  ;;  %v1800_v28 = vadd.f32 %v1768_v60, %v1457_v54  ;;  %v1629_v47 = vsel %vm7954_vm8, %v1627_v5, %v1628_v15 }
 0x1ae   : > { %v6360_v23 = vrot.slane %v1408_v30, 9  ;;  %v1731_v58 = vrot.slane %v1460_v13, 7  ;;  %v1526_v45 = vadd.f32 %v8995_v19, %v1190_v12  ;;  %v1772_v14 = vadd.f32 %v1723_v7, %v1629_v47 }
 0x1af   : > { %v12108_v56 = vrot.slane %v8843_v37, 7  ;;  %v1527_v62 = vadd.f32 %v1457_v54, %v1191_v9  ;;  %v1630_v41 = vrot.slane %v1628_v15, 2  ;;  %v1725_v48 = vadd.f32 %v1693_v59, %v1408_v30 }
 0x1b0   : > { %v1734_v27 = vrot.slane %v1461_v36, 7  ;;  %v1737_v20 = vrot.slane %v9071_v24, 7  ;;  %v9083_v16 = vadd.f32 %v1799_v40, %v1626_v0  ;;  %v1770_v60 = vadd.f32 %v1721_v46, %v9066_v21  ;;  %v1410_v40 = vpop.f32.mrf.mxu1 }
 0x1b1   : > { %v9086_v38 = vadd.f32 %v1771_v51, %v1460_v13  ;;  %v9088_v5 = vadd.f32 %v1800_v28, %v1629_v47  ;;  %v6362_v2 = vrot.slane %v8843_v37, 9  ;;  %v9092_v19 = vrot.slane %v9076_v57, 2 }
 0x1b2   : > { %12219 = vst [vmem:[#allocation20_spill] sm:$0xff] %v9083_v16  ;;  %v9095_v54 = vrot.slane %v9076_v57, 4  ;;  %v1528_v12 = vadd.f32 %v9037_v63, %v1192_v32  ;;  %v1694_v15 = vadd.f32 %v1626_v0, %v1526_v45  ;;  %v9098_v7 = vadd.f32 %v1772_v14, %v1461_v36 }
 0x1b3   : > { %12220 = vst [vmem:[#allocation29_spill] sm:$0xff] %v9088_v5  ;;  %v1820_v9 = vrot.slane %v12108_v56, 2  ;;  %v1632_v28 = vsel %vm7954_vm8, %v1630_v41, %v6359_v55  ;;  %v1695_v59 = vadd.f32 %v1629_v47, %v1527_v62  ;;  %v9105_v46 = vrot.slane %v9076_v57, 6 }
 0x1b4   : > { %12221 = vst [vmem:[#allocation30_spill] sm:$0xff] %v9092_v19  ;;  %v9109_v51 = vadd.f32 %v9076_v57, %v8729_v22  ;;  %v1724_v32 = vadd.f32 %v1692_v33, %v9037_v63  ;;  %v1736_v0 = vrot.slane %v1734_v27, 2  ;;  %v1802_v45 = vadd.f32 %v1770_v60, %v1408_v30  ;;  %v9119_v33 = vpop.f32.mrf.mxu2 }
 0x1b5   : > { %v2233_v14 = vrot.slane %v9076_v57, 7  ;;  %v1732_v56 = vsel %vm7954_vm8, %v6360_v23, %v1731_v58  ;;  %v1733_v5 = vrot.slane %v1731_v58, 2  ;;  %v1696_v16 = vadd.f32 %v1632_v28, %v1528_v12 }
 0x1b6   : > { %12222 = vst [vmem:[#allocation31_spill] sm:$0xff] %v9109_v51  ;;  %v1726_v55 = vadd.f32 %v1694_v15, %v1460_v13  ;;  %v1739_v62 = vrot.slane %v1737_v20, 2  ;;  %v1740_v47 = vrot.slane %v1410_v40, 7  ;;  %v9117_v41 = vsel %vm7954_vm8, %v1820_v9, %v6362_v2 }
 0x1b7   : > { %12223 = vst [vmem:[#allocation32_spill] sm:$0xff] %v9117_v41  ;;  %v1463_v22 = vrot.slane %v1410_v40, 2  ;;  %v1727_v51 = vadd.f32 %v1695_v59, %v1461_v36  ;;  %v1774_v19 = vadd.f32 %v1732_v56, %v1725_v48  ;;  %v2242_v30 = vrot.slane %v9105_v46, 7 }
 0x1b8   : > { %v1464_v60 = vrot.slane %v1410_v40, 4  ;;  %v1738_v23 = vsel %vm7954_vm8, %v1736_v0, %v1737_v20  ;;  %v1773_v58 = vadd.f32 %v1724_v32, %v1632_v28  ;;  %v1465_v12 = vrot.slane %v1410_v40, 6 }
 0x1b9   : > { %v1735_v13 = vsel %vm7954_vm8, %v1733_v5, %v1734_v27  ;;  %v1801_v2 = vadd.f32 %v9011_v11, %v9037_v63  ;;  %v6373_v15 = vrot.slane %v9056_v10, 9  ;;  %v9129_v36 = vrot.slane %v2233_v14, 2 }
 0x1ba   : > { %v1728_v48 = vadd.f32 %v1696_v16, %v9071_v24  ;;  %v1741_v9 = vsel %vm7954_vm8, %v1739_v62, %v1740_v47  ;;  %v1775_v59 = vadd.f32 %v1735_v13, %v1726_v55  ;;  %v1776_v41 = vadd.f32 %v1738_v23, %v1727_v51 }
 0x1bb   : > { %v1806_v20 = vadd.f32 %v1774_v19, %v1463_v22  ;;  %v1794_v40 = vadd.f32 %v8696_v52, %v8788_v1  ;;  %v1685_v27 = vadd.f32 %v8626_v25, %v8932_v35  ;;  %v1805_v11 = vadd.f32 %v1773_v58, %v9071_v24 }
 0x1bc   : > { %v6361_v63 = vrot.slane %v1463_v22, 9  ;;  %v1812_v5 = vrot.slane %v1464_v60, 7  ;;  %v2172_v32 = vadd.f32 %v9056_v10, %v8719_v26  ;;  %v1815_v16 = vrot.slane %v1465_v12, 7 }
 0x1bd   : > { %v9141_v0 = vadd.f32 %v1801_v2, %v1632_v28  ;;  %v9145_v51 = vsel %vm7954_vm8, %v6373_v15, %v2233_v14  ;;  %v12113_v19 = vrot.slane %v9095_v54, 7  ;;  %v1777_v52 = vadd.f32 %v1741_v9, %v1728_v48 }
 0x1be   : > { %v1807_v55 = vadd.f32 %v1775_v59, %v1464_v60  ;;  %v9149_v25 = vrot.slane %v9119_v33, 2  ;;  %v1765_v35 = vadd.f32 %v8822_v17, %v8851_v34  ;;  %v1808_v24 = vadd.f32 %v1776_v41, %v1465_v12  ;;  %v9168_v41 = vpop.f32.mrf.mxu2 }
 0x1bf   : > { %12224 = vst [vmem:[#allocation33_spill] sm:$0xff] %v9141_v0  ;;  %v1843_v26 = vadd.f32 %v1794_v40, %v9051_v4  ;;  %v9155_v28 = vrot.slane %v9119_v33, 6  ;;  %v1717_v62 = vadd.f32 %v1685_v27, %v8788_v1  ;;  %v1813_v14 = vsel %vm7954_vm8, %v6361_v63, %v1812_v5 }
 0x1c0   : > { %12225 = vst [vmem:[#allocation34_spill] sm:$0xff] %v9149_v25  ;;  %v9160_v47 = vadd.f32 %v1802_v45, %v1732_v56  ;;  %v2340_v22 = vadd.f32 %v9145_v51, %v2172_v32  ;;  %v2241_v60 = vrot.slane %v12113_v19, 2  ;;  %v1814_v58 = vrot.slane %v1812_v5, 2  ;;  %v12232_v5 = vld [vmem:[#allocation17_spill] sm:$0xff] }
 0x1c1   : > { %12226 = vst [vmem:[#allocation35_spill] sm:$0xff] %v9155_v28  ;;  %v1817_v17 = vrot.slane %v1815_v16, 2  ;;  %v9166_v34 = vadd.f32 %v9086_v38, %v1735_v13  ;;  %v2175_v1 = vadd.f32 %v9095_v54, %v8872_v53  ;;  %v9173_v12 = vadd.f32 %v1777_v52, %v8843_v37 }
 0x1c2   : > { %v6374_v56 = vrot.slane %v9119_v33, 9  ;;  %v12112_v45 = vrot.slane %v9149_v25, 7  ;;  %v1797_v2 = vadd.f32 %v1765_v35, %v8920_v29  ;;  %v9179_v15 = vadd.f32 %v9098_v7, %v1738_v23 }
 0x1c3   : > { %12227 = vst [vmem:[#allocation36_spill] sm:$0xff] %v9166_v34  ;;  %v2176_v38 = vadd.f32 %v9119_v33, %v1843_v26  ;;  %v1766_v13 = vadd.f32 %v1717_v62, %v9051_v4  ;;  %v12111_v48 = vrot.slane %v9155_v28, 7  ;;  %v9184_v59 = vadd.f32 %v1805_v11, %v1741_v9  ;;  %v12264_v34 = vld [vmem:[#allocation19_spill] sm:$0xff] }
 0x1c4   : > { %12228 = vst [vmem:[#allocation37_spill] sm:$0xff] %v9179_v15  ;;  %v2372_v53 = vadd.f32 %v2340_v22, %v9076_v57  ;;  %v2112_v40 = vrot.slane %v9168_v41, 2  ;;  %v9190_v27 = vsel %vm7954_vm8, %v2241_v60, %v2242_v30  ;;  %v1816_v29 = vsel %vm7954_vm8, %v1814_v58, %v1815_v16 }
 0x1c5   : > { %12229 = vst [vmem:[#allocation38_spill] sm:$0xff] %v9184_v59  ;;  %v12230_v7 = vrot.slane %v8843_v37, 7  ;;  %v9198_v23 = vadd.f32 %v1813_v14, %v1806_v20  ;;  %v2343_v9 = vadd.f32 %v9190_v27, %v2175_v1  ;;  %v2247_v11 = vsel %vm7954_vm8, %v6374_v56, %v12112_v45 }
 0x1c6   : > { %v1846_v30 = vadd.f32 %v1797_v2, %v8999_v43  ;;  %v9207_v63 = vrot.slane %v9168_v41, 4  ;;  %v1785_v37 = vadd.f32 %v12232_v5, %v8412_v61  ;;  %v2344_v32 = vadd.f32 %v2247_v11, %v2176_v38  ;;  %v9238_v56 = vpop.f32.mrf.mxu2  ;;  %v9241_v38 = vpop.f32.mrf.mxu3 }
 0x1c7   : > { %v1819_v4 = vsel %vm7954_vm8, %v1817_v17, %v12230_v7  ;;  %v1798_v16 = vadd.f32 %v1766_v13, %v8935_v42  ;;  %v2254_v20 = vrot.slane %v12111_v48, 2  ;;  %v2255_v52 = vrot.slane %v9168_v41, 7  ;;  %12235 = vst [vmem:[#allocation41_spill] sm:$0xff] %v9238_v56  ;;  %v6967_v7 = vld [vmem:[%s12076_s4 + $0x450] sm:$0xf] }
 0x1c8   : > { %12231 = vst [vmem:[#allocation39_spill] sm:$0xff] %v9207_v63  ;;  %v9215_v35 = vadd.f32 %v1816_v29, %v1807_v55  ;;  %v9217_v26 = vadd.f32 %v1819_v4, %v1808_v24  ;;  %v2404_v43 = vadd.f32 %v2372_v53, %v9119_v33  ;;  %v6375_v62 = vrot.slane %v2112_v40, 9  ;;  %v12243_v48 = vld [vmem:[#allocation22_spill] sm:$0xff] }
 0x1c9   : > { %v9221_v14 = vrot.slane %v9119_v33, 4  ;;  %v2375_v61 = vadd.f32 %v2343_v9, %v9105_v46  ;;  %v9225_v22 = vrot.slane %v8966_v50, 2  ;;  %v2207_v42 = vrot.slane %v8874_v6, 7 }
 0x1ca   : > { %v9229_v60 = vrot.slane %v9168_v41, 6  ;;  %v2179_v55 = vadd.f32 %v9155_v28, %v1846_v30  ;;  %v12110_v24 = vrot.slane %v9207_v63, 7  ;;  %v1834_v58 = vadd.f32 %v1785_v37, %v8609_v3  ;;  %v7516_v37 = vld [vmem:[%s12076_s4 + $0x464] sm:$0xf0] }
 0x1cb   : > { %12233 = vst [vmem:[#allocation17_spill] sm:$0xff] %v9221_v14  ;;  %v1847_v17 = vadd.f32 %v1798_v16, %v9066_v21  ;;  %v2256_v33 = vsel %vm7954_vm8, %v2254_v20, %v2255_v52  ;;  %v2376_v1 = vadd.f32 %v2344_v32, %v9149_v25  ;;  %v2210_v2 = vrot.slane %v8893_v8, 7  ;;  %v12240_v16 = vld [vmem:[#allocation23_spill] sm:$0xff]  ;;  %v12241_v20 = vld [vmem:[#allocation14_spill] sm:$0xff] }
 0x1cc   : > { %12234 = vst [vmem:[#allocation40_spill] sm:$0xff] %v9229_v60  ;;  %v2453_v13 = vadd.f32 %v2404_v43, %v2247_v11  ;;  %v9247_v53 = vsel %vm7954_vm8, %v6375_v62, %v12110_v24  ;;  %v9250_v3 = vrot.slane %v9238_v56, 4  ;;  %v12238_v21 = vrot.slane %v8846_v39, 9  ;;  %v7159_v24 = vld [vmem:[%s12076_s4 + $0x5d0] sm:$0xf] }
 0x1cd   : > { %12236 = vst [vmem:[#allocation42_spill] sm:$0xff] %v9247_v53  ;;  %v2407_v4 = vadd.f32 %v2375_v61, %v9155_v28  ;;  %v2209_v9 = vrot.slane %v2207_v42, 2  ;;  %v12239_v11 = vrot.slane %v8966_v50, 7  ;;  %v2216_v5 = vrot.slane %v9225_v22, 7 }
 0x1ce   : > { %12237 = vst [vmem:[#allocation43_spill] sm:$0xff] %v9250_v3  ;;  %v2208_v29 = vsel %vm7954_vm8, %v12238_v21, %v2207_v42  ;;  %v2347_v32 = vadd.f32 %v2256_v33, %v2179_v55  ;;  %v1833_v52 = vadd.f32 %v12241_v20, %v12240_v16  ;;  %v2167_v43 = vadd.f32 %v8966_v50, %v1834_v58  ;;  %v7564_v55 = vld [vmem:[%s12076_s4 + $0x5e4] sm:$0xf0]  ;;  %v12244_v58 = vld [vmem:[#allocation15_spill] sm:$0xff] }
 0x1cf   : > { %v2215_v30 = vrot.slane %v12239_v11, 2  ;;  %v2740_v62 = vrot.slane %v9241_v38, 2  ;;  %v2180_v21 = vadd.f32 %v2112_v40, %v1847_v17  ;;  %v9270_v61 = vadd.f32 %v2376_v1, %v2112_v40  ;;  %v12245_v40 = vld [vmem:[#allocation18_spill] sm:$0xff] }
 0x1d0   : > { %v2212_v42 = vrot.slane %v2210_v2, 2  ;;  %v2332_v11 = vadd.f32 %v2208_v29, %v8897_v31  ;;  %v2165_v16 = vadd.f32 %v8874_v6, %v12243_v48  ;;  %v2392_v20 = vadd.f32 %v12244_v58, %v8846_v39 }
 0x1d1   : > { %12242 = vst [vmem:[#allocation23_spill] sm:$0xff] %v9270_v61  ;;  %v2393_v17 = vadd.f32 %v12245_v40, %v8874_v6  ;;  %v6968_v1 = vor.u32 %v7516_v37, %v6967_v7  ;;  %v2456_v45 = vadd.f32 %v2407_v4, %v2256_v33  ;;  %v2211_v31 = vsel %vm7954_vm8, %v2209_v9, %v2210_v2  ;;  %v12247_v2 = vld [vmem:[#allocation13_spill] sm:$0xff]  ;;  %v12248_v9 = vld [vmem:[#allocation16_spill] sm:$0xff]  ;;  %v410_v40 = vld [vmem:[%s7838_s27 + $0x278] sm:$0x3]  ;;  %s6260_s27 = sshll.u32 %s324_s26, 4  ;;  %s6261_s27 = int_to_ptr.vmem [resolvable:$true] %s6260_s27 }
 0x1d2   : > { %v2217_v19 = vsel %vm7954_vm8, %v2215_v30, %v2216_v5  ;;  %v2834_v61 = vrot.slane %v2740_v62, 7  ;;  %v2166_v15 = vadd.f32 %v8893_v8, %v1833_v52  ;;  %v2741_v48 = vrot.slane %v9241_v38, 4 }
 0x1d3   : > { %v2335_v0 = vadd.f32 %v2217_v19, %v2167_v43  ;;  %4931 = vmatpush.bf16.msra.mxu2 %v6968_v1  ;;  %v7160_v39 = vor.u32 %v7564_v55, %v7159_v24  ;;  %v12246_v58 = vrot.slane %v8966_v50, 7  ;;  %v2364_v7 = vadd.f32 %v2332_v11, %v8874_v6 }
 0x1d4   : > { %v2394_v4 = vadd.f32 %v12247_v2, %v8893_v8  ;;  %v2395_v30 = vadd.f32 %v12248_v9, %v8966_v50  ;;  %v9301_v5 = vadd.f32 %v2453_v13, %v9149_v25  ;;  %v9304_v37 = vadd.f32 %v2347_v32, %v9168_v41  ;;  %v9319_v2 = vpop.f32.mrf.mxu3 }
 0x1d5   : > { %v2214_v33 = vsel %vm7954_vm8, %v2212_v42, %v12246_v58  ;;  %v9307_v24 = vrot.slane %v9238_v56, 6  ;;  %v2442_v52 = vadd.f32 %v2393_v17, %v2211_v31  ;;  %4959 = vmatpush.bf16.msra.mxu3 %v7160_v39  ;;  %v9310_v43 = vadd.f32 %v9247_v53, %v2180_v21 }
 0x1d6   : > { %12249 = vst [vmem:[#allocation14_spill] sm:$0xff] %v9301_v5  ;;  %v9313_v42 = vadd.f32 %v2456_v45, %v9168_v41  ;;  %v2441_v11 = vadd.f32 %v2392_v20, %v2208_v29  ;;  %v2836_v55 = vrot.slane %v2834_v61, 2  ;;  %v2333_v1 = vadd.f32 %v2211_v31, %v2165_v16 }
 0x1d7   : > { %12250 = vst [vmem:[#allocation22_spill] sm:$0xff] %v9304_v37  ;;  %v2334_v13 = vadd.f32 %v2214_v33, %v2166_v15  ;;  %v9317_v58 = vadd.f32 %v2335_v0, %v9225_v22  ;;  %v2837_v32 = vrot.slane %v2741_v48, 7  ;;  %v2396_v17 = vadd.f32 %v2364_v7, %v8989_v44 }
 0x1d8   : > { %12251 = vst [vmem:[#allocation15_spill] sm:$0xff] %v9310_v43  ;;  %v2443_v39 = vadd.f32 %v2394_v4, %v2214_v33  ;;  %v2444_v9 = vadd.f32 %v2395_v30, %v2217_v19  ;;  %v6372_v21 = vrot.slane %v8989_v44, 9  ;;  %v2474_v41 = vadd.f32 %v2442_v52, %v8893_v8 }
 0x1d9   : > { %12252 = vst [vmem:[#allocation18_spill] sm:$0xff] %v9313_v42  ;;  %v2742_v45 = vrot.slane %v9241_v38, 6  ;;  %v6386_v29 = vrot.slane %v9241_v38, 9  ;;  %v2524_v16 = vmax.f32 %v410_v40, 0.0  ;;  %v2473_v15 = vadd.f32 %v2441_v11, %v8874_v6 }
 0x1da   : > { %v2838_v0 = vsel %vm7954_vm8, %v2836_v55, %v2837_v32  ;;  %v2220_v20 = vrot.slane %v9006_v49, 7  ;;  %v2743_v31 = vrot.slane %v9319_v2, 2  ;;  %v2801_v33 = vadd.f32 %v2740_v62, %v2474_v41 }
 0x1db   : > { %v2835_v19 = vsel %vm7954_vm8, %v6386_v29, %v2834_v61  ;;  %v2839_v7 = vrot.slane %v2837_v32, 2  ;;  %2643 = vst [vmem:[#allocation1 + $0x1] ss:$4 sm:$0xff] %v2524_v16  ;;  %v9334_v4 = vrot.slane %v9319_v2, 4  ;;  %v2365_v30 = vadd.f32 %v2333_v1, %v8893_v8  ;;  %v12255_v16 = vld [vmem:[#allocation7_spill] sm:$0xff] }
 0x1dc   : > { %v2800_v6 = vadd.f32 %v9241_v38, %v2473_v15  ;;  %v2221_v52 = vsel %vm7954_vm8, %v6372_v21, %v2220_v20  ;;  %v9341_v11 = vrot.slane %v9319_v2, 6  ;;  %v2366_v62 = vadd.f32 %v2334_v13, %v8966_v50  ;;  %v9350_v38 = vld [vmem:[%s12074_s2] ss:$0 sm:$0xff]  ;;  %v12254_v13 = vld [vmem:[#allocation21_spill] sm:$0xff] }
 0x1dd   : > { %v2475_v55 = vadd.f32 %v2443_v39, %v8966_v50  ;;  %v2840_v61 = vrot.slane %v2742_v45, 7  ;;  %v2969_v40 = vadd.f32 %v2838_v0, %v2801_v33  ;;  %v2476_v32 = vadd.f32 %v2444_v9, %v9225_v22  ;;  %12253 = vst [vmem:[#allocation13_spill] sm:$0xff] %v9350_v38  ;;  %v9359_v22 = vld [vmem:[%s12075_s3] ss:$0 sm:$0xff] }
 0x1de   : > { %v2968_v41 = vadd.f32 %v2835_v19, %v2800_v6  ;;  %v6387_v29 = vrot.slane %v2743_v31, 9  ;;  %v2847_v8 = vrot.slane %v9334_v4, 7  ;;  %v1788_v50 = vadd.f32 %v12255_v16, %v12254_v13  ;;  %v9364_v6 = vpop.f32.mrf.mxu2 }
 0x1df   : > { %v2802_v1 = vadd.f32 %v2741_v48, %v2475_v55  ;;  %v2841_v21 = vsel %vm7954_vm8, %v2839_v7, %v2840_v61  ;;  %v2445_v39 = vadd.f32 %v2396_v17, %v2221_v52  ;;  %v2850_v0 = vrot.slane %v9341_v11, 7  ;;  %12256 = vst [vmem:[#allocation16_spill] sm:$0xff] %v9364_v6  ;;  %v12257_v7 = vld [vmem:[#allocation24_spill] sm:$0xff]  ;;  %v12258_v55 = vld [vmem:[#allocation10_spill] sm:$0xff] }
 0x1e0   : > { %v2848_v9 = vsel %vm7954_vm8, %v6387_v29, %v2847_v8  ;;  %v2849_v15 = vrot.slane %v2847_v8, 2  ;;  %v3000_v33 = vadd.f32 %v2968_v41, %v2743_v31  ;;  %v2803_v48 = vadd.f32 %v2742_v45, %v2476_v32 }
 0x1e1   : > { %v2842_v19 = vrot.slane %v2840_v61, 2  ;;  %v1835_v13 = vadd.f32 %v12258_v55, %v12257_v7  ;;  %v3001_v17 = vadd.f32 %v2969_v40, %v9334_v4  ;;  %v9370_v16 = vrot.slane %v9364_v6, 4  ;;  %v12260_v61 = vld [vmem:[#allocation11_spill] sm:$0xff]  ;;  %v9387_v7 = vpop.f32.mrf.mxu3  ;;  %v12262_v55 = vld [vmem:[#allocation25_spill] sm:$0xff] }
 0x1e2   : > { %v9374_v53 = vsel %vm7954_vm8, %v2849_v15, %v2850_v0  ;;  %v3049_v29 = vadd.f32 %v3000_v33, %v2848_v9  ;;  %v9377_v8 = vrot.slane %v9350_v38, 2  ;;  %v2970_v45 = vadd.f32 %v2841_v21, %v2802_v1  ;;  %v12263_v21 = vld [vmem:[#allocation28_spill] sm:$0xff] }
 0x1e3   : > { %v9381_v32 = vadd.f32 %v9006_v49, %v12260_v61  ;;  %v3050_v41 = vadd.f32 %v3001_v17, %v9374_v53  ;;  %v9385_v40 = vrot.slane %v9359_v22, 2  ;;  %v1837_v37 = vadd.f32 %v1788_v50, %v12262_v55 }
 0x1e4   : > { %12259 = vst [vmem:[#allocation21_spill] sm:$0xff] %v9377_v8  ;;  %v2477_v15 = vadd.f32 %v2445_v39, %v9006_v49  ;;  %v2843_v33 = vrot.slane %v9319_v2, 7  ;;  %v3091_v43 = vmul.f32 %v9350_v38, %v3049_v29  ;;  %v2168_v1 = vadd.f32 %v8989_v44, %v1835_v13  ;;  %v9405_v29 = vld.sshfl [vmem:[#allocation1] sm:$0xff pattern:$0x73625140] }
 0x1e5   : > { %12261 = vst [vmem:[#allocation7_spill] sm:$0xff] %v9385_v40  ;;  %v2223_v61 = vrot.slane %v12263_v21, 7  ;;  %v2226_v42 = vrot.slane %v12264_v34, 7  ;;  %v3092_v17 = vmul.f32 %v9377_v8, %v3050_v41  ;;  %v9399_v5 = vrot.slane %v9387_v7, 4 }
 0x1e6   : > { %v2804_v63 = vadd.f32 %v2743_v31, %v2477_v15  ;;  %v3133_v56 = vadd.f32 %v9359_v22, %v3091_v43  ;;  %v9402_v50 = vrot.slane %v9387_v7, 6  ;;  %v2222_v2 = vrot.slane %v2220_v20, 2  ;;  %12265 = vst [vmem:[#allocation24_spill] sm:$0xff] %v9405_v29 }
 0x1e7   : > { %v2397_v39 = vadd.f32 %v2365_v30, %v9006_v49  ;;  %v3134_v44 = vadd.f32 %v9385_v40, %v3092_v17  ;;  %v2853_v13 = vrot.slane %v9387_v7, 7  ;;  %v2844_v31 = vsel %vm7954_vm8, %v2842_v19, %v2843_v33 }
 0x1e8   : > { %v3165_v41 = vmax.f32 %v3133_v56, 0.0  ;;  %v6389_v43 = vrot.slane %v9399_v5, 9  ;;  %v12126_v55 = vrot.slane %v9402_v50, 7  ;;  %v2225_v15 = vrot.slane %v2223_v61, 2 }
 0x1e9   : > { %v2336_v60 = vadd.f32 %v2221_v52, %v2168_v1  ;;  %v2852_v28 = vrot.slane %v2850_v0, 2  ;;  %v3166_v20 = vmax.f32 %v3134_v44, 0.0  ;;  %v2398_v30 = vadd.f32 %v2366_v62, %v12263_v21  ;;  %v9461_v44 = vpop.f32.mrf.mxu2 }
 0x1ea   : > { %v2972_v8 = vadd.f32 %v2848_v9, %v2804_v63  ;;  %3229 = vst [vmem:[#allocation1] ss:$4 sm:$0xff] %v3165_v41  ;;  %v2855_v29 = vrot.slane %v2853_v13, 2  ;;  %v6388_v17 = vrot.slane %v9387_v7, 9  ;;  %v9416_v40 = vrot.slane %v12263_v21, 4 }
 0x1eb   : > { %3231 = vst [vmem:[#allocation1 + $0x1] ss:$4 sm:$0xff] %v3166_v20  ;;  %v9420_v56 = vsel %vm7954_vm8, %v2852_v28, %v2853_v13  ;;  %v9426_v52 = vsel %vm7954_vm8, %v6389_v43, %v12126_v55  ;;  %v2971_v62 = vadd.f32 %v2844_v31, %v2803_v48  ;;  %v2170_v63 = vadd.f32 %v12263_v21, %v1837_v37  ;;  %v6943_v37 = vld [vmem:[%s12076_s4 + $0x420] sm:$0xf] }
 0x1ec   : > { %v3002_v9 = vadd.f32 %v2970_v45, %v9341_v11  ;;  %v9432_v0 = vsel %vm7954_vm8, %v2855_v29, %v6388_v17  ;;  %v3004_v19 = vadd.f32 %v2972_v8, %v9399_v5  ;;  %v2224_v28 = vsel %vm7954_vm8, %v2222_v2, %v2223_v61  ;;  %v7510_v45 = vld [vmem:[%s12076_s4 + $0x434] sm:$0xf0] }
 0x1ed   : > { %v2227_v33 = vsel %vm7954_vm8, %v2225_v15, %v2226_v42  ;;  %v2368_v1 = vadd.f32 %v2336_v60, %v9006_v49  ;;  %v3003_v48 = vadd.f32 %v2971_v62, %v9387_v7  ;;  %v9450_v61 = vrot.slane %v9350_v38, 4  ;;  %v7135_v49 = vld [vmem:[%s12076_s4 + $0x5a0] sm:$0xf]  ;;  %v7558_v60 = vld [vmem:[%s12076_s4 + $0x5b4] sm:$0xf0] }
 0x1ee   : > { %v3051_v8 = vadd.f32 %v3002_v9, %v9420_v56  ;;  %v3053_v29 = vadd.f32 %v3004_v19, %v9426_v52  ;;  %v9453_v2 = vrot.slane %v9350_v38, 6  ;;  %v2228_v13 = vrot.slane %v2226_v42, 2 }
 0x1ef   : > { %v2229_v31 = vrot.slane %v9416_v40, 7  ;;  %v3052_v41 = vadd.f32 %v3003_v48, %v9432_v0  ;;  %v9466_v43 = vrot.slane %v9359_v22, 4  ;;  %v9471_v17 = vrot.slane %v9359_v22, 6 }
 0x1f0   : > { %v3093_v15 = vmul.f32 %v9450_v61, %v3051_v8  ;;  %v3095_v20 = vmul.f32 %v9350_v38, %v3053_v29  ;;  %v6944_v62 = vor.u32 %v7510_v45, %v6943_v37  ;;  %v2337_v9 = vadd.f32 %v2224_v28, %v9381_v32  ;;  %v12267_v29 = vld [vmem:[#allocation8_spill] sm:$0xff] }
 0x1f1   : > { %v2446_v19 = vadd.f32 %v2397_v39, %v2224_v28  ;;  %v3094_v42 = vmul.f32 %v9453_v2, %v3052_v41  ;;  %v7136_v55 = vor.u32 %v7558_v60, %v7135_v49  ;;  %v2338_v25 = vadd.f32 %v2227_v33, %v2170_v63 }
 0x1f2   : > { %v2447_v14 = vadd.f32 %v2398_v30, %v2227_v33  ;;  %v3135_v48 = vadd.f32 %v9466_v43, %v3093_v15  ;;  %v3137_v59 = vadd.f32 %v9359_v22, %v3095_v20  ;;  %4932 = vmatpush.bf16.msra.mxu2 %v6944_v62  ;;  %v9478_v8 = vrot.slane %v9461_v44, 2 }
 0x1f3   : > { %v2171_v38 = vadd.f32 %v12264_v34, %v12267_v29  ;;  %v2400_v37 = vadd.f32 %v2368_v1, %v9056_v10  ;;  %v3136_v32 = vadd.f32 %v9471_v17, %v3094_v42  ;;  %4960 = vmatpush.bf16.msra.mxu3 %v7136_v55  ;;  %v2230_v39 = vsel %vm7954_vm8, %v2228_v13, %v2229_v31 }
 0x1f4   : > { %12266 = vst [vmem:[#allocation10_spill] sm:$0xff] %v9478_v8  ;;  %v2399_v30 = vadd.f32 %v9317_v58, %v12264_v34  ;;  %v3167_v63 = vmax.f32 %v3135_v48, 0.0  ;;  %v3169_v28 = vmax.f32 %v3137_v59, 0.0  ;;  %v9489_v33 = vrot.slane %v9364_v6, 2  ;;  %v9511_v48 = vpop.f32.mrf.mxu2 }
 0x1f5   : > { %v2478_v45 = vadd.f32 %v2446_v19, %v12263_v21  ;;  %v3168_v49 = vmax.f32 %v3136_v32, 0.0  ;;  %v9493_v60 = vrot.slane %v9364_v6, 6  ;;  %v6376_v55 = vrot.slane %v9250_v3, 9 }
 0x1f6   : > { %3233 = vst [vmem:[#allocation1 + $0x2] ss:$4 sm:$0xff] %v3167_v63  ;;  %v12132_v1 = vrot.slane %v9307_v24, 7  ;;  %v2285_v58 = vrot.slane %v9461_v44, 7  ;;  %v2479_v59 = vadd.f32 %v2447_v14, %v12264_v34  ;;  %v2339_v31 = vadd.f32 %v2230_v39, %v2171_v38 }
 0x1f7   : > { %v2805_v13 = vadd.f32 %v9334_v4, %v2478_v45  ;;  %v2449_v41 = vadd.f32 %v2400_v37, %v9145_v51  ;;  %3235 = vst [vmem:[#allocation1 + $0x3] ss:$4 sm:$0xff] %v3168_v49  ;;  %v9503_v15 = vadd.f32 %v2337_v9, %v12263_v21  ;;  %v9506_v20 = vadd.f32 %v2338_v25, %v12264_v34  ;;  %v9535_v37 = vpop.f32.mrf.mxu3 }
 0x1f8   : > { %v2448_v62 = vadd.f32 %v2399_v30, %v2230_v39  ;;  %3238 = vst [vmem:[#allocation1 + $0x20] ss:$4 sm:$0xff] %v3169_v28  ;;  %v2288_v19 = vrot.slane %v9478_v8, 7  ;;  %v2806_v42 = vadd.f32 %v9341_v11, %v2479_v59  ;;  %v2184_v51 = vadd.f32 %v9250_v3, %v9160_v47 }
 0x1f9   : > { %v2973_v14 = vadd.f32 %v9374_v53, %v2805_v13  ;;  %v6377_v4 = vrot.slane %v9493_v60, 9  ;;  %v9517_v38 = vrot.slane %v9461_v44, 4  ;;  %v2188_v25 = vadd.f32 %v9493_v60, %v9198_v23 }
 0x1fa   : > { %v9525_v34 = vsel %vm7954_vm8, %v6376_v55, %v12132_v1  ;;  %v2287_v53 = vrot.slane %v2285_v58, 2  ;;  %v2371_v11 = vadd.f32 %v2339_v31, %v9416_v40  ;;  %v2481_v21 = vadd.f32 %v2449_v41, %v9076_v57 }
 0x1fb   : > { %12268 = vst [vmem:[#allocation11_spill] sm:$0xff] %v9517_v38  ;;  %v12270_v47 = vrot.slane %v9402_v50, 7  ;;  %v2189_v29 = vadd.f32 %v9461_v44, %v9215_v35  ;;  %v2480_v23 = vadd.f32 %v2448_v62, %v9416_v40  ;;  %v9539_v32 = vrot.slane %v9511_v48, 2 }
 0x1fc   : > { %12269 = vst [vmem:[#allocation25_spill] sm:$0xff] %v9525_v34  ;;  %v9542_v39 = vrot.slane %v9511_v48, 4  ;;  %v2290_v30 = vrot.slane %v2288_v19, 2  ;;  %v2808_v63 = vadd.f32 %v9399_v5, %v2481_v21  ;;  %v2974_v28 = vadd.f32 %v9420_v56, %v2806_v42 }
 0x1fd   : > { %v9531_v9 = vrot.slane %v12270_v47, 2  ;;  %v2286_v45 = vsel %vm7954_vm8, %v6377_v4, %v2285_v58  ;;  %v2352_v35 = vadd.f32 %v9525_v34, %v2184_v51  ;;  %v9551_v40 = vsel %vm7954_vm8, %v2287_v53, %v2288_v19  ;;  %v12273_v4 = vld [vmem:[#allocation30_spill] sm:$0xff] }
 0x1fe   : > { %v3236_v49 = vld.sshfl [vmem:[#allocation1] sm:$0xff pattern:$0x73625140]  ;;  %12271 = vst [vmem:[#allocation28_spill] sm:$0xff] %v9551_v40  ;;  %v2291_v55 = vrot.slane %v9517_v38, 7  ;;  %v2356_v59 = vadd.f32 %v2286_v45, %v2188_v25  ;;  %v9555_v13 = vrot.slane %v9535_v37, 2  ;;  %v2403_v5 = vadd.f32 %v2371_v11, %v9095_v54 }
 0x1ff   : > { %v2807_v56 = vadd.f32 %v9387_v7, %v2480_v23  ;;  %v9560_v31 = vadd.f32 %v2973_v14, %v9402_v50  ;;  %v2357_v58 = vadd.f32 %v9551_v40, %v2189_v29  ;;  %v9563_v41 = vpack.c.bf16 %v3236_v49, %v3236_v49  ;;  %v6583_v29 = vld [vmem:[%s12076_s4 + $0x150] sm:$0xf]  ;;  %v7468_v49 = vld [vmem:[%s12076_s4 + $0x2e4] sm:$0xf0] }
 0x200   : > { %v9567_v62 = vsel %vm7954_vm8, %v2290_v30, %v2291_v55  ;;  %v2426_v19 = vrot.slane %v9539_v32, 7  ;;  %v2429_v42 = vrot.slane %v9542_v39, 7  ;;  %v9572_v51 = vrot.slane %v9511_v48, 6 }
 0x201   : > { %12272 = vst [vmem:[#allocation19_spill] sm:$0xff] %v9567_v62  ;;  %v2190_v7 = vadd.f32 %v9478_v8, %v9217_v26  ;;  %v2384_v14 = vadd.f32 %v2352_v35, %v9307_v24  ;;  %v2236_v25 = vrot.slane %v12273_v4, 7  ;;  %v9579_v53 = vadd.f32 %v9426_v52, %v2808_v63  ;;  %v7420_v26 = vld [vmem:[%s12076_s4 + $0x164] sm:$0xf0]  ;;  %v6775_v35 = vld [vmem:[%s12076_s4 + $0x2d0] sm:$0xf] }
 0x202   : > { %v2388_v11 = vadd.f32 %v2356_v59, %v9461_v44  ;;  %v12141_v21 = vrot.slane %v9535_v37, 7  ;;  %v2452_v23 = vadd.f32 %v2403_v5, %v9190_v27  ;;  %v2389_v52 = vadd.f32 %v2357_v58, %v9478_v8 }
 0x203   : > { %v2358_v30 = vadd.f32 %v9567_v62, %v2190_v7  ;;  %v6378_v63 = vrot.slane %v9511_v48, 9  ;;  %v3299_v59 = vunpack.c.l.b16 %v9563_v41  ;;  %v2428_v1 = vrot.slane %v2426_v19, 2 }
 0x204   : > { %v2431_v10 = vrot.slane %v2429_v42, 2  ;;  %v2865_v27 = vrot.slane %v12141_v21, 2  ;;  %v2416_v5 = vadd.f32 %v2384_v14, %v9493_v60  ;;  %v2238_v7 = vrot.slane %v2236_v25, 2 }
 0x205   : > { %v3006_v47 = vadd.f32 %v2974_v28, %v9535_v37  ;;  %v2420_v62 = vadd.f32 %v2388_v11, %v9511_v48  ;;  %v12274_v40 = vrot.slane %v9555_v13, 7  ;;  %v6584_v34 = vor.u32 %v7420_v26, %v6583_v29 }
 0x206   : > { %v6776_v3 = vor.u32 %v7468_v49, %v6775_v35  ;;  %v2390_v6 = vadd.f32 %v2358_v30, %v9517_v38  ;;  %v2421_v21 = vadd.f32 %v2389_v52, %v9539_v32  ;;  %v2427_v60 = vsel %vm7954_vm8, %v6378_v63, %v2426_v19 }
 0x207   : > { %v2867_v8 = vsel %vm7954_vm8, %v2865_v27, %v12274_v40  ;;  %v2430_v28 = vsel %vm7954_vm8, %v2428_v1, %v2429_v42  ;;  %v3306_v58 = vpack.c.b16 %v3299_v59, %v3299_v59  ;;  %v2402_v48 = vadd.f32 %v9506_v20, %v12273_v4  ;;  %4875 = vmatpush.bf16.msrb.mxu0 %v6584_v34 }
 0x208   : > { %v3055_v14 = vadd.f32 %v3006_v47, %v2867_v8  ;;  %4903 = vmatpush.bf16.msrb.mxu1 %v6776_v3  ;;  %v9620_v40 = vrot.slane %v9461_v44, 6  ;;  %v2975_v11 = vadd.f32 %v9432_v0, %v2807_v56  ;;  %v12276_v29 = vrot.slane %v9572_v51, 7  ;;  %v12278_v3 = vld [vmem:[#allocation27_spill] sm:$0xff] }
 0x209   : > { %v12277_v47 = vrot.slane %v9095_v54, 7  ;;  %v2465_v20 = vadd.f32 %v2416_v5, %v2286_v45  ;;  %v2469_v34 = vadd.f32 %v2427_v60, %v2420_v62  ;;  %v2174_v26 = vadd.f32 %v12273_v4, %v12278_v3  ;;  %v12282_v60 = vld [vmem:[#allocation32_spill] sm:$0xff] }
 0x20a   : > { %12275 = vst [vmem:[#allocation8_spill] sm:$0xff] %v9620_v40  ;;  %v2433_v19 = vsel %vm7954_vm8, %v2431_v10, %v12276_v29  ;;  %v3097_v42 = vmul.f32 %v9450_v61, %v3055_v14  ;;  %v2484_v30 = vadd.f32 %v2452_v23, %v9105_v46  ;;  %v2422_v0 = vadd.f32 %v2390_v6, %v9542_v39 }
 0x20b   : > { %v2240_v1 = vsel %vm7954_vm8, %v2238_v7, %v12277_v47  ;;  %v2470_v56 = vadd.f32 %v2430_v28, %v2421_v21  ;;  %v9637_v52 = vrot.slane %v9535_v37, 6  ;;  %v3316_v35 = vshll.u32 %v3306_v58, 16 }
 0x20c   : > { %v3139_v10 = vadd.f32 %v9466_v43, %v3097_v42  ;;  %v2451_v63 = vadd.f32 %v2402_v48, %v2240_v1  ;;  %v2293_v49 = vrot.slane %v2291_v55, 2  ;;  %v2294_v59 = vrot.slane %v9620_v40, 7 }
 0x20d   : > { %v2471_v45 = vadd.f32 %v2433_v19, %v2422_v0  ;;  %v9642_v62 = vadd.f32 %v9555_v13, %v2484_v30  ;;  %v12142_v46 = vrot.slane %v9489_v33, 7  ;;  %v9646_v6 = vadd.f32 %v2465_v20, %v9461_v44  ;;  %v9669_v19 = vpop.f32.mrf.mxu3 }
 0x20e   : > { %v3171_v27 = vmax.f32 %v3139_v10, 0.0  ;;  %v9649_v21 = vadd.f32 %v2469_v34, %v9539_v32  ;;  %v2342_v23 = vadd.f32 %v2240_v1, %v2174_v26  ;;  %v2237_v55 = vsel %vm7954_vm8, %v9129_v36, %v2236_v25  ;;  %v12283_v36 = vld [vmem:[#allocation12_spill] sm:$0xff]  ;;  %v12284_v25 = vld [vmem:[#allocation6_spill] sm:$0xff] }
 0x20f   : > { %12279 = vst [vmem:[#allocation30_spill] sm:$0xff] %v9646_v6  ;;  %v9655_v5 = vadd.f32 %v2470_v56, %v9542_v39  ;;  %v6390_v7 = vrot.slane %v9535_v37, 11  ;;  %v1858_v14 = vadd.f32 %v12282_v60, %v9173_v12  ;;  %v2401_v28 = vadd.f32 %v9503_v15, %v9076_v57  ;;  %v12286_v34 = vld [vmem:[#allocation38_spill] sm:$0xff]  ;;  %v9684_v56 = vpop.f32.mrf.mxu2 }
 0x210   : > { %12280 = vst [vmem:[#allocation27_spill] sm:$0xff] %v9649_v21  ;;  %v2483_v32 = vadd.f32 %v2451_v63, %v9095_v54  ;;  %v3318_v48 = vrot.slane %v3316_v35, 1  ;;  %v9665_v29 = vsel %vm7954_vm8, %v2293_v49, %v2294_v59  ;;  %v1795_v39 = vadd.f32 %v12284_v25, %v12283_v36  ;;  %v12293_v25 = vld [vmem:[#allocation17_spill] sm:$0xff] }
 0x211   : > { %12281 = vst [vmem:[#allocation44_spill] sm:$0xff] %v9655_v5  ;;  %v9672_v47 = vadd.f32 %v2471_v45, %v9572_v51  ;;  %v2191_v12 = vadd.f32 %v9517_v38, %v1858_v14  ;;  %v2280_v57 = vrot.slane %v12142_v46, 2  ;;  %v2450_v15 = vadd.f32 %v2401_v28, %v2237_v55  ;;  %v12298_v5 = vld [vmem:[#allocation13_spill] sm:$0xff] }
 0x212   : > { %3242 = vst [vmem:[#allocation1 + $0x22] ss:$4 sm:$0xff] %v3171_v27  ;;  %v2374_v1 = vadd.f32 %v2342_v23, %v9095_v54  ;;  %v2810_v42 = vadd.f32 %v9535_v37, %v2483_v32  ;;  %v3314_v20 = vshrl.u32 %v3306_v58, 16  ;;  %v2187_v3 = vadd.f32 %v9489_v33, %v12286_v34  ;;  %v12289_v58 = vld [vmem:[#allocation26_spill] sm:$0xff] }
 0x213   : > { %12285 = vst [vmem:[#allocation32_spill] sm:$0xff] %v9672_v47  ;;  %v12287_v26 = vrot.slane %v9555_v13, 7  ;;  %v6391_v0 = vrot.slane %v9637_v52, 9  ;;  %v2359_v10 = vadd.f32 %v9665_v29, %v2191_v12  ;;  %v9688_v63 = vrot.slane %v9669_v19, 2 }
 0x214   : > { %12288 = vst [vmem:[#allocation12_spill] sm:$0xff] %v9684_v56  ;;  %v2978_v35 = vadd.f32 %v2867_v8, %v2810_v42  ;;  %v3007_v54 = vadd.f32 %v2975_v11, %v9555_v13  ;;  %v3319_v49 = vor.u32 %v3318_v48, %v3314_v20  ;;  %v1844_v59 = vadd.f32 %v1795_v39, %v12289_v58  ;;  %v12295_v20 = vld [vmem:[#allocation31_spill] sm:$0xff]  ;;  %v6919_v58 = vld [vmem:[%s12076_s4 + $0x3f0] sm:$0xf] }
 0x215   : > { %v2868_v30 = vrot.slane %v12287_v26, 2  ;;  %v12290_v45 = vrot.slane %v9370_v16, 7  ;;  %v12291_v23 = vrot.slane %v9572_v51, 7  ;;  %v2482_v14 = vadd.f32 %v2450_v15, %v12273_v4  ;;  %v12294_v15 = vld [vmem:[#allocation34_spill] sm:$0xff] }
 0x216   : > { %v9704_v28 = vrot.slane %v9669_v19, 4  ;;  %v12292_v11 = vrot.slane %v9535_v37, 7  ;;  %v2873_v48 = vrot.slane %v9669_v19, 7  ;;  %v9715_v36 = vadd.f32 %v2359_v10, %v9620_v40 }
 0x217   : > { %v9696_v27 = vsel %vm7954_vm8, %v2280_v57, %v12290_v45  ;;  %v9700_v60 = vrot.slane %v12291_v23, 2  ;;  %v2249_v39 = vrot.slane %v12293_v25, 7  ;;  %v2809_v12 = vadd.f32 %v9402_v50, %v2482_v14  ;;  %v7111_v23 = vld [vmem:[%s12076_s4 + $0x570] sm:$0xf]  ;;  %v7552_v14 = vld [vmem:[%s12076_s4 + $0x584] sm:$0xf0] }
 0x218   : > { %v2355_v8 = vadd.f32 %v9696_v27, %v2187_v3  ;;  %v2864_v32 = vsel %vm7954_vm8, %v9531_v9, %v12292_v11  ;;  %v2876_v57 = vrot.slane %v9688_v63, 7  ;;  %v9721_v42 = vadd.f32 %v12294_v15, %v1844_v59 }
 0x219   : > { %v2341_v37 = vadd.f32 %v2237_v55, %v12295_v20  ;;  %v9726_v34 = vsel %vm7954_vm8, %v2868_v30, %v6390_v7  ;;  %v2875_v9 = vrot.slane %v2873_v48, 2  ;;  %v9730_v3 = vsel %vm7954_vm8, %v6391_v0, %v2873_v48  ;;  %v7504_v55 = vld [vmem:[%s12076_s4 + $0x404] sm:$0xf0] }
 0x21a   : > { %v2878_v26 = vrot.slane %v2876_v57, 2  ;;  %v12143_v10 = vrot.slane %v9704_v28, 7  ;;  %v2977_v50 = vadd.f32 %v2864_v32, %v2809_v12  ;;  %v2387_v7 = vadd.f32 %v2355_v8, %v9370_v16 }
 0x21b   : > { %v12296_v30 = vrot.slane %v12294_v15, 7  ;;  %v9744_v0 = vsel %vm7954_vm8, %v2875_v9, %v2876_v57  ;;  %v3008_v45 = vadd.f32 %v9579_v53, %v9637_v52  ;;  %v2251_v8 = vrot.slane %v2249_v39, 2 }
 0x21c   : > { %v9758_v11 = vsel %vm7954_vm8, %v2878_v26, %v12143_v10  ;;  %v3009_v48 = vadd.f32 %v2977_v50, %v9669_v19  ;;  %v3010_v53 = vadd.f32 %v2978_v35, %v9688_v63  ;;  %v2373_v12 = vadd.f32 %v2341_v37, %v12273_v4  ;;  %v12297_v10 = vld [vmem:[#allocation21_spill] sm:$0xff] }
 0x21d   : > { %v2248_v59 = vrot.slane %v12296_v30, 2  ;;  %v3054_v57 = vadd.f32 %v9560_v31, %v2864_v32  ;;  %v3056_v20 = vadd.f32 %v3007_v54, %v9726_v34  ;;  %v3057_v9 = vadd.f32 %v3008_v45, %v9730_v3  ;;  %v6559_v31 = vld [vmem:[%s12076_s4 + $0x120] sm:$0xf]  ;;  %v7414_v54 = vld [vmem:[%s12076_s4 + $0x134] sm:$0xf0] }
 0x21e   : > { %v3058_v30 = vadd.f32 %v3009_v48, %v9744_v0  ;;  %v3059_v46 = vadd.f32 %v3010_v53, %v9758_v11  ;;  %v6920_v13 = vor.u32 %v7504_v55, %v6919_v58  ;;  %v7112_v47 = vor.u32 %v7552_v14, %v7111_v23  ;;  %v6751_v32 = vld [vmem:[%s12076_s4 + $0x2a0] sm:$0xf]  ;;  %v7462_v45 = vld [vmem:[%s12076_s4 + $0x2b4] sm:$0xf0] }
 0x21f   : > { %v2406_v26 = vadd.f32 %v2374_v1, %v12293_v25  ;;  %v3096_v50 = vmul.f32 %v12297_v10, %v3054_v57  ;;  %v3098_v35 = vmul.f32 %v9453_v2, %v3056_v20  ;;  %v3099_v4 = vmul.f32 %v12298_v5, %v3057_v9  ;;  %v12299_v23 = vld [vmem:[#allocation7_spill] sm:$0xff] }
 0x220   : > { %v3372_v37 = vrot.slane %v3319_v49, 7  ;;  %v3100_v1 = vmul.f32 %v12297_v10, %v3058_v30  ;;  %v3101_v58 = vmul.f32 %v9450_v61, %v3059_v46  ;;  %4933 = vmatpush.bf16.msra.mxu2 %v6920_v13  ;;  %4961 = vmatpush.bf16.msra.mxu3 %v7112_v47  ;;  %v6560_v55 = vor.u32 %v7414_v54, %v6559_v31  ;;  %v6895_v49 = vld [vmem:[%s12076_s4 + $0x3c0] sm:$0xf]  ;;  %v7498_v46 = vld [vmem:[%s12076_s4 + $0x3d4] sm:$0xf0] }
 0x221   : > { %v3138_v14 = vadd.f32 %v12299_v23, %v3096_v50  ;;  %v3140_v48 = vadd.f32 %v9471_v17, %v3098_v35  ;;  %v3141_v53 = vadd.f32 %v9359_v22, %v3099_v4  ;;  %v6752_v57 = vor.u32 %v7462_v45, %v6751_v32  ;;  %v12300_v30 = vld [vmem:[#allocation35_spill] sm:$0xff] }
 0x222   : > { %v2250_v47 = vsel %vm7954_vm8, %v2248_v59, %v2249_v39  ;;  %v2405_v13 = vadd.f32 %v2373_v12, %v12294_v15  ;;  %v3142_v20 = vadd.f32 %v12299_v23, %v3100_v1  ;;  %v3143_v9 = vadd.f32 %v9466_v43, %v3101_v58  ;;  %4876 = vmatpush.bf16.msrb.mxu0 %v6560_v55  ;;  %v12304_v58 = vld [vmem:[#allocation9_spill] sm:$0xff] }
 0x223   : > { %v12301_v50 = vrot.slane %v12300_v30, 7  ;;  %v3170_v4 = vmax.f32 %v3138_v14, 0.0  ;;  %v3172_v31 = vmax.f32 %v3140_v48, 0.0  ;;  %v3173_v54 = vmax.f32 %v3141_v53, 0.0  ;;  %4904 = vmatpush.bf16.msrb.mxu1 %v6752_v57  ;;  %v12306_v48 = vld [vmem:[#allocation40_spill] sm:$0xff] }
 0x224   : > { %v2419_v32 = vadd.f32 %v2387_v7, %v9517_v38  ;;  %v12302_v39 = vrot.slane %v9684_v56, 7  ;;  %v3174_v59 = vmax.f32 %v3142_v20, 0.0  ;;  %v6896_v12 = vor.u32 %v7498_v46, %v6895_v49  ;;  %v9839_v20 = vpop.f32.mrf.mxu3 }
 0x225   : > { %v2253_v35 = vsel %vm7954_vm8, %v2251_v8, %v12301_v50  ;;  %v9812_v1 = vsel %vm760_vm2, %v9563_v41, %v3372_v37  ;;  %v2423_v8 = vadd.f32 %v9715_v36, %v9572_v51  ;;  %v2178_v55 = vadd.f32 %v12293_v25, %v12304_v58  ;;  %3240 = vst [vmem:[#allocation1 + $0x21] ss:$4 sm:$0xff] %v3170_v4  ;;  %v12313_v4 = vld [vmem:[#allocation39_spill] sm:$0xff] }
 0x226   : > { %v2436_v15 = vsel %vm7954_vm8, %v9700_v60, %v12302_v39  ;;  %12303 = vst [vmem:[#allocation6_spill] sm:$0xff] %v9812_v1  ;;  %v3175_v45 = vmax.f32 %v3143_v9, 0.0  ;;  %v9820_v7 = vsel %vm3401_vm9, %v9563_v41, %v3372_v37  ;;  %v2454_v14 = vadd.f32 %v2405_v13, %v2250_v47  ;;  %4934 = vmatpush.bf16.msra.mxu2 %v6896_v12  ;;  %v12312_v9 = vld [vmem:[#allocation41_spill] sm:$0xff] }
 0x227   : > { %12305 = vst [vmem:[#allocation38_spill] sm:$0xff] %v9820_v7  ;;  %v2455_v60 = vadd.f32 %v2406_v26, %v2253_v35  ;;  %v2262_v53 = vrot.slane %v12306_v48, 7  ;;  %v9825_v57 = vsel %vm761_vm3, %v9563_v41, %v3372_v37  ;;  %v9829_v51 = vsel %vm3403_vm10, %v9563_v41, %v3372_v37  ;;  %v12311_v26 = vld [vmem:[#allocation14_spill] sm:$0xff]  ;;  %v12318_v12 = vld [vmem:[#allocation29_spill] sm:$0xff] }
 0x228   : > { %3244 = vst [vmem:[#allocation1 + $0x23] ss:$4 sm:$0xff] %v3172_v31  ;;  %v9831_v36 = vadd.f32 %v2436_v15, %v2423_v8  ;;  %v2345_v49 = vadd.f32 %v2250_v47, %v9721_v42  ;;  %v9835_v46 = vadd.f32 %v2419_v32, %v9665_v29  ;;  %v2812_v13 = vadd.f32 %v9637_v52, %v12311_v26  ;;  %v12317_v15 = vld [vmem:[#allocation20_spill] sm:$0xff]  ;;  %v12319_v26 = vld [vmem:[#allocation18_spill] sm:$0xff] }
 0x229   : > { %12307 = vst [vmem:[#allocation26_spill] sm:$0xff] %v9825_v57  ;;  %v9842_v50 = vrot.slane %v12312_v9, 2  ;;  %v12314_v41 = vrot.slane %v12313_v4, 7  ;;  %v2264_v31 = vrot.slane %v2262_v53, 2  ;;  %v2265_v42 = vrot.slane %v12312_v9, 7 }
 0x22a   : > { %12308 = vst [vmem:[#allocation17_spill] sm:$0xff] %v9829_v51  ;;  %v12315_v47 = vrot.slane %v9307_v24, 7  ;;  %v2486_v52 = vadd.f32 %v2454_v14, %v12293_v25  ;;  %v2487_v39 = vadd.f32 %v2455_v60, %v12300_v30  ;;  %v2182_v8 = vadd.f32 %v12306_v48, %v12318_v12 }
 0x22b   : > { %12309 = vst [vmem:[#allocation34_spill] sm:$0xff] %v9831_v36  ;;  %v2261_v37 = vrot.slane %v12314_v41, 2  ;;  %v2346_v58 = vadd.f32 %v2253_v35, %v2178_v55  ;;  %v9859_v41 = vadd.f32 %v9704_v28, %v12319_v26  ;;  %v2979_v60 = vadd.f32 %v9726_v34, %v9642_v62  ;;  %v12328_v36 = vld [vmem:[#allocation42_spill] sm:$0xff] }
 0x22c   : > { %3246 = vst [vmem:[#allocation1] ss:$4 sm:$0xff] %v3173_v54  ;;  %v2274_v29 = vrot.slane %v12315_v47, 2  ;;  %v12316_v54 = vld [vmem:[#allocation16_spill] sm:$0xff]  ;;  %v2813_v21 = vadd.f32 %v9669_v19, %v2486_v52  ;;  %v9864_v14 = vadd.f32 %v9688_v63, %v2487_v39  ;;  %v2266_v55 = vsel %vm7954_vm8, %v2264_v31, %v2265_v42 }
 0x22d   : > { %12310 = vst [vmem:[#allocation31_spill] sm:$0xff] %v9835_v46  ;;  %v2275_v32 = vrot.slane %v12316_v54, 7  ;;  %v2267_v63 = vrot.slane %v2265_v42, 2  ;;  %v2350_v47 = vadd.f32 %v2266_v55, %v2182_v8  ;;  %v2980_v62 = vadd.f32 %v9730_v3, %v2812_v13 }
 0x22e   : > { %3247 = vst [vmem:[#allocation1 + $0x1] ss:$4 sm:$0xff] %v3174_v59  ;;  %v2181_v59 = vadd.f32 %v12313_v4, %v12317_v15  ;;  %v12320_v15 = vld [vmem:[#allocation36_spill] sm:$0xff]  ;;  %v12323_v31 = vrot.slane %v9704_v28, 7  ;;  %v9887_v1 = vadd.f32 %v9744_v0, %v2813_v21  ;;  %v9894_v3 = vrot.slane %v9839_v20, 2 }
 0x22f   : > { %3248 = vst [vmem:[#allocation1 + $0x2] ss:$4 sm:$0xff] %v3175_v45  ;;  %v2377_v45 = vadd.f32 %v2345_v49, %v12293_v25  ;;  %v2185_v12 = vadd.f32 %v9307_v24, %v12320_v15  ;;  %v3245_v35 = vld.sshfl [vmem:[#allocation1 + $0x20] sm:$0xff pattern:$0x73625140]  ;;  %v2263_v25 = vsel %vm7954_vm8, %v2261_v37, %v2262_v53  ;;  %v2268_v49 = vrot.slane %v9842_v50, 7 }
 0x230   : > { %v2276_v52 = vsel %vm7954_vm8, %v2274_v29, %v2275_v32  ;;  %v2277_v39 = vrot.slane %v2275_v32, 2  ;;  %v2349_v26 = vadd.f32 %v2263_v25, %v2181_v59  ;;  %v9878_v34 = vpack.c.bf16 %v3245_v35, %v3245_v35  ;;  %v12321_v15 = vld [vmem:[#allocation33_spill] sm:$0xff]  ;;  %v12324_v59 = vld [vmem:[#allocation15_spill] sm:$0xff] }
 0x231   : > { %v2183_v6 = vadd.f32 %v12312_v9, %v12321_v15  ;;  %v12322_v53 = vld [vmem:[#allocation37_spill] sm:$0xff]  ;;  %v2881_v51 = vrot.slane %v12323_v31, 2  ;;  %v2353_v42 = vadd.f32 %v2276_v52, %v2185_v12  ;;  %v2378_v29 = vadd.f32 %v2346_v58, %v12300_v30  ;;  %v2710_v58 = vpop.f32.mrf.mxu3 }
 0x232   : > { %v2186_v37 = vadd.f32 %v12316_v54, %v12322_v53  ;;  %v9891_v32 = vadd.f32 %v2979_v60, %v9704_v28  ;;  %v9897_v13 = vadd.f32 %v2980_v62, %v9839_v20  ;;  %v2380_v8 = vadd.f32 %v12324_v59, %v12313_v4  ;;  %v12327_v59 = vld [vmem:[#allocation43_spill] sm:$0xff] }
 0x233   : > { %v2269_v35 = vsel %vm7954_vm8, %v2267_v63, %v2268_v49  ;;  %v12325_v21 = vrot.slane %v9489_v33, 7  ;;  %v2381_v28 = vadd.f32 %v2349_v26, %v12306_v48  ;;  %v2382_v30 = vadd.f32 %v2350_v47, %v12312_v9 }
 0x234   : > { %v3300_v60 = vunpack.c.l.b16 %v9878_v34  ;;  %v2351_v12 = vadd.f32 %v2269_v35, %v2183_v6  ;;  %v2409_v15 = vadd.f32 %v2377_v45, %v12313_v4  ;;  %v9912_v53 = vrot.slane %v9839_v20, 4 }
 0x235   : > { %v2279_v0 = vsel %vm7954_vm8, %v2277_v39, %v12325_v21  ;;  %v2385_v49 = vadd.f32 %v2353_v42, %v12316_v54  ;;  %v2410_v63 = vadd.f32 %v2378_v29, %v12306_v48  ;;  %v12326_v39 = vld [vmem:[#allocation22_spill] sm:$0xff]  ;;  %v9919_v26 = vrot.slane %v9839_v20, 6  ;;  %v12329_v42 = vld [vmem:[#allocation23_spill] sm:$0xff] }
 0x236   : > { %v2354_v62 = vadd.f32 %v2279_v0, %v2186_v37  ;;  %v2411_v31 = vadd.f32 %v12326_v39, %v12312_v9  ;;  %v6393_v47 = vrot.slane %v9839_v20, 9  ;;  %v2412_v6 = vadd.f32 %v2380_v8, %v12327_v59 }
 0x237   : > { %v9923_v37 = vrot.slane %v2710_v58, 4  ;;  %v2413_v45 = vadd.f32 %v2381_v28, %v9307_v24  ;;  %v2414_v21 = vadd.f32 %v2382_v30, %v12316_v54  ;;  %v2457_v56 = vadd.f32 %v12329_v42, %v12328_v36  ;;  %v12330_v30 = vld [vmem:[#allocation25_spill] sm:$0xff] }
 0x238   : > { %v2886_v29 = vrot.slane %v9894_v3, 7  ;;  %v3307_v46 = vpack.c.b16 %v3300_v60, %v3300_v60  ;;  %v9931_v39 = vadd.f32 %v2351_v12, %v9842_v50  ;;  %v9934_v40 = vadd.f32 %v2354_v62, %v9489_v33 }
 0x239   : > { %v2458_v38 = vadd.f32 %v2409_v15, %v2263_v25  ;;  %v9937_v8 = vadd.f32 %v2385_v49, %v9461_v44  ;;  %v2459_v59 = vadd.f32 %v2410_v63, %v2266_v55  ;;  %v2460_v28 = vadd.f32 %v2411_v31, %v2269_v35 }
 0x23a   : > { %v9939_v57 = vrot.slane %v2710_v58, 2  ;;  %v9942_v7 = vadd.f32 %v2412_v6, %v12330_v30  ;;  %v2888_v36 = vrot.slane %v2886_v29, 2  ;;  %v2889_v60 = vrot.slane %v9912_v53, 7 }
 0x23b   : > { %v2899_v12 = vrot.slane %v9923_v37, 7  ;;  %v9947_v42 = vrot.slane %v9878_v34, 6  ;;  %v2462_v62 = vadd.f32 %v2413_v45, %v2276_v52  ;;  %v9949_v25 = vadd.f32 %v2414_v21, %v2279_v0 }
 0x23c   : > { %v2489_v44 = vadd.f32 %v2457_v56, %v12313_v4  ;;  %v3323_v55 = vshll.u32 %v3307_v46, 16  ;;  %v2490_v35 = vadd.f32 %v2458_v38, %v12306_v48  ;;  %v9953_v15 = vrot.slane %v2710_v58, 6 }
 0x23d   : > { %v2892_v49 = vrot.slane %v9919_v26, 7  ;;  %v9957_v63 = vadd.f32 %v2459_v59, %v12312_v9  ;;  %v12331_v31 = vrot.slane %v9669_v19, 13  ;;  %v2895_v52 = vrot.slane %v2710_v58, 7 }
 0x23e   : > { %v6394_v0 = vrot.slane %v9939_v57, 9  ;;  %v2887_v56 = vsel %vm7954_vm8, %v6393_v47, %v2886_v29  ;;  %v2890_v38 = vsel %vm7954_vm8, %v2888_v36, %v2889_v60  ;;  %v2891_v48 = vrot.slane %v2889_v60, 2 }
 0x23f   : > { %v2883_v6 = vsel %vm7954_vm8, %v2881_v51, %v12331_v31  ;;  %v2901_v4 = vrot.slane %v2899_v12, 2  ;;  %v9969_v45 = vadd.f32 %v2460_v28, %v9842_v50  ;;  %v2816_v9 = vadd.f32 %v9839_v20, %v2489_v44 }
 0x240   : > { %v2817_v19 = vadd.f32 %v9894_v3, %v2490_v35  ;;  %v2982_v51 = vadd.f32 %v9758_v11, %v9864_v14  ;;  %v3325_v58 = vrot.slane %v3323_v55, 1  ;;  %v9976_v21 = vadd.f32 %v2462_v62, %v12316_v54  ;;  %v10004_v62 = vpop.f32.mrf.mxu3 }
 0x241   : > { %v2894_v47 = vrot.slane %v2892_v49, 2  ;;  %v2902_v29 = vrot.slane %v9953_v15, 7  ;;  %v9981_v59 = vsel %vm7954_vm8, %v6394_v0, %v2899_v12  ;;  %v2983_v50 = vadd.f32 %v2883_v6, %v9859_v41 }
 0x242   : > { %v2984_v28 = vadd.f32 %v2887_v56, %v2816_v9  ;;  %v2985_v20 = vadd.f32 %v2890_v38, %v2817_v19  ;;  %v9986_v30 = vsel %vm7954_vm8, %v2891_v48, %v2892_v49  ;;  %v3013_v14 = vadd.f32 %v9887_v1, %v9894_v3 }
 0x243   : > { %v9990_v11 = vsel %vm7954_vm8, %v2894_v47, %v2895_v52  ;;  %v9996_v54 = vsel %vm7954_vm8, %v2901_v4, %v2902_v29  ;;  %v3014_v41 = vadd.f32 %v2982_v51, %v9912_v53  ;;  %v3015_v36 = vadd.f32 %v2983_v50, %v9919_v26  ;;  %v6727_v50 = vld [vmem:[%s12076_s4 + $0x270] sm:$0xf] }
 0x244   : > { %v3016_v60 = vadd.f32 %v2984_v28, %v9939_v57  ;;  %v3017_v12 = vadd.f32 %v2985_v20, %v9923_v37  ;;  %v3321_v44 = vshrl.u32 %v3307_v46, 16  ;;  %v3060_v55 = vadd.f32 %v9891_v32, %v2883_v6  ;;  %v6535_v32 = vld [vmem:[%s12076_s4 + $0xf0] sm:$0xf]  ;;  %v7456_v28 = vld [vmem:[%s12076_s4 + $0x284] sm:$0xf0] }
 0x245   : > { %v3061_v35 = vadd.f32 %v9897_v13, %v2887_v56  ;;  %v3062_v49 = vadd.f32 %v3013_v14, %v2890_v38  ;;  %v3063_v31 = vadd.f32 %v3014_v41, %v9986_v30  ;;  %v3064_v1 = vadd.f32 %v3015_v36, %v9990_v11  ;;  %v7408_v13 = vld [vmem:[%s12076_s4 + $0x104] sm:$0xf0]  ;;  %v7087_v41 = vld [vmem:[%s12076_s4 + $0x540] sm:$0xf]  ;;  %v7546_v36 = vld [vmem:[%s12076_s4 + $0x554] sm:$0xf0] }
 0x246   : > { %v3065_v3 = vadd.f32 %v3016_v60, %v9981_v59  ;;  %v3066_v52 = vadd.f32 %v3017_v12, %v9996_v54  ;;  %v10012_v0 = vor.u32 %v3325_v58, %v3321_v44  ;;  %v3102_v48 = vmul.f32 %v9453_v2, %v3060_v55  ;;  %v6511_v60 = vld [vmem:[%s12076_s4 + $0xc0] sm:$0xf] }
 0x247   : > { %v3103_v4 = vmul.f32 %v12298_v5, %v3061_v35  ;;  %v3104_v46 = vmul.f32 %v12297_v10, %v3062_v49  ;;  %v3105_v6 = vmul.f32 %v9450_v61, %v3063_v31  ;;  %v3106_v56 = vmul.f32 %v9453_v2, %v3064_v1 }
 0x248   : > { %v3107_v38 = vmul.f32 %v12298_v5, %v3065_v3  ;;  %v2415_v9 = vadd.f32 %v9931_v39, %v9489_v33  ;;  %v3144_v19 = vadd.f32 %v9471_v17, %v3102_v48  ;;  %v6536_v47 = vor.u32 %v7408_v13, %v6535_v32  ;;  %v7450_v48 = vld [vmem:[%s12076_s4 + $0x254] sm:$0xf0] }
 0x249   : > { %v3145_v51 = vadd.f32 %v9359_v22, %v3103_v4  ;;  %v3146_v58 = vadd.f32 %v12299_v23, %v3104_v46  ;;  %v3108_v5 = vmul.f32 %v12297_v10, %v3066_v52  ;;  %v3147_v20 = vadd.f32 %v9466_v43, %v3105_v6  ;;  %v6703_v52 = vld [vmem:[%s12076_s4 + $0x240] sm:$0xf]  ;;  %v10083_v6 = vpop.f32.mrf.mxu3 }
 0x24a   : > { %v3148_v39 = vadd.f32 %v9471_v17, %v3106_v56  ;;  %v10041_v14 = vadd.f32 %v9359_v22, %v3107_v38  ;;  %v3176_v12 = vmax.f32 %v3144_v19, 0.0  ;;  %4877 = vmatpush.bf16.msrb.mxu0 %v6536_v47  ;;  %v6728_v35 = vor.u32 %v7456_v28, %v6727_v50  ;;  %v7402_v22 = vld [vmem:[%s12076_s4 + $0xd4] sm:$0xf0] }
 0x24b   : > { %v3177_v44 = vmax.f32 %v3145_v51, 0.0  ;;  %v3178_v55 = vmax.f32 %v3146_v58, 0.0  ;;  %v10056_v49 = vrot.slane %v10012_v0, 5  ;;  %v2495_v31 = vadd.f32 %v9949_v25, %v9489_v33  ;;  %v7063_v51 = vld [vmem:[%s12076_s4 + $0x510] sm:$0xf] }
 0x24c   : > { %v2818_v1 = vadd.f32 %v9912_v53, %v9957_v63  ;;  %v3179_v3 = vmax.f32 %v3147_v20, 0.0  ;;  %v2819_v4 = vadd.f32 %v9919_v26, %v9969_v45  ;;  %v3180_v46 = vmax.f32 %v3148_v39, 0.0  ;;  %3249 = vst [vmem:[#allocation1 + $0x3] ss:$4 sm:$0xff] %v3176_v12  ;;  %4905 = vmatpush.bf16.msrb.mxu1 %v6728_v35  ;;  %v6871_v53 = vld [vmem:[%s12076_s4 + $0x390] sm:$0xf] }
 0x24d   : > { %v7088_v32 = vor.u32 %v7546_v36, %v7087_v41  ;;  %v10071_v33 = vrot.slane %v10004_v62, 6  ;;  %v2904_v25 = vrot.slane %v2902_v29, 2  ;;  %v3150_v63 = vadd.f32 %v12299_v23, %v3108_v5  ;;  %3251 = vst [vmem:[#allocation1 + $0x20] ss:$4 sm:$0xff] %v3177_v44  ;;  %v7492_v45 = vld [vmem:[%s12076_s4 + $0x3a4] sm:$0xf0] }
 0x24e   : > { %v2905_v13 = vrot.slane %v10004_v62, 7  ;;  %v6512_v26 = vor.u32 %v7402_v22, %v6511_v60  ;;  %v2986_v56 = vadd.f32 %v9986_v30, %v2818_v1  ;;  %v2987_v38 = vadd.f32 %v9990_v11, %v2819_v4  ;;  %3252 = vst [vmem:[#allocation1 + $0x21] ss:$4 sm:$0xff] %v3178_v55  ;;  %v7540_v30 = vld [vmem:[%s12076_s4 + $0x524] sm:$0xf0] }
 0x24f   : > { %v3181_v19 = vmax.f32 %v10041_v14, 0.0  ;;  %4962 = vmatpush.bf16.msra.mxu3 %v7088_v32  ;;  %v2464_v29 = vadd.f32 %v2415_v9, %v9696_v27  ;;  %3253 = vst [vmem:[#allocation1 + $0x22] ss:$4 sm:$0xff] %v3179_v3  ;;  %v6395_v47 = vrot.slane %v10004_v62, 9  ;;  %v6704_v50 = vor.u32 %v7450_v48, %v6703_v52 }
 0x250   : > { %v2907_v58 = vrot.slane %v2905_v13, 2  ;;  %4878 = vmatpush.bf16.msrb.mxu0 %v6512_v26  ;;  %v6872_v28 = vor.u32 %v7492_v45, %v6871_v53  ;;  %3254 = vst [vmem:[#allocation1 + $0x23] ss:$4 sm:$0xff] %v3180_v46  ;;  %v2912_v11 = vrot.slane %v10071_v33, 7  ;;  %v3019_v27 = vadd.f32 %v2987_v38, %v10004_v62 }
 0x251   : > { %v7064_v9 = vor.u32 %v7540_v30, %v7063_v51  ;;  %v10099_v5 = vrot.slane %v10083_v6, 2  ;;  %v2493_v20 = vadd.f32 %v9942_v7, %v9307_v24  ;;  %v2821_v39 = vadd.f32 %v9923_v37, %v9976_v21  ;;  %4906 = vmatpush.bf16.msrb.mxu1 %v6704_v50  ;;  %v12333_v50 = vld [vmem:[#allocation28_spill] sm:$0xff] }
 0x252   : > { %v3182_v14 = vmax.f32 %v3150_v63, 0.0  ;;  %v2909_v41 = vsel %vm7954_vm8, %v2907_v58, %v6395_v47  ;;  %4935 = vmatpush.bf16.msra.mxu2 %v6872_v28  ;;  %v3404_v36 = vsel %vm3403_vm10, %v9947_v42, %v10056_v49  ;;  %v2822_v60 = vadd.f32 %v9953_v15, %v2495_v31 }
 0x253   : > { %v3068_v12 = vadd.f32 %v3019_v27, %v2909_v41  ;;  %4963 = vmatpush.bf16.msra.mxu3 %v7064_v9  ;;  %v2906_v24 = vsel %vm7954_vm8, %v2904_v25, %v2905_v13  ;;  %v2989_v7 = vadd.f32 %v9996_v54, %v2821_v39  ;;  %v3250_v37 = vld.sshfl [vmem:[#allocation1] sm:$0xff pattern:$0x73625140]  ;;  %v2496_v21 = vadd.f32 %v2464_v29, %v9370_v16 }
 0x254   : > { %v2915_v44 = vrot.slane %v10083_v6, 7  ;;  %v2918_v55 = vrot.slane %v10099_v5, 7  ;;  %v3018_v35 = vadd.f32 %v2986_v56, %v9953_v15  ;;  %3256 = vst [vmem:[#allocation1] ss:$4 sm:$0xff] %v3181_v19  ;;  %v10118_v22 = vpack.c.bf16 %v3250_v37, %v3250_v37  ;;  %v12332_v56 = vld [vmem:[#allocation10_spill] sm:$0xff] }
 0x255   : > { %v3110_v31 = vmul.f32 %v9453_v2, %v3068_v12  ;;  %v2914_v1 = vrot.slane %v2912_v11, 2  ;;  %3257 = vst [vmem:[#allocation1 + $0x1] ss:$4 sm:$0xff] %v3182_v14  ;;  %v2823_v54 = vadd.f32 %v10004_v62, %v2496_v21  ;;  %v2990_v52 = vadd.f32 %v2906_v24, %v2822_v60  ;;  %v10160_v60 = vpop.f32.mrf.mxu3  ;;  %v12334_v12 = vld [vmem:[#allocation38_spill] sm:$0xff] }
 0x256   : > { %v2917_v3 = vrot.slane %v2915_v44, 2  ;;  %v2920_v16 = vrot.slane %v2918_v55, 2  ;;  %v3301_v48 = vunpack.c.l.b16 %v10118_v22  ;;  %v6397_v46 = vrot.slane %v10083_v6, 11 }
 0x257   : > { %v3152_v4 = vadd.f32 %v9471_v17, %v3110_v31  ;;  %v10128_v15 = vsel %vm7954_vm8, %v2914_v1, %v2915_v44  ;;  %v3255_v32 = vld.sshfl [vmem:[#allocation1 + $0x20] sm:$0xff pattern:$0x73625140]  ;;  %v2991_v53 = vadd.f32 %v2909_v41, %v2823_v54  ;;  %v3021_v63 = vadd.f32 %v2989_v7, %v10071_v33  ;;  %v6487_v54 = vld [vmem:[%s12076_s4 + $0x90] sm:$0xf] }
 0x258   : > { %v10133_v25 = vsel %vm7954_vm8, %v2917_v3, %v2918_v55  ;;  %v3022_v13 = vadd.f32 %v2990_v52, %v10083_v6  ;;  %v3410_v26 = vsel %vm763_vm5, %v9947_v42, %v10056_v49  ;;  %v2418_v38 = vadd.f32 %v9934_v40, %v12332_v56  ;;  %v12336_v7 = vld [vmem:[#allocation19_spill] sm:$0xff]  ;;  %v7396_v3 = vld [vmem:[%s12076_s4 + $0xa4] sm:$0xf0] }
 0x259   : > { %v3184_v45 = vmax.f32 %v3152_v4, 0.0  ;;  %v10144_v19 = vsel %vm7954_vm8, %v2920_v16, %v6397_v46  ;;  %v3023_v29 = vadd.f32 %v2991_v53, %v10099_v5  ;;  %v3067_v51 = vadd.f32 %v3018_v35, %v2906_v24 }
 0x25a   : > { %v3070_v58 = vadd.f32 %v3021_v63, %v10128_v15  ;;  %v3071_v47 = vadd.f32 %v3022_v13, %v10133_v25  ;;  %v2466_v28 = vadd.f32 %v9937_v8, %v12333_v50  ;;  %v2820_v30 = vadd.f32 %v9939_v57, %v2493_v20  ;;  %v12335_v57 = vld [vmem:[#allocation26_spill] sm:$0xff]  ;;  %v12337_v13 = vld [vmem:[#allocation11_spill] sm:$0xff]  ;;  %v12340_v50 = vld [vmem:[#allocation12_spill] sm:$0xff] }
 0x25b   : > { %v10152_v27 = vpack.c.bf16 %v3255_v32, %v3255_v32  ;;  %v10154_v40 = vpack.c.b16 %v3301_v48, %v3301_v48  ;;  %3259 = vst [vmem:[#allocation1 + $0x3] ss:$4 sm:$0xff] %v3184_v45  ;;  %v3072_v9 = vadd.f32 %v3023_v29, %v10144_v19  ;;  %v3109_v39 = vmul.f32 %v9450_v61, %v3067_v51  ;;  %v6679_v29 = vld [vmem:[%s12076_s4 + $0x210] sm:$0xf]  ;;  %v12338_v51 = vld [vmem:[#allocation8_spill] sm:$0xff] }
 0x25c   : > { %v3112_v14 = vmul.f32 %v12297_v10, %v3070_v58  ;;  %v3113_v41 = vmul.f32 %v9450_v61, %v3071_v47  ;;  %v10164_v8 = vsel %vm3405_vm11, %v12334_v12, %v3404_v36  ;;  %v10168_v20 = vsel %vm3411_vm12, %v12335_v57, %v3410_v26  ;;  %v12339_v58 = vld [vmem:[#allocation31_spill] sm:$0xff] }
 0x25d   : > { %v10171_v24 = vrot.slane %v10004_v62, 4  ;;  %v2467_v37 = vadd.f32 %v2418_v38, %v12336_v7  ;;  %v3114_v21 = vmul.f32 %v9453_v2, %v3072_v9  ;;  %v3151_v44 = vadd.f32 %v9466_v43, %v3109_v39  ;;  %v12341_v9 = vld [vmem:[#allocation34_spill] sm:$0xff]  ;;  %v6847_v39 = vld [vmem:[%s12076_s4 + $0x360] sm:$0xf] }
 0x25e   : > { %v3154_v55 = vadd.f32 %v12299_v23, %v3112_v14  ;;  %v3155_v35 = vadd.f32 %v9466_v43, %v3113_v41  ;;  %v10179_v36 = vrot.slane %v10012_v0, 7  ;;  %v3398_v31 = vsel %vm761_vm3, %v9947_v42, %v10056_v49 }
 0x25f   : > { %v3302_v62 = vunpack.c.l.b16 %v10152_v27  ;;  %v3330_v1 = vshll.u32 %v10154_v40, 16  ;;  %v3156_v16 = vadd.f32 %v9471_v17, %v3114_v21  ;;  %v3183_v0 = vmax.f32 %v3151_v44, 0.0 }
 0x260   : > { %v3186_v52 = vmax.f32 %v3154_v55, 0.0  ;;  %v3187_v48 = vmax.f32 %v3155_v35, 0.0  ;;  %v3408_v4 = vrot.slane %v10164_v8, 1  ;;  %v3414_v46 = vrot.slane %v10168_v20, 2  ;;  %v7039_v55 = vld [vmem:[%s12076_s4 + $0x4e0] sm:$0xf] }
 0x261   : > { %v3417_v32 = vsel %vm3416_vm13, %v9947_v42, %v10056_v49  ;;  %v6396_v53 = vrot.slane %v10171_v24, 9  ;;  %v2498_v63 = vadd.f32 %v2466_v28, %v12332_v56  ;;  %v2499_v26 = vadd.f32 %v2467_v37, %v12337_v13  ;;  %3258 = vst [vmem:[#allocation1 + $0x2] ss:$4 sm:$0xff] %v3183_v0  ;;  %v7444_v28 = vld [vmem:[%s12076_s4 + $0x224] sm:$0xf0] }
 0x262   : > { %v3188_v45 = vmax.f32 %v3156_v16, 0.0  ;;  %v6488_v38 = vor.u32 %v7396_v3, %v6487_v54  ;;  %v10206_v47 = vadd.f32 %v12339_v58, %v12338_v51  ;;  %v10210_v42 = vadd.f32 %v12341_v9, %v12340_v50  ;;  %3262 = vst [vmem:[#allocation1 + $0x21] ss:$4 sm:$0xff] %v3186_v52  ;;  %v12343_v37 = vld [vmem:[#allocation17_spill] sm:$0xff]  ;;  %v7534_v35 = vld [vmem:[%s12076_s4 + $0x4f4] sm:$0xf0]  ;;  %v10246_v3 = vpop.f32.mrf.mxu3 }
 0x263   : > { %v2988_v49 = vadd.f32 %v9981_v59, %v2820_v30  ;;  %v10213_v56 = vpack.c.b16 %v3302_v62, %v3302_v62  ;;  %v3332_v14 = vrot.slane %v3330_v1, 1  ;;  %v2825_v41 = vadd.f32 %v10071_v33, %v2498_v63  ;;  %3263 = vst [vmem:[#allocation1 + $0x22] ss:$4 sm:$0xff] %v3187_v48  ;;  %v7486_v59 = vld [vmem:[%s12076_s4 + $0x374] sm:$0xf0]  ;;  %v12346_v58 = vld [vmem:[#allocation44_spill] sm:$0xff] }
 0x264   : > { %v2826_v12 = vadd.f32 %v10083_v6, %v2499_v26  ;;  %v2925_v57 = vrot.slane %v10160_v60, 7  ;;  %v12342_v30 = vld [vmem:[#allocation6_spill] sm:$0xff]  ;;  %v10233_v21 = vsel %vm3418_vm14, %v12343_v37, %v3417_v32  ;;  %3264 = vst [vmem:[#allocation1 + $0x23] ss:$4 sm:$0xff] %v3188_v45  ;;  %4879 = vmatpush.bf16.msrb.mxu0 %v6488_v38  ;;  %v3328_v62 = vshrl.u32 %v10154_v40, 16 }
 0x265   : > { %v10229_v7 = vsel %vm594_vm0, %v12342_v30, %v3398_v31  ;;  %v3020_v44 = vadd.f32 %v2988_v49, %v10171_v24  ;;  %v2766_v31 = vrot.slane %v10083_v6, 6  ;;  %v2993_v1 = vadd.f32 %v10128_v15, %v2825_v41  ;;  %v12344_v45 = vld [vmem:[#allocation30_spill] sm:$0xff]  ;;  %v12347_v49 = vld [vmem:[#allocation32_spill] sm:$0xff] }
 0x266   : > { %v2994_v54 = vadd.f32 %v10133_v25, %v2826_v12  ;;  %v3337_v16 = vshll.u32 %v10213_v56, 16  ;;  %v2767_v0 = vrot.slane %v10160_v60, 2  ;;  %v10251_v52 = vrot.slane %v10160_v60, 4 }
 0x267   : > { %v6680_v48 = vor.u32 %v7444_v28, %v6679_v29  ;;  %v10253_v32 = vor.u32 %v3332_v14, %v3328_v62  ;;  %v2927_v63 = vrot.slane %v2925_v57, 2  ;;  %v6848_v40 = vor.u32 %v7486_v59, %v6847_v39  ;;  %v12345_v29 = vld [vmem:[#allocation27_spill] sm:$0xff] }
 0x268   : > { %v7040_v13 = vor.u32 %v7534_v35, %v7039_v55  ;;  %v3025_v6 = vadd.f32 %v2993_v1, %v10160_v60  ;;  %v2770_v15 = vrot.slane %v10246_v3, 2  ;;  %v2771_v25 = vrot.slane %v10246_v3, 4 }
 0x269   : > { %4907 = vmatpush.bf16.msrb.mxu1 %v6680_v48  ;;  %v2772_v26 = vrot.slane %v10246_v3, 6  ;;  %4936 = vmatpush.bf16.msra.mxu2 %v6848_v40  ;;  %v2824_v38 = vadd.f32 %v10171_v24, %v12344_v45  ;;  %v2828_v51 = vadd.f32 %v2766_v31, %v12345_v29  ;;  %v2829_v50 = vadd.f32 %v10160_v60, %v12346_v58  ;;  %v6463_v58 = vld [vmem:[%s12076_s4 + $0x60] sm:$0xf] }
 0x26a   : > { %4964 = vmatpush.bf16.msra.mxu3 %v7040_v13  ;;  %v6398_v9 = vrot.slane %v2766_v31, 9  ;;  %v2830_v28 = vadd.f32 %v2767_v0, %v12347_v49  ;;  %v2913_v39 = vsel %vm7954_vm8, %v6396_v53, %v2912_v11  ;;  %v2928_v14 = vrot.slane %v2767_v0, 7 }
 0x26b   : > { %v2931_v41 = vrot.slane %v10251_v52, 7  ;;  %v2992_v24 = vadd.f32 %v2913_v39, %v2824_v38  ;;  %v3026_v59 = vadd.f32 %v2994_v54, %v2767_v0  ;;  %v6400_v30 = vrot.slane %v10246_v3, 9 }
 0x26c   : > { %v2926_v12 = vsel %vm7954_vm8, %v6398_v9, %v2925_v57  ;;  %v2929_v37 = vsel %vm7954_vm8, %v2927_v63, %v2928_v14  ;;  %v2930_v55 = vrot.slane %v2928_v14, 2  ;;  %v3034_v62 = vrot.slane %v2770_v15, 7 }
 0x26d   : > { %v2996_v35 = vadd.f32 %v2926_v12, %v2828_v51  ;;  %v2997_v33 = vadd.f32 %v2929_v37, %v2829_v50  ;;  %v3024_v1 = vadd.f32 %v2992_v24, %v2766_v31  ;;  %v3037_v48 = vrot.slane %v2771_v25, 7  ;;  %v7390_v50 = vld [vmem:[%s12076_s4 + $0x74] sm:$0xf0] }
 0x26e   : > { %v10277_v11 = vrot.slane %v2772_v26, 7  ;;  %v2932_v53 = vsel %vm7954_vm8, %v2930_v55, %v2931_v41  ;;  %v3035_v54 = vsel %vm7954_vm8, %v6400_v30, %v3034_v62  ;;  %v3036_v0 = vrot.slane %v3034_v62, 2  ;;  %v7438_v24 = vld [vmem:[%s12076_s4 + $0x1f4] sm:$0xf0] }
 0x26f   : > { %v3028_v57 = vadd.f32 %v2996_v35, %v10246_v3  ;;  %v2998_v63 = vadd.f32 %v2932_v53, %v2830_v28  ;;  %v3029_v40 = vadd.f32 %v2997_v33, %v2770_v15  ;;  %v3039_v13 = vrot.slane %v3037_v48, 2  ;;  %v7660_v35 = vld [vmem:[%s12075_s3] ss:$0 sm:$0xff]  ;;  %v6823_v3 = vld [vmem:[%s12076_s4 + $0x330] sm:$0xf] }
 0x270   : > { %v3069_v31 = vadd.f32 %v3020_v44, %v2913_v39  ;;  %v3038_v45 = vsel %vm7954_vm8, %v3036_v0, %v3037_v48  ;;  %v3073_v38 = vadd.f32 %v3024_v1, %v2926_v12  ;;  %v3074_v29 = vadd.f32 %v3025_v6, %v2929_v37  ;;  %v7659_v6 = vld [vmem:[%s12074_s2] ss:$0 sm:$0xff]  ;;  %v2722_v0 = vpop.f32.mrf.mxu3 }
 0x271   : > { %v3075_v51 = vadd.f32 %v3026_v59, %v2932_v53  ;;  %v3030_v9 = vadd.f32 %v2998_v63, %v2771_v25  ;;  %v3041_v15 = vsel %vm7954_vm8, %v3039_v13, %v10277_v11  ;;  %v3077_v44 = vadd.f32 %v3035_v54, %v3028_v57  ;;  %v6655_v25 = vld [vmem:[%s12076_s4 + $0x1e0] sm:$0xf] }
 0x272   : > { %v3078_v49 = vadd.f32 %v3038_v45, %v3029_v40  ;;  %v3111_v28 = vmul.f32 %v7659_v6, %v3069_v31  ;;  %v3115_v39 = vmul.f32 %v7659_v6, %v3073_v38  ;;  %v3116_v14 = vmul.f32 %v12297_v10, %v3074_v29  ;;  %v3260_v40 = vld.sshfl [vmem:[#allocation1] sm:$0xff pattern:$0x73625140] }
 0x273   : > { %v3117_v12 = vmul.f32 %v9450_v61, %v3075_v51  ;;  %v3079_v59 = vadd.f32 %v3041_v15, %v3030_v9  ;;  %v3119_v30 = vmul.f32 %v7659_v6, %v3077_v44  ;;  %v6464_v55 = vor.u32 %v7390_v50, %v6463_v58 }
 0x274   : > { %v3120_v37 = vmul.f32 %v12297_v10, %v3078_v49  ;;  %v3153_v62 = vadd.f32 %v7660_v35, %v3111_v28  ;;  %v3157_v33 = vadd.f32 %v7660_v35, %v3115_v39  ;;  %v3158_v1 = vadd.f32 %v12299_v23, %v3116_v14  ;;  %v12349_v49 = vld [vmem:[#allocation24_spill] sm:$0xff] }
 0x275   : > { %v3159_v48 = vadd.f32 %v9466_v43, %v3117_v12  ;;  %v10317_v53 = vsel %vm760_vm2, %v9878_v34, %v10179_v36  ;;  %v3339_v57 = vrot.slane %v3337_v16, 1  ;;  %v3121_v10 = vmul.f32 %v9450_v61, %v3079_v59  ;;  %4880 = vmatpush.bf16.msrb.mxu0 %v6464_v55 }
 0x276   : > { %v6656_v54 = vor.u32 %v7438_v24, %v6655_v25  ;;  %v2827_v63 = vadd.f32 %v10099_v5, %v10206_v47  ;;  %v3185_v13 = vmax.f32 %v3153_v62, 0.0  ;;  %v3189_v31 = vmax.f32 %v3157_v33, 0.0 }
 0x277   : > { %v3190_v45 = vmax.f32 %v3158_v1, 0.0  ;;  %v3377_v38 = vrot.slane %v10253_v32, 5  ;;  %v6399_v29 = vrot.slane %v10160_v60, 13  ;;  %v3161_v51 = vadd.f32 %v7660_v35, %v3119_v30  ;;  %v12348_v60 = vld [vmem:[#allocation5_spill] sm:$0xff] }
 0x278   : > { %v3191_v58 = vmax.f32 %v3159_v48, 0.0  ;;  %4908 = vmatpush.bf16.msrb.mxu1 %v6656_v54  ;;  %v3162_v16 = vadd.f32 %v12299_v23, %v3120_v37  ;;  %3261 = vst [vmem:[#allocation1 + $0x20] ss:$4 sm:$0xff] %v3185_v13  ;;  %v2933_v61 = vrot.slane %v2931_v41, 2  ;;  %v2995_v50 = vadd.f32 %v10144_v19, %v2827_v63  ;;  %v7480_v54 = vld [vmem:[%s12076_s4 + $0x344] sm:$0xf0] }
 0x279   : > { %v3043_v5 = vrot.slane %v2722_v0, 7  ;;  %v3163_v47 = vadd.f32 %v9466_v43, %v3121_v10  ;;  %3266 = vst [vmem:[#allocation1] ss:$4 sm:$0xff] %v3189_v31  ;;  %v2831_v9 = vadd.f32 %v10251_v52, %v10210_v42  ;;  %v10333_v15 = vpack.c.bf16 %v3260_v40, %v3260_v40  ;;  %v7015_v0 = vld [vmem:[%s12076_s4 + $0x4b0] sm:$0xf] }
 0x27a   : > { %v2018_v44 = vpack.c.bf16 %v12348_v60, %v12348_v60  ;;  %3267 = vst [vmem:[#allocation1 + $0x1] ss:$4 sm:$0xff] %v3190_v45  ;;  %v2935_v23 = vsel %vm7954_vm8, %v2933_v61, %v6399_v29  ;;  %v3027_v41 = vadd.f32 %v2995_v50, %v10251_v52  ;;  %v3042_v19 = vrot.slane %v10277_v11, 2  ;;  %v7528_v45 = vld [vmem:[%s12076_s4 + $0x4c4] sm:$0xf0] }
 0x27b   : > { %v2664_v43 = vpack.c.bf16 %v12349_v49, %v12349_v49  ;;  %v10344_v6 = vrot.slane %v10152_v27, 6  ;;  %v3376_v42 = vrot.slane %v10118_v22, 6  ;;  %3268 = vst [vmem:[#allocation1 + $0x2] ss:$4 sm:$0xff] %v3191_v58  ;;  %v2999_v28 = vadd.f32 %v2935_v23, %v2831_v9  ;;  %v7432_v9 = vld [vmem:[%s12076_s4 + $0x1c4] sm:$0xf0] }
 0x27c   : > { %v3303_v39 = vunpack.c.l.b16 %v10333_v15  ;;  %6369 = vmatmul.msk.bf16.gmra.mxu2 %vm572_vm1, %v2018_v44  ;;  %v3335_v14 = vshrl.u32 %v10213_v56, 16  ;;  %v3193_v12 = vmax.f32 %v3161_v51, 0.0  ;;  %v3044_v52 = vsel %vm7954_vm8, %v3042_v19, %v3043_v5  ;;  %v7384_v5 = vld [vmem:[%s12076_s4 + $0x44] sm:$0xf0] }
 0x27d   : > { %v3076_v11 = vadd.f32 %v3027_v41, %v2935_v23  ;;  %6385 = vmatmul.msk.bf16.gmra.mxu3 %vm572_vm1, %v2664_v43  ;;  %v10354_v25 = vrot.slane %v10253_v32, 7  ;;  %v3194_v24 = vmax.f32 %v3162_v16, 0.0  ;;  %v3031_v59 = vadd.f32 %v2999_v28, %v2772_v26 }
 0x27e   : > { %v3310_v30 = vpack.c.b16 %v3303_v39, %v3303_v39  ;;  %v3427_v37 = vsel %vm761_vm3, %v3376_v42, %v3377_v38  ;;  %v3195_v55 = vmax.f32 %v3163_v47, 0.0  ;;  %v3340_v35 = vor.u32 %v3339_v57, %v3335_v14  ;;  %v6631_v47 = vld [vmem:[%s12076_s4 + $0x1b0] sm:$0xf] }
 0x27f   : > { %v3118_v56 = vmul.f32 %v9453_v2, %v3076_v11  ;;  %v3430_v18 = vsel %vm3401_vm9, %v9878_v34, %v10179_v36  ;;  %v3431_v62 = vsel %vm3403_vm10, %v3376_v42, %v3377_v38  ;;  %v3265_v33 = vld.sshfl [vmem:[#allocation1 + $0x20] sm:$0xff pattern:$0x73625140]  ;;  %v3080_v32 = vadd.f32 %v3044_v52, %v3031_v59 }
 0x280   : > { %v3344_v1 = vshll.u32 %v3310_v30, 16  ;;  %v3436_v26 = vsel %vm763_vm5, %v3376_v42, %v3377_v38  ;;  %v3441_v48 = vsel %vm3416_vm13, %v3376_v42, %v3377_v38  ;;  %3271 = vst [vmem:[#allocation1 + $0x20] ss:$4 sm:$0xff] %v3193_v12  ;;  %v10369_v10 = vpack.c.bf16 %v3265_v33, %v3265_v33 }
 0x281   : > { %v3160_v57 = vadd.f32 %v9471_v17, %v3118_v56  ;;  %v3428_v63 = vsel %vm594_vm0, %v10317_v53, %v3427_v37  ;;  %3272 = vst [vmem:[#allocation1 + $0x21] ss:$4 sm:$0xff] %v3194_v24  ;;  %v3122_v40 = vmul.f32 %v9453_v2, %v3080_v32  ;;  %v3342_v13 = vshrl.u32 %v3310_v30, 16  ;;  %v6439_v53 = vld [vmem:[%s12076_s4 + $0x30] sm:$0xf] }
 0x282   : > { %v3346_v31 = vrot.slane %v3344_v1, 1  ;;  %v3432_v38 = vsel %vm3405_vm11, %v3430_v18, %v3431_v62  ;;  %3273 = vst [vmem:[#allocation1 + $0x22] ss:$4 sm:$0xff] %v3195_v55  ;;  %v3304_v29 = vunpack.c.l.b16 %v10369_v10  ;;  %v3380_v58 = vrot.slane %v3340_v35, 5  ;;  %v6799_v32 = vld [vmem:[%s12076_s4 + $0x300] sm:$0xf] }
 0x283   : > { %v3192_v51 = vmax.f32 %v3160_v57, 0.0  ;;  %v3435_v2 = vsel %vm761_vm3, %v9878_v34, %v10179_v36  ;;  %v3440_v16 = vsel %vm3403_vm10, %v9878_v34, %v10179_v36  ;;  %v3164_v61 = vadd.f32 %v9471_v17, %v3122_v40 }
 0x284   : > { %v3347_v50 = vor.u32 %v3346_v31, %v3342_v13  ;;  %v3437_v60 = vsel %vm3411_vm12, %v3435_v2, %v3436_v26  ;;  %v10407_v44 = vsel %vm3418_vm14, %v3440_v16, %v3441_v48  ;;  %v3311_v34 = vpack.c.b16 %v3304_v29, %v3304_v29 }
 0x285   : > { %3269 = vst [vmem:[#allocation1 + $0x3] ss:$4 sm:$0xff] %v3192_v51  ;;  %v6824_v17 = vor.u32 %v7480_v54, %v6823_v3  ;;  %v3434_v36 = vrot.slane %v3432_v38, 1  ;;  %v3568_v23 = vunpack.i.h.s16 %v3428_v63  ;;  %v3196_v41 = vmax.f32 %v3164_v61, 0.0 }
 0x286   : > { %v7016_v19 = vor.u32 %v7528_v45, %v7015_v0  ;;  %v3351_v49 = vshll.u32 %v3311_v34, 16  ;;  %v10409_v43 = vrot.slane %v3347_v50, 5  ;;  %v6440_v42 = vor.u32 %v7384_v5, %v6439_v53  ;;  %v6991_v5 = vld [vmem:[%s12076_s4 + $0x480] sm:$0xf] }
 0x287   : > { %4937 = vmatpush.bf16.msra.mxu2 %v6824_v17  ;;  %v6632_v28 = vor.u32 %v7432_v9, %v6631_v47  ;;  %v3421_v39 = vrot.slane %v10233_v21, 3  ;;  %v3439_v14 = vrot.slane %v3437_v60, 2  ;;  %v3444_v12 = vrot.slane %v10407_v44, 3  ;;  %3274 = vst [vmem:[#allocation1 + $0x23] ss:$4 sm:$0xff] %v3196_v41 }
 0x288   : > { %v3454_v52 = vsel %vm3403_vm10, %v10344_v6, %v3380_v58  ;;  %v3447_v11 = vsel %vm760_vm2, %v10118_v22, %v10354_v25  ;;  %v10418_v24 = vrot.slane %v3340_v35, 7  ;;  %v3382_v59 = vrot.slane %v10333_v15, 6  ;;  %4965 = vmatpush.bf16.msra.mxu3 %v7016_v19  ;;  %4881 = vmatpush.bf16.msrb.mxu0 %v6440_v42  ;;  %v7522_v47 = vld [vmem:[%s12076_s4 + $0x494] sm:$0xf0]  ;;  %v6415_v9 = vld [vmem:[%s12076_s4] sm:$0xf] }
 0x289   : > { %v3459_v30 = vsel %vm763_vm5, %v10344_v6, %v3380_v58  ;;  %v3453_v21 = vsel %vm3401_vm9, %v10118_v22, %v10354_v25  ;;  %v3458_v37 = vsel %vm761_vm3, %v10118_v22, %v10354_v25  ;;  %v3463_v55 = vsel %vm3403_vm10, %v10118_v22, %v10354_v25  ;;  %4909 = vmatpush.bf16.msrb.mxu1 %v6632_v28  ;;  %v7474_v22 = vld [vmem:[%s12076_s4 + $0x314] sm:$0xf0]  ;;  %v6969_v41 = vld [vmem:[%s12076_s4 + $0x468] sm:$0xf0]  ;;  %v7561_v19 = vld [vmem:[%s12076_s4 + $0x5d4] sm:$0xf] }
 0x28a   : > { %v3464_v56 = vsel %vm3416_vm13, %v10344_v6, %v3380_v58  ;;  %v6402_v35 = vpack.i.b16 %v3434_v36, %v3568_v23  ;;  %v3353_v18 = vrot.slane %v3351_v49, 1  ;;  %v10435_v62 = vsel %vm3405_vm11, %v3453_v21, %v3454_v52  ;;  %v7426_v60 = vld [vmem:[%s12076_s4 + $0x194] sm:$0xf0]  ;;  %v7513_v23 = vld [vmem:[%s12076_s4 + $0x454] sm:$0xf] }
 0x28b   : > { %v3477_v33 = vsel %vm3403_vm10, %v3382_v59, %v10409_v43  ;;  %v3570_v25 = vunpack.i.h.s16 %v3434_v36  ;;  %v3572_v1 = vunpack.i.h.s16 %v3439_v14  ;;  %v6401_v3 = vpack.i.b16 %v3428_v63, %v3421_v39  ;;  %v7161_v49 = vld [vmem:[%s12076_s4 + $0x5e8] sm:$0xf0]  ;;  %v7417_v39 = vld [vmem:[%s12076_s4 + $0x154] sm:$0xf] }
 0x28c   : > { %v3270_v26 = vld.sshfl [vmem:[#allocation1] sm:$0xff pattern:$0x73625140]  ;;  %v10446_v48 = vsel %vm3411_vm12, %v3458_v37, %v3459_v30  ;;  %v3349_v54 = vshrl.u32 %v3311_v34, 16  ;;  %v10451_v0 = vsel %vm3418_vm14, %v3463_v55, %v3464_v56  ;;  %v3476_v40 = vsel %vm3401_vm9, %v10152_v27, %v10418_v24  ;;  %v6777_v52 = vld [vmem:[%s12076_s4 + $0x2e8] sm:$0xf0] }
 0x28d   : > { %v10448_v57 = vpack.c.bf16 %v3270_v26, %v3270_v26  ;;  %3839 = vst [vmem:[#allocation1 + $0x4] ss:$9 sm:$0xff] %v6402_v35  ;;  %v3450_v13 = vsel %vm761_vm3, %v10344_v6, %v3380_v58  ;;  %v3457_v63 = vrot.slane %v10435_v62, 1  ;;  %v10460_v31 = vsel %vm3405_vm11, %v3476_v40, %v3477_v33  ;;  %v6945_v56 = vld [vmem:[%s12076_s4 + $0x438] sm:$0xf0] }
 0x28e   : > { %v6800_v45 = vor.u32 %v7474_v22, %v6799_v32  ;;  %v3275_v38 = vld.sshfl [vmem:[#allocation1 + $0x20] sm:$0xff pattern:$0x73625140]  ;;  %v10463_v51 = vor.u32 %v3353_v18, %v3349_v54  ;;  %v10466_v53 = vrot.slane %v10369_v10, 6  ;;  %v3462_v2 = vrot.slane %v10446_v48, 2 }
 0x28f   : > { %v3305_v29 = vunpack.c.l.b16 %v10448_v57  ;;  %v6403_v16 = vpack.i.b16 %v3439_v14, %v3570_v25  ;;  %v10469_v61 = vpack.c.bf16 %v3275_v38, %v3275_v38  ;;  %v10471_v6 = vrot.slane %v3347_v50, 7  ;;  %3827 = vst [vmem:[#allocation1] ss:$9 sm:$0xff] %v10229_v7  ;;  %v7378_v50 = vld [vmem:[%s12076_s4 + $0x14] sm:$0xf0] }
 0x290   : > { %v3467_v58 = vrot.slane %v10451_v0, 3  ;;  %v6607_v7 = vld [vmem:[%s12076_s4 + $0x180] sm:$0xf]  ;;  %v3473_v34 = vsel %vm761_vm3, %v3382_v59, %v10409_v43  ;;  %v3480_v17 = vrot.slane %v10460_v31, 1  ;;  %v3482_v36 = vsel %vm763_vm5, %v3382_v59, %v10409_v43  ;;  %3830 = vst [vmem:[#allocation1 + $0x1] ss:$9 sm:$0xff] %v3408_v4  ;;  %4938 = vmatpush.bf16.msra.mxu2 %v6800_v45 }
 0x291   : > { %v10493_v44 = vpack.c.b16 %v3305_v29, %v3305_v29  ;;  %v6404_v42 = vpack.i.b16 %v3444_v12, %v3572_v1  ;;  %v3363_v8 = vunpack.c.l.b16 %v10469_v61  ;;  %v3451_v4 = vsel %vm594_vm0, %v3447_v11, %v3450_v13  ;;  %3833 = vst [vmem:[#allocation1 + $0x2] ss:$9 sm:$0xff] %v3414_v46  ;;  %v6585_v14 = vld [vmem:[%s12076_s4 + $0x168] sm:$0xf0]  ;;  %v7465_v12 = vld [vmem:[%s12076_s4 + $0x2d4] sm:$0xf] }
 0x292   : > { %v3487_v28 = vsel %vm3416_vm13, %v3382_v59, %v10409_v43  ;;  %v10534_v20 = vrot.slane %v10463_v51, 5  ;;  %v3470_v46 = vsel %vm760_vm2, %v10152_v27, %v10418_v24  ;;  %v3481_v11 = vsel %vm761_vm3, %v10152_v27, %v10418_v24  ;;  %3836 = vst [vmem:[#allocation1 + $0x3] ss:$9 sm:$0xff] %v6401_v3  ;;  %v7507_v59 = vld [vmem:[%s12076_s4 + $0x424] sm:$0xf] }
 0x293   : > { %v3358_v43 = vshll.u32 %v10493_v44, 16  ;;  %v3364_v30 = vpack.c.b16 %v3363_v8, %v3363_v8  ;;  %v10546_v21 = vsel %vm594_vm0, %v3470_v46, %v3473_v34  ;;  %v10549_v37 = vsel %vm3411_vm12, %v3481_v11, %v3482_v36  ;;  %3842 = vst [vmem:[#allocation1 + $0x5] ss:$9 sm:$0xff] %v6403_v16  ;;  %v7555_v35 = vld [vmem:[%s12076_s4 + $0x5a4] sm:$0xf] }
 0x294   : > { %v3486_v55 = vsel %vm3403_vm10, %v10152_v27, %v10418_v24  ;;  %3845 = vst [vmem:[#allocation1 + $0x6] ss:$9 sm:$0xff] %v6404_v42  ;;  %v6992_v33 = vor.u32 %v7522_v47, %v6991_v5  ;;  %v6416_v32 = vor.u32 %v7378_v50, %v6415_v9  ;;  %v6608_v22 = vor.u32 %v7426_v60, %v6607_v7  ;;  %v7137_v27 = vld [vmem:[%s12076_s4 + $0x5b8] sm:$0xf0]  ;;  %v7411_v24 = vld [vmem:[%s12076_s4 + $0x124] sm:$0xf] }
 0x295   : > { %v10561_v18 = vsel %vm3418_vm14, %v3486_v55, %v3487_v28  ;;  %v3360_v25 = vrot.slane %v3358_v43, 1  ;;  %v3368_v1 = vshll.u32 %v3364_v30, 16  ;;  %3848 = vst [vmem:[#allocation1 + $0x7] ss:$9 sm:$0xff] %v3451_v4  ;;  %v6972_v3 = vor.u32 %v7513_v23, %v6969_v41  ;;  %v6561_v54 = vld [vmem:[%s12076_s4 + $0x138] sm:$0xf0] }
 0x296   : > { %v7164_v26 = vor.u32 %v7561_v19, %v7161_v49  ;;  %v3485_v40 = vrot.slane %v10549_v37, 2  ;;  %v3500_v13 = vsel %vm3403_vm10, %v10466_v53, %v10534_v20  ;;  %4966 = vmatpush.bf16.msra.mxu3 %v6992_v33  ;;  %4882 = vmatpush.bf16.msrb.mxu0 %v6416_v32  ;;  %v6588_v45 = vor.u32 %v7417_v39, %v6585_v14  ;;  %v7459_v34 = vld [vmem:[%s12076_s4 + $0x2a4] sm:$0xf]  ;;  %v7501_v41 = vld [vmem:[%s12076_s4 + $0x3f4] sm:$0xf] }
 0x297   : > { %v6780_v38 = vor.u32 %v7465_v12, %v6777_v52  ;;  %v3356_v29 = vshrl.u32 %v10493_v44, 16  ;;  %v3370_v16 = vrot.slane %v3368_v1, 1  ;;  %v3490_v5 = vrot.slane %v10561_v18, 3  ;;  %4910 = vmatpush.bf16.msrb.mxu1 %v6608_v22  ;;  %5043 = vmatpush.bf16.msrb.mxu2 %v6972_v3  ;;  %v6753_v44 = vld [vmem:[%s12076_s4 + $0x2b8] sm:$0xf0] }
 0x298   : > { %v6948_v47 = vor.u32 %v7507_v59, %v6945_v56  ;;  %v3366_v9 = vshrl.u32 %v3364_v30, 16  ;;  %v3499_v50 = vsel %vm3401_vm9, %v10333_v15, %v10471_v6  ;;  %v7140_v7 = vor.u32 %v7555_v35, %v7137_v27  ;;  %v6921_v19 = vld [vmem:[%s12076_s4 + $0x408] sm:$0xf0]  ;;  %v7549_v49 = vld [vmem:[%s12076_s4 + $0x574] sm:$0xf] }
 0x299   : > { %v6564_v60 = vor.u32 %v7411_v24, %v6561_v54  ;;  %v3361_v36 = vor.u32 %v3360_v25, %v3356_v29  ;;  %v10588_v23 = vsel %vm3405_vm11, %v3499_v50, %v3500_v13  ;;  %v7113_v8 = vld [vmem:[%s12076_s4 + $0x588] sm:$0xf0]  ;;  %v7405_v4 = vld [vmem:[%s12076_s4 + $0xf4] sm:$0xf]  ;;  %v10609_v39 = vrot.slane %v10463_v51, 7 }
 0x29a   : > { %5071 = vmatpush.bf16.msrb.mxu3 %v7164_v26  ;;  %4987 = vmatpush.bf16.msra.mxu0 %v6588_v45  ;;  %v3371_v42 = vor.u32 %v3370_v16, %v3366_v9  ;;  %v6537_v28 = vld [vmem:[%s12076_s4 + $0x108] sm:$0xf0]  ;;  %v10612_v14 = vrot.slane %v10448_v57, 6  ;;  %v3582_v12 = vunpack.i.h.s16 %v10546_v21  ;;  %v3584_v52 = vunpack.i.h.s16 %v3480_v17  ;;  %v7453_v56 = vld [vmem:[%s12076_s4 + $0x274] sm:$0xf] }
 0x29b   : > { %5015 = vmatpush.bf16.msra.mxu1 %v6780_v38  ;;  %5044 = vmatpush.bf16.msrb.mxu2 %v6948_v47  ;;  %v10618_v43 = vrot.slane %v10469_v61, 6  ;;  %v3503_v46 = vrot.slane %v10588_v23, 1  ;;  %v6756_v30 = vor.u32 %v7459_v34, %v6753_v44  ;;  %v6924_v55 = vor.u32 %v7501_v41, %v6921_v19  ;;  %v6729_v61 = vld [vmem:[%s12076_s4 + $0x288] sm:$0xf0]  ;;  %v7495_v24 = vld [vmem:[%s12076_s4 + $0x3c4] sm:$0xf] }
 0x29c   : > { %v10621_v11 = vld [vmem:[#allocation1] sm:$0xff]  ;;  %v10623_v59 = vld [vmem:[#allocation1 + $0x9] sm:$0xff]  ;;  %v10625_v51 = vld [vmem:[#allocation1 + $0x12] sm:$0xff]  ;;  %v10633_v35 = vrot.slane %v3361_v36, 5  ;;  %v3586_v33 = vunpack.i.h.s16 %v3485_v40  ;;  %v7116_v22 = vor.u32 %v7549_v49, %v7113_v8  ;;  %v6540_v27 = vor.u32 %v7405_v4, %v6537_v28 }
 0x29d   : > { %4883 = vmatmul.bf16.vlgmr.msrb.gmra.mxu0 %v10621_v11  ;;  %4911 = vmatmul.bf16.vlgmr.msrb.gmra.mxu1 %v10623_v59  ;;  %v10639_v32 = vld [vmem:[#allocation1 + $0x1b] sm:$0xff]  ;;  %v7543_v1 = vld [vmem:[%s12076_s4 + $0x544] sm:$0xf]  ;;  %v10650_v3 = vrot.slane %v3361_v36, 7  ;;  %v10652_v26 = vrot.slane %v3371_v42, 5  ;;  %v3496_v54 = vsel %vm761_vm3, %v10466_v53, %v10534_v20  ;;  %v3493_v38 = vsel %vm760_vm2, %v10333_v15, %v10471_v6 }
 0x29e   : > { %5072 = vmatpush.bf16.msrb.mxu3 %v7140_v7  ;;  %4988 = vmatpush.bf16.msra.mxu0 %v6564_v60  ;;  %v6897_v25 = vld [vmem:[%s12076_s4 + $0x3d8] sm:$0xf0]  ;;  %v7399_v45 = vld [vmem:[%s12076_s4 + $0xc4] sm:$0xf]  ;;  %v6405_v29 = vpack.i.b16 %v10546_v21, %v3467_v58  ;;  %3854 = vst [vmem:[#allocation1] ss:$9 sm:$0xff] %v3457_v63  ;;  %v10682_v9 = vsel %vm761_vm3, %v10333_v15, %v10471_v6 }
 0x29f   : > { %4939 = vmatmul.bf16.vlgmr.msra.gmra.mxu2 %v10625_v51  ;;  %v7089_v13 = vld [vmem:[%s12076_s4 + $0x558] sm:$0xf0]  ;;  %4967 = vmatmul.bf16.vlgmr.msra.gmra.mxu3 %v10639_v32  ;;  %v7447_v47 = vld [vmem:[%s12076_s4 + $0x244] sm:$0xf]  ;;  %v6406_v0 = vpack.i.b16 %v3480_v17, %v3582_v12  ;;  %v6407_v62 = vpack.i.b16 %v3485_v40, %v3584_v52  ;;  %3856 = vst [vmem:[#allocation1 + $0x1] ss:$9 sm:$0xff] %v3462_v2 }
 0x2a0   : > { %v6513_v16 = vld [vmem:[%s12076_s4 + $0xd8] sm:$0xf0]  ;;  %5016 = vmatpush.bf16.msra.mxu1 %v6756_v30  ;;  %5045 = vmatpush.bf16.msrb.mxu2 %v6924_v55  ;;  %v7489_v58 = vld [vmem:[%s12076_s4 + $0x394] sm:$0xf]  ;;  %v3497_v21 = vsel %vm594_vm0, %v3493_v38, %v3496_v54  ;;  %v6408_v31 = vpack.i.b16 %v3490_v5, %v3586_v33  ;;  %3858 = vst [vmem:[#allocation1 + $0x2] ss:$9 sm:$0xff] %v6405_v29 }
 0x2a1   : > { %v6705_v63 = vld [vmem:[%s12076_s4 + $0x258] sm:$0xf0]  ;;  %v6732_v48 = vor.u32 %v7453_v56, %v6729_v61  ;;  %v6873_v2 = vld [vmem:[%s12076_s4 + $0x3a8] sm:$0xf0]  ;;  %v7537_v17 = vld [vmem:[%s12076_s4 + $0x514] sm:$0xf]  ;;  %v3510_v37 = vsel %vm3416_vm13, %v10466_v53, %v10534_v20  ;;  %v3523_v18 = vsel %vm3403_vm10, %v10612_v14, %v10633_v35  ;;  %v6900_v40 = vor.u32 %v7495_v24, %v6897_v25 }
 0x2a2   : > { %5073 = vmatpush.bf16.msrb.mxu3 %v7116_v22  ;;  %4989 = vmatpush.bf16.msra.mxu0 %v6540_v27  ;;  %3860 = vst [vmem:[#allocation1 + $0x3] ss:$9 sm:$0xff] %v6406_v0  ;;  %v7092_v5 = vor.u32 %v7543_v1, %v7089_v13  ;;  %v7065_v50 = vld [vmem:[%s12076_s4 + $0x528] sm:$0xf0]  ;;  %v7393_v7 = vld [vmem:[%s12076_s4 + $0x94] sm:$0xf]  ;;  %v3522_v60 = vsel %vm3401_vm9, %v10369_v10, %v10609_v39 }
 0x2a3   : > { %v3527_v34 = vsel %vm761_vm3, %v10369_v10, %v10609_v39  ;;  %v3528_v44 = vsel %vm763_vm5, %v10612_v14, %v10633_v35  ;;  %3862 = vst [vmem:[#allocation1 + $0x4] ss:$9 sm:$0xff] %v6407_v62  ;;  %v6516_v36 = vor.u32 %v7399_v45, %v6513_v16  ;;  %v6489_v41 = vld [vmem:[%s12076_s4 + $0xa8] sm:$0xf0]  ;;  %v7441_v19 = vld [vmem:[%s12076_s4 + $0x214] sm:$0xf]  ;;  %v3519_v49 = vsel %vm761_vm3, %v10612_v14, %v10633_v35 }
 0x2a4   : > { %3864 = vst [vmem:[#allocation1 + $0x5] ss:$9 sm:$0xff] %v6408_v31  ;;  %5017 = vmatpush.bf16.msra.mxu1 %v6732_v48  ;;  %5046 = vmatpush.bf16.msrb.mxu2 %v6900_v40  ;;  %v6708_v42 = vor.u32 %v7447_v47, %v6705_v63  ;;  %v6876_v8 = vor.u32 %v7489_v58, %v6873_v2  ;;  %v6681_v4 = vld [vmem:[%s12076_s4 + $0x228] sm:$0xf0]  ;;  %v7483_v28 = vld [vmem:[%s12076_s4 + $0x364] sm:$0xf] }
 0x2a5   : > { %v3524_v12 = vsel %vm3405_vm11, %v3522_v60, %v3523_v18  ;;  %3866 = vst [vmem:[#allocation1 + $0x6] ss:$9 sm:$0xff] %v3497_v21  ;;  %v7068_v52 = vor.u32 %v7537_v17, %v7065_v50  ;;  %v6492_v30 = vor.u32 %v7393_v7, %v6489_v41  ;;  %v6849_v55 = vld [vmem:[%s12076_s4 + $0x378] sm:$0xf0]  ;;  %v7531_v56 = vld [vmem:[%s12076_s4 + $0x4e4] sm:$0xf]  ;;  %v3505_v61 = vsel %vm763_vm5, %v10466_v53, %v10534_v20 }
 0x2a6   : > { %5074 = vmatpush.bf16.msrb.mxu3 %v7092_v5  ;;  %4990 = vmatpush.bf16.msra.mxu0 %v6516_v36  ;;  %v3509_v33 = vsel %vm3403_vm10, %v10333_v15, %v10471_v6  ;;  %v3516_v22 = vsel %vm760_vm2, %v10369_v10, %v10609_v39  ;;  %v3529_v27 = vsel %vm3411_vm12, %v3527_v34, %v3528_v44  ;;  %v7041_v24 = vld [vmem:[%s12076_s4 + $0x4f8] sm:$0xf0]  ;;  %v7387_v53 = vld [vmem:[%s12076_s4 + $0x64] sm:$0xf]  ;;  %v3526_v25 = vrot.slane %v3524_v12, 1 }
 0x2a7   : > { %3868 = vst [vmem:[#allocation1 + $0x7] ss:$9 sm:$0xff] %v3503_v46  ;;  %v3511_v20 = vsel %vm3418_vm14, %v3509_v33, %v3510_v37  ;;  %v3520_v15 = vsel %vm594_vm0, %v3516_v22, %v3519_v49  ;;  %v3533_v6 = vsel %vm3416_vm13, %v10612_v14, %v10633_v35  ;;  %v3546_v23 = vsel %vm3403_vm10, %v10618_v43, %v10652_v26  ;;  %v6465_v46 = vld [vmem:[%s12076_s4 + $0x78] sm:$0xf0]  ;;  %v7435_v29 = vld [vmem:[%s12076_s4 + $0x1e4] sm:$0xf] }
 0x2a8   : > { %v3551_v1 = vsel %vm763_vm5, %v10618_v43, %v10652_v26  ;;  %5018 = vmatpush.bf16.msra.mxu1 %v6708_v42  ;;  %5047 = vmatpush.bf16.msrb.mxu2 %v6876_v8  ;;  %v6684_v54 = vor.u32 %v7441_v19, %v6681_v4  ;;  %v6852_v13 = vor.u32 %v7483_v28, %v6849_v55  ;;  %v3531_v45 = vrot.slane %v3529_v27, 2  ;;  %v6657_v16 = vld [vmem:[%s12076_s4 + $0x1f8] sm:$0xf0]  ;;  %v7477_v36 = vld [vmem:[%s12076_s4 + $0x334] sm:$0xf] }
 0x2a9   : > { %v3532_v14 = vsel %vm3403_vm10, %v10369_v10, %v10609_v39  ;;  %v7044_v35 = vor.u32 %v7531_v56, %v7041_v24  ;;  %v6468_v38 = vor.u32 %v7387_v53, %v6465_v46  ;;  %v3506_v47 = vsel %vm3411_vm12, %v10682_v9, %v3505_v61  ;;  %v6825_v41 = vld [vmem:[%s12076_s4 + $0x348] sm:$0xf0]  ;;  %v7525_v8 = vld [vmem:[%s12076_s4 + $0x4b4] sm:$0xf]  ;;  %v7471_v24 = vld [vmem:[%s12076_s4 + $0x304] sm:$0xf] }
 0x2aa   : > { %5075 = vmatpush.bf16.msrb.mxu3 %v7068_v52  ;;  %4991 = vmatpush.bf16.msra.mxu0 %v6492_v30  ;;  %v3534_v0 = vsel %vm3418_vm14, %v3532_v14, %v3533_v6  ;;  %v3545_v10 = vsel %vm3401_vm9, %v10448_v57, %v10650_v3  ;;  %v3550_v39 = vsel %vm761_vm3, %v10448_v57, %v10650_v3  ;;  %v3596_v58 = vunpack.i.h.s16 %v3520_v15  ;;  %v7017_v4 = vld [vmem:[%s12076_s4 + $0x4c8] sm:$0xf0]  ;;  %v7381_v30 = vld [vmem:[%s12076_s4 + $0x34] sm:$0xf]  ;;  %v6801_v53 = vld [vmem:[%s12076_s4 + $0x318] sm:$0xf0] }
 0x2ab   : > { %v3547_v62 = vsel %vm3405_vm11, %v3545_v10, %v3546_v23  ;;  %v10800_v63 = vsel %vm3411_vm12, %v3550_v39, %v3551_v1  ;;  %v3513_v21 = vrot.slane %v3511_v20, 3  ;;  %v3598_v31 = vunpack.i.h.s16 %v3526_v25  ;;  %v6441_v55 = vld [vmem:[%s12076_s4 + $0x48] sm:$0xf0]  ;;  %v7429_v61 = vld [vmem:[%s12076_s4 + $0x1b4] sm:$0xf] }
 0x2ac   : > { %5019 = vmatpush.bf16.msra.mxu1 %v6684_v54  ;;  %5048 = vmatpush.bf16.msrb.mxu2 %v6852_v13  ;;  %v6660_v9 = vor.u32 %v7435_v29, %v6657_v16  ;;  %v3508_v48 = vrot.slane %v3506_v47, 2  ;;  %v3536_v2 = vrot.slane %v3534_v0, 3  ;;  %v3600_v17 = vunpack.i.h.s16 %v3531_v45  ;;  %v6633_v33 = vld [vmem:[%s12076_s4 + $0x1c8] sm:$0xf0]  ;;  %v7375_v23 = vld [vmem:[%s12076_s4 + $0x4] sm:$0xf] }
 0x2ad   : > { %v3542_v5 = vsel %vm761_vm3, %v10618_v43, %v10652_v26  ;;  %v3549_v50 = vrot.slane %v3547_v62, 1  ;;  %v3554_v7 = vrot.slane %v10800_v63, 2  ;;  %v6409_v60 = vpack.i.b16 %v3520_v15, %v3513_v21  ;;  %v7519_v15 = vld [vmem:[%s12076_s4 + $0x484] sm:$0xf]  ;;  %v6417_v46 = vld [vmem:[%s12076_s4 + $0x18] sm:$0xf0] }
 0x2ae   : > { %v10802_v37 = vld [vmem:[#allocation1] sm:$0xff]  ;;  %v10804_v18 = vld [vmem:[#allocation1 + $0x9] sm:$0xff]  ;;  %v10806_v40 = vld [vmem:[#allocation1 + $0x12] sm:$0xff]  ;;  %5076 = vmatpush.bf16.msrb.mxu3 %v7044_v35  ;;  %4992 = vmatpush.bf16.msra.mxu0 %v6468_v38  ;;  %v6410_v44 = vpack.i.b16 %v3526_v25, %v3596_v58  ;;  %v3539_v19 = vsel %vm760_vm2, %v10448_v57, %v10650_v3  ;;  %v6411_v49 = vpack.i.b16 %v3531_v45, %v3598_v31 }
 0x2af   : > { %4888 = vmatmul.bf16.gmra.mxu0 %v10802_v37  ;;  %4916 = vmatmul.bf16.gmra.mxu1 %v10804_v18  ;;  %v10814_v34 = vld [vmem:[#allocation1 + $0x1b] sm:$0xff]  ;;  %v6828_v42 = vor.u32 %v7477_v36, %v6825_v41  ;;  %v3543_v28 = vsel %vm594_vm0, %v3539_v19, %v3542_v5  ;;  %v6412_v12 = vpack.i.b16 %v3536_v2, %v3600_v17  ;;  %v7517_v47 = vld [vmem:[%s12076_s4 + $0x46c] sm:$0xf0]  ;;  %v6951_v2 = vld [vmem:[%s12076_s4 + $0x428] sm:$0xf] }
 0x2b0   : > { %4944 = vmatmul.bf16.gmra.mxu2 %v10806_v40  ;;  %4972 = vmatmul.bf16.gmra.mxu3 %v10814_v34  ;;  %3874 = vst [vmem:[#allocation1] ss:$9 sm:$0xff] %v3508_v48  ;;  %v7020_v52 = vor.u32 %v7525_v8, %v7017_v4  ;;  %v6444_v56 = vor.u32 %v7381_v30, %v6441_v55  ;;  %v6975_v16 = vld [vmem:[%s12076_s4 + $0x458] sm:$0xf]  ;;  %v7565_v39 = vld [vmem:[%s12076_s4 + $0x5ec] sm:$0xf0] }
 0x2b1   : > { %3876 = vst [vmem:[#allocation1 + $0x1] ss:$9 sm:$0xff] %v6409_v60  ;;  %5020 = vmatpush.bf16.msra.mxu1 %v6660_v9  ;;  %5049 = vmatpush.bf16.msrb.mxu2 %v6828_v42  ;;  %v3556_v22 = vsel %vm3416_vm13, %v10618_v43, %v10652_v26  ;;  %v6636_v27 = vor.u32 %v7429_v61, %v6633_v33  ;;  %v6993_v43 = vld [vmem:[%s12076_s4 + $0x498] sm:$0xf0]  ;;  %v7167_v10 = vld [vmem:[%s12076_s4 + $0x5d8] sm:$0xf] }
 0x2b2   : > { %3878 = vst [vmem:[#allocation1 + $0x2] ss:$9 sm:$0xff] %v6410_v44  ;;  %5077 = vmatpush.bf16.msrb.mxu3 %v7020_v52  ;;  %4993 = vmatpush.bf16.msra.mxu0 %v6444_v56  ;;  %v6804_v20 = vor.u32 %v7471_v24, %v6801_v53  ;;  %v3555_v26 = vsel %vm3403_vm10, %v10448_v57, %v10650_v3  ;;  %v7423_v57 = vld [vmem:[%s12076_s4 + $0x184] sm:$0xf]  ;;  %v6609_v3 = vld [vmem:[%s12076_s4 + $0x198] sm:$0xf0] }
 0x2b3   : > { %3880 = vst [vmem:[#allocation1 + $0x3] ss:$9 sm:$0xff] %v6411_v49  ;;  %v6996_v6 = vor.u32 %v7519_v15, %v6993_v43  ;;  %v3557_v25 = vsel %vm3418_vm14, %v3555_v26, %v3556_v22  ;;  %v6420_v1 = vor.u32 %v7375_v23, %v6417_v46  ;;  %v6612_v54 = vor.u32 %v7423_v57, %v6609_v3  ;;  %v6591_v62 = vld [vmem:[%s12076_s4 + $0x158] sm:$0xf]  ;;  %v7421_v58 = vld [vmem:[%s12076_s4 + $0x16c] sm:$0xf0] }
 0x2b4   : > { %3882 = vst [vmem:[#allocation1 + $0x4] ss:$9 sm:$0xff] %v6412_v12  ;;  %v3559_v13 = vrot.slane %v3557_v25, 3  ;;  %v6976_v0 = vor.u32 %v7517_v47, %v6975_v16  ;;  %v7168_v63 = vor.u32 %v7565_v39, %v7167_v10  ;;  %v6783_v21 = vld [vmem:[%s12076_s4 + $0x2d8] sm:$0xf]  ;;  %v6592_v9 = vor.u32 %v7421_v58, %v6591_v62 }
 0x2b5   : > { %3884 = vst [vmem:[#allocation1 + $0x5] ss:$9 sm:$0xff] %v3543_v28  ;;  %5021 = vmatpush.bf16.msra.mxu1 %v6636_v27  ;;  %5050 = vmatpush.bf16.msrb.mxu2 %v6804_v20  ;;  %v7469_v31 = vld [vmem:[%s12076_s4 + $0x2ec] sm:$0xf0]  ;;  %v7511_v17 = vld [vmem:[%s12076_s4 + $0x43c] sm:$0xf0] }
 0x2b6   : > { %3886 = vst [vmem:[#allocation1 + $0x6] ss:$9 sm:$0xff] %v3549_v50  ;;  %5078 = vmatpush.bf16.msrb.mxu3 %v6996_v6  ;;  %4994 = vmatpush.bf16.msra.mxu0 %v6420_v1  ;;  %v3608_v45 = vunpack.i.l.s16 %v3559_v13  ;;  %v6784_v48 = vor.u32 %v7469_v31, %v6783_v21  ;;  %v7143_v5 = vld [vmem:[%s12076_s4 + $0x5a8] sm:$0xf]  ;;  %v6952_v50 = vor.u32 %v7511_v17, %v6951_v2  ;;  %v7415_v44 = vld [vmem:[%s12076_s4 + $0x13c] sm:$0xf0] }
 0x2b7   : > { %3888 = vst [vmem:[#allocation1 + $0x7] ss:$9 sm:$0xff] %v3554_v7  ;;  %v7559_v7 = vld [vmem:[%s12076_s4 + $0x5bc] sm:$0xf0]  ;;  %v6567_v60 = vld [vmem:[%s12076_s4 + $0x128] sm:$0xf] }
 0x2b8   : > { %v7144_v36 = vor.u32 %v7559_v7, %v7143_v5  ;;  %v6568_v41 = vor.u32 %v7415_v44, %v6567_v60  ;;  %v6759_v19 = vld [vmem:[%s12076_s4 + $0x2a8] sm:$0xf]  ;;  %v7463_v49 = vld [vmem:[%s12076_s4 + $0x2bc] sm:$0xf0]  ;;  %v6927_v52 = vld [vmem:[%s12076_s4 + $0x3f8] sm:$0xf] }
 0x2b9   : > { %5022 = vmatpush.bf16.msra.mxu1 %v6612_v54  ;;  %5155 = vmatpush.bf16.msra.mxu2 %v6976_v0  ;;  %v6760_v42 = vor.u32 %v7463_v49, %v6759_v19  ;;  %v7505_v30 = vld [vmem:[%s12076_s4 + $0x40c] sm:$0xf0]  ;;  %v7119_v55 = vld [vmem:[%s12076_s4 + $0x578] sm:$0xf]  ;;  %v6903_v15 = vld [vmem:[%s12076_s4 + $0x3c8] sm:$0xf] }
 0x2ba   : > { %5183 = vmatpush.bf16.msra.mxu3 %v7168_v63  ;;  %5099 = vmatpush.bf16.msrb.mxu0 %v6592_v9  ;;  %v6928_v56 = vor.u32 %v7505_v30, %v6927_v52  ;;  %v7553_v61 = vld [vmem:[%s12076_s4 + $0x58c] sm:$0xf0]  ;;  %v6543_v33 = vld [vmem:[%s12076_s4 + $0xf8] sm:$0xf]  ;;  %v7499_v26 = vld [vmem:[%s12076_s4 + $0x3dc] sm:$0xf0] }
 0x2bb   : > { %v7409_v22 = vld [vmem:[%s12076_s4 + $0x10c] sm:$0xf0]  ;;  %v7120_v27 = vor.u32 %v7553_v61, %v7119_v55  ;;  %v6735_v53 = vld [vmem:[%s12076_s4 + $0x278] sm:$0xf]  ;;  %v7095_v6 = vld [vmem:[%s12076_s4 + $0x548] sm:$0xf]  ;;  %v6904_v46 = vor.u32 %v7499_v26, %v6903_v15 }
 0x2bc   : > { %v6544_v24 = vor.u32 %v7409_v22, %v6543_v33  ;;  %v7457_v20 = vld [vmem:[%s12076_s4 + $0x28c] sm:$0xf0]  ;;  %v7547_v23 = vld [vmem:[%s12076_s4 + $0x55c] sm:$0xf0]  ;;  %v6519_v1 = vld [vmem:[%s12076_s4 + $0xc8] sm:$0xf] }
 0x2bd   : > { %5127 = vmatpush.bf16.msrb.mxu1 %v6784_v48  ;;  %5156 = vmatpush.bf16.msra.mxu2 %v6952_v50  ;;  %v6736_v43 = vor.u32 %v7457_v20, %v6735_v53  ;;  %v7096_v25 = vor.u32 %v7547_v23, %v7095_v6  ;;  %v7403_v57 = vld [vmem:[%s12076_s4 + $0xdc] sm:$0xf0]  ;;  %v6711_v3 = vld [vmem:[%s12076_s4 + $0x248] sm:$0xf]  ;;  %v6879_v16 = vld [vmem:[%s12076_s4 + $0x398] sm:$0xf] }
 0x2be   : > { %v10877_v14 = vld [vmem:[#allocation1] sm:$0xff]  ;;  %v10879_v35 = vld [vmem:[#allocation1 + $0x9] sm:$0xff]  ;;  %v10881_v38 = vld [vmem:[#allocation1 + $0x12] sm:$0xff]  ;;  %5184 = vmatpush.bf16.msra.mxu3 %v7144_v36  ;;  %5100 = vmatpush.bf16.msrb.mxu0 %v6568_v41  ;;  %v6520_v54 = vor.u32 %v7403_v57, %v6519_v1 }
 0x2bf   : > { %4893 = vmatmul.bf16.gmra.mxu0 %v10877_v14  ;;  %4921 = vmatmul.bf16.gmra.mxu1 %v10879_v35  ;;  %v10885_v29 = vld [vmem:[#allocation1 + $0x1b] sm:$0xff]  ;;  %v7493_v47 = vld [vmem:[%s12076_s4 + $0x3ac] sm:$0xf0]  ;;  %v6855_v48 = vld [vmem:[%s12076_s4 + $0x368] sm:$0xf] }
 0x2c0   : > { %4949 = vmatmul.bf16.gmra.mxu2 %v10881_v38  ;;  %4977 = vmatmul.bf16.gmra.mxu3 %v10885_v29  ;;  %3894 = vst [vmem:[#allocation1] ss:$9 sm:$0xff] %v3608_v45  ;;  %v7451_v13 = vld [vmem:[%s12076_s4 + $0x25c] sm:$0xf0]  ;;  %v7071_v0 = vld [vmem:[%s12076_s4 + $0x518] sm:$0xf]  ;;  %v6880_v10 = vor.u32 %v7493_v47, %v6879_v16 }
 0x2c1   : > { %5128 = vmatpush.bf16.msrb.mxu1 %v6760_v42  ;;  %5157 = vmatpush.bf16.msra.mxu2 %v6928_v56  ;;  %v6712_v45 = vor.u32 %v7451_v13, %v6711_v3  ;;  %v7541_v39 = vld [vmem:[%s12076_s4 + $0x52c] sm:$0xf0]  ;;  %v6495_v62 = vld [vmem:[%s12076_s4 + $0x98] sm:$0xf]  ;;  %v7487_v17 = vld [vmem:[%s12076_s4 + $0x37c] sm:$0xf0] }
 0x2c2   : > { %5185 = vmatpush.bf16.msra.mxu3 %v7120_v27  ;;  %5101 = vmatpush.bf16.msrb.mxu0 %v6544_v24  ;;  %v7397_v63 = vld [vmem:[%s12076_s4 + $0xac] sm:$0xf0]  ;;  %v7072_v58 = vor.u32 %v7541_v39, %v7071_v0  ;;  %v6687_v31 = vld [vmem:[%s12076_s4 + $0x218] sm:$0xf]  ;;  %v7047_v5 = vld [vmem:[%s12076_s4 + $0x4e8] sm:$0xf]  ;;  %v6856_v7 = vor.u32 %v7487_v17, %v6855_v48 }
 0x2c3   : > { %v6496_v21 = vor.u32 %v7397_v63, %v6495_v62  ;;  %v7445_v9 = vld [vmem:[%s12076_s4 + $0x22c] sm:$0xf0]  ;;  %v7535_v50 = vld [vmem:[%s12076_s4 + $0x4fc] sm:$0xf0]  ;;  %v6471_v44 = vld [vmem:[%s12076_s4 + $0x68] sm:$0xf] }
 0x2c4   : > { %v6688_v2 = vor.u32 %v7445_v9, %v6687_v31  ;;  %v7048_v60 = vor.u32 %v7535_v50, %v7047_v5  ;;  %v7391_v36 = vld [vmem:[%s12076_s4 + $0x7c] sm:$0xf0]  ;;  %v6663_v41 = vld [vmem:[%s12076_s4 + $0x1e8] sm:$0xf]  ;;  %v6831_v52 = vld [vmem:[%s12076_s4 + $0x338] sm:$0xf] }
 0x2c5   : > { %5129 = vmatpush.bf16.msrb.mxu1 %v6736_v43  ;;  %5158 = vmatpush.bf16.msra.mxu2 %v6904_v46  ;;  %v6472_v19 = vor.u32 %v7391_v36, %v6471_v44  ;;  %v7439_v49 = vld [vmem:[%s12076_s4 + $0x1fc] sm:$0xf0]  ;;  %v7481_v30 = vld [vmem:[%s12076_s4 + $0x34c] sm:$0xf0]  ;;  %v7023_v55 = vld [vmem:[%s12076_s4 + $0x4b8] sm:$0xf] }
 0x2c6   : > { %5186 = vmatpush.bf16.msra.mxu3 %v7096_v25  ;;  %5102 = vmatpush.bf16.msrb.mxu0 %v6520_v54  ;;  %v6664_v42 = vor.u32 %v7439_v49, %v6663_v41  ;;  %v6832_v56 = vor.u32 %v7481_v30, %v6831_v52  ;;  %v7529_v61 = vld [vmem:[%s12076_s4 + $0x4cc] sm:$0xf0]  ;;  %v6447_v33 = vld [vmem:[%s12076_s4 + $0x38] sm:$0xf]  ;;  %v6807_v15 = vld [vmem:[%s12076_s4 + $0x308] sm:$0xf] }
 0x2c7   : > { %v10937_v8 = vld [vmem:[#allocation1] sm:$0xff]  ;;  %v10939_v4 = vld [vmem:[#allocation1 + $0x9] sm:$0xff]  ;;  %v10943_v28 = vld [vmem:[#allocation1 + $0x12] sm:$0xff]  ;;  %v7024_v27 = vor.u32 %v7529_v61, %v7023_v55 }
 0x2c8   : > { %v10945_v12 = vld [vmem:[#allocation1 + $0x1b] sm:$0xff]  ;;  %v7385_v22 = vld [vmem:[%s12076_s4 + $0x4c] sm:$0xf0]  ;;  %v6999_v6 = vld [vmem:[%s12076_s4 + $0x488] sm:$0xf] }
 0x2c9   : > { %5130 = vmatpush.bf16.msrb.mxu1 %v6712_v45  ;;  %5159 = vmatpush.bf16.msra.mxu2 %v6880_v10  ;;  %v6448_v24 = vor.u32 %v7385_v22, %v6447_v33  ;;  %v6639_v53 = vld [vmem:[%s12076_s4 + $0x1b8] sm:$0xf]  ;;  %v7433_v20 = vld [vmem:[%s12076_s4 + $0x1cc] sm:$0xf0]  ;;  %v7475_v26 = vld [vmem:[%s12076_s4 + $0x31c] sm:$0xf0] }
 0x2ca   : > { %5187 = vmatpush.bf16.msra.mxu3 %v7072_v58  ;;  %5103 = vmatpush.bf16.msrb.mxu0 %v6496_v21  ;;  %v6640_v43 = vor.u32 %v7433_v20, %v6639_v53  ;;  %v7523_v23 = vld [vmem:[%s12076_s4 + $0x49c] sm:$0xf0]  ;;  %v6808_v46 = vor.u32 %v7475_v26, %v6807_v15  ;;  %v6423_v1 = vld [vmem:[%s12076_s4 + $0x8] sm:$0xf]  ;;  %v7514_v0 = vld [vmem:[%s12076_s4 + $0x45c] sm:$0xf] }
 0x2cb   : > { %v7000_v25 = vor.u32 %v7523_v23, %v6999_v6  ;;  %v7379_v57 = vld [vmem:[%s12076_s4 + $0x1c] sm:$0xf0]  ;;  %v6615_v3 = vld [vmem:[%s12076_s4 + $0x188] sm:$0xf]  ;;  %v6977_v10 = vld [vmem:[%s12076_s4 + $0x470] sm:$0xf0] }
 0x2cc   : > { %v6424_v54 = vor.u32 %v7379_v57, %v6423_v1  ;;  %v7427_v13 = vld [vmem:[%s12076_s4 + $0x19c] sm:$0xf0]  ;;  %v7562_v39 = vld [vmem:[%s12076_s4 + $0x5dc] sm:$0xf]  ;;  %v6980_v62 = vor.u32 %v7514_v0, %v6977_v10  ;;  %v7169_v63 = vld [vmem:[%s12076_s4 + $0x5f0] sm:$0xf0] }
 0x2cd   : > { %5131 = vmatpush.bf16.msrb.mxu1 %v6688_v2  ;;  %5160 = vmatpush.bf16.msra.mxu2 %v6856_v7  ;;  %v6616_v45 = vor.u32 %v7427_v13, %v6615_v3  ;;  %v7172_v58 = vor.u32 %v7562_v39, %v7169_v63  ;;  %v7418_v9 = vld [vmem:[%s12076_s4 + $0x15c] sm:$0xf]  ;;  %v6593_v48 = vld [vmem:[%s12076_s4 + $0x170] sm:$0xf0]  ;;  %v7508_v50 = vld [vmem:[%s12076_s4 + $0x42c] sm:$0xf] }
 0x2ce   : > { %5188 = vmatpush.bf16.msra.mxu3 %v7048_v60  ;;  %5104 = vmatpush.bf16.msrb.mxu0 %v6472_v19  ;;  %v7466_v2 = vld [vmem:[%s12076_s4 + $0x2dc] sm:$0xf]  ;;  %v6596_v17 = vor.u32 %v7418_v9, %v6593_v48  ;;  %v6785_v5 = vld [vmem:[%s12076_s4 + $0x2f0] sm:$0xf0]  ;;  %v6953_v7 = vld [vmem:[%s12076_s4 + $0x440] sm:$0xf0] }
 0x2cf   : > { %4898 = vmatmul.bf16.gmra.mxu0 %v10937_v8  ;;  %4926 = vmatmul.bf16.gmra.mxu1 %v10939_v4  ;;  %v6788_v60 = vor.u32 %v7466_v2, %v6785_v5  ;;  %v6956_v44 = vor.u32 %v7508_v50, %v6953_v7  ;;  %v7556_v36 = vld [vmem:[%s12076_s4 + $0x5ac] sm:$0xf]  ;;  %v7145_v41 = vld [vmem:[%s12076_s4 + $0x5c0] sm:$0xf0]  ;;  %v6929_v61 = vld [vmem:[%s12076_s4 + $0x410] sm:$0xf0] }
 0x2d0   : > { %4954 = vmatmul.bf16.gmra.mxu2 %v10943_v28  ;;  %4982 = vmatmul.bf16.gmra.mxu3 %v10945_v12  ;;  %v7148_v19 = vor.u32 %v7556_v36, %v7145_v41  ;;  %v7412_v49 = vld [vmem:[%s12076_s4 + $0x12c] sm:$0xf]  ;;  %v6761_v55 = vld [vmem:[%s12076_s4 + $0x2c0] sm:$0xf0]  ;;  %v7406_v26 = vld [vmem:[%s12076_s4 + $0xfc] sm:$0xf] }
 0x2d1   : > { %5132 = vmatpush.bf16.msrb.mxu1 %v6664_v42  ;;  %5161 = vmatpush.bf16.msra.mxu2 %v6832_v56  ;;  %v6569_v42 = vld [vmem:[%s12076_s4 + $0x140] sm:$0xf0]  ;;  %v7460_v52 = vld [vmem:[%s12076_s4 + $0x2ac] sm:$0xf]  ;;  %v7502_v56 = vld [vmem:[%s12076_s4 + $0x3fc] sm:$0xf] }
 0x2d2   : > { %5189 = vmatpush.bf16.msra.mxu3 %v7024_v27  ;;  %5105 = vmatpush.bf16.msrb.mxu0 %v6448_v24  ;;  %v6572_v30 = vor.u32 %v7412_v49, %v6569_v42  ;;  %v6764_v33 = vor.u32 %v7460_v52, %v6761_v55  ;;  %v6932_v22 = vor.u32 %v7502_v56, %v6929_v61  ;;  %v7550_v27 = vld [vmem:[%s12076_s4 + $0x57c] sm:$0xf]  ;;  %v7121_v24 = vld [vmem:[%s12076_s4 + $0x590] sm:$0xf0]  ;;  %v7496_v1 = vld [vmem:[%s12076_s4 + $0x3cc] sm:$0xf] }
 0x2d3   : > { %v7124_v53 = vor.u32 %v7550_v27, %v7121_v24  ;;  %v6545_v6 = vld [vmem:[%s12076_s4 + $0x110] sm:$0xf0]  ;;  %v7454_v23 = vld [vmem:[%s12076_s4 + $0x27c] sm:$0xf]  ;;  %v6905_v57 = vld [vmem:[%s12076_s4 + $0x3e0] sm:$0xf0] }
 0x2d4   : > { %v7544_v13 = vld [vmem:[%s12076_s4 + $0x54c] sm:$0xf]  ;;  %v11200_v0 = vld [vmem:[%s12077_s5] sm:$0x3f]  ;;  %v7490_v50 = vld [vmem:[%s12076_s4 + $0x39c] sm:$0xf] }
 0x2d5   : > { %5133 = vmatpush.bf16.msrb.mxu1 %v6640_v43  ;;  %5162 = vmatpush.bf16.msra.mxu2 %v6808_v46  ;;  %v6548_v46 = vor.u32 %v7406_v26, %v6545_v6  ;;  %v7400_v9 = vld [vmem:[%s12076_s4 + $0xcc] sm:$0xf]  ;;  %v6521_v48 = vld [vmem:[%s12076_s4 + $0xe0] sm:$0xf0]  ;;  %v6881_v7 = vld [vmem:[%s12076_s4 + $0x3b0] sm:$0xf0] }
 0x2d6   : > { %5190 = vmatpush.bf16.msra.mxu3 %v7000_v25  ;;  %5106 = vmatpush.bf16.msrb.mxu0 %v6424_v54  ;;  %v6737_v25 = vld [vmem:[%s12076_s4 + $0x290] sm:$0xf0]  ;;  %v6908_v54 = vor.u32 %v7496_v1, %v6905_v57  ;;  %v7448_v2 = vld [vmem:[%s12076_s4 + $0x24c] sm:$0xf]  ;;  %v6713_v5 = vld [vmem:[%s12076_s4 + $0x260] sm:$0xf0]  ;;  %v6884_v36 = vor.u32 %v7490_v50, %v6881_v7 }
 0x2d7   : > { %v6740_v3 = vor.u32 %v7454_v23, %v6737_v25  ;;  %v7538_v41 = vld [vmem:[%s12076_s4 + $0x51c] sm:$0xf]  ;;  %v6689_v6 = vld [vmem:[%s12076_s4 + $0x230] sm:$0xf0]  ;;  %v7484_v23 = vld [vmem:[%s12076_s4 + $0x36c] sm:$0xf] }
 0x2d8   : > { %v7394_v24 = vld [vmem:[%s12076_s4 + $0x9c] sm:$0xf]  ;;  %v7532_v57 = vld [vmem:[%s12076_s4 + $0x4ec] sm:$0xf]  ;;  %v6665_v50 = vld [vmem:[%s12076_s4 + $0x200] sm:$0xf0] }
 0x2d9   : > { %5134 = vmatpush.bf16.msrb.mxu1 %v6616_v45  ;;  %v7097_v45 = vld [vmem:[%s12076_s4 + $0x560] sm:$0xf0]  ;;  %v7478_v7 = vld [vmem:[%s12076_s4 + $0x33c] sm:$0xf] }
 0x2df   : > { %4995 = vmatmul.bf16.vlgmr.msra.gmra.mxu0 %v10621_v11  ;;  %5023 = vmatmul.bf16.vlgmr.msra.gmra.mxu1 %v10623_v59 }
 0x2e0   : > { %5051 = vmatmul.bf16.vlgmr.msrb.gmra.mxu2 %v10625_v51  ;;  %5079 = vmatmul.bf16.vlgmr.msrb.gmra.mxu3 %v10639_v32 }
 0x2e1   : > { %5267 = vmatpush.bf16.msrb.mxu2 %v6980_v62  ;;  %5295 = vmatpush.bf16.msrb.mxu3 %v7172_v58 }
 0x2e2   : > { %5211 = vmatpush.bf16.msra.mxu0 %v6596_v17  ;;  %5239 = vmatpush.bf16.msra.mxu1 %v6788_v60  ;;  %v6524_v17 = vor.u32 %v7400_v9, %v6521_v48  ;;  %v11226_v60 = vld [vmem:[%s12078_s6] sm:$0x3f]  ;;  %v7388_v48 = vld [vmem:[%s12076_s4 + $0x6c] sm:$0xf] }
 0x2e5   : > { %5268 = vmatpush.bf16.msrb.mxu2 %v6956_v44  ;;  %5296 = vmatpush.bf16.msrb.mxu3 %v7148_v19  ;;  %v6716_v44 = vor.u32 %v7448_v2, %v6713_v5  ;;  %v7073_v19 = vld [vmem:[%s12076_s4 + $0x530] sm:$0xf0]  ;;  %v6473_v2 = vld [vmem:[%s12076_s4 + $0x80] sm:$0xf0] }
 0x2e6   : > { %5212 = vmatpush.bf16.msra.mxu0 %v6572_v30  ;;  %5240 = vmatpush.bf16.msra.mxu1 %v6764_v33  ;;  %v7076_v49 = vor.u32 %v7538_v41, %v7073_v19  ;;  %v11236_v30 = vperm.slane %v11226_v60, 0  ;;  %v6476_v5 = vor.u32 %v7388_v48, %v6473_v2 }
 0x2e9   : > { %5269 = vmatpush.bf16.msrb.mxu2 %v6932_v22  ;;  %5297 = vmatpush.bf16.msrb.mxu3 %v7124_v53  ;;  %v6497_v53 = vld [vmem:[%s12076_s4 + $0xb0] sm:$0xf0] }
 0x2ea   : > { %5213 = vmatpush.bf16.msra.mxu0 %v6548_v46  ;;  %5241 = vmatpush.bf16.msra.mxu1 %v6740_v3  ;;  %v6500_v26 = vor.u32 %v7394_v24, %v6497_v53  ;;  %v6857_v46 = vld [vmem:[%s12076_s4 + $0x380] sm:$0xf0] }
 0x2eb   : > { %v6860_v1 = vor.u32 %v7484_v23, %v6857_v46  ;;  %v7049_v3 = vld [vmem:[%s12076_s4 + $0x500] sm:$0xf0] }
 0x2ed   : > { %5270 = vmatpush.bf16.msrb.mxu2 %v6908_v54 }
 0x2ee   : > { %5214 = vmatpush.bf16.msra.mxu0 %v6524_v17  ;;  %5242 = vmatpush.bf16.msra.mxu1 %v6716_v44  ;;  %v7436_v17 = vld [vmem:[%s12076_s4 + $0x1ec] sm:$0xf]  ;;  %v6833_v44 = vld [vmem:[%s12076_s4 + $0x350] sm:$0xf0] }
 0x2ef   : > { %5000 = vmatmul.bf16.gmra.mxu0 %v10802_v37  ;;  %5028 = vmatmul.bf16.gmra.mxu1 %v10804_v18  ;;  %v6668_v41 = vor.u32 %v7436_v17, %v6665_v50  ;;  %v6836_v19 = vor.u32 %v7478_v7, %v6833_v44  ;;  %v7001_v17 = vld [vmem:[%s12076_s4 + $0x4a0] sm:$0xf0] }
 0x2f0   : > { %5056 = vmatmul.bf16.gmra.mxu2 %v10806_v40  ;;  %5084 = vmatmul.bf16.gmra.mxu3 %v10814_v34  ;;  %v6425_v50 = vld [vmem:[%s12076_s4 + $0x20] sm:$0xf0] }
 0x2f1   : > { %5271 = vmatpush.bf16.msrb.mxu2 %v6884_v36 }
 0x2f2   : > { %5215 = vmatpush.bf16.msra.mxu0 %v6500_v26 }
 0x2f5   : > { %5272 = vmatpush.bf16.msrb.mxu2 %v6860_v1 }
 0x2f6   : > { %5216 = vmatpush.bf16.msra.mxu0 %v6476_v5  ;;  %v7376_v5 = vld [vmem:[%s12076_s4 + $0xc] sm:$0xf] }
 0x2f9   : > { %5273 = vmatpush.bf16.msrb.mxu2 %v6836_v19  ;;  %v7424_v19 = vld [vmem:[%s12076_s4 + $0x18c] sm:$0xf] }
 0x2ff   : > { %5005 = vmatmul.bf16.gmra.mxu0 %v10877_v14  ;;  %5033 = vmatmul.bf16.gmra.mxu1 %v10879_v35  ;;  %v2079_v16 = vpop.f32.mrf.mxu2 }
 0x300   : > { %5061 = vmatmul.bf16.gmra.mxu2 %v10881_v38  ;;  %5089 = vmatmul.bf16.gmra.mxu3 %v10885_v29  ;;  %v2725_v47 = vpop.f32.mrf.mxu3  ;;  %v7100_v16 = vor.u32 %v7544_v13, %v7097_v45  ;;  %v7052_v13 = vor.u32 %v7532_v57, %v7049_v3 }
 0x302   : > { %5298 = vmatpush.bf16.msrb.mxu3 %v7100_v16 }
 0x306   : > { %5299 = vmatpush.bf16.msrb.mxu3 %v7076_v49  ;;  %v7526_v49 = vld [vmem:[%s12076_s4 + $0x4bc] sm:$0xf] }
 0x307   : > { %v2080_v21 = vpop.f32.mrf.mxu2 }
 0x308   : > { %v2726_v31 = vpop.f32.mrf.mxu3  ;;  %v11203_v21 = vperm.slane %v11200_v0, 0 }
 0x30a   : > { %5300 = vmatpush.bf16.msrb.mxu3 %v7052_v13  ;;  %v6449_v13 = vld [vmem:[%s12076_s4 + $0x50] sm:$0xf0] }
 0x30f   : > { %5010 = vmatmul.bf16.gmra.mxu0 %v10937_v8  ;;  %5038 = vmatmul.bf16.gmra.mxu1 %v10939_v4 }
 0x310   : > { %5066 = vmatmul.bf16.gmra.mxu2 %v10943_v28  ;;  %5094 = vmatmul.bf16.gmra.mxu3 %v10945_v12 }
 0x31a   : > { %v4884_v20 = vpop.f32.mrf.mxu0  ;;  %v4912_v15 = vpop.f32.mrf.mxu1 }
 0x31b   : > { %v4913_v43 = vadd.f32 %v4912_v15, %v4884_v20  ;;  %v7442_v20 = vld [vmem:[%s12076_s4 + $0x21c] sm:$0xf] }
 0x31c   : > { %v6692_v25 = vor.u32 %v7442_v20, %v6689_v6 }
 0x31e   : > { %5243 = vmatpush.bf16.msra.mxu1 %v6692_v25 }
 0x31f   : > { %5107 = vmatmul.bf16.vlgmr.msrb.gmra.mxu0 %v10621_v11  ;;  %5135 = vmatmul.bf16.vlgmr.msrb.gmra.mxu1 %v10623_v59 }
 0x320   : > { %5163 = vmatmul.bf16.vlgmr.msra.gmra.mxu2 %v10625_v51  ;;  %5191 = vmatmul.bf16.vlgmr.msra.gmra.mxu3 %v10639_v32 }
 0x322   : > { %v4940_v47 = vpop.f32.mrf.mxu2  ;;  %v4968_v39 = vpop.f32.mrf.mxu3  ;;  %5244 = vmatpush.bf16.msra.mxu1 %v6668_v41  ;;  %v6428_v41 = vor.u32 %v7376_v5, %v6425_v50  ;;  %v7464_v5 = vld [vmem:[%s12076_s4 + $0x2c4] sm:$0xf0]  ;;  %v6935_v50 = vld [vmem:[%s12076_s4 + $0x400] sm:$0xf] }
 0x323   : > { %v4941_v10 = vadd.f32 %v4940_v47, %v4913_v43  ;;  %v4886_v62 = vpop.f32.mrf.mxu0  ;;  %v4914_v63 = vpop.f32.mrf.mxu1 }
 0x324   : > { %v4915_v31 = vadd.f32 %v4914_v63, %v4886_v62 }
 0x325   : > { %v4969_v58 = vadd.f32 %v4968_v39, %v4941_v10 }
 0x327   : > { %v5561_v52 = vmul.f32 %v11203_v21, %v4969_v58 }
 0x329   : > { %v5617_v15 = vadd.f32 %v11236_v30, %v5561_v52 }
 0x32a   : > { %v4942_v42 = vpop.f32.mrf.mxu2  ;;  %v4970_v56 = vpop.f32.mrf.mxu3 }
 0x32b   : > { %v4943_v55 = vadd.f32 %v4942_v42, %v4915_v31  ;;  %v5659_v45 = vmax.f32 %v5617_v15, 0.0  ;;  %v7025_v42 = vld [vmem:[%s12076_s4 + $0x4d0] sm:$0xf0] }
 0x32c   : > { %v4889_v61 = vpop.f32.mrf.mxu0  ;;  %v4917_v33 = vpop.f32.mrf.mxu1  ;;  %v7028_v52 = vor.u32 %v7526_v49, %v7025_v42  ;;  %v6617_v49 = vld [vmem:[%s12076_s4 + $0x1a0] sm:$0xf0]  ;;  %v6983_v42 = vld [vmem:[%s12076_s4 + $0x460] sm:$0xf] }
 0x32d   : > { %v4971_v22 = vadd.f32 %v4970_v56, %v4943_v55  ;;  %v4918_v27 = vadd.f32 %v4917_v33, %v4889_v61 }
 0x32e   : > { %5301 = vmatpush.bf16.msrb.mxu3 %v7028_v52 }
 0x32f   : > { %v5567_v43 = vmul.f32 %v11203_v21, %v4971_v22  ;;  %5112 = vmatmul.bf16.gmra.mxu0 %v10802_v37  ;;  %5140 = vmatmul.bf16.gmra.mxu1 %v10804_v18 }
 0x330   : > { %5168 = vmatmul.bf16.gmra.mxu2 %v10806_v40  ;;  %5196 = vmatmul.bf16.gmra.mxu3 %v10814_v34 }
 0x331   : > { %v5623_v54 = vadd.f32 %v11236_v30, %v5567_v43 }
 0x333   : > { %v5665_v16 = vmax.f32 %v5623_v54, 0.0  ;;  %v4945_v47 = vpop.f32.mrf.mxu2  ;;  %v4973_v10 = vpop.f32.mrf.mxu3  ;;  %v7382_v54 = vld [vmem:[%s12076_s4 + $0x3c] sm:$0xf] }
 0x334   : > { %v4946_v39 = vadd.f32 %v4945_v47, %v4918_v27  ;;  %v4891_v62 = vpop.f32.mrf.mxu0  ;;  %v4919_v63 = vpop.f32.mrf.mxu1 }
 0x335   : > { %v5701_v58 = vadd.f32 %v5665_v16, %v5659_v45  ;;  %v4920_v31 = vadd.f32 %v4919_v63, %v4891_v62  ;;  %v7430_v45 = vld [vmem:[%s12076_s4 + $0x1bc] sm:$0xf] }
 0x336   : > { %v4974_v9 = vadd.f32 %v4973_v10, %v4946_v39  ;;  %v6452_v10 = vor.u32 %v7382_v54, %v6449_v13  ;;  %v6641_v39 = vld [vmem:[%s12076_s4 + $0x1d0] sm:$0xf0]  ;;  %v7512_v54 = vld [vmem:[%s12076_s4 + $0x444] sm:$0xf0]  ;;  %v7151_v13 = vld [vmem:[%s12076_s4 + $0x5b0] sm:$0xf] }
 0x337   : > { %v6644_v62 = vor.u32 %v7430_v45, %v6641_v39 }
 0x338   : > { %v5573_v36 = vmul.f32 %v11203_v21, %v4974_v9  ;;  %5217 = vmatpush.bf16.msra.mxu0 %v6452_v10  ;;  %v7520_v9 = vld [vmem:[%s12076_s4 + $0x48c] sm:$0xf] }
 0x339   : > { %5245 = vmatpush.bf16.msra.mxu1 %v6644_v62 }
 0x33a   : > { %v5629_v55 = vadd.f32 %v11236_v30, %v5573_v36  ;;  %v7004_v36 = vor.u32 %v7520_v9, %v7001_v17  ;;  %v6575_v9 = vld [vmem:[%s12076_s4 + $0x130] sm:$0xf] }
 0x33b   : > { %v4947_v56 = vpop.f32.mrf.mxu2  ;;  %v4975_v61 = vpop.f32.mrf.mxu3 }
 0x33c   : > { %v5671_v33 = vmax.f32 %v5629_v55, 0.0  ;;  %v4948_v22 = vadd.f32 %v4947_v56, %v4920_v31  ;;  %v4894_v27 = vpop.f32.mrf.mxu0  ;;  %v4922_v24 = vpop.f32.mrf.mxu1  ;;  %v6809_v31 = vld [vmem:[%s12076_s4 + $0x320] sm:$0xf0]  ;;  %5302 = vmatpush.bf16.msrb.mxu3 %v7004_v36  ;;  %5218 = vmatpush.bf16.msra.mxu0 %v6428_v41 }
 0x33d   : > { %v4923_v53 = vadd.f32 %v4922_v24, %v4894_v27  ;;  %v7175_v27 = vld [vmem:[%s12076_s4 + $0x5e0] sm:$0xf] }
 0x33e   : > { %v5702_v20 = vadd.f32 %v5701_v58, %v5671_v33  ;;  %v4976_v15 = vadd.f32 %v4975_v61, %v4948_v22  ;;  %v7472_v58 = vld [vmem:[%s12076_s4 + $0x30c] sm:$0xf]  ;;  %v6620_v33 = vor.u32 %v7424_v19, %v6617_v49  ;;  %v7518_v22 = vld [vmem:[%s12076_s4 + $0x474] sm:$0xf0]  ;;  %v7127_v19 = vld [vmem:[%s12076_s4 + $0x580] sm:$0xf] }
 0x33f   : > { %5117 = vmatmul.bf16.gmra.mxu0 %v10877_v14  ;;  %5145 = vmatmul.bf16.gmra.mxu1 %v10879_v35  ;;  %v6812_v2 = vor.u32 %v7472_v58, %v6809_v31  ;;  %v7554_v49 = vld [vmem:[%s12076_s4 + $0x594] sm:$0xf0] }
 0x340   : > { %v5579_v43 = vmul.f32 %v11203_v21, %v4976_v15  ;;  %5173 = vmatmul.bf16.gmra.mxu2 %v10881_v38  ;;  %5201 = vmatmul.bf16.gmra.mxu3 %v10885_v29  ;;  %v6599_v15 = vld [vmem:[%s12076_s4 + $0x160] sm:$0xf] }
 0x341   : > { %5274 = vmatpush.bf16.msrb.mxu2 %v6812_v2  ;;  %5246 = vmatpush.bf16.msra.mxu1 %v6620_v33  ;;  %v6767_v2 = vld [vmem:[%s12076_s4 + $0x2b0] sm:$0xf] }
 0x342   : > { %v5635_v26 = vadd.f32 %v11236_v30, %v5579_v43  ;;  %v6768_v36 = vor.u32 %v7464_v5, %v6767_v2  ;;  %v7542_v2 = vld [vmem:[%s12076_s4 + $0x534] sm:$0xf0] }
 0x343   : > { %v4950_v6 = vpop.f32.mrf.mxu2  ;;  %v4978_v23 = vpop.f32.mrf.mxu3 }
 0x344   : > { %v5677_v46 = vmax.f32 %v5635_v26, 0.0  ;;  %v4951_v25 = vadd.f32 %v4950_v6, %v4923_v53  ;;  %v4896_v1 = vpop.f32.mrf.mxu0  ;;  %v4924_v57 = vpop.f32.mrf.mxu1  ;;  %v6984_v53 = vor.u32 %v7518_v22, %v6983_v42  ;;  %v7128_v42 = vor.u32 %v7554_v49, %v7127_v19 }
 0x345   : > { %v4925_v3 = vadd.f32 %v4924_v57, %v4896_v1 }
 0x346   : > { %v5703_v16 = vadd.f32 %v5702_v20, %v5677_v46  ;;  %v4979_v47 = vadd.f32 %v4978_v23, %v4951_v25  ;;  %v7566_v20 = vld [vmem:[%s12076_s4 + $0x5f4] sm:$0xf0]  ;;  %v6791_v46 = vld [vmem:[%s12076_s4 + $0x2e0] sm:$0xf]  ;;  %5379 = vmatpush.bf16.msra.mxu2 %v6984_v53 }
 0x347   : > { %v7176_v6 = vor.u32 %v7566_v20, %v7175_v27  ;;  %v7422_v23 = vld [vmem:[%s12076_s4 + $0x174] sm:$0xf0] }
 0x348   : > { %v5585_v63 = vmul.f32 %v11203_v21, %v4979_v47  ;;  %v7470_v25 = vld [vmem:[%s12076_s4 + $0x2f4] sm:$0xf0]  ;;  %v6600_v1 = vor.u32 %v7422_v23, %v6599_v15  ;;  %v6743_v15 = vld [vmem:[%s12076_s4 + $0x280] sm:$0xf]  ;;  %v7500_v23 = vld [vmem:[%s12076_s4 + $0x3e4] sm:$0xf0] }
 0x349   : > { %v6792_v57 = vor.u32 %v7470_v25, %v6791_v46  ;;  %5407 = vmatpush.bf16.msra.mxu3 %v7176_v6  ;;  %v7410_v53 = vld [vmem:[%s12076_s4 + $0x114] sm:$0xf0]  ;;  %v7103_v46 = vld [vmem:[%s12076_s4 + $0x550] sm:$0xf]  ;;  %v7548_v25 = vld [vmem:[%s12076_s4 + $0x564] sm:$0xf0] }
 0x34a   : > { %v5641_v48 = vadd.f32 %v11236_v30, %v5585_v63  ;;  %5323 = vmatpush.bf16.msrb.mxu0 %v6600_v1 }
 0x34b   : > { %v4952_v7 = vpop.f32.mrf.mxu2  ;;  %v4980_v44 = vpop.f32.mrf.mxu3  ;;  %5351 = vmatpush.bf16.msrb.mxu1 %v6792_v57  ;;  %v7104_v57 = vor.u32 %v7548_v25, %v7103_v46 }
 0x34c   : > { %v5683_v52 = vmax.f32 %v5641_v48, 0.0  ;;  %v4953_v55 = vadd.f32 %v4952_v7, %v4925_v3  ;;  %v4899_v56 = vpop.f32.mrf.mxu0  ;;  %v4927_v61 = vpop.f32.mrf.mxu1  ;;  %v6959_v3 = vld [vmem:[%s12076_s4 + $0x430] sm:$0xf]  ;;  %v7416_v48 = vld [vmem:[%s12076_s4 + $0x144] sm:$0xf0] }
 0x34d   : > { %v4928_v24 = vadd.f32 %v4927_v61, %v4899_v56  ;;  %v6576_v17 = vor.u32 %v7416_v48, %v6575_v9  ;;  %v7506_v7 = vld [vmem:[%s12076_s4 + $0x414] sm:$0xf0]  ;;  %v7079_v48 = vld [vmem:[%s12076_s4 + $0x520] sm:$0xf] }
 0x34e   : > { %v5704_v43 = vadd.f32 %v5703_v16, %v5683_v52  ;;  %v4981_v26 = vadd.f32 %v4980_v44, %v4953_v55  ;;  %v6936_v41 = vor.u32 %v7506_v7, %v6935_v50  ;;  %v11467_v50 = vperm.slane %v11226_v60, 1 }
 0x34f   : > { %5122 = vmatmul.bf16.gmra.mxu0 %v10937_v8  ;;  %5150 = vmatmul.bf16.gmra.mxu1 %v10939_v4  ;;  %v7560_v8 = vld [vmem:[%s12076_s4 + $0x5c4] sm:$0xf0]  ;;  %v6960_v4 = vor.u32 %v7512_v54, %v6959_v3 }
 0x350   : > { %v5591_v45 = vmul.f32 %v11203_v21, %v4981_v26  ;;  %5178 = vmatmul.bf16.gmra.mxu2 %v10943_v28  ;;  %5206 = vmatmul.bf16.gmra.mxu3 %v10945_v12  ;;  %v7152_v16 = vor.u32 %v7560_v8, %v7151_v13  ;;  %v6911_v26 = vld [vmem:[%s12076_s4 + $0x3d0] sm:$0xf] }
 0x351   : > { %5380 = vmatpush.bf16.msra.mxu2 %v6960_v4  ;;  %5324 = vmatpush.bf16.msrb.mxu0 %v6576_v17  ;;  %v6912_v1 = vor.u32 %v7500_v23, %v6911_v26  ;;  %v11439_v4 = vperm.slane %v11200_v0, 1  ;;  %v7080_v17 = vor.u32 %v7542_v2, %v7079_v48  ;;  %v7530_v48 = vld [vmem:[%s12076_s4 + $0x4d4] sm:$0xf0] }
 0x352   : > { %v5647_v47 = vadd.f32 %v11236_v30, %v5591_v45  ;;  %5408 = vmatpush.bf16.msra.mxu3 %v7152_v16  ;;  %5352 = vmatpush.bf16.msrb.mxu1 %v6768_v36 }
 0x353   : > { %v4955_v10 = vpop.f32.mrf.mxu2  ;;  %v4983_v39 = vpop.f32.mrf.mxu3 }
 0x354   : > { %v5689_v62 = vmax.f32 %v5647_v47, 0.0  ;;  %v4956_v63 = vadd.f32 %v4955_v10, %v4928_v24  ;;  %v4901_v58 = vpop.f32.mrf.mxu0  ;;  %v4929_v28 = vpop.f32.mrf.mxu1  ;;  %v6551_v24 = vld [vmem:[%s12076_s4 + $0x100] sm:$0xf]  ;;  %v6527_v10 = vld [vmem:[%s12076_s4 + $0xd0] sm:$0xf] }
 0x355   : > { %5381 = vmatpush.bf16.msra.mxu2 %v6936_v41  ;;  %v6552_v20 = vor.u32 %v7410_v53, %v6551_v24  ;;  %v7452_v58 = vld [vmem:[%s12076_s4 + $0x264] sm:$0xf0]  ;;  %v6887_v28 = vld [vmem:[%s12076_s4 + $0x3a0] sm:$0xf] }
 0x356   : > { %v5705_v12 = vadd.f32 %v5704_v43, %v5689_v62  ;;  %v4984_v31 = vadd.f32 %v4983_v39, %v4956_v63  ;;  %5409 = vmatpush.bf16.msra.mxu3 %v7128_v42  ;;  %v7458_v43 = vld [vmem:[%s12076_s4 + $0x294] sm:$0xf0]  ;;  %v7404_v39 = vld [vmem:[%s12076_s4 + $0xe4] sm:$0xf0]  ;;  %v6719_v62 = vld [vmem:[%s12076_s4 + $0x250] sm:$0xf] }
 0x357   : > { %v6744_v6 = vor.u32 %v7458_v43, %v6743_v15  ;;  %5325 = vmatpush.bf16.msrb.mxu0 %v6552_v20  ;;  %v6528_v63 = vor.u32 %v7404_v39, %v6527_v10  ;;  %v7055_v15 = vld [vmem:[%s12076_s4 + $0x4f0] sm:$0xf]  ;;  %v7536_v43 = vld [vmem:[%s12076_s4 + $0x504] sm:$0xf0] }
 0x358   : > { %v5597_v44 = vmul.f32 %v11203_v21, %v4984_v31  ;;  %v6720_v31 = vor.u32 %v7452_v58, %v6719_v62  ;;  %v7056_v26 = vor.u32 %v7536_v43, %v7055_v15  ;;  %v6671_v10 = vld [vmem:[%s12076_s4 + $0x1f0] sm:$0xf]  ;;  %v7440_v62 = vld [vmem:[%s12076_s4 + $0x204] sm:$0xf0]  ;;  %v7482_v58 = vld [vmem:[%s12076_s4 + $0x354] sm:$0xf0] }
 0x359   : > { %5353 = vmatpush.bf16.msrb.mxu1 %v6744_v6  ;;  %5382 = vmatpush.bf16.msra.mxu2 %v6912_v1  ;;  %v7386_v15 = vld [vmem:[%s12076_s4 + $0x54] sm:$0xf0]  ;;  %v6647_v43 = vld [vmem:[%s12076_s4 + $0x1c0] sm:$0xf] }
 0x35a   : > { %v5653_v52 = vadd.f32 %v11236_v30, %v5597_v44  ;;  %5410 = vmatpush.bf16.msra.mxu3 %v7104_v57 }
 0x35b   : > { %v4957_v55 = vpop.f32.mrf.mxu2  ;;  %v4985_v56 = vpop.f32.mrf.mxu3  ;;  %5326 = vmatpush.bf16.msrb.mxu0 %v6528_v63  ;;  %v6839_v63 = vld [vmem:[%s12076_s4 + $0x340] sm:$0xf] }
 0x35c   : > { %v5695_v21 = vmax.f32 %v5653_v52, 0.0  ;;  %v4996_v61 = vpop.f32.mrf.mxu0  ;;  %v5024_v33 = vpop.f32.mrf.mxu1  ;;  %v6503_v52 = vld [vmem:[%s12076_s4 + $0xa0] sm:$0xf]  ;;  %v7398_v55 = vld [vmem:[%s12076_s4 + $0xb4] sm:$0xf0] }
 0x35d   : > { %v5025_v22 = vadd.f32 %v5024_v33, %v4996_v61  ;;  %5354 = vmatpush.bf16.msrb.mxu1 %v6720_v31  ;;  %v6695_v56 = vld [vmem:[%s12076_s4 + $0x220] sm:$0xf]  ;;  %v6504_v61 = vor.u32 %v7398_v55, %v6503_v52  ;;  %v7446_v33 = vld [vmem:[%s12076_s4 + $0x234] sm:$0xf0]  ;;  %v6840_v31 = vor.u32 %v7482_v58, %v6839_v63  ;;  %v6623_v58 = vld [vmem:[%s12076_s4 + $0x190] sm:$0xf] }
 0x35e   : > { %v5706_v27 = vsel %vm760_vm2, %v5695_v21, 0.0  ;;  %5411 = vmatpush.bf16.msra.mxu3 %v7080_v17  ;;  %v6696_v53 = vor.u32 %v7446_v33, %v6695_v56 }
 0x35f   : > { %v11414_v30 = vadd.f32 %v5706_v27, %v5705_v12  ;;  %5219 = vmatmul.bf16.vlgmr.msra.gmra.mxu0 %v10621_v11  ;;  %5247 = vmatmul.bf16.vlgmr.msra.gmra.mxu1 %v10623_v59  ;;  %v7494_v12 = vld [vmem:[%s12076_s4 + $0x3b4] sm:$0xf0]  ;;  %v7488_v27 = vld [vmem:[%s12076_s4 + $0x384] sm:$0xf0] }
 0x360   : > { %5275 = vmatmul.bf16.vlgmr.msrb.gmra.mxu2 %v10625_v51  ;;  %5303 = vmatmul.bf16.vlgmr.msrb.gmra.mxu3 %v10639_v32  ;;  %v6888_v9 = vor.u32 %v7494_v12, %v6887_v28  ;;  %v6672_v12 = vor.u32 %v7440_v62, %v6671_v10 }
 0x361   : > { %5327 = vmatpush.bf16.msrb.mxu0 %v6504_v61  ;;  %5355 = vmatpush.bf16.msrb.mxu1 %v6696_v53 }
 0x362   : > { %5383 = vmatpush.bf16.msra.mxu2 %v6888_v9  ;;  %5412 = vmatpush.bf16.msra.mxu3 %v7056_v26  ;;  %v7031_v9 = vld [vmem:[%s12076_s4 + $0x4c0] sm:$0xf] }
 0x363   : > { %v5052_v3 = vpop.f32.mrf.mxu2  ;;  %v5080_v54 = vpop.f32.mrf.mxu3  ;;  %v7032_v2 = vor.u32 %v7530_v48, %v7031_v9 }
 0x364   : > { %v5053_v13 = vadd.f32 %v5052_v3, %v5025_v22  ;;  %v4998_v45 = vpop.f32.mrf.mxu0  ;;  %v5026_v8 = vpop.f32.mrf.mxu1  ;;  %v6863_v22 = vld [vmem:[%s12076_s4 + $0x370] sm:$0xf] }
 0x365   : > { %v5027_v16 = vadd.f32 %v5026_v8, %v4998_v45  ;;  %v6864_v20 = vor.u32 %v7488_v27, %v6863_v22  ;;  %5356 = vmatpush.bf16.msrb.mxu1 %v6672_v12  ;;  %v7515_v12 = vld [vmem:[%s12076_s4 + $0x464] sm:$0xf] }
 0x366   : > { %v5081_v47 = vadd.f32 %v5080_v54, %v5053_v13  ;;  %5413 = vmatpush.bf16.msra.mxu3 %v7032_v2 }
 0x367   : > { %5384 = vmatpush.bf16.msra.mxu2 %v6864_v20  ;;  %v6455_v20 = vld [vmem:[%s12076_s4 + $0x40] sm:$0xf] }
 0x368   : > { %v5562_v5 = vmul.f32 %v11439_v4, %v5081_v47  ;;  %v7392_v47 = vld [vmem:[%s12076_s4 + $0x84] sm:$0xf0] }
 0x36a   : > { %v5618_v21 = vadd.f32 %v11467_v50, %v5562_v5 }
 0x36b   : > { %v5054_v7 = vpop.f32.mrf.mxu2  ;;  %v5082_v44 = vpop.f32.mrf.mxu3  ;;  %5385 = vmatpush.bf16.msra.mxu2 %v6840_v31 }
 0x36c   : > { %v5055_v36 = vadd.f32 %v5054_v7, %v5027_v16  ;;  %v5001_v41 = vpop.f32.mrf.mxu0  ;;  %v5029_v19 = vpop.f32.mrf.mxu1  ;;  %v5660_v25 = vmax.f32 %v5618_v21, 0.0  ;;  %v6479_v16 = vld [vmem:[%s12076_s4 + $0x70] sm:$0xf] }
 0x36d   : > { %v5030_v49 = vadd.f32 %v5029_v19, %v5001_v41  ;;  %v6480_v39 = vor.u32 %v7392_v47, %v6479_v16  ;;  %v6431_v16 = vld [vmem:[%s12076_s4 + $0x10] sm:$0xf]  ;;  %v7380_v47 = vld [vmem:[%s12076_s4 + $0x24] sm:$0xf0] }
 0x36e   : > { %v5083_v42 = vadd.f32 %v5082_v44, %v5055_v36  ;;  %v6432_v63 = vor.u32 %v7380_v47, %v6431_v16  ;;  %v7413_v47 = vld [vmem:[%s12076_s4 + $0x134] sm:$0xf] }
 0x36f   : > { %5224 = vmatmul.bf16.gmra.mxu0 %v10802_v37  ;;  %5252 = vmatmul.bf16.gmra.mxu1 %v10804_v18 }
 0x370   : > { %v5568_v24 = vmul.f32 %v11439_v4, %v5083_v42  ;;  %5280 = vmatmul.bf16.gmra.mxu2 %v10806_v40  ;;  %5308 = vmatmul.bf16.gmra.mxu3 %v10814_v34 }
 0x371   : > { %5328 = vmatpush.bf16.msrb.mxu0 %v6480_v39 }
 0x372   : > { %v5624_v6 = vadd.f32 %v11467_v50, %v5568_v24 }
 0x373   : > { %v5057_v23 = vpop.f32.mrf.mxu2  ;;  %v5085_v46 = vpop.f32.mrf.mxu3 }
 0x374   : > { %v5666_v1 = vmax.f32 %v5624_v6, 0.0  ;;  %v5058_v57 = vadd.f32 %v5057_v23, %v5030_v49  ;;  %v5003_v3 = vpop.f32.mrf.mxu0  ;;  %v5031_v54 = vpop.f32.mrf.mxu1  ;;  %v6456_v23 = vor.u32 %v7386_v15, %v6455_v20  ;;  %v7557_v20 = vld [vmem:[%s12076_s4 + $0x5b4] sm:$0xf] }
 0x375   : > { %v5032_v13 = vadd.f32 %v5031_v54, %v5003_v3  ;;  %v7476_v3 = vld [vmem:[%s12076_s4 + $0x324] sm:$0xf0]  ;;  %v7007_v54 = vld [vmem:[%s12076_s4 + $0x490] sm:$0xf] }
 0x376   : > { %v5714_v45 = vadd.f32 %v5666_v1, %v5660_v25  ;;  %v5086_v8 = vadd.f32 %v5085_v46, %v5058_v57  ;;  %v7434_v46 = vld [vmem:[%s12076_s4 + $0x1d4] sm:$0xf0]  ;;  %5329 = vmatpush.bf16.msrb.mxu0 %v6456_v23  ;;  %v6815_v57 = vld [vmem:[%s12076_s4 + $0x310] sm:$0xf] }
 0x377   : > { %v6648_v25 = vor.u32 %v7434_v46, %v6647_v43  ;;  %v11610_v43 = vld [vmem:[#allocation1 + $0x12] sm:$0xff] }
 0x378   : > { %v5574_v28 = vmul.f32 %v11439_v4, %v5086_v8  ;;  %v7524_v8 = vld [vmem:[%s12076_s4 + $0x4a4] sm:$0xf0] }
 0x379   : > { %5357 = vmatpush.bf16.msrb.mxu1 %v6648_v25  ;;  %v7008_v62 = vor.u32 %v7524_v8, %v7007_v54 }
 0x37a   : > { %v5630_v17 = vadd.f32 %v11467_v50, %v5574_v28  ;;  %v7428_v28 = vld [vmem:[%s12076_s4 + $0x1a4] sm:$0xf0]  ;;  %5330 = vmatpush.bf16.msrb.mxu0 %v6432_v63  ;;  %v6769_v63 = vld [vmem:[%s12076_s4 + $0x2c8] sm:$0xf0] }
 0x37b   : > { %v5059_v5 = vpop.f32.mrf.mxu2  ;;  %v5087_v7 = vpop.f32.mrf.mxu3  ;;  %5414 = vmatpush.bf16.msra.mxu3 %v7008_v62 }
 0x37c   : > { %v5672_v44 = vmax.f32 %v5630_v17, 0.0  ;;  %v5060_v36 = vadd.f32 %v5059_v5, %v5032_v13  ;;  %v5006_v41 = vpop.f32.mrf.mxu0  ;;  %v5034_v19 = vpop.f32.mrf.mxu1  ;;  %v6624_v17 = vor.u32 %v7428_v28, %v6623_v58  ;;  %v6985_v5 = vld [vmem:[%s12076_s4 + $0x478] sm:$0xf0]  ;;  %v7503_v58 = vld [vmem:[%s12076_s4 + $0x404] sm:$0xf] }
 0x37d   : > { %v5035_v49 = vadd.f32 %v5034_v19, %v5006_v41  ;;  %v7177_v41 = vld [vmem:[%s12076_s4 + $0x5f8] sm:$0xf0]  ;;  %v7419_v19 = vld [vmem:[%s12076_s4 + $0x164] sm:$0xf] }
 0x37e   : > { %v5715_v42 = vadd.f32 %v5714_v45, %v5672_v44  ;;  %v5088_v52 = vadd.f32 %v5087_v7, %v5060_v36  ;;  %v6816_v45 = vor.u32 %v7476_v3, %v6815_v57  ;;  %v7563_v7 = vld [vmem:[%s12076_s4 + $0x5e4] sm:$0xf]  ;;  %v6988_v36 = vor.u32 %v7515_v12, %v6985_v5  ;;  %5358 = vmatpush.bf16.msrb.mxu1 %v6624_v17  ;;  %v6937_v28 = vld [vmem:[%s12076_s4 + $0x418] sm:$0xf0] }
 0x37f   : > { %5229 = vmatmul.bf16.gmra.mxu0 %v10877_v14  ;;  %5257 = vmatmul.bf16.gmra.mxu1 %v10879_v35 }
 0x380   : > { %v5580_v55 = vmul.f32 %v11439_v4, %v5088_v52  ;;  %5285 = vmatmul.bf16.gmra.mxu2 %v10881_v38  ;;  %5313 = vmatmul.bf16.gmra.mxu3 %v10885_v29  ;;  %v7180_v52 = vor.u32 %v7563_v7, %v7177_v41 }
 0x381   : > { %5386 = vmatpush.bf16.msra.mxu2 %v6816_v45 }
 0x382   : > { %v5636_v56 = vadd.f32 %v11467_v50, %v5580_v55  ;;  %v6601_v55 = vld [vmem:[%s12076_s4 + $0x178] sm:$0xf0]  ;;  %5519 = vmatpush.bf16.msrb.mxu3 %v7180_v52 }
 0x383   : > { %v5062_v21 = vpop.f32.mrf.mxu2  ;;  %v5090_v61 = vpop.f32.mrf.mxu3  ;;  %v6553_v52 = vld [vmem:[%s12076_s4 + $0x118] sm:$0xf0] }
 0x384   : > { %v5678_v33 = vmax.f32 %v5636_v56, 0.0  ;;  %v5063_v22 = vadd.f32 %v5062_v21, %v5035_v49  ;;  %v5008_v27 = vpop.f32.mrf.mxu0  ;;  %v5036_v24 = vpop.f32.mrf.mxu1  ;;  %v7467_v56 = vld [vmem:[%s12076_s4 + $0x2e4] sm:$0xf]  ;;  %v6793_v21 = vld [vmem:[%s12076_s4 + $0x2f8] sm:$0xf0] }
 0x385   : > { %v5037_v53 = vadd.f32 %v5036_v24, %v5008_v27  ;;  %v6796_v27 = vor.u32 %v7467_v56, %v6793_v21  ;;  %v7509_v24 = vld [vmem:[%s12076_s4 + $0x434] sm:$0xf]  ;;  %5491 = vmatpush.bf16.msrb.mxu2 %v6988_v36  ;;  %v7455_v56 = vld [vmem:[%s12076_s4 + $0x284] sm:$0xf]  ;;  %v6745_v21 = vld [vmem:[%s12076_s4 + $0x298] sm:$0xf0] }
 0x386   : > { %v5716_v26 = vadd.f32 %v5715_v42, %v5678_v33  ;;  %v5091_v6 = vadd.f32 %v5090_v61, %v5063_v22  ;;  %v11594_v61 = vld [vmem:[#allocation1] sm:$0xff]  ;;  %v11597_v33 = vld [vmem:[#allocation1 + $0x9] sm:$0xff]  ;;  %v6604_v22 = vor.u32 %v7419_v19, %v6601_v55 }
 0x387   : > { %5463 = vmatpush.bf16.msra.mxu1 %v6796_v27  ;;  %v6748_v27 = vor.u32 %v7455_v56, %v6745_v21 }
 0x388   : > { %v5586_v1 = vmul.f32 %v11439_v4, %v5091_v6  ;;  %v7153_v6 = vld [vmem:[%s12076_s4 + $0x5c8] sm:$0xf0]  ;;  %5435 = vmatpush.bf16.msra.mxu0 %v6604_v22  ;;  %v7497_v22 = vld [vmem:[%s12076_s4 + $0x3d4] sm:$0xf] }
 0x389   : > { %v7156_v46 = vor.u32 %v7557_v20, %v7153_v6  ;;  %v7105_v20 = vld [vmem:[%s12076_s4 + $0x568] sm:$0xf0] }
 0x38a   : > { %v5642_v13 = vadd.f32 %v11467_v50, %v5586_v1 }
 0x38b   : > { %v5064_v10 = vpop.f32.mrf.mxu2  ;;  %v5092_v39 = vpop.f32.mrf.mxu3  ;;  %5520 = vmatpush.bf16.msrb.mxu3 %v7156_v46 }
 0x38c   : > { %v5684_v31 = vmax.f32 %v5642_v13, 0.0  ;;  %v5065_v9 = vadd.f32 %v5064_v10, %v5037_v53  ;;  %v5011_v48 = vpop.f32.mrf.mxu0  ;;  %v5039_v2 = vpop.f32.mrf.mxu1  ;;  %v6961_v53 = vld [vmem:[%s12076_s4 + $0x448] sm:$0xf0] }
 0x38d   : > { %v5040_v44 = vadd.f32 %v5039_v2, %v5011_v48  ;;  %v6964_v23 = vor.u32 %v7509_v24, %v6961_v53  ;;  %v6577_v10 = vld [vmem:[%s12076_s4 + $0x148] sm:$0xf0]  ;;  %v7551_v48 = vld [vmem:[%s12076_s4 + $0x584] sm:$0xf]  ;;  %v7129_v2 = vld [vmem:[%s12076_s4 + $0x598] sm:$0xf0] }
 0x38e   : > { %v5717_v49 = vadd.f32 %v5716_v26, %v5684_v31  ;;  %v5093_v42 = vadd.f32 %v5092_v39, %v5065_v9  ;;  %v11613_v26 = vld [vmem:[#allocation1 + $0x1b] sm:$0xff]  ;;  %v7461_v39 = vld [vmem:[%s12076_s4 + $0x2b4] sm:$0xf]  ;;  %v6580_v62 = vor.u32 %v7413_v47, %v6577_v10  ;;  %v6940_v9 = vor.u32 %v7503_v58, %v6937_v28  ;;  %v6913_v24 = vld [vmem:[%s12076_s4 + $0x3e8] sm:$0xf0] }
 0x38f   : > { %5234 = vmatmul.bf16.gmra.mxu0 %v11594_v61  ;;  %5262 = vmatmul.bf16.gmra.mxu1 %v11597_v33  ;;  %v6772_v31 = vor.u32 %v7461_v39, %v6769_v63  ;;  %v7132_v17 = vor.u32 %v7551_v48, %v7129_v2  ;;  %v7545_v53 = vld [vmem:[%s12076_s4 + $0x554] sm:$0xf]  ;;  %v7491_v10 = vld [vmem:[%s12076_s4 + $0x3a4] sm:$0xf]  ;;  %v6889_v39 = vld [vmem:[%s12076_s4 + $0x3b8] sm:$0xf0] }
 0x390   : > { %v5592_v15 = vmul.f32 %v11439_v4, %v5093_v42  ;;  %5290 = vmatmul.bf16.gmra.mxu2 %v11610_v43  ;;  %5318 = vmatmul.bf16.gmra.mxu3 %v11613_v26  ;;  %v7407_v42 = vld [vmem:[%s12076_s4 + $0x104] sm:$0xf]  ;;  %v7108_v6 = vor.u32 %v7545_v53, %v7105_v20  ;;  %v6892_v63 = vor.u32 %v7491_v10, %v6889_v39  ;;  %v7081_v28 = vld [vmem:[%s12076_s4 + $0x538] sm:$0xf0]  ;;  %v6673_v10 = vld [vmem:[%s12076_s4 + $0x208] sm:$0xf0] }
 0x391   : > { %5492 = vmatpush.bf16.msrb.mxu2 %v6964_v23  ;;  %5436 = vmatpush.bf16.msra.mxu0 %v6580_v62  ;;  %v6556_v55 = vor.u32 %v7407_v42, %v6553_v52  ;;  %v7539_v58 = vld [vmem:[%s12076_s4 + $0x524] sm:$0xf]  ;;  %v6697_v42 = vld [vmem:[%s12076_s4 + $0x238] sm:$0xf0]  ;;  %v7485_v52 = vld [vmem:[%s12076_s4 + $0x374] sm:$0xf] }
 0x392   : > { %v5648_v25 = vadd.f32 %v11467_v50, %v5592_v15  ;;  %5464 = vmatpush.bf16.msra.mxu1 %v6772_v31  ;;  %5521 = vmatpush.bf16.msrb.mxu3 %v7132_v17  ;;  %v6916_v15 = vor.u32 %v7497_v22, %v6913_v24  ;;  %v7057_v24 = vld [vmem:[%s12076_s4 + $0x508] sm:$0xf0]  ;;  %v7479_v39 = vld [vmem:[%s12076_s4 + $0x344] sm:$0xf] }
 0x393   : > { %v5067_v1 = vpop.f32.mrf.mxu2  ;;  %v5095_v57 = vpop.f32.mrf.mxu3 }
 0x394   : > { %v5690_v3 = vmax.f32 %v5648_v25, 0.0  ;;  %v5068_v54 = vadd.f32 %v5067_v1, %v5040_v44  ;;  %v5013_v13 = vpop.f32.mrf.mxu0  ;;  %v5041_v45 = vpop.f32.mrf.mxu1 }
 0x395   : > { %5493 = vmatpush.bf16.msrb.mxu2 %v6940_v9  ;;  %5437 = vmatpush.bf16.msra.mxu0 %v6556_v55  ;;  %v7401_v45 = vld [vmem:[%s12076_s4 + $0xd4] sm:$0xf]  ;;  %v11706_v9 = vperm.slane %v11226_v60, 2  ;;  %v7443_v60 = vld [vmem:[%s12076_s4 + $0x224] sm:$0xf] }
 0x396   : > { %v5718_v8 = vadd.f32 %v5717_v49, %v5690_v3  ;;  %v5096_v16 = vadd.f32 %v5095_v57, %v5068_v54  ;;  %5465 = vmatpush.bf16.msra.mxu1 %v6748_v27  ;;  %5522 = vmatpush.bf16.msrb.mxu3 %v7108_v6  ;;  %v11678_v3 = vperm.slane %v11200_v0, 2  ;;  %v6721_v0 = vld [vmem:[%s12076_s4 + $0x268] sm:$0xf0]  ;;  %v6700_v21 = vor.u32 %v7443_v60, %v6697_v42  ;;  %v7533_v27 = vld [vmem:[%s12076_s4 + $0x4f4] sm:$0xf] }
 0x397   : > { %v6865_v55 = vld [vmem:[%s12076_s4 + $0x388] sm:$0xf0]  ;;  %v7060_v53 = vor.u32 %v7533_v27, %v7057_v24  ;;  %v7383_v24 = vld [vmem:[%s12076_s4 + $0x44] sm:$0xf] }
 0x398   : > { %v5598_v12 = vmul.f32 %v11439_v4, %v5096_v16  ;;  %v7449_v16 = vld [vmem:[%s12076_s4 + $0x254] sm:$0xf]  ;;  %v6868_v22 = vor.u32 %v7485_v52, %v6865_v55 }
 0x399   : > { %5494 = vmatpush.bf16.msrb.mxu2 %v6916_v15  ;;  %v6724_v62 = vor.u32 %v7449_v16, %v6721_v0  ;;  %v6481_v16 = vld [vmem:[%s12076_s4 + $0x88] sm:$0xf0] }
 0x39a   : > { %v5654_v5 = vadd.f32 %v11467_v50, %v5598_v12  ;;  %v7084_v12 = vor.u32 %v7539_v58, %v7081_v28 }
 0x39b   : > { %v5069_v7 = vpop.f32.mrf.mxu2  ;;  %v5097_v44 = vpop.f32.mrf.mxu3  ;;  %5466 = vmatpush.bf16.msra.mxu1 %v6724_v62  ;;  %v6841_v62 = vld [vmem:[%s12076_s4 + $0x358] sm:$0xf0] }
 0x39c   : > { %v5696_v4 = vmax.f32 %v5654_v5, 0.0  ;;  %v5108_v36 = vpop.f32.mrf.mxu0  ;;  %v5136_v41 = vpop.f32.mrf.mxu1  ;;  %5523 = vmatpush.bf16.msrb.mxu3 %v7084_v12  ;;  %v6844_v28 = vor.u32 %v7479_v39, %v6841_v62  ;;  %v7527_v12 = vld [vmem:[%s12076_s4 + $0x4c4] sm:$0xf] }
 0x39d   : > { %v5137_v19 = vadd.f32 %v5136_v41, %v5108_v36  ;;  %5495 = vmatpush.bf16.msrb.mxu2 %v6892_v63  ;;  %v7395_v36 = vld [vmem:[%s12076_s4 + $0xa4] sm:$0xf]  ;;  %v6505_v41 = vld [vmem:[%s12076_s4 + $0xb8] sm:$0xf0] }
 0x39e   : > { %v5719_v49 = vsel %vm760_vm2, %v5696_v4, 0.0 }
 0x39f   : > { %v11653_v50 = vadd.f32 %v5719_v49, %v5718_v8  ;;  %5331 = vmatmul.bf16.vlgmr.msrb.gmra.mxu0 %v10621_v11  ;;  %5359 = vmatmul.bf16.vlgmr.msrb.gmra.mxu1 %v10623_v59  ;;  %v6529_v8 = vld [vmem:[%s12076_s4 + $0xe8] sm:$0xf0]  ;;  %v6508_v49 = vor.u32 %v7395_v36, %v6505_v41 }
 0x3a0   : > { %5387 = vmatmul.bf16.vlgmr.msra.gmra.mxu2 %v10625_v51  ;;  %5415 = vmatmul.bf16.vlgmr.msra.gmra.mxu3 %v10639_v32  ;;  %v6532_v47 = vor.u32 %v7401_v45, %v6529_v8  ;;  %v7389_v8 = vld [vmem:[%s12076_s4 + $0x74] sm:$0xf] }
 0x3a1   : > { %5467 = vmatpush.bf16.msra.mxu1 %v6700_v21  ;;  %5496 = vmatpush.bf16.msrb.mxu2 %v6868_v22  ;;  %v6484_v0 = vor.u32 %v7389_v8, %v6481_v16  ;;  %v7009_v16 = vld [vmem:[%s12076_s4 + $0x4a8] sm:$0xf0] }
 0x3a2   : > { %5438 = vmatpush.bf16.msra.mxu0 %v6532_v47  ;;  %5524 = vmatpush.bf16.msrb.mxu3 %v7060_v53  ;;  %v7437_v47 = vld [vmem:[%s12076_s4 + $0x1f4] sm:$0xf]  ;;  %v6457_v53 = vld [vmem:[%s12076_s4 + $0x58] sm:$0xf0] }
 0x3a3   : > { %v5164_v23 = vpop.f32.mrf.mxu2  ;;  %v5192_v46 = vpop.f32.mrf.mxu3  ;;  %v6676_v58 = vor.u32 %v7437_v47, %v6673_v10  ;;  %v7377_v47 = vld [vmem:[%s12076_s4 + $0x14] sm:$0xf] }
 0x3a4   : > { %v5165_v25 = vadd.f32 %v5164_v23, %v5137_v19  ;;  %v5110_v1 = vpop.f32.mrf.mxu0  ;;  %v5138_v57 = vpop.f32.mrf.mxu1 }
 0x3a5   : > { %v5139_v54 = vadd.f32 %v5138_v57, %v5110_v1  ;;  %5468 = vmatpush.bf16.msra.mxu1 %v6676_v58  ;;  %5497 = vmatpush.bf16.msrb.mxu2 %v6844_v28  ;;  %v7425_v58 = vld [vmem:[%s12076_s4 + $0x194] sm:$0xf]  ;;  %v6625_v28 = vld [vmem:[%s12076_s4 + $0x1a8] sm:$0xf0] }
 0x3a6   : > { %v5193_v13 = vadd.f32 %v5192_v46, %v5165_v25  ;;  %5439 = vmatpush.bf16.msra.mxu0 %v6508_v49 }
 0x3a8   : > { %v5563_v31 = vmul.f32 %v11678_v3, %v5193_v13 }
 0x3aa   : > { %v5619_v19 = vadd.f32 %v11706_v9, %v5563_v31  ;;  %v7033_v31 = vld [vmem:[%s12076_s4 + $0x4d8] sm:$0xf0]  ;;  %5440 = vmatpush.bf16.msra.mxu0 %v6484_v0  ;;  %v6433_v0 = vld [vmem:[%s12076_s4 + $0x28] sm:$0xf0] }
 0x3ab   : > { %v5166_v48 = vpop.f32.mrf.mxu2  ;;  %v5194_v2 = vpop.f32.mrf.mxu3 }
 0x3ac   : > { %v5167_v17 = vadd.f32 %v5166_v48, %v5139_v54  ;;  %v5113_v5 = vpop.f32.mrf.mxu0  ;;  %v5141_v7 = vpop.f32.mrf.mxu1  ;;  %v5661_v23 = vmax.f32 %v5619_v19, 0.0  ;;  %v7036_v48 = vor.u32 %v7527_v12, %v7033_v31 }
 0x3ad   : > { %v5142_v44 = vadd.f32 %v5141_v7, %v5113_v5 }
 0x3ae   : > { %v5195_v4 = vadd.f32 %v5194_v2, %v5167_v17  ;;  %5525 = vmatpush.bf16.msrb.mxu3 %v7036_v48 }
 0x3af   : > { %5336 = vmatmul.bf16.gmra.mxu0 %v10802_v37  ;;  %5364 = vmatmul.bf16.gmra.mxu1 %v10804_v18 }
 0x3b0   : > { %v5569_v56 = vmul.f32 %v11678_v3, %v5195_v4  ;;  %5392 = vmatmul.bf16.gmra.mxu2 %v10806_v40  ;;  %5420 = vmatmul.bf16.gmra.mxu3 %v10814_v34 }
 0x3b2   : > { %v5625_v20 = vadd.f32 %v11706_v9, %v5569_v56 }
 0x3b3   : > { %v5169_v15 = vpop.f32.mrf.mxu2  ;;  %v5197_v6 = vpop.f32.mrf.mxu3 }
 0x3b4   : > { %v5667_v46 = vmax.f32 %v5625_v20, 0.0  ;;  %v5170_v25 = vadd.f32 %v5169_v15, %v5142_v44  ;;  %v5115_v1 = vpop.f32.mrf.mxu0  ;;  %v5143_v57 = vpop.f32.mrf.mxu1  ;;  %v7431_v20 = vld [vmem:[%s12076_s4 + $0x1c4] sm:$0xf] }
 0x3b5   : > { %v5144_v54 = vadd.f32 %v5143_v57, %v5115_v1  ;;  %v7473_v57 = vld [vmem:[%s12076_s4 + $0x314] sm:$0xf] }
 0x3b6   : > { %v5727_v13 = vadd.f32 %v5667_v46, %v5661_v23  ;;  %v5198_v45 = vadd.f32 %v5197_v6, %v5170_v25  ;;  %v6460_v23 = vor.u32 %v7383_v24, %v6457_v53  ;;  %v6649_v46 = vld [vmem:[%s12076_s4 + $0x1d8] sm:$0xf0] }
 0x3b7   : > { %v6652_v25 = vor.u32 %v7431_v20, %v6649_v46  ;;  %v7581_v46 = vld [vmem:[%s12079_s7 + $0x70] sm:$0xff] }
 0x3b8   : > { %v5575_v63 = vmul.f32 %v11678_v3, %v5198_v45  ;;  %5441 = vmatpush.bf16.msra.mxu0 %v6460_v23  ;;  %v7573_v23 = vld [vmem:[%s12079_s7 + $0x30] sm:$0xff] }
 0x3b9   : > { %5469 = vmatpush.bf16.msra.mxu1 %v6652_v25  ;;  %v7589_v25 = vld [vmem:[%s12079_s7 + $0xb0] sm:$0xff] }
 0x3ba   : > { %v5631_v2 = vadd.f32 %v11706_v9, %v5575_v63  ;;  %v6436_v63 = vor.u32 %v7377_v47, %v6433_v0  ;;  %v7587_v47 = vld [vmem:[%s12079_s7 + $0xa0] sm:$0xff] }
 0x3bb   : > { %v5171_v17 = vpop.f32.mrf.mxu2  ;;  %v5199_v5 = vpop.f32.mrf.mxu3 }
 0x3bc   : > { %v5673_v7 = vmax.f32 %v5631_v2, 0.0  ;;  %v5172_v44 = vadd.f32 %v5171_v17, %v5144_v54  ;;  %v5118_v4 = vpop.f32.mrf.mxu0  ;;  %v5146_v36 = vpop.f32.mrf.mxu1  ;;  %v6817_v54 = vld [vmem:[%s12076_s4 + $0x328] sm:$0xf0]  ;;  %v6628_v2 = vor.u32 %v7425_v58, %v6625_v28  ;;  %5442 = vmatpush.bf16.msra.mxu0 %v6436_v63  ;;  %v7586_v63 = vld [vmem:[%s12079_s7 + $0x98] sm:$0xff] }
 0x3bd   : > { %v5147_v41 = vadd.f32 %v5146_v36, %v5118_v4  ;;  %v6820_v8 = vor.u32 %v7473_v57, %v6817_v54  ;;  %v7580_v57 = vld [vmem:[%s12079_s7 + $0x68] sm:$0xff] }
 0x3be   : > { %v5728_v60 = vadd.f32 %v5727_v13, %v5673_v7  ;;  %v5200_v19 = vadd.f32 %v5199_v5, %v5172_v44  ;;  %v7521_v13 = vld [vmem:[%s12076_s4 + $0x494] sm:$0xf]  ;;  %5470 = vmatpush.bf16.msra.mxu1 %v6628_v2 }
 0x3bf   : > { %5341 = vmatmul.bf16.gmra.mxu0 %v10877_v14  ;;  %5369 = vmatmul.bf16.gmra.mxu1 %v10879_v35  ;;  %v7012_v62 = vor.u32 %v7521_v13, %v7009_v16  ;;  %v7579_v16 = vld [vmem:[%s12079_s7 + $0x60] sm:$0xff] }
 0x3c0   : > { %v5581_v49 = vmul.f32 %v11678_v3, %v5200_v19  ;;  %5397 = vmatmul.bf16.gmra.mxu2 %v10881_v38  ;;  %5425 = vmatmul.bf16.gmra.mxu3 %v10885_v29 }
 0x3c1   : > { %5498 = vmatpush.bf16.msrb.mxu2 %v6820_v8  ;;  %5526 = vmatpush.bf16.msrb.mxu3 %v7012_v62  ;;  %v7571_v8 = vld [vmem:[%s12079_s7 + $0x20] sm:$0xff]  ;;  %v7578_v62 = vld [vmem:[%s12079_s7 + $0x58] sm:$0xff] }
 0x3c2   : > { %v5637_v42 = vadd.f32 %v11706_v9, %v5581_v49 }
 0x3c3   : > { %v5174_v52 = vpop.f32.mrf.mxu2  ;;  %v5202_v55 = vpop.f32.mrf.mxu3 }
 0x3c4   : > { %v5679_v56 = vmax.f32 %v5637_v42, 0.0  ;;  %v5175_v21 = vadd.f32 %v5174_v52, %v5147_v41  ;;  %v11771_v22 = vpop.f32.mrf.mxu0  ;;  %v5148_v27 = vpop.f32.mrf.mxu1 }
 0x3c6   : > { %v5729_v15 = vadd.f32 %v5728_v60, %v5679_v56  ;;  %v5203_v6 = vadd.f32 %v5202_v55, %v5175_v21  ;;  %v7574_v56 = vld [vmem:[%s12079_s7 + $0x38] sm:$0xff] }
 0x3c7   : > { %6170 = vmatpush.bf16.msrb.mxu0 %v7574_v56  ;;  %v5708_v56 = vrot.slane %v11414_v30, 4 }
 0x3c8   : > { %v5587_v1 = vmul.f32 %v11678_v3, %v5203_v6 }
 0x3ca   : > { %v5643_v45 = vadd.f32 %v11706_v9, %v5587_v1  ;;  %v7572_v1 = vld [vmem:[%s12079_s7 + $0x28] sm:$0xff] }
 0x3cb   : > { %v5176_v10 = vpop.f32.mrf.mxu2  ;;  %v5204_v39 = vpop.f32.mrf.mxu3  ;;  %6171 = vmatpush.bf16.msrb.mxu0 %v7573_v23 }
 0x3cc   : > { %v5685_v12 = vmax.f32 %v5643_v45, 0.0  ;;  %v5123_v31 = vpop.f32.mrf.mxu0  ;;  %v5151_v48 = vpop.f32.mrf.mxu1 }
 0x3ce   : > { %v11811_v17 = vadd.f32 %v5729_v15, %v5685_v12 }
 0x3cf   : > { %5346 = vmatmul.bf16.gmra.mxu0 %v11594_v61  ;;  %5374 = vmatmul.bf16.gmra.mxu1 %v11597_v33 }
 0x3d0   : > { %5402 = vmatmul.bf16.gmra.mxu2 %v11610_v43  ;;  %5430 = vmatmul.bf16.gmra.mxu3 %v11613_v26 }
 0x3d1   : > { %6172 = vmatpush.bf16.msrb.mxu0 %v7572_v1  ;;  %v5709_v1 = vadd.f32 %v5708_v56, %v11414_v30  ;;  %v7575_v30 = vld [vmem:[%s12079_s7 + $0x40] sm:$0xff] }
 0x3d3   : > { %v5179_v5 = vpop.f32.mrf.mxu2  ;;  %v5207_v7 = vpop.f32.mrf.mxu3 }
 0x3d4   : > { %v5125_v44 = vpop.f32.mrf.mxu0  ;;  %v5153_v4 = vpop.f32.mrf.mxu1 }
 0x3d5   : > { %6173 = vmatpush.bf16.msrb.mxu0 %v7571_v8 }
 0x3db   : > { %v5181_v36 = vpop.f32.mrf.mxu2  ;;  %v5209_v41 = vpop.f32.mrf.mxu3 }
 0x3dc   : > { %v11817_v60 = vpop.f32.mrf.mxu0  ;;  %v11819_v19 = vpop.f32.mrf.mxu1  ;;  %v7597_v41 = vld [vmem:[%s12079_s7 + $0xf0] sm:$0xff] }
 0x3dd   : > { %v5249_v44 = vadd.f32 %v11819_v19, %v11817_v60 }
 0x3df   : > { %5443 = vmatmul.bf16.vlgmr.msra.gmra.mxu0 %v10621_v11  ;;  %5471 = vmatmul.bf16.vlgmr.msra.gmra.mxu1 %v10623_v59  ;;  %v7582_v11 = vld [vmem:[%s12079_s7 + $0x78] sm:$0xff] }
 0x3e0   : > { %5499 = vmatmul.bf16.vlgmr.msrb.gmra.mxu2 %v10625_v51  ;;  %5527 = vmatmul.bf16.vlgmr.msrb.gmra.mxu3 %v10639_v32  ;;  %v7590_v59 = vld [vmem:[%s12079_s7 + $0xb8] sm:$0xff]  ;;  %v5152_v51 = vadd.f32 %v5151_v48, %v5123_v31  ;;  %v5149_v32 = vadd.f32 %v5148_v27, %v11771_v22 }
 0x3e1   : > { %6183 = vmatpush.bf16.msrb.mxu1 %v7582_v11  ;;  %6196 = vmatpush.bf16.msra.mxu2 %v7590_v59 }
 0x3e2   : > { %v5180_v21 = vadd.f32 %v5179_v5, %v5152_v51  ;;  %v5177_v20 = vadd.f32 %v5176_v10, %v5149_v32  ;;  %v5721_v51 = vrot.slane %v11653_v50, 4 }
 0x3e3   : > { %v11825_v49 = vpop.f32.mrf.mxu2  ;;  %v11827_v42 = vpop.f32.mrf.mxu3 }
 0x3e4   : > { %v11829_v52 = vpop.f32.mrf.mxu0  ;;  %v5250_v55 = vpop.f32.mrf.mxu1  ;;  %v5208_v22 = vadd.f32 %v5207_v7, %v5180_v21  ;;  %v5205_v27 = vadd.f32 %v5204_v39, %v5177_v20  ;;  %v7570_v39 = vld [vmem:[%s12079_s7 + $0x18] sm:$0xff] }
 0x3e5   : > { %6184 = vmatpush.bf16.msrb.mxu1 %v7581_v46  ;;  %6197 = vmatpush.bf16.msra.mxu2 %v7589_v25  ;;  %v5251_v5 = vadd.f32 %v5250_v55, %v11829_v52  ;;  %v11933_v46 = vld [vmem:[%s12077_s5] sm:$0x3f] }
 0x3e6   : > { %6174 = vmatpush.bf16.msrb.mxu0 %v7570_v39  ;;  %v11936_v25 = vperm.slane %v11933_v46, 3 }
 0x3e9   : > { %6185 = vmatpush.bf16.msrb.mxu1 %v7580_v57  ;;  %v5722_v57 = vadd.f32 %v5721_v51, %v11653_v50  ;;  %v7583_v50 = vld [vmem:[%s12079_s7 + $0x80] sm:$0xff] }
 0x3eb   : > { %v5278_v24 = vpop.f32.mrf.mxu2  ;;  %v11841_v53 = vpop.f32.mrf.mxu3 }
 0x3ec   : > { %v5225_v15 = vpop.f32.mrf.mxu0  ;;  %v5253_v6 = vpop.f32.mrf.mxu1  ;;  %v5279_v4 = vadd.f32 %v5278_v24, %v5251_v5 }
 0x3ed   : > { %6186 = vmatpush.bf16.msrb.mxu1 %v7579_v16  ;;  %v5254_v36 = vadd.f32 %v5253_v6, %v5225_v15  ;;  %v7568_v15 = vld [vmem:[%s12079_s7 + $0x8] sm:$0xff] }
 0x3ee   : > { %v5307_v32 = vadd.f32 %v11841_v53, %v5279_v4  ;;  %v7576_v6 = vld [vmem:[%s12079_s7 + $0x48] sm:$0xff] }
 0x3ef   : > { %5448 = vmatmul.bf16.gmra.mxu0 %v10802_v37  ;;  %5476 = vmatmul.bf16.gmra.mxu1 %v10804_v18  ;;  %v7588_v37 = vld [vmem:[%s12079_s7 + $0xa8] sm:$0xff]  ;;  %v5599_v18 = vmul.f32 %v11678_v3, %v5208_v22 }
 0x3f0   : > { %5504 = vmatmul.bf16.gmra.mxu2 %v10806_v40  ;;  %5532 = vmatmul.bf16.gmra.mxu3 %v10814_v34  ;;  %v5593_v34 = vmul.f32 %v11678_v3, %v5205_v27  ;;  %v7598_v3 = vld [vmem:[%s12079_s7 + $0xf8] sm:$0xff]  ;;  %v7584_v53 = vld [vmem:[%s12079_s7 + $0x88] sm:$0xff] }
 0x3f1   : > { %6198 = vmatpush.bf16.msra.mxu2 %v7588_v37  ;;  %v5655_v0 = vadd.f32 %v11706_v9, %v5599_v18  ;;  %6209 = vmatpush.bf16.msra.mxu3 %v7598_v3  ;;  %v7595_v18 = vld [vmem:[%s12079_s7 + $0xe0] sm:$0xff] }
 0x3f2   : > { %v5649_v10 = vadd.f32 %v11706_v9, %v5593_v34  ;;  %6187 = vmatpush.bf16.msrb.mxu1 %v7578_v62 }
 0x3f3   : > { %v5281_v40 = vpop.f32.mrf.mxu2  ;;  %v11866_v54 = vpop.f32.mrf.mxu3  ;;  %v5697_v58 = vmax.f32 %v5655_v0, 0.0 }
 0x3f4   : > { %v5227_v13 = vpop.f32.mrf.mxu0  ;;  %v5255_v45 = vpop.f32.mrf.mxu1  ;;  %v5691_v9 = vmax.f32 %v5649_v10, 0.0  ;;  %v5710_v10 = vrot.slane %v5709_v1, 2 }
 0x3f5   : > { %6199 = vmatpush.bf16.msra.mxu2 %v7587_v47  ;;  %v5732_v2 = vsel %vm760_vm2, %v5697_v58, 0.0  ;;  %v5256_v60 = vadd.f32 %v5255_v45, %v5227_v13  ;;  %6210 = vmatpush.bf16.msra.mxu3 %v7597_v41  ;;  %v11958_v45 = vld [vmem:[%s12078_s6] sm:$0x3f]  ;;  %v5723_v58 = vrot.slane %v5722_v57, 2 }
 0x3f6   : > { %v5731_v7 = vadd.f32 %v11811_v17, %v5691_v9  ;;  %v5282_v17 = vadd.f32 %v5281_v40, %v5254_v36  ;;  %v7567_v40 = vld [vmem:[%s12079_s7] sm:$0xff]  ;;  %v5608_v8 = vperm.slane %v11958_v45, 3  ;;  %v7594_v9 = vld [vmem:[%s12079_s7 + $0xd8] sm:$0xff] }
 0x3f7   : > { %v5724_v4 = vadd.f32 %v5723_v58, %v5722_v57 }
 0x3f8   : > { %v5733_v52 = vadd.f32 %v5732_v2, %v5731_v7  ;;  %v5310_v22 = vadd.f32 %v11866_v54, %v5282_v17 }
 0x3f9   : > { %6200 = vmatpush.bf16.msra.mxu2 %v7586_v63  ;;  %v5725_v56 = vrot.slane %v5724_v4, 1 }
 0x3fa   : > { %v5734_v20 = vrot.slane %v5733_v52, 4  ;;  %v5576_v16 = vmul.f32 %v11936_v25, %v5310_v22 }
 0x3fb   : > { %v5283_v28 = vpop.f32.mrf.mxu2  ;;  %v5311_v12 = vpop.f32.mrf.mxu3  ;;  %v5726_v22 = vadd.f32 %v5725_v56, %v5724_v4 }
 0x3fc   : > { %v5230_v31 = vpop.f32.mrf.mxu0  ;;  %v5258_v48 = vpop.f32.mrf.mxu1  ;;  %v5284_v21 = vadd.f32 %v5283_v28, %v5256_v60  ;;  %v5735_v54 = vadd.f32 %v5734_v20, %v5733_v52  ;;  %v5632_v5 = vadd.f32 %v5608_v8, %v5576_v16 }
 0x3fd   : > { %v5259_v24 = vadd.f32 %v5258_v48, %v5230_v31 }
 0x3fe   : > { %v5312_v37 = vadd.f32 %v5311_v12, %v5284_v21  ;;  %v5736_v31 = vrot.slane %v5735_v54, 2 }
 0x3ff   : > { %5453 = vmatmul.bf16.gmra.mxu0 %v10877_v14  ;;  %5481 = vmatmul.bf16.gmra.mxu1 %v10879_v35  ;;  %v7569_v14 = vld [vmem:[%s12079_s7 + $0x10] sm:$0xff] }
 0x400   : > { %5509 = vmatmul.bf16.gmra.mxu2 %v10881_v38  ;;  %5537 = vmatmul.bf16.gmra.mxu3 %v10885_v29  ;;  %v7577_v35 = vld [vmem:[%s12079_s7 + $0x50] sm:$0xff]  ;;  %v5277_v29 = vadd.f32 %v11825_v49, %v5249_v44  ;;  %v7596_v49 = vld [vmem:[%s12079_s7 + $0xe8] sm:$0xff]  ;;  %v5582_v12 = vmul.f32 %v11936_v25, %v5312_v37  ;;  %v5711_v44 = vadd.f32 %v5710_v10, %v5709_v1 }
 0x401   : > { %v7585_v38 = vld [vmem:[%s12079_s7 + $0x90] sm:$0xff]  ;;  %6175 = vmatpush.bf16.msrb.mxu0 %v7569_v14  ;;  %6188 = vmatpush.bf16.msrb.mxu1 %v7577_v35  ;;  %v5737_v35 = vadd.f32 %v5736_v31, %v5735_v54 }
 0x402   : > { %6201 = vmatpush.bf16.msra.mxu2 %v7585_v38  ;;  %v5305_v23 = vadd.f32 %v11827_v42, %v5277_v29  ;;  %6211 = vmatpush.bf16.msra.mxu3 %v7596_v49  ;;  %v5570_v42 = vmul.f32 %v11936_v25, %v5307_v32  ;;  %v5638_v41 = vadd.f32 %v5608_v8, %v5582_v12  ;;  %v7593_v14 = vld [vmem:[%s12079_s7 + $0xd0] sm:$0xff]  ;;  %v5674_v29 = vmax.f32 %v5632_v5, 0.0  ;;  %v7592_v32 = vld [vmem:[%s12079_s7 + $0xc8] sm:$0xff] }
 0x403   : > { %v5286_v19 = vpop.f32.mrf.mxu2  ;;  %v5314_v55 = vpop.f32.mrf.mxu3  ;;  %v5738_v21 = vrot.slane %v5737_v35, 1 }
 0x404   : > { %v5232_v11 = vpop.f32.mrf.mxu0  ;;  %v5260_v59 = vpop.f32.mrf.mxu1  ;;  %v5287_v27 = vadd.f32 %v5286_v19, %v5259_v24  ;;  %v5564_v13 = vmul.f32 %v11936_v25, %v5305_v23  ;;  %v5626_v28 = vadd.f32 %v5608_v8, %v5570_v42 }
 0x405   : > { %6176 = vmatpush.bf16.msrb.mxu0 %v7568_v15  ;;  %6189 = vmatpush.bf16.msrb.mxu1 %v7576_v6  ;;  %v5261_v34 = vadd.f32 %v5260_v59, %v5232_v11  ;;  %v5680_v59 = vmax.f32 %v5638_v41, 0.0  ;;  %v5739_v57 = vadd.f32 %v5738_v21, %v5737_v35  ;;  %v7606_v41 = vld [vmem:[%s12079_s7 + $0x138] sm:$0xff] }
 0x406   : > { %6202 = vmatpush.bf16.msra.mxu2 %v7584_v53  ;;  %v5315_v47 = vadd.f32 %v5314_v55, %v5287_v27  ;;  %6212 = vmatpush.bf16.msra.mxu3 %v7595_v18  ;;  %v5620_v2 = vadd.f32 %v5608_v8, %v5564_v13  ;;  %v5668_v36 = vmax.f32 %v5626_v28, 0.0  ;;  %v7591_v27 = vld [vmem:[%s12079_s7 + $0xc0] sm:$0xff] }
 0x407   : > { %v5781_v16 = vpack.c.bf16 %v5739_v57, %v5739_v57  ;;  %v5609_v57 = vperm.slane %v11958_v45, 4 }
 0x408   : > { %v5588_v7 = vmul.f32 %v11936_v25, %v5315_v47 }
 0x409   : > { %6177 = vmatpush.bf16.msrb.mxu0 %v7567_v40  ;;  %6190 = vmatpush.bf16.msrb.mxu1 %v7575_v30 }
 0x40a   : > { %6203 = vmatpush.bf16.msra.mxu2 %v7583_v50  ;;  %6213 = vmatpush.bf16.msra.mxu3 %v7594_v9 }
 0x40b   : > { %v5288_v0 = vpop.f32.mrf.mxu2  ;;  %v5316_v3 = vpop.f32.mrf.mxu3 }
 0x40c   : > { %v5289_v39 = vadd.f32 %v5288_v0, %v5261_v34  ;;  %v5235_v62 = vpop.f32.mrf.mxu0  ;;  %v5263_v63 = vpop.f32.mrf.mxu1 }
 0x40d   : > { %v5264_v38 = vadd.f32 %v5263_v63, %v5235_v62  ;;  %6222 = vmatpush.bf16.msra.mxu0 %v7606_v41 }
 0x40e   : > { %v5317_v48 = vadd.f32 %v5316_v3, %v5289_v39  ;;  %6214 = vmatpush.bf16.msra.mxu3 %v7593_v14 }
 0x40f   : > { %5458 = vmatmul.bf16.gmra.mxu0 %v11594_v61  ;;  %5486 = vmatmul.bf16.gmra.mxu1 %v11597_v33  ;;  %v5662_v61 = vmax.f32 %v5620_v2, 0.0  ;;  %v5644_v33 = vadd.f32 %v5608_v8, %v5588_v7 }
 0x410   : > { %5514 = vmatmul.bf16.gmra.mxu2 %v11610_v43  ;;  %5542 = vmatmul.bf16.gmra.mxu3 %v11613_v26  ;;  %v5594_v52 = vmul.f32 %v11936_v25, %v5317_v48  ;;  %v5712_v43 = vrot.slane %v5711_v44, 1 }
 0x411   : > { %v5740_v11 = vadd.f32 %v5668_v36, %v5662_v61  ;;  %v5686_v20 = vmax.f32 %v5644_v33, 0.0 }
 0x412   : > { %v5650_v51 = vadd.f32 %v5608_v8, %v5594_v52  ;;  %v5713_v23 = vadd.f32 %v5712_v43, %v5711_v44  ;;  %6215 = vmatpush.bf16.msra.mxu3 %v7592_v32 }
 0x413   : > { %v5291_v17 = vpop.f32.mrf.mxu2  ;;  %v5319_v60 = vpop.f32.mrf.mxu3  ;;  %v5741_v49 = vadd.f32 %v5740_v11, %v5674_v29 }
 0x414   : > { %v5292_v19 = vadd.f32 %v5291_v17, %v5264_v38  ;;  %v5237_v26 = vpop.f32.mrf.mxu0  ;;  %v5265_v55 = vpop.f32.mrf.mxu1  ;;  %v5692_v53 = vmax.f32 %v5650_v51, 0.0  ;;  %v5779_v50 = vpack.c.bf16 %v5713_v23, %v5713_v23 }
 0x415   : > { %v5742_v6 = vadd.f32 %v5741_v49, %v5680_v59 }
 0x416   : > { %v5320_v24 = vadd.f32 %v5319_v60, %v5292_v19  ;;  %6216 = vmatpush.bf16.msra.mxu3 %v7591_v27  ;;  %v7605_v60 = vld [vmem:[%s12079_s7 + $0x130] sm:$0xff] }
 0x417   : > { %v5743_v42 = vadd.f32 %v5742_v6, %v5686_v20  ;;  %6223 = vmatpush.bf16.msra.mxu0 %v7605_v60  ;;  %v5553_v20 = vperm.slane %v11933_v46, 4 }
 0x418   : > { %v5600_v15 = vmul.f32 %v11936_v25, %v5320_v24  ;;  %v5780_v25 = vpack.c.bf16 %v5726_v22, %v5726_v22  ;;  %v7604_v24 = vld [vmem:[%s12079_s7 + $0x128] sm:$0xff]  ;;  %v7603_v22 = vld [vmem:[%s12079_s7 + $0x120] sm:$0xff] }
 0x419   : > { %v5744_v34 = vadd.f32 %v5743_v42, %v5692_v53 }
 0x41a   : > { %v5656_v1 = vadd.f32 %v5608_v8, %v5600_v15 }
 0x41b   : > { %v5293_v37 = vpop.f32.mrf.mxu2  ;;  %v5321_v18 = vpop.f32.mrf.mxu3  ;;  %6224 = vmatpush.bf16.msra.mxu0 %v7604_v24 }
 0x41c   : > { %v5698_v40 = vmax.f32 %v5656_v1, 0.0  ;;  %v5332_v30 = vpop.f32.mrf.mxu0  ;;  %v5360_v54 = vpop.f32.mrf.mxu1 }
 0x41d   : > { %v5361_v29 = vadd.f32 %v5360_v54, %v5332_v30  ;;  %v7602_v30 = vld [vmem:[%s12079_s7 + $0x118] sm:$0xff] }
 0x41e   : > { %v5745_v13 = vsel %vm760_vm2, %v5698_v40, 0.0 }
 0x41f   : > { %v5746_v47 = vadd.f32 %v5745_v13, %v5744_v34  ;;  %6178 = vmatmul.bf16.vlgmr.msrb.gmra.mxu0 %v5779_v50  ;;  %6191 = vmatmul.bf16.vlgmr.msrb.gmra.mxu1 %v5780_v25 }
 0x420   : > { %6204 = vmatmul.bf16.vlgmr.msra.gmra.mxu2 %v5781_v16  ;;  %6225 = vmatpush.bf16.msra.mxu0 %v7603_v22 }
 0x421   : > { %v5747_v0 = vrot.slane %v5746_v47, 4 }
 0x423   : > { %v5748_v8 = vadd.f32 %v5747_v0, %v5746_v47  ;;  %v5388_v3 = vpop.f32.mrf.mxu2  ;;  %v5416_v10 = vpop.f32.mrf.mxu3 }
 0x424   : > { %v5334_v39 = vpop.f32.mrf.mxu0  ;;  %v5362_v62 = vpop.f32.mrf.mxu1  ;;  %v5389_v43 = vadd.f32 %v5388_v3, %v5361_v29  ;;  %6226 = vmatpush.bf16.msra.mxu0 %v7602_v30  ;;  %v7601_v3 = vld [vmem:[%s12079_s7 + $0x110] sm:$0xff] }
 0x425   : > { %v5749_v63 = vrot.slane %v5748_v8, 2  ;;  %v5363_v61 = vadd.f32 %v5362_v62, %v5334_v39 }
 0x426   : > { %v5417_v49 = vadd.f32 %v5416_v10, %v5389_v43 }
 0x427   : > { %v5750_v58 = vadd.f32 %v5749_v63, %v5748_v8 }
 0x428   : > { %v5565_v1 = vmul.f32 %v5553_v20, %v5417_v49  ;;  %6227 = vmatpush.bf16.msra.mxu0 %v7601_v3  ;;  %v7613_v3 = vld [vmem:[%s12079_s7 + $0x170] sm:$0xff] }
 0x429   : > { %v5751_v28 = vrot.slane %v5750_v58, 1 }
 0x42a   : > { %v5621_v47 = vadd.f32 %v5609_v57, %v5565_v1 }
 0x42b   : > { %v5390_v12 = vpop.f32.mrf.mxu2  ;;  %v5418_v9 = vpop.f32.mrf.mxu3  ;;  %v5752_v31 = vadd.f32 %v5751_v28, %v5750_v58 }
 0x42c   : > { %v5337_v48 = vpop.f32.mrf.mxu0  ;;  %v5365_v2 = vpop.f32.mrf.mxu1  ;;  %v5391_v33 = vadd.f32 %v5390_v12, %v5363_v61  ;;  %v5663_v58 = vmax.f32 %v5621_v47, 0.0 }
 0x42d   : > { %v5782_v5 = vpack.c.bf16 %v5752_v31, %v5752_v31  ;;  %v5366_v17 = vadd.f32 %v5365_v2, %v5337_v48  ;;  %v7600_v48 = vld [vmem:[%s12079_s7 + $0x108] sm:$0xff] }
 0x42e   : > { %v5419_v51 = vadd.f32 %v5418_v9, %v5391_v33  ;;  %6228 = vmatpush.bf16.msra.mxu0 %v7600_v48 }
 0x42f   : > { %6217 = vmatmul.bf16.vlgmr.msra.gmra.mxu3 %v5782_v5 }
 0x430   : > { %v5571_v53 = vmul.f32 %v5553_v20, %v5419_v51 }
 0x432   : > { %v5627_v25 = vadd.f32 %v5609_v57, %v5571_v53 }
 0x433   : > { %v5393_v7 = vpop.f32.mrf.mxu2  ;;  %v5421_v44 = vpop.f32.mrf.mxu3 }
 0x434   : > { %v5339_v4 = vpop.f32.mrf.mxu0  ;;  %v5367_v36 = vpop.f32.mrf.mxu1  ;;  %v5394_v19 = vadd.f32 %v5393_v7, %v5366_v17  ;;  %v5669_v10 = vmax.f32 %v5627_v25, 0.0 }
 0x435   : > { %v5368_v26 = vadd.f32 %v5367_v36, %v5339_v4 }
 0x436   : > { %v5422_v15 = vadd.f32 %v5421_v44, %v5394_v19  ;;  %v5753_v44 = vadd.f32 %v5669_v10, %v5663_v58 }
 0x438   : > { %v5577_v42 = vmul.f32 %v5553_v20, %v5422_v15 }
 0x43a   : > { %v5633_v0 = vadd.f32 %v5609_v57, %v5577_v42 }
 0x43b   : > { %v5395_v52 = vpop.f32.mrf.mxu2  ;;  %v5423_v14 = vpop.f32.mrf.mxu3 }
 0x43c   : > { %v5342_v35 = vpop.f32.mrf.mxu0  ;;  %v5370_v38 = vpop.f32.mrf.mxu1  ;;  %v5396_v32 = vadd.f32 %v5395_v52, %v5368_v26  ;;  %v5675_v28 = vmax.f32 %v5633_v0, 0.0 }
 0x43d   : > { %v5371_v21 = vadd.f32 %v5370_v38, %v5342_v35  ;;  %v7599_v35 = vld [vmem:[%s12079_s7 + $0x100] sm:$0xff] }
 0x43e   : > { %v5424_v23 = vadd.f32 %v5423_v14, %v5396_v32  ;;  %v5754_v52 = vadd.f32 %v5753_v44, %v5675_v28  ;;  %6229 = vmatpush.bf16.msra.mxu0 %v7599_v35 }
 0x440   : > { %v5583_v13 = vmul.f32 %v5553_v20, %v5424_v23 }
 0x442   : > { %v5639_v39 = vadd.f32 %v5609_v57, %v5583_v13 }
 0x443   : > { %v5398_v55 = vpop.f32.mrf.mxu2  ;;  %v5426_v56 = vpop.f32.mrf.mxu3 }
 0x444   : > { %v5344_v11 = vpop.f32.mrf.mxu0  ;;  %v5372_v59 = vpop.f32.mrf.mxu1  ;;  %v5399_v6 = vadd.f32 %v5398_v55, %v5371_v21  ;;  %v5681_v4 = vmax.f32 %v5639_v39, 0.0 }
 0x445   : > { %v5373_v27 = vadd.f32 %v5372_v59, %v5344_v11 }
 0x446   : > { %v5427_v37 = vadd.f32 %v5426_v56, %v5399_v6  ;;  %v5755_v61 = vadd.f32 %v5754_v52, %v5681_v4  ;;  %v7611_v52 = vld [vmem:[%s12079_s7 + $0x160] sm:$0xff] }
 0x448   : > { %v5589_v8 = vmul.f32 %v5553_v20, %v5427_v37 }
 0x44a   : > { %v5645_v12 = vadd.f32 %v5609_v57, %v5589_v8 }
 0x44b   : > { %v5400_v18 = vpop.f32.mrf.mxu2  ;;  %v5428_v40 = vpop.f32.mrf.mxu3 }
 0x44c   : > { %v5401_v54 = vadd.f32 %v5400_v18, %v5373_v27  ;;  %v5347_v34 = vpop.f32.mrf.mxu0  ;;  %v5375_v50 = vpop.f32.mrf.mxu1  ;;  %v5687_v14 = vmax.f32 %v5645_v12, 0.0 }
 0x44d   : > { %v5376_v63 = vadd.f32 %v5375_v50, %v5347_v34 }
 0x44e   : > { %v5429_v16 = vadd.f32 %v5428_v40, %v5401_v54  ;;  %v5756_v17 = vadd.f32 %v5755_v61, %v5687_v14  ;;  %v7614_v54 = vld [vmem:[%s12079_s7 + $0x178] sm:$0xff] }
 0x44f   : > { %6235 = vmatpush.bf16.msra.mxu1 %v7614_v54 }
 0x450   : > { %v5595_v62 = vmul.f32 %v5553_v20, %v5429_v16 }
 0x452   : > { %v5651_v36 = vadd.f32 %v5609_v57, %v5595_v62 }
 0x453   : > { %v5403_v9 = vpop.f32.mrf.mxu2  ;;  %v5431_v31 = vpop.f32.mrf.mxu3  ;;  %6236 = vmatpush.bf16.msra.mxu1 %v7613_v3 }
 0x454   : > { %v5404_v2 = vadd.f32 %v5403_v9, %v5376_v63  ;;  %v5349_v5 = vpop.f32.mrf.mxu0  ;;  %v5377_v7 = vpop.f32.mrf.mxu1  ;;  %v5693_v29 = vmax.f32 %v5651_v36, 0.0 }
 0x455   : > { %v5554_v7 = vperm.slane %v11933_v46, 5  ;;  %v7610_v46 = vld [vmem:[%s12079_s7 + $0x158] sm:$0xff] }
 0x456   : > { %v5432_v41 = vadd.f32 %v5431_v31, %v5404_v2  ;;  %v5757_v56 = vadd.f32 %v5756_v17, %v5693_v29  ;;  %v7612_v2 = vld [vmem:[%s12079_s7 + $0x168] sm:$0xff] }
 0x457   : > { %6237 = vmatpush.bf16.msra.mxu1 %v7612_v2 }
 0x458   : > { %v5601_v38 = vmul.f32 %v5553_v20, %v5432_v41 }
 0x45a   : > { %v5657_v33 = vadd.f32 %v5609_v57, %v5601_v38  ;;  %v5610_v38 = vperm.slane %v11958_v45, 5  ;;  %v7609_v45 = vld [vmem:[%s12079_s7 + $0x150] sm:$0xff] }
 0x45b   : > { %v5405_v60 = vpop.f32.mrf.mxu2  ;;  %v5433_v43 = vpop.f32.mrf.mxu3  ;;  %6238 = vmatpush.bf16.msra.mxu1 %v7611_v52 }
 0x45c   : > { %v5699_v19 = vmax.f32 %v5657_v33, 0.0  ;;  %v5444_v26 = vpop.f32.mrf.mxu0  ;;  %v5472_v55 = vpop.f32.mrf.mxu1 }
 0x45d   : > { %v5473_v47 = vadd.f32 %v5472_v55, %v5444_v26 }
 0x45e   : > { %v5758_v11 = vsel %vm760_vm2, %v5699_v19, 0.0 }
 0x45f   : > { %v5759_v59 = vadd.f32 %v5758_v11, %v5757_v56  ;;  %6239 = vmatpush.bf16.msra.mxu1 %v7610_v46 }
 0x461   : > { %v5760_v51 = vrot.slane %v5759_v59, 4 }
 0x463   : > { %v5761_v32 = vadd.f32 %v5760_v51, %v5759_v59  ;;  %v5500_v21 = vpop.f32.mrf.mxu2  ;;  %v5528_v24 = vpop.f32.mrf.mxu3  ;;  %6240 = vmatpush.bf16.msra.mxu1 %v7609_v45 }
 0x464   : > { %v5446_v49 = vpop.f32.mrf.mxu0  ;;  %v5474_v20 = vpop.f32.mrf.mxu1  ;;  %v5501_v10 = vadd.f32 %v5500_v21, %v5473_v47  ;;  %v5881_v47 = vld [vmem:[%s12080_s8] sm:$0x1] }
 0x465   : > { %v5762_v15 = vrot.slane %v5761_v32, 2  ;;  %v5475_v16 = vadd.f32 %v5474_v20, %v5446_v49 }
 0x466   : > { %v5529_v5 = vadd.f32 %v5528_v24, %v5501_v10 }
 0x467   : > { %v5763_v6 = vadd.f32 %v5762_v15, %v5761_v32 }
 0x468   : > { %v5566_v35 = vmul.f32 %v5554_v7, %v5529_v5 }
 0x469   : > { %v5764_v53 = vrot.slane %v5763_v6, 1 }
 0x46a   : > { %v5622_v11 = vadd.f32 %v5610_v38, %v5566_v35 }
 0x46b   : > { %v5502_v23 = vpop.f32.mrf.mxu2  ;;  %v5530_v22 = vpop.f32.mrf.mxu3  ;;  %v5765_v27 = vadd.f32 %v5764_v53, %v5763_v6 }
 0x46c   : > { %v5449_v1 = vpop.f32.mrf.mxu0  ;;  %v5477_v57 = vpop.f32.mrf.mxu1  ;;  %v5503_v0 = vadd.f32 %v5502_v23, %v5475_v16  ;;  %v5664_v20 = vmax.f32 %v5622_v11, 0.0 }
 0x46d   : > { %v5783_v42 = vpack.c.bf16 %v5765_v27, %v5765_v27  ;;  %v5478_v8 = vadd.f32 %v5477_v57, %v5449_v1 }
 0x46e   : > { %v5531_v9 = vadd.f32 %v5530_v22, %v5503_v0  ;;  %v7608_v22 = vld [vmem:[%s12079_s7 + $0x148] sm:$0xff] }
 0x46f   : > { %6230 = vmatmul.bf16.vlgmr.msra.gmra.mxu0 %v5783_v42  ;;  %6241 = vmatpush.bf16.msra.mxu1 %v7608_v22 }
 0x470   : > { %v5572_v36 = vmul.f32 %v5554_v7, %v5531_v9 }
 0x472   : > { %v5628_v26 = vadd.f32 %v5610_v38, %v5572_v36 }
 0x473   : > { %v5505_v37 = vpop.f32.mrf.mxu2  ;;  %v5533_v18 = vpop.f32.mrf.mxu3 }
 0x474   : > { %v5451_v40 = vpop.f32.mrf.mxu0  ;;  %v5479_v30 = vpop.f32.mrf.mxu1  ;;  %v5506_v39 = vadd.f32 %v5505_v37, %v5478_v8  ;;  %v5670_v32 = vmax.f32 %v5628_v26, 0.0 }
 0x475   : > { %v5480_v62 = vadd.f32 %v5479_v30, %v5451_v40 }
 0x476   : > { %v5534_v44 = vadd.f32 %v5533_v18, %v5506_v39  ;;  %v5766_v42 = vadd.f32 %v5670_v32, %v5664_v20 }
 0x478   : > { %v5578_v61 = vmul.f32 %v5554_v7, %v5534_v44 }
 0x47a   : > { %v5634_v59 = vadd.f32 %v5610_v38, %v5578_v61 }
 0x47b   : > { %v5507_v34 = vpop.f32.mrf.mxu2  ;;  %v5535_v50 = vpop.f32.mrf.mxu3 }
 0x47c   : > { %v5454_v25 = vpop.f32.mrf.mxu0  ;;  %v5482_v13 = vpop.f32.mrf.mxu1  ;;  %v5508_v31 = vadd.f32 %v5507_v34, %v5480_v62  ;;  %v5676_v15 = vmax.f32 %v5634_v59, 0.0  ;;  %v7607_v34 = vld [vmem:[%s12079_s7 + $0x140] sm:$0xff] }
 0x47d   : > { %v5483_v48 = vadd.f32 %v5482_v13, %v5454_v25  ;;  %6242 = vmatpush.bf16.msra.mxu1 %v7607_v34 }
 0x47e   : > { %v5536_v41 = vadd.f32 %v5535_v50, %v5508_v31  ;;  %v5767_v30 = vadd.f32 %v5766_v42, %v5676_v15 }
 0x480   : > { %v5584_v55 = vmul.f32 %v5554_v7, %v5536_v41 }
 0x482   : > { %v5640_v21 = vadd.f32 %v5610_v38, %v5584_v55 }
 0x483   : > { %v5510_v63 = vpop.f32.mrf.mxu2  ;;  %v5538_v58 = vpop.f32.mrf.mxu3 }
 0x484   : > { %v5456_v28 = vpop.f32.mrf.mxu0  ;;  %v5484_v12 = vpop.f32.mrf.mxu1  ;;  %v5511_v4 = vadd.f32 %v5510_v63, %v5483_v48  ;;  %v5682_v37 = vmax.f32 %v5640_v21, 0.0 }
 0x485   : > { %v5485_v14 = vadd.f32 %v5484_v12, %v5456_v28 }
 0x486   : > { %v5539_v29 = vadd.f32 %v5538_v58, %v5511_v4  ;;  %v5768_v25 = vadd.f32 %v5767_v30, %v5682_v37 }
 0x488   : > { %v5590_v51 = vmul.f32 %v5554_v7, %v5539_v29 }
 0x48a   : > { %v5646_v6 = vadd.f32 %v5610_v38, %v5590_v51 }
 0x48b   : > { %v5512_v33 = vpop.f32.mrf.mxu2  ;;  %v5540_v17 = vpop.f32.mrf.mxu3 }
 0x48c   : > { %v5513_v60 = vadd.f32 %v5512_v33, %v5485_v14  ;;  %v5459_v43 = vpop.f32.mrf.mxu0  ;;  %v5487_v19 = vpop.f32.mrf.mxu1  ;;  %v5688_v54 = vmax.f32 %v5646_v6, 0.0 }
 0x48d   : > { %v5488_v49 = vadd.f32 %v5487_v19, %v5459_v43 }
 0x48e   : > { %v5541_v56 = vadd.f32 %v5540_v17, %v5513_v60  ;;  %v5769_v0 = vadd.f32 %v5768_v25, %v5688_v54 }
 0x490   : > { %v5596_v24 = vmul.f32 %v5554_v7, %v5541_v56 }
 0x492   : > { %v5652_v18 = vadd.f32 %v5610_v38, %v5596_v24 }
 0x493   : > { %v5515_v53 = vpop.f32.mrf.mxu2  ;;  %v5543_v23 = vpop.f32.mrf.mxu3 }
 0x494   : > { %v5516_v27 = vadd.f32 %v5515_v53, %v5488_v49  ;;  %v5461_v1 = vpop.f32.mrf.mxu0  ;;  %v5489_v57 = vpop.f32.mrf.mxu1  ;;  %v5694_v13 = vmax.f32 %v5652_v18, 0.0 }
 0x496   : > { %v5544_v40 = vadd.f32 %v5543_v23, %v5516_v27  ;;  %v5770_v63 = vadd.f32 %v5769_v0, %v5694_v13 }
 0x498   : > { %v5602_v50 = vmul.f32 %v5554_v7, %v5544_v40 }
 0x49a   : > { %v5658_v16 = vadd.f32 %v5610_v38, %v5602_v50 }
 0x49b   : > { %v5517_v8 = vpop.f32.mrf.mxu2  ;;  %v5545_v3 = vpop.f32.mrf.mxu3 }
 0x49c   : > { %v5700_v10 = vmax.f32 %v5658_v16, 0.0  ;;  %v6179_v39 = vpop.f32.mrf.mxu0  ;;  %v6192_v62 = vpop.f32.mrf.mxu1 }
 0x49d   : > { %v6180_v58 = vadd.f32 %v6179_v39, %v5881_v47 }
 0x49e   : > { %v5771_v28 = vsel %vm760_vm2, %v5700_v10, 0.0 }
 0x49f   : > { %v5772_v12 = vadd.f32 %v5771_v28, %v5770_v63  ;;  %v6193_v9 = vadd.f32 %v6192_v62, %v6180_v58 }
 0x4a1   : > { %v5773_v31 = vrot.slane %v5772_v12, 4 }
 0x4a3   : > { %v5774_v48 = vadd.f32 %v5773_v31, %v5772_v12  ;;  %v6205_v2 = vpop.f32.mrf.mxu2 }
 0x4a4   : > { %v6206_v5 = vadd.f32 %v6205_v2, %v6193_v9  ;;  %v6181_v7 = vpop.f32.mrf.mxu0  ;;  %v6194_v44 = vpop.f32.mrf.mxu1 }
 0x4a5   : > { %v5775_v4 = vrot.slane %v5774_v48, 2 }
 0x4a7   : > { %v5776_v36 = vadd.f32 %v5775_v4, %v5774_v48 }
 0x4a9   : > { %v5777_v41 = vrot.slane %v5776_v36, 1 }
 0x4ab   : > { %v6207_v52 = vpop.f32.mrf.mxu2  ;;  %v5778_v14 = vadd.f32 %v5777_v41, %v5776_v36 }
 0x4ad   : > { %v5784_v35 = vpack.c.bf16 %v5778_v14, %v5778_v14 }
 0x4af   : > { %6243 = vmatmul.bf16.vlgmr.msra.gmra.mxu1 %v5784_v35 }
 0x4b2   : > { %v6218_v38 = vpop.f32.mrf.mxu3 }
 0x4b3   : > { %v6219_v61 = vadd.f32 %v6218_v38, %v6206_v5 }
 0x4ba   : > { %v6220_v29 = vpop.f32.mrf.mxu3 }
 0x4ec   : > { %v6231_v33 = vpop.f32.mrf.mxu0 }
 0x4ed   : > { %v6232_v46 = vadd.f32 %v6231_v33, %v6219_v61 }
 0x4f4   : > { %v6233_v17 = vpop.f32.mrf.mxu0 }
 0x52c   : > { %v6244_v60 = vpop.f32.mrf.mxu1 }
 0x52d   : > { %v6245_v43 = vadd.f32 %v6244_v60, %v6232_v46 }
 0x52f   : > { %6248 = vst [vmem:[%s324_s26] sm:$0x1] %v6245_v43 }
 0x530   : > { %7694 = shalt.err (!%p7691_p3)
}
 0x531   : > { %7618 = dma.vmem_to_hbm [thread:$0]  (%p7819_p5), %s6261_s27, 16, %s6263_s28, %s6250_s29  }
 0x534   : > { %v6246_v19 = vpop.f32.mrf.mxu1 }
 0x535 PF: > { %p7624_p4 = scmp.ge.s32.totalorder %s7729_s12, 2  ;;  %s6274_s22 = sand.u32 1, %s7717_s30  }
 0x536   : > { %s6275_s25 = scalar_lea.sflag [#allocation3], %s6274_s22 }
 0x537   : > { %p7621_p7 = pnand %p7624_p4, %p7823_p6 }
 0x539   : > { %p7622_p8 = pneg %p7621_p7 }
 0x53b   : > { %7712 = dma.done.wait (%p7622_p8), %s6275_s25, 16  }
 0x53c   : > { %7714 = vsyncadd (%p7622_p8), %s6275_s25, 4294967280  ;;  %p19_p9 = scmp.ge.s32.totalorder %s7806_s15, 4   ;;  %s12350_s30 = smov %s7721_s10 }
 0x53d   : > { %s12351_s10 = smov %s7725_s11  ;;  %s12352_s11 = smov %s7817_s18 }
 0x53e   : > { %s12353_s12 = smov %s7806_s15  ;;  %21 = sbr.rel (!%p19_p9) target bundleno = 3 (0x3), region = 133 }
 0x543   :  { %6280 = vsyncpa [#allocation3], 1 }
 0x544   :  { %6282 = vsyncpa [#allocation3 + $0x1], 1 }

</bundles_post_ra>
